<compile_context>
chip_gen: v7x
topology: tpu7x:2x2x1
jax: 0.10.0
libtpu: 0.0.40
codegen_flags: <defaults>
</compile_context>

<pallas_src>
import jax
import jax.numpy as jnp
from jax.experimental import pallas as pl
from jax.experimental.pallas import tpu as pltpu

BN_EPS = 1e-3


# ----------------------------- fused Pallas kernel --------------------------

def _make_incept_kernel(H, W, G):
    """Fused InceptionA+InceptionB kernel for an HxW image (G: halo rows)."""
    M = H * W

    def kernel(x_ref, s_ref, mask_ref,
               wa_stem_ref, ba_stem_ref,
               wa5_ref, ba5_ref, wa32_ref, ba32_ref, wa33_ref, ba33_ref,
               wb_stem_ref, bb_stem_ref,
               wb12_ref, bb12_ref, wb32_ref, bb32_ref, wb33_ref, bb33_ref,
               out_ref,
               hb96, hb144, hb192, hbp):
        # Zero only the halo border bands (the interiors are fully overwritten
        # before every use).  Cheap: ~2*(G+W) rows per buffer per step.
        for hb in (hb96, hb144, hb192):
            c = hb.shape[1]
            hb[0:G + W, :] = jnp.zeros((G + W, c), jnp.bfloat16)
            hb[G + M - W:M + 2 * G, :] = jnp.zeros((G + W, c), jnp.bfloat16)
        hbp[0:G, :] = jnp.zeros((G, 128), jnp.bfloat16)
        hbp[G + M:M + 2 * G, :] = jnp.zeros((G, 128), jnp.bfloat16)

        # Precomputed per-row dx-tap validity masks (0/1, bf16).
        m_left = mask_ref[:, 0:1]    # 1 where w != 0    (dx = -1 tap valid)
        m_right = mask_ref[:, 1:2]   # 1 where w != W-1  (dx = +1 tap valid)

        def conv3x3(hb, act_bf, w_ref):
            # act_bf: (M, Cin) bf16.  hb: (M+2G, 3*Cin) bf16 halo scratch.
            # w_ref: (9*Cin, Cout) bf16, rows ordered (dx-major, dy, cin) with
            # the BN scale folded in.  Returns the f32 accumulator (M, Cout).
            cin = act_bf.shape[-1]
            hb[G + W:G + W + M, 0:cin] = act_bf              # dy = -1 block
            hb[G:G + M, cin:2 * cin] = act_bf                # dy =  0 block
            hb[G - W:G - W + M, 2 * cin:3 * cin] = act_bf    # dy = +1 block
            s_m = hb[G - 1:G - 1 + M, :] * m_left            # dx = -1 taps
            s_c = hb[G:G + M, :]                             # dx =  0 taps
            s_p = hb[G + 1:G + 1 + M, :] * m_right           # dx = +1 taps
            acc = jnp.dot(s_m, w_ref[0:3 * cin, :],
                          preferred_element_type=jnp.float32)
            acc = acc + jnp.dot(s_c, w_ref[3 * cin:6 * cin, :],
                                preferred_element_type=jnp.float32)
            acc = acc + jnp.dot(s_p, w_ref[6 * cin:9 * cin, :],
                                preferred_element_type=jnp.float32)
            return acc

        x = x_ref[0]                                         # (M, 96) bf16

        # ------------------------------ InceptionA ---------------------------
        # cols [0:32]=b1x1 [32:64]=b5x5_1 [64:96]=b3x3dbl_1 [96:112]=b_pool
        stem_a = jnp.maximum(
            jnp.dot(x, wa_stem_ref[...], preferred_element_type=jnp.float32)
            + ba_stem_ref[...], 0.0).astype(jnp.bfloat16)    # (M, 128)

        b5 = jnp.maximum(conv3x3(hb96, stem_a[:, 32:64], wa5_ref)
                         + ba5_ref[...], 0.0).astype(jnp.bfloat16)     # (M, 32)
        t3 = jnp.maximum(conv3x3(hb96, stem_a[:, 64:96], wa32_ref)
                         + ba32_ref[...], 0.0).astype(jnp.bfloat16)    # (M, 48)
        b3 = jnp.maximum(conv3x3(hb144, t3, wa33_ref)
                         + ba33_ref[...], 0.0).astype(jnp.bfloat16)    # (M, 48)

        # InceptionA output; avg_pool2d(k=1, s=1) is the identity.
        xa = jnp.concatenate([stem_a[:, 0:32], b5, b3, stem_a[:, 96:112]],
                             axis=-1)                        # (M, 128) bf16

        # ------------------------------ InceptionB ---------------------------
        # cols [0:64]=branch1x1_1 [64:96]=branch3x3dbl_1
        stem_b = jnp.maximum(
            jnp.dot(xa, wb_stem_ref[...], preferred_element_type=jnp.float32)
            + bb_stem_ref[...], 0.0).astype(jnp.bfloat16)    # (M, 128)

        # stride-2 branches evaluated at stride 1; subsampled later.
        y80 = jnp.maximum(conv3x3(hb192, stem_b[:, 0:64], wb12_ref)
                          + bb12_ref[...], 0.0).astype(jnp.bfloat16)   # (M, 80)
        tb = jnp.maximum(conv3x3(hb96, stem_b[:, 64:96], wb32_ref)
                         + bb32_ref[...], 0.0).astype(jnp.bfloat16)    # (M, 48)
        y48 = jnp.maximum(conv3x3(hb144, tb, wb33_ref)
                          + bb33_ref[...], 0.0).astype(jnp.bfloat16)   # (M, 48)

        # branch_pool: separable 3x3 max-pool.  xa >= 0 (post-ReLU), so the
        # zero borders / masked-to-zero taps match PyTorch's -inf padding.
        hbp[G:G + M, :] = xa
        rowmax = jnp.maximum(
            xa, jnp.maximum(hbp[G - 1:G - 1 + M, :] * m_left,
                            hbp[G + 1:G + 1 + M, :] * m_right))
        hbp[G:G + M, :] = rowmax
        pooled = jnp.maximum(
            rowmax, jnp.maximum(hbp[G - W:G - W + M, :],
                                hbp[G + W:G + W + M, :]))    # (M, 128) bf16

        # Fused stride-2 subsampling of all three branches: one bf16
        # (Mo, M) @ (M, 256) 0/1 selection matmul, single lane-dense store.
        big = jnp.concatenate([y80, y48, pooled], axis=-1)   # (M, 256) bf16
        out_ref[0] = jnp.dot(s_ref[...], big,
                             preferred_element_type=jnp.float32)

    return kernel


# ------------------------------- wrapper -------------------------------------

@jax.jit
def incept_block1(params, x_nchw):
    """InceptBlock1 forward: NCHW (N,96,H,W) -> NCHW (N,256,H/2,W/2)."""
    N, C, H, W = x_nchw.shape
    assert C == 96 and H % 2 == 0 and W % 2 == 0
    M, Ho, Wo = H * W, H // 2, W // 2
    Mo = Ho * Wo
    G = max(8, -(-W // 8) * 8)      # halo border rows: >= W, sublane aligned

    # NCHW -> (N, H*W, C), rows ordered (h, w); bf16 feeds the MXU.
    x = jnp.transpose(x_nchw, (0, 2, 3, 1)).reshape(N, M, C).astype(jnp.bfloat16)

    # 0/1 stride-2 row-selection matrix (exact in bf16).
    i = jnp.arange(Mo)
    src = (i // Wo) * (2 * W) + (i % Wo) * 2
    S = (jnp.arange(M)[None, :] == src[:, None]).astype(jnp.bfloat16)  # (Mo, M)

    # Hoisted per-row dx-tap validity masks.
    col = jnp.arange(M) % W
    masks = jnp.stack([(col != 0), (col != W - 1)],
                      axis=-1).astype(jnp.bfloat16)                    # (M, 2)

    worder = ["wa_stem", "ba_stem", "wa5", "ba5", "wa32", "ba32", "wa33", "ba33",
              "wb_stem", "bb_stem", "wb12", "bb12", "wb32", "bb32", "wb33", "bb33"]
    weights = [params[k] for k in worder]

    def rep(a):                     # whole-array block, shared by all programs
        nd = a.ndim
        return pl.BlockSpec(a.shape, lambda n, nd=nd: (0,) * nd)

    out = pl.pallas_call(
        _make_incept_kernel(H, W, G),
        out_shape=jax.ShapeDtypeStruct((N, Mo, 256), jnp.float32),
        grid=(N,),
        in_specs=[pl.BlockSpec((1, M, C), lambda n: (n, 0, 0)),
                  rep(S), rep(masks)] + [rep(a) for a in weights],
        out_specs=pl.BlockSpec((1, Mo, 256), lambda n: (n, 0, 0)),
        scratch_shapes=[
            pltpu.VMEM((M + 2 * G, 96), jnp.bfloat16),    # 3*32  dy-packed halo
            pltpu.VMEM((M + 2 * G, 144), jnp.bfloat16),   # 3*48
            pltpu.VMEM((M + 2 * G, 192), jnp.bfloat16),   # 3*64
            pltpu.VMEM((M + 2 * G, 128), jnp.bfloat16),   # max-pool halo
        ],
        compiler_params=pltpu.CompilerParams(
            dimension_semantics=("parallel",)),
    )(x, S, masks, *weights)

    return jnp.transpose(out.reshape(N, Ho, Wo, 256), (0, 3, 1, 2))


# --------------------------- parameters (synthetic) ---------------------------

def _conv_bn(key, cin, cout, ksize):
    """Synthetic Conv2d(bias=False)+BatchNorm2d params, BN folded (inference)."""
    k1, k2, k3, k4, k5 = jax.random.split(key, 5)
    wt = jax.random.normal(k1, (cout, cin, ksize, ksize), jnp.float32) * 0.1
    gamma = jax.random.uniform(k2, (cout,), jnp.float32, 0.5, 1.5)
    beta = jax.random.normal(k3, (cout,), jnp.float32) * 0.1
    r_mean = jax.random.normal(k4, (cout,), jnp.float32) * 0.1
    r_var = jax.random.uniform(k5, (cout,), jnp.float32, 0.5, 1.5)
    scale = gamma / jnp.sqrt(r_var + BN_EPS)
    bias = beta - r_mean * scale
    if ksize == 1:
        w = wt[:, :, 0, 0].T * scale[None, :]                   # (cin, cout)
    else:
        # (cout,cin,kh,kw) -> (kw,kh,cin,cout) -> (9*cin, cout): rows ordered
        # dx-major then (dy, cin), matching the kernel's slab/weight slicing.
        w = jnp.transpose(wt, (3, 2, 1, 0)).reshape(ksize * ksize * cin, cout)
        w = w * scale[None, :]
    return w, bias


def _pack_stem(ws, bs, width=128):
    w = jnp.concatenate(ws, axis=1)
    b = jnp.concatenate(bs, axis=0)
    w = jnp.pad(w, ((0, 0), (0, width - w.shape[1])))
    b = jnp.pad(b, ((0, width - b.shape[0]),))
    return w.astype(jnp.bfloat16), b.reshape(1, width).astype(jnp.float32)


def init_incept_block1(key):
    ks = jax.random.split(key, 12)
    # InceptionA(96 -> 32 | 32 | 48 | 16)
    w_a1, b_a1 = _conv_bn(ks[0], 96, 32, 1)      # branch1x1
    w_a51, b_a51 = _conv_bn(ks[1], 96, 32, 1)    # branch5x5_1
    w_a52, b_a52 = _conv_bn(ks[2], 32, 32, 3)    # branch5x5_2
    w_a31, b_a31 = _conv_bn(ks[3], 96, 32, 1)    # branch3x3dbl_1
    w_a32, b_a32 = _conv_bn(ks[4], 32, 48, 3)    # branch3x3dbl_2
    w_a33, b_a33 = _conv_bn(ks[5], 48, 48, 3)    # branch3x3dbl_3
    w_ap, b_ap = _conv_bn(ks[6], 96, 16, 1)      # branch_pool
    # InceptionB(128 -> 80 | 48 | pooled 128)
    w_b11, b_b11 = _conv_bn(ks[7], 128, 64, 1)   # branch1x1_1
    w_b12, b_b12 = _conv_bn(ks[8], 64, 80, 3)    # branch1x1_2 (stride 2)
    w_b31, b_b31 = _conv_bn(ks[9], 128, 32, 1)   # branch3x3dbl_1
    w_b32, b_b32 = _conv_bn(ks[10], 32, 48, 3)   # branch3x3dbl_2
    w_b33, b_b33 = _conv_bn(ks[11], 48, 48, 3)   # branch3x3dbl_3 (stride 2)

    wa_stem, ba_stem = _pack_stem([w_a1, w_a51, w_a31, w_ap],
                                  [b_a1, b_a51, b_a31, b_ap])
    wb_stem, bb_stem = _pack_stem([w_b11, w_b31], [b_b11, b_b31])

    def tap(w, b):
        return w.astype(jnp.bfloat16), b.reshape(1, -1).astype(jnp.float32)

    wa5, ba5 = tap(w_a52, b_a52)
    wa32p, ba32p = tap(w_a32, b_a32)
    wa33p, ba33p = tap(w_a33, b_a33)
    wb12, bb12 = tap(w_b12, b_b12)
    wb32p, bb32p = tap(w_b32, b_b32)
    wb33p, bb33p = tap(w_b33, b_b33)

    return dict(wa_stem=wa_stem, ba_stem=ba_stem,
                wa5=wa5, ba5=ba5, wa32=wa32p, ba32=ba32p, wa33=wa33p, ba33=ba33p,
                wb_stem=wb_stem, bb_stem=bb_stem,
                wb12=wb12, bb12=bb12, wb32=wb32p, bb32=bb32p,
                wb33=wb33p, bb33=bb33p)


# ---------------------------------- main --------------------------------------

if __name__ == "__main__":
    key = jax.random.PRNGKey(0)
    kx, kp = jax.random.split(key)
    # NCHW input, in_channels=96 as required by the module.
    x = jax.random.normal(kx, (2, 96, 16, 16), jnp.float32)
    params = init_incept_block1(kp)

    y = jax.block_until_ready(incept_block1(params, x))

    assert y.shape == (2, 256, 8, 8), y.shape
    assert y.dtype == jnp.float32
    assert bool(jnp.all(jnp.isfinite(y)))
    print("KERNEL_OK")
</pallas_src>

<mosaic_0001>
module attributes {stable_mosaic.version = 11 : i64} {
  func.func @kernel(%arg0: i32, %arg1: memref<1x256x96xbf16, #tpu.memory_space<vmem>>, %arg2: memref<64x256xbf16, #tpu.memory_space<vmem>>, %arg3: memref<256x2xbf16, #tpu.memory_space<vmem>>, %arg4: memref<96x128xbf16, #tpu.memory_space<vmem>>, %arg5: memref<1x128xf32, #tpu.memory_space<vmem>>, %arg6: memref<288x32xbf16, #tpu.memory_space<vmem>>, %arg7: memref<1x32xf32, #tpu.memory_space<vmem>>, %arg8: memref<288x48xbf16, #tpu.memory_space<vmem>>, %arg9: memref<1x48xf32, #tpu.memory_space<vmem>>, %arg10: memref<432x48xbf16, #tpu.memory_space<vmem>>, %arg11: memref<1x48xf32, #tpu.memory_space<vmem>>, %arg12: memref<128x128xbf16, #tpu.memory_space<vmem>>, %arg13: memref<1x128xf32, #tpu.memory_space<vmem>>, %arg14: memref<576x80xbf16, #tpu.memory_space<vmem>>, %arg15: memref<1x80xf32, #tpu.memory_space<vmem>>, %arg16: memref<288x48xbf16, #tpu.memory_space<vmem>>, %arg17: memref<1x48xf32, #tpu.memory_space<vmem>>, %arg18: memref<432x48xbf16, #tpu.memory_space<vmem>>, %arg19: memref<1x48xf32, #tpu.memory_space<vmem>>, %arg20: memref<1x64x256xf32, #tpu.memory_space<vmem>>, %arg21: memref<288x96xbf16, #tpu.memory_space<vmem>>, %arg22: memref<288x144xbf16, #tpu.memory_space<vmem>>, %arg23: memref<288x192xbf16, #tpu.memory_space<vmem>>, %arg24: memref<288x128xbf16, #tpu.memory_space<vmem>>) attributes {dimension_semantics = [#tpu.dimension_semantics<parallel>], iteration_bounds = array<i64: 2>, scalar_prefetch = 0 : i64, scratch_operands = 4 : i64, tpu.core_type = #tpu.core_type<tc>, window_params = [{transform_indices = @transform_0, window_bounds = array<i64: 1, 256, 96>}, {pipeline_mode = #tpu.pipeline_mode<synchronous>, transform_indices = @transform_1, window_bounds = array<i64: 64, 256>}, {pipeline_mode = #tpu.pipeline_mode<synchronous>, transform_indices = @transform_2, window_bounds = array<i64: 256, 2>}, {pipeline_mode = #tpu.pipeline_mode<synchronous>, transform_indices = @transform_3, window_bounds = array<i64: 96, 128>}, {pipeline_mode = #tpu.pipeline_mode<synchronous>, transform_indices = @transform_4, window_bounds = array<i64: 1, 128>}, {pipeline_mode = #tpu.pipeline_mode<synchronous>, transform_indices = @transform_5, window_bounds = array<i64: 288, 32>}, {pipeline_mode = #tpu.pipeline_mode<synchronous>, transform_indices = @transform_6, window_bounds = array<i64: 1, 32>}, {pipeline_mode = #tpu.pipeline_mode<synchronous>, transform_indices = @transform_7, window_bounds = array<i64: 288, 48>}, {pipeline_mode = #tpu.pipeline_mode<synchronous>, transform_indices = @transform_8, window_bounds = array<i64: 1, 48>}, {pipeline_mode = #tpu.pipeline_mode<synchronous>, transform_indices = @transform_9, window_bounds = array<i64: 432, 48>}, {pipeline_mode = #tpu.pipeline_mode<synchronous>, transform_indices = @transform_10, window_bounds = array<i64: 1, 48>}, {pipeline_mode = #tpu.pipeline_mode<synchronous>, transform_indices = @transform_11, window_bounds = array<i64: 128, 128>}, {pipeline_mode = #tpu.pipeline_mode<synchronous>, transform_indices = @transform_12, window_bounds = array<i64: 1, 128>}, {pipeline_mode = #tpu.pipeline_mode<synchronous>, transform_indices = @transform_13, window_bounds = array<i64: 576, 80>}, {pipeline_mode = #tpu.pipeline_mode<synchronous>, transform_indices = @transform_14, window_bounds = array<i64: 1, 80>}, {pipeline_mode = #tpu.pipeline_mode<synchronous>, transform_indices = @transform_15, window_bounds = array<i64: 288, 48>}, {pipeline_mode = #tpu.pipeline_mode<synchronous>, transform_indices = @transform_16, window_bounds = array<i64: 1, 48>}, {pipeline_mode = #tpu.pipeline_mode<synchronous>, transform_indices = @transform_17, window_bounds = array<i64: 432, 48>}, {pipeline_mode = #tpu.pipeline_mode<synchronous>, transform_indices = @transform_18, window_bounds = array<i64: 1, 48>}, {transform_indices = @transform_19, window_bounds = array<i64: 1, 64, 256>}]} {
    %cst = arith.constant 0.000000e+00 : bf16
    %0 = vector.broadcast %cst : bf16 to vector<32x96xbf16>
    %c0 = arith.constant 0 : index
    %c0_0 = arith.constant 0 : index
    %1 = vector.load %arg21[%c0, %c0_0] : memref<288x96xbf16, #tpu.memory_space<vmem>>, vector<32x96xbf16>
    tpu.vector_store %arg21[%c0, %c0_0], %0 {strides = array<i32>} : memref<288x96xbf16, #tpu.memory_space<vmem>>, vector<32x96xbf16>,
    %cst_1 = arith.constant 0.000000e+00 : bf16
    %2 = vector.broadcast %cst_1 : bf16 to vector<32x96xbf16>
    %c256 = arith.constant 256 : index
    %c0_2 = arith.constant 0 : index
    %3 = vector.load %arg21[%c256, %c0_2] : memref<288x96xbf16, #tpu.memory_space<vmem>>, vector<32x96xbf16>
    tpu.vector_store %arg21[%c256, %c0_2], %2 {strides = array<i32>} : memref<288x96xbf16, #tpu.memory_space<vmem>>, vector<32x96xbf16>,
    %cst_3 = arith.constant 0.000000e+00 : bf16
    %4 = vector.broadcast %cst_3 : bf16 to vector<32x144xbf16>
    %c0_4 = arith.constant 0 : index
    %c0_5 = arith.constant 0 : index
    %5 = vector.load %arg22[%c0_4, %c0_5] : memref<288x144xbf16, #tpu.memory_space<vmem>>, vector<32x144xbf16>
    tpu.vector_store %arg22[%c0_4, %c0_5], %4 {strides = array<i32>} : memref<288x144xbf16, #tpu.memory_space<vmem>>, vector<32x144xbf16>,
    %cst_6 = arith.constant 0.000000e+00 : bf16
    %6 = vector.broadcast %cst_6 : bf16 to vector<32x144xbf16>
    %c256_7 = arith.constant 256 : index
    %c0_8 = arith.constant 0 : index
    %7 = vector.load %arg22[%c256_7, %c0_8] : memref<288x144xbf16, #tpu.memory_space<vmem>>, vector<32x144xbf16>
    tpu.vector_store %arg22[%c256_7, %c0_8], %6 {strides = array<i32>} : memref<288x144xbf16, #tpu.memory_space<vmem>>, vector<32x144xbf16>,
    %cst_9 = arith.constant 0.000000e+00 : bf16
    %8 = vector.broadcast %cst_9 : bf16 to vector<32x192xbf16>
    %c0_10 = arith.constant 0 : index
    %c0_11 = arith.constant 0 : index
    %9 = vector.load %arg23[%c0_10, %c0_11] : memref<288x192xbf16, #tpu.memory_space<vmem>>, vector<32x192xbf16>
    tpu.vector_store %arg23[%c0_10, %c0_11], %8 {strides = array<i32>} : memref<288x192xbf16, #tpu.memory_space<vmem>>, vector<32x192xbf16>,
    %cst_12 = arith.constant 0.000000e+00 : bf16
    %10 = vector.broadcast %cst_12 : bf16 to vector<32x192xbf16>
    %c256_13 = arith.constant 256 : index
    %c0_14 = arith.constant 0 : index
    %11 = vector.load %arg23[%c256_13, %c0_14] : memref<288x192xbf16, #tpu.memory_space<vmem>>, vector<32x192xbf16>
    tpu.vector_store %arg23[%c256_13, %c0_14], %10 {strides = array<i32>} : memref<288x192xbf16, #tpu.memory_space<vmem>>, vector<32x192xbf16>,
    %cst_15 = arith.constant 0.000000e+00 : bf16
    %12 = vector.broadcast %cst_15 : bf16 to vector<16x128xbf16>
    %c0_16 = arith.constant 0 : index
    %c0_17 = arith.constant 0 : index
    %13 = vector.load %arg24[%c0_16, %c0_17] : memref<288x128xbf16, #tpu.memory_space<vmem>>, vector<16x128xbf16>
    tpu.vector_store %arg24[%c0_16, %c0_17], %12 {strides = array<i32>} : memref<288x128xbf16, #tpu.memory_space<vmem>>, vector<16x128xbf16>,
    %cst_18 = arith.constant 0.000000e+00 : bf16
    %14 = vector.broadcast %cst_18 : bf16 to vector<16x128xbf16>
    %c272 = arith.constant 272 : index
    %c0_19 = arith.constant 0 : index
    %15 = vector.load %arg24[%c272, %c0_19] : memref<288x128xbf16, #tpu.memory_space<vmem>>, vector<16x128xbf16>
    tpu.vector_store %arg24[%c272, %c0_19], %14 {strides = array<i32>} : memref<288x128xbf16, #tpu.memory_space<vmem>>, vector<16x128xbf16>,
    %c0_20 = arith.constant 0 : index
    %c0_21 = arith.constant 0 : index
    %16 = vector.load %arg3[%c0_20, %c0_21] : memref<256x2xbf16, #tpu.memory_space<vmem>>, vector<256x1xbf16>
    %c0_22 = arith.constant 0 : index
    %c1 = arith.constant 1 : index
    %17 = vector.load %arg3[%c0_22, %c1] : memref<256x2xbf16, #tpu.memory_space<vmem>>, vector<256x1xbf16>
    %c0_23 = arith.constant 0 : index
    %c0_24 = arith.constant 0 : index
    %c0_25 = arith.constant 0 : index
    %18 = vector.load %arg1[%c0_23, %c0_24, %c0_25] : memref<1x256x96xbf16, #tpu.memory_space<vmem>>, vector<1x256x96xbf16>
    %19 = vector.shape_cast %18 : vector<1x256x96xbf16> to vector<256x96xbf16>
    %c0_26 = arith.constant 0 : index
    %c0_27 = arith.constant 0 : index
    %20 = vector.load %arg4[%c0_26, %c0_27] : memref<96x128xbf16, #tpu.memory_space<vmem>>, vector<96x128xbf16>
    %cst_28 = arith.constant dense<0.000000e+00> : vector<256x128xf32>
    %21 = tpu.matmul %19, %20, %cst_28 {dimension_numbers = #tpu.dot_dimension_numbers<[1], [0], [0], [1], [0, 0, 1, 1], [], []>} : vector<256x96xbf16>, vector<96x128xbf16>, vector<256x128xf32> -> vector<256x128xf32>
    %c0_29 = arith.constant 0 : index
    %c0_30 = arith.constant 0 : index
    %22 = vector.load %arg5[%c0_29, %c0_30] : memref<1x128xf32, #tpu.memory_space<vmem>>, vector<1x128xf32>
    %23 = vector.broadcast %22 : vector<1x128xf32> to vector<256x128xf32>
    %24 = arith.addf %21, %23 : vector<256x128xf32>
    %cst_31 = arith.constant 0.000000e+00 : f32
    %25 = vector.broadcast %cst_31 : f32 to vector<256x128xf32>
    %26 = arith.maximumf %24, %25 : vector<256x128xf32>
    %27 = arith.truncf %26 : vector<256x128xf32> to vector<256x128xbf16>
    %28 = vector.extract_strided_slice %27 {offsets = [0, 32], sizes = [256, 32], strides = [1, 1]} : vector<256x128xbf16> to vector<256x32xbf16>
    %c32 = arith.constant 32 : index
    %c0_32 = arith.constant 0 : index
    %29 = vector.load %arg21[%c32, %c0_32] : memref<288x96xbf16, #tpu.memory_space<vmem>>, vector<256x32xbf16>
    tpu.vector_store %arg21[%c32, %c0_32], %28 {strides = array<i32>} : memref<288x96xbf16, #tpu.memory_space<vmem>>, vector<256x32xbf16>,
    %c16 = arith.constant 16 : index
    %c32_33 = arith.constant 32 : index
    %30 = vector.load %arg21[%c16, %c32_33] : memref<288x96xbf16, #tpu.memory_space<vmem>>, vector<256x32xbf16>
    tpu.vector_store %arg21[%c16, %c32_33], %28 {strides = array<i32>} : memref<288x96xbf16, #tpu.memory_space<vmem>>, vector<256x32xbf16>,
    %c0_34 = arith.constant 0 : index
    %c64 = arith.constant 64 : index
    %31 = vector.load %arg21[%c0_34, %c64] : memref<288x96xbf16, #tpu.memory_space<vmem>>, vector<256x32xbf16>
    tpu.vector_store %arg21[%c0_34, %c64], %28 {strides = array<i32>} : memref<288x96xbf16, #tpu.memory_space<vmem>>, vector<256x32xbf16>,
    %c15 = arith.constant 15 : index
    %c0_35 = arith.constant 0 : index
    %32 = vector.load %arg21[%c15, %c0_35] : memref<288x96xbf16, #tpu.memory_space<vmem>>, vector<256x96xbf16>
    %33 = vector.broadcast %16 : vector<256x1xbf16> to vector<256x96xbf16>
    %34 = arith.mulf %32, %33 : vector<256x96xbf16>
    %c16_36 = arith.constant 16 : index
    %c0_37 = arith.constant 0 : index
    %35 = vector.load %arg21[%c16_36, %c0_37] : memref<288x96xbf16, #tpu.memory_space<vmem>>, vector<256x96xbf16>
    %c17 = arith.constant 17 : index
    %c0_38 = arith.constant 0 : index
    %36 = vector.load %arg21[%c17, %c0_38] : memref<288x96xbf16, #tpu.memory_space<vmem>>, vector<256x96xbf16>
    %37 = vector.broadcast %17 : vector<256x1xbf16> to vector<256x96xbf16>
    %38 = arith.mulf %36, %37 : vector<256x96xbf16>
    %c0_39 = arith.constant 0 : index
    %c0_40 = arith.constant 0 : index
    %39 = vector.load %arg6[%c0_39, %c0_40] : memref<288x32xbf16, #tpu.memory_space<vmem>>, vector<96x32xbf16>
    %cst_41 = arith.constant dense<0.000000e+00> : vector<256x32xf32>
    %40 = tpu.matmul %34, %39, %cst_41 {dimension_numbers = #tpu.dot_dimension_numbers<[1], [0], [0], [1], [0, 0, 1, 1], [], []>} : vector<256x96xbf16>, vector<96x32xbf16>, vector<256x32xf32> -> vector<256x32xf32>
    %c96 = arith.constant 96 : index
    %c0_42 = arith.constant 0 : index
    %41 = vector.load %arg6[%c96, %c0_42] : memref<288x32xbf16, #tpu.memory_space<vmem>>, vector<96x32xbf16>
    %cst_43 = arith.constant dense<0.000000e+00> : vector<256x32xf32>
    %42 = tpu.matmul %35, %41, %cst_43 {dimension_numbers = #tpu.dot_dimension_numbers<[1], [0], [0], [1], [0, 0, 1, 1], [], []>} : vector<256x96xbf16>, vector<96x32xbf16>, vector<256x32xf32> -> vector<256x32xf32>
    %43 = arith.addf %40, %42 : vector<256x32xf32>
    %c192 = arith.constant 192 : index
    %c0_44 = arith.constant 0 : index
    %44 = vector.load %arg6[%c192, %c0_44] : memref<288x32xbf16, #tpu.memory_space<vmem>>, vector<96x32xbf16>
    %cst_45 = arith.constant dense<0.000000e+00> : vector<256x32xf32>
    %45 = tpu.matmul %38, %44, %cst_45 {dimension_numbers = #tpu.dot_dimension_numbers<[1], [0], [0], [1], [0, 0, 1, 1], [], []>} : vector<256x96xbf16>, vector<96x32xbf16>, vector<256x32xf32> -> vector<256x32xf32>
    %46 = arith.addf %43, %45 : vector<256x32xf32>
    %c0_46 = arith.constant 0 : index
    %c0_47 = arith.constant 0 : index
    %47 = vector.load %arg7[%c0_46, %c0_47] : memref<1x32xf32, #tpu.memory_space<vmem>>, vector<1x32xf32>
    %48 = vector.broadcast %47 : vector<1x32xf32> to vector<256x32xf32>
    %49 = arith.addf %46, %48 : vector<256x32xf32>
    %cst_48 = arith.constant 0.000000e+00 : f32
    %50 = vector.broadcast %cst_48 : f32 to vector<256x32xf32>
    %51 = arith.maximumf %49, %50 : vector<256x32xf32>
    %52 = arith.truncf %51 : vector<256x32xf32> to vector<256x32xbf16>
    %53 = vector.extract_strided_slice %27 {offsets = [0, 64], sizes = [256, 32], strides = [1, 1]} : vector<256x128xbf16> to vector<256x32xbf16>
    %c32_49 = arith.constant 32 : index
    %c0_50 = arith.constant 0 : index
    %54 = vector.load %arg21[%c32_49, %c0_50] : memref<288x96xbf16, #tpu.memory_space<vmem>>, vector<256x32xbf16>
    tpu.vector_store %arg21[%c32_49, %c0_50], %53 {strides = array<i32>} : memref<288x96xbf16, #tpu.memory_space<vmem>>, vector<256x32xbf16>,
    %c16_51 = arith.constant 16 : index
    %c32_52 = arith.constant 32 : index
    %55 = vector.load %arg21[%c16_51, %c32_52] : memref<288x96xbf16, #tpu.memory_space<vmem>>, vector<256x32xbf16>
    tpu.vector_store %arg21[%c16_51, %c32_52], %53 {strides = array<i32>} : memref<288x96xbf16, #tpu.memory_space<vmem>>, vector<256x32xbf16>,
    %c0_53 = arith.constant 0 : index
    %c64_54 = arith.constant 64 : index
    %56 = vector.load %arg21[%c0_53, %c64_54] : memref<288x96xbf16, #tpu.memory_space<vmem>>, vector<256x32xbf16>
    tpu.vector_store %arg21[%c0_53, %c64_54], %53 {strides = array<i32>} : memref<288x96xbf16, #tpu.memory_space<vmem>>, vector<256x32xbf16>,
    %c15_55 = arith.constant 15 : index
    %c0_56 = arith.constant 0 : index
    %57 = vector.load %arg21[%c15_55, %c0_56] : memref<288x96xbf16, #tpu.memory_space<vmem>>, vector<256x96xbf16>
    %58 = vector.broadcast %16 : vector<256x1xbf16> to vector<256x96xbf16>
    %59 = arith.mulf %57, %58 : vector<256x96xbf16>
    %c16_57 = arith.constant 16 : index
    %c0_58 = arith.constant 0 : index
    %60 = vector.load %arg21[%c16_57, %c0_58] : memref<288x96xbf16, #tpu.memory_space<vmem>>, vector<256x96xbf16>
    %c17_59 = arith.constant 17 : index
    %c0_60 = arith.constant 0 : index
    %61 = vector.load %arg21[%c17_59, %c0_60] : memref<288x96xbf16, #tpu.memory_space<vmem>>, vector<256x96xbf16>
    %62 = vector.broadcast %17 : vector<256x1xbf16> to vector<256x96xbf16>
    %63 = arith.mulf %61, %62 : vector<256x96xbf16>
    %c0_61 = arith.constant 0 : index
    %c0_62 = arith.constant 0 : index
    %64 = vector.load %arg8[%c0_61, %c0_62] : memref<288x48xbf16, #tpu.memory_space<vmem>>, vector<96x48xbf16>
    %cst_63 = arith.constant dense<0.000000e+00> : vector<256x48xf32>
    %65 = tpu.matmul %59, %64, %cst_63 {dimension_numbers = #tpu.dot_dimension_numbers<[1], [0], [0], [1], [0, 0, 1, 1], [], []>} : vector<256x96xbf16>, vector<96x48xbf16>, vector<256x48xf32> -> vector<256x48xf32>
    %c96_64 = arith.constant 96 : index
    %c0_65 = arith.constant 0 : index
    %66 = vector.load %arg8[%c96_64, %c0_65] : memref<288x48xbf16, #tpu.memory_space<vmem>>, vector<96x48xbf16>
    %cst_66 = arith.constant dense<0.000000e+00> : vector<256x48xf32>
    %67 = tpu.matmul %60, %66, %cst_66 {dimension_numbers = #tpu.dot_dimension_numbers<[1], [0], [0], [1], [0, 0, 1, 1], [], []>} : vector<256x96xbf16>, vector<96x48xbf16>, vector<256x48xf32> -> vector<256x48xf32>
    %68 = arith.addf %65, %67 : vector<256x48xf32>
    %c192_67 = arith.constant 192 : index
    %c0_68 = arith.constant 0 : index
    %69 = vector.load %arg8[%c192_67, %c0_68] : memref<288x48xbf16, #tpu.memory_space<vmem>>, vector<96x48xbf16>
    %cst_69 = arith.constant dense<0.000000e+00> : vector<256x48xf32>
    %70 = tpu.matmul %63, %69, %cst_69 {dimension_numbers = #tpu.dot_dimension_numbers<[1], [0], [0], [1], [0, 0, 1, 1], [], []>} : vector<256x96xbf16>, vector<96x48xbf16>, vector<256x48xf32> -> vector<256x48xf32>
    %71 = arith.addf %68, %70 : vector<256x48xf32>
    %c0_70 = arith.constant 0 : index
    %c0_71 = arith.constant 0 : index
    %72 = vector.load %arg9[%c0_70, %c0_71] : memref<1x48xf32, #tpu.memory_space<vmem>>, vector<1x48xf32>
    %73 = vector.broadcast %72 : vector<1x48xf32> to vector<256x48xf32>
    %74 = arith.addf %71, %73 : vector<256x48xf32>
    %cst_72 = arith.constant 0.000000e+00 : f32
    %75 = vector.broadcast %cst_72 : f32 to vector<256x48xf32>
    %76 = arith.maximumf %74, %75 : vector<256x48xf32>
    %77 = arith.truncf %76 : vector<256x48xf32> to vector<256x48xbf16>
    %c32_73 = arith.constant 32 : index
    %c0_74 = arith.constant 0 : index
    %78 = vector.load %arg22[%c32_73, %c0_74] : memref<288x144xbf16, #tpu.memory_space<vmem>>, vector<256x48xbf16>
    tpu.vector_store %arg22[%c32_73, %c0_74], %77 {strides = array<i32>} : memref<288x144xbf16, #tpu.memory_space<vmem>>, vector<256x48xbf16>,
    %c16_75 = arith.constant 16 : index
    %c48 = arith.constant 48 : index
    %79 = vector.load %arg22[%c16_75, %c48] : memref<288x144xbf16, #tpu.memory_space<vmem>>, vector<256x48xbf16>
    tpu.vector_store %arg22[%c16_75, %c48], %77 {strides = array<i32>} : memref<288x144xbf16, #tpu.memory_space<vmem>>, vector<256x48xbf16>,
    %c0_76 = arith.constant 0 : index
    %c96_77 = arith.constant 96 : index
    %80 = vector.load %arg22[%c0_76, %c96_77] : memref<288x144xbf16, #tpu.memory_space<vmem>>, vector<256x48xbf16>
    tpu.vector_store %arg22[%c0_76, %c96_77], %77 {strides = array<i32>} : memref<288x144xbf16, #tpu.memory_space<vmem>>, vector<256x48xbf16>,
    %c15_78 = arith.constant 15 : index
    %c0_79 = arith.constant 0 : index
    %81 = vector.load %arg22[%c15_78, %c0_79] : memref<288x144xbf16, #tpu.memory_space<vmem>>, vector<256x144xbf16>
    %82 = vector.broadcast %16 : vector<256x1xbf16> to vector<256x144xbf16>
    %83 = arith.mulf %81, %82 : vector<256x144xbf16>
    %c16_80 = arith.constant 16 : index
    %c0_81 = arith.constant 0 : index
    %84 = vector.load %arg22[%c16_80, %c0_81] : memref<288x144xbf16, #tpu.memory_space<vmem>>, vector<256x144xbf16>
    %c17_82 = arith.constant 17 : index
    %c0_83 = arith.constant 0 : index
    %85 = vector.load %arg22[%c17_82, %c0_83] : memref<288x144xbf16, #tpu.memory_space<vmem>>, vector<256x144xbf16>
    %86 = vector.broadcast %17 : vector<256x1xbf16> to vector<256x144xbf16>
    %87 = arith.mulf %85, %86 : vector<256x144xbf16>
    %c0_84 = arith.constant 0 : index
    %c0_85 = arith.constant 0 : index
    %88 = vector.load %arg10[%c0_84, %c0_85] : memref<432x48xbf16, #tpu.memory_space<vmem>>, vector<144x48xbf16>
    %cst_86 = arith.constant dense<0.000000e+00> : vector<256x48xf32>
    %89 = tpu.matmul %83, %88, %cst_86 {dimension_numbers = #tpu.dot_dimension_numbers<[1], [0], [0], [1], [0, 0, 1, 1], [], []>} : vector<256x144xbf16>, vector<144x48xbf16>, vector<256x48xf32> -> vector<256x48xf32>
    %c144 = arith.constant 144 : index
    %c0_87 = arith.constant 0 : index
    %90 = vector.load %arg10[%c144, %c0_87] : memref<432x48xbf16, #tpu.memory_space<vmem>>, vector<144x48xbf16>
    %cst_88 = arith.constant dense<0.000000e+00> : vector<256x48xf32>
    %91 = tpu.matmul %84, %90, %cst_88 {dimension_numbers = #tpu.dot_dimension_numbers<[1], [0], [0], [1], [0, 0, 1, 1], [], []>} : vector<256x144xbf16>, vector<144x48xbf16>, vector<256x48xf32> -> vector<256x48xf32>
    %92 = arith.addf %89, %91 : vector<256x48xf32>
    %c288 = arith.constant 288 : index
    %c0_89 = arith.constant 0 : index
    %93 = vector.load %arg10[%c288, %c0_89] : memref<432x48xbf16, #tpu.memory_space<vmem>>, vector<144x48xbf16>
    %cst_90 = arith.constant dense<0.000000e+00> : vector<256x48xf32>
    %94 = tpu.matmul %87, %93, %cst_90 {dimension_numbers = #tpu.dot_dimension_numbers<[1], [0], [0], [1], [0, 0, 1, 1], [], []>} : vector<256x144xbf16>, vector<144x48xbf16>, vector<256x48xf32> -> vector<256x48xf32>
    %95 = arith.addf %92, %94 : vector<256x48xf32>
    %c0_91 = arith.constant 0 : index
    %c0_92 = arith.constant 0 : index
    %96 = vector.load %arg11[%c0_91, %c0_92] : memref<1x48xf32, #tpu.memory_space<vmem>>, vector<1x48xf32>
    %97 = vector.broadcast %96 : vector<1x48xf32> to vector<256x48xf32>
    %98 = arith.addf %95, %97 : vector<256x48xf32>
    %cst_93 = arith.constant 0.000000e+00 : f32
    %99 = vector.broadcast %cst_93 : f32 to vector<256x48xf32>
    %100 = arith.maximumf %98, %99 : vector<256x48xf32>
    %101 = arith.truncf %100 : vector<256x48xf32> to vector<256x48xbf16>
    %102 = vector.extract_strided_slice %27 {offsets = [0, 0], sizes = [256, 32], strides = [1, 1]} : vector<256x128xbf16> to vector<256x32xbf16>
    %103 = vector.extract_strided_slice %27 {offsets = [0, 96], sizes = [256, 16], strides = [1, 1]} : vector<256x128xbf16> to vector<256x16xbf16>
    %104 = tpu.concatenate %102, %52, %101, %103 in 1 : vector<256x32xbf16>, vector<256x32xbf16>, vector<256x48xbf16>, vector<256x16xbf16> -> vector<256x128xbf16>
    %c0_94 = arith.constant 0 : index
    %c0_95 = arith.constant 0 : index
    %105 = vector.load %arg12[%c0_94, %c0_95] : memref<128x128xbf16, #tpu.memory_space<vmem>>, vector<128x128xbf16>
    %cst_96 = arith.constant dense<0.000000e+00> : vector<256x128xf32>
    %106 = tpu.matmul %104, %105, %cst_96 {dimension_numbers = #tpu.dot_dimension_numbers<[1], [0], [0], [1], [0, 0, 1, 1], [], []>} : vector<256x128xbf16>, vector<128x128xbf16>, vector<256x128xf32> -> vector<256x128xf32>
    %c0_97 = arith.constant 0 : index
    %c0_98 = arith.constant 0 : index
    %107 = vector.load %arg13[%c0_97, %c0_98] : memref<1x128xf32, #tpu.memory_space<vmem>>, vector<1x128xf32>
    %108 = vector.broadcast %107 : vector<1x128xf32> to vector<256x128xf32>
    %109 = arith.addf %106, %108 : vector<256x128xf32>
    %cst_99 = arith.constant 0.000000e+00 : f32
    %110 = vector.broadcast %cst_99 : f32 to vector<256x128xf32>
    %111 = arith.maximumf %109, %110 : vector<256x128xf32>
    %112 = arith.truncf %111 : vector<256x128xf32> to vector<256x128xbf16>
    %113 = vector.extract_strided_slice %112 {offsets = [0, 0], sizes = [256, 64], strides = [1, 1]} : vector<256x128xbf16> to vector<256x64xbf16>
    %c32_100 = arith.constant 32 : index
    %c0_101 = arith.constant 0 : index
    %114 = vector.load %arg23[%c32_100, %c0_101] : memref<288x192xbf16, #tpu.memory_space<vmem>>, vector<256x64xbf16>
    tpu.vector_store %arg23[%c32_100, %c0_101], %113 {strides = array<i32>} : memref<288x192xbf16, #tpu.memory_space<vmem>>, vector<256x64xbf16>,
    %c16_102 = arith.constant 16 : index
    %c64_103 = arith.constant 64 : index
    %115 = vector.load %arg23[%c16_102, %c64_103] : memref<288x192xbf16, #tpu.memory_space<vmem>>, vector<256x64xbf16>
    tpu.vector_store %arg23[%c16_102, %c64_103], %113 {strides = array<i32>} : memref<288x192xbf16, #tpu.memory_space<vmem>>, vector<256x64xbf16>,
    %c0_104 = arith.constant 0 : index
    %c128 = arith.constant 128 : index
    %116 = vector.load %arg23[%c0_104, %c128] : memref<288x192xbf16, #tpu.memory_space<vmem>>, vector<256x64xbf16>
    tpu.vector_store %arg23[%c0_104, %c128], %113 {strides = array<i32>} : memref<288x192xbf16, #tpu.memory_space<vmem>>, vector<256x64xbf16>,
    %c15_105 = arith.constant 15 : index
    %c0_106 = arith.constant 0 : index
    %117 = vector.load %arg23[%c15_105, %c0_106] : memref<288x192xbf16, #tpu.memory_space<vmem>>, vector<256x192xbf16>
    %118 = vector.broadcast %16 : vector<256x1xbf16> to vector<256x192xbf16>
    %119 = arith.mulf %117, %118 : vector<256x192xbf16>
    %c16_107 = arith.constant 16 : index
    %c0_108 = arith.constant 0 : index
    %120 = vector.load %arg23[%c16_107, %c0_108] : memref<288x192xbf16, #tpu.memory_space<vmem>>, vector<256x192xbf16>
    %c17_109 = arith.constant 17 : index
    %c0_110 = arith.constant 0 : index
    %121 = vector.load %arg23[%c17_109, %c0_110] : memref<288x192xbf16, #tpu.memory_space<vmem>>, vector<256x192xbf16>
    %122 = vector.broadcast %17 : vector<256x1xbf16> to vector<256x192xbf16>
    %123 = arith.mulf %121, %122 : vector<256x192xbf16>
    %c0_111 = arith.constant 0 : index
    %c0_112 = arith.constant 0 : index
    %124 = vector.load %arg14[%c0_111, %c0_112] : memref<576x80xbf16, #tpu.memory_space<vmem>>, vector<192x80xbf16>
    %cst_113 = arith.constant dense<0.000000e+00> : vector<256x80xf32>
    %125 = tpu.matmul %119, %124, %cst_113 {dimension_numbers = #tpu.dot_dimension_numbers<[1], [0], [0], [1], [0, 0, 1, 1], [], []>} : vector<256x192xbf16>, vector<192x80xbf16>, vector<256x80xf32> -> vector<256x80xf32>
    %c192_114 = arith.constant 192 : index
    %c0_115 = arith.constant 0 : index
    %126 = vector.load %arg14[%c192_114, %c0_115] : memref<576x80xbf16, #tpu.memory_space<vmem>>, vector<192x80xbf16>
    %cst_116 = arith.constant dense<0.000000e+00> : vector<256x80xf32>
    %127 = tpu.matmul %120, %126, %cst_116 {dimension_numbers = #tpu.dot_dimension_numbers<[1], [0], [0], [1], [0, 0, 1, 1], [], []>} : vector<256x192xbf16>, vector<192x80xbf16>, vector<256x80xf32> -> vector<256x80xf32>
    %128 = arith.addf %125, %127 : vector<256x80xf32>
    %c384 = arith.constant 384 : index
    %c0_117 = arith.constant 0 : index
    %129 = vector.load %arg14[%c384, %c0_117] : memref<576x80xbf16, #tpu.memory_space<vmem>>, vector<192x80xbf16>
    %cst_118 = arith.constant dense<0.000000e+00> : vector<256x80xf32>
    %130 = tpu.matmul %123, %129, %cst_118 {dimension_numbers = #tpu.dot_dimension_numbers<[1], [0], [0], [1], [0, 0, 1, 1], [], []>} : vector<256x192xbf16>, vector<192x80xbf16>, vector<256x80xf32> -> vector<256x80xf32>
    %131 = arith.addf %128, %130 : vector<256x80xf32>
    %c0_119 = arith.constant 0 : index
    %c0_120 = arith.constant 0 : index
    %132 = vector.load %arg15[%c0_119, %c0_120] : memref<1x80xf32, #tpu.memory_space<vmem>>, vector<1x80xf32>
    %133 = vector.broadcast %132 : vector<1x80xf32> to vector<256x80xf32>
    %134 = arith.addf %131, %133 : vector<256x80xf32>
    %cst_121 = arith.constant 0.000000e+00 : f32
    %135 = vector.broadcast %cst_121 : f32 to vector<256x80xf32>
    %136 = arith.maximumf %134, %135 : vector<256x80xf32>
    %137 = arith.truncf %136 : vector<256x80xf32> to vector<256x80xbf16>
    %138 = vector.extract_strided_slice %112 {offsets = [0, 64], sizes = [256, 32], strides = [1, 1]} : vector<256x128xbf16> to vector<256x32xbf16>
    %c32_122 = arith.constant 32 : index
    %c0_123 = arith.constant 0 : index
    %139 = vector.load %arg21[%c32_122, %c0_123] : memref<288x96xbf16, #tpu.memory_space<vmem>>, vector<256x32xbf16>
    tpu.vector_store %arg21[%c32_122, %c0_123], %138 {strides = array<i32>} : memref<288x96xbf16, #tpu.memory_space<vmem>>, vector<256x32xbf16>,
    %c16_124 = arith.constant 16 : index
    %c32_125 = arith.constant 32 : index
    %140 = vector.load %arg21[%c16_124, %c32_125] : memref<288x96xbf16, #tpu.memory_space<vmem>>, vector<256x32xbf16>
    tpu.vector_store %arg21[%c16_124, %c32_125], %138 {strides = array<i32>} : memref<288x96xbf16, #tpu.memory_space<vmem>>, vector<256x32xbf16>,
    %c0_126 = arith.constant 0 : index
    %c64_127 = arith.constant 64 : index
    %141 = vector.load %arg21[%c0_126, %c64_127] : memref<288x96xbf16, #tpu.memory_space<vmem>>, vector<256x32xbf16>
    tpu.vector_store %arg21[%c0_126, %c64_127], %138 {strides = array<i32>} : memref<288x96xbf16, #tpu.memory_space<vmem>>, vector<256x32xbf16>,
    %c15_128 = arith.constant 15 : index
    %c0_129 = arith.constant 0 : index
    %142 = vector.load %arg21[%c15_128, %c0_129] : memref<288x96xbf16, #tpu.memory_space<vmem>>, vector<256x96xbf16>
    %143 = vector.broadcast %16 : vector<256x1xbf16> to vector<256x96xbf16>
    %144 = arith.mulf %142, %143 : vector<256x96xbf16>
    %c16_130 = arith.constant 16 : index
    %c0_131 = arith.constant 0 : index
    %145 = vector.load %arg21[%c16_130, %c0_131] : memref<288x96xbf16, #tpu.memory_space<vmem>>, vector<256x96xbf16>
    %c17_132 = arith.constant 17 : index
    %c0_133 = arith.constant 0 : index
    %146 = vector.load %arg21[%c17_132, %c0_133] : memref<288x96xbf16, #tpu.memory_space<vmem>>, vector<256x96xbf16>
    %147 = vector.broadcast %17 : vector<256x1xbf16> to vector<256x96xbf16>
    %148 = arith.mulf %146, %147 : vector<256x96xbf16>
    %c0_134 = arith.constant 0 : index
    %c0_135 = arith.constant 0 : index
    %149 = vector.load %arg16[%c0_134, %c0_135] : memref<288x48xbf16, #tpu.memory_space<vmem>>, vector<96x48xbf16>
    %cst_136 = arith.constant dense<0.000000e+00> : vector<256x48xf32>
    %150 = tpu.matmul %144, %149, %cst_136 {dimension_numbers = #tpu.dot_dimension_numbers<[1], [0], [0], [1], [0, 0, 1, 1], [], []>} : vector<256x96xbf16>, vector<96x48xbf16>, vector<256x48xf32> -> vector<256x48xf32>
    %c96_137 = arith.constant 96 : index
    %c0_138 = arith.constant 0 : index
    %151 = vector.load %arg16[%c96_137, %c0_138] : memref<288x48xbf16, #tpu.memory_space<vmem>>, vector<96x48xbf16>
    %cst_139 = arith.constant dense<0.000000e+00> : vector<256x48xf32>
    %152 = tpu.matmul %145, %151, %cst_139 {dimension_numbers = #tpu.dot_dimension_numbers<[1], [0], [0], [1], [0, 0, 1, 1], [], []>} : vector<256x96xbf16>, vector<96x48xbf16>, vector<256x48xf32> -> vector<256x48xf32>
    %153 = arith.addf %150, %152 : vector<256x48xf32>
    %c192_140 = arith.constant 192 : index
    %c0_141 = arith.constant 0 : index
    %154 = vector.load %arg16[%c192_140, %c0_141] : memref<288x48xbf16, #tpu.memory_space<vmem>>, vector<96x48xbf16>
    %cst_142 = arith.constant dense<0.000000e+00> : vector<256x48xf32>
    %155 = tpu.matmul %148, %154, %cst_142 {dimension_numbers = #tpu.dot_dimension_numbers<[1], [0], [0], [1], [0, 0, 1, 1], [], []>} : vector<256x96xbf16>, vector<96x48xbf16>, vector<256x48xf32> -> vector<256x48xf32>
    %156 = arith.addf %153, %155 : vector<256x48xf32>
    %c0_143 = arith.constant 0 : index
    %c0_144 = arith.constant 0 : index
    %157 = vector.load %arg17[%c0_143, %c0_144] : memref<1x48xf32, #tpu.memory_space<vmem>>, vector<1x48xf32>
    %158 = vector.broadcast %157 : vector<1x48xf32> to vector<256x48xf32>
    %159 = arith.addf %156, %158 : vector<256x48xf32>
    %cst_145 = arith.constant 0.000000e+00 : f32
    %160 = vector.broadcast %cst_145 : f32 to vector<256x48xf32>
    %161 = arith.maximumf %159, %160 : vector<256x48xf32>
    %162 = arith.truncf %161 : vector<256x48xf32> to vector<256x48xbf16>
    %c32_146 = arith.constant 32 : index
    %c0_147 = arith.constant 0 : index
    %163 = vector.load %arg22[%c32_146, %c0_147] : memref<288x144xbf16, #tpu.memory_space<vmem>>, vector<256x48xbf16>
    tpu.vector_store %arg22[%c32_146, %c0_147], %162 {strides = array<i32>} : memref<288x144xbf16, #tpu.memory_space<vmem>>, vector<256x48xbf16>,
    %c16_148 = arith.constant 16 : index
    %c48_149 = arith.constant 48 : index
    %164 = vector.load %arg22[%c16_148, %c48_149] : memref<288x144xbf16, #tpu.memory_space<vmem>>, vector<256x48xbf16>
    tpu.vector_store %arg22[%c16_148, %c48_149], %162 {strides = array<i32>} : memref<288x144xbf16, #tpu.memory_space<vmem>>, vector<256x48xbf16>,
    %c0_150 = arith.constant 0 : index
    %c96_151 = arith.constant 96 : index
    %165 = vector.load %arg22[%c0_150, %c96_151] : memref<288x144xbf16, #tpu.memory_space<vmem>>, vector<256x48xbf16>
    tpu.vector_store %arg22[%c0_150, %c96_151], %162 {strides = array<i32>} : memref<288x144xbf16, #tpu.memory_space<vmem>>, vector<256x48xbf16>,
    %c15_152 = arith.constant 15 : index
    %c0_153 = arith.constant 0 : index
    %166 = vector.load %arg22[%c15_152, %c0_153] : memref<288x144xbf16, #tpu.memory_space<vmem>>, vector<256x144xbf16>
    %167 = vector.broadcast %16 : vector<256x1xbf16> to vector<256x144xbf16>
    %168 = arith.mulf %166, %167 : vector<256x144xbf16>
    %c16_154 = arith.constant 16 : index
    %c0_155 = arith.constant 0 : index
    %169 = vector.load %arg22[%c16_154, %c0_155] : memref<288x144xbf16, #tpu.memory_space<vmem>>, vector<256x144xbf16>
    %c17_156 = arith.constant 17 : index
    %c0_157 = arith.constant 0 : index
    %170 = vector.load %arg22[%c17_156, %c0_157] : memref<288x144xbf16, #tpu.memory_space<vmem>>, vector<256x144xbf16>
    %171 = vector.broadcast %17 : vector<256x1xbf16> to vector<256x144xbf16>
    %172 = arith.mulf %170, %171 : vector<256x144xbf16>
    %c0_158 = arith.constant 0 : index
    %c0_159 = arith.constant 0 : index
    %173 = vector.load %arg18[%c0_158, %c0_159] : memref<432x48xbf16, #tpu.memory_space<vmem>>, vector<144x48xbf16>
    %cst_160 = arith.constant dense<0.000000e+00> : vector<256x48xf32>
    %174 = tpu.matmul %168, %173, %cst_160 {dimension_numbers = #tpu.dot_dimension_numbers<[1], [0], [0], [1], [0, 0, 1, 1], [], []>} : vector<256x144xbf16>, vector<144x48xbf16>, vector<256x48xf32> -> vector<256x48xf32>
    %c144_161 = arith.constant 144 : index
    %c0_162 = arith.constant 0 : index
    %175 = vector.load %arg18[%c144_161, %c0_162] : memref<432x48xbf16, #tpu.memory_space<vmem>>, vector<144x48xbf16>
    %cst_163 = arith.constant dense<0.000000e+00> : vector<256x48xf32>
    %176 = tpu.matmul %169, %175, %cst_163 {dimension_numbers = #tpu.dot_dimension_numbers<[1], [0], [0], [1], [0, 0, 1, 1], [], []>} : vector<256x144xbf16>, vector<144x48xbf16>, vector<256x48xf32> -> vector<256x48xf32>
    %177 = arith.addf %174, %176 : vector<256x48xf32>
    %c288_164 = arith.constant 288 : index
    %c0_165 = arith.constant 0 : index
    %178 = vector.load %arg18[%c288_164, %c0_165] : memref<432x48xbf16, #tpu.memory_space<vmem>>, vector<144x48xbf16>
    %cst_166 = arith.constant dense<0.000000e+00> : vector<256x48xf32>
    %179 = tpu.matmul %172, %178, %cst_166 {dimension_numbers = #tpu.dot_dimension_numbers<[1], [0], [0], [1], [0, 0, 1, 1], [], []>} : vector<256x144xbf16>, vector<144x48xbf16>, vector<256x48xf32> -> vector<256x48xf32>
    %180 = arith.addf %177, %179 : vector<256x48xf32>
    %c0_167 = arith.constant 0 : index
    %c0_168 = arith.constant 0 : index
    %181 = vector.load %arg19[%c0_167, %c0_168] : memref<1x48xf32, #tpu.memory_space<vmem>>, vector<1x48xf32>
    %182 = vector.broadcast %181 : vector<1x48xf32> to vector<256x48xf32>
    %183 = arith.addf %180, %182 : vector<256x48xf32>
    %cst_169 = arith.constant 0.000000e+00 : f32
    %184 = vector.broadcast %cst_169 : f32 to vector<256x48xf32>
    %185 = arith.maximumf %183, %184 : vector<256x48xf32>
    %186 = arith.truncf %185 : vector<256x48xf32> to vector<256x48xbf16>
    %c16_170 = arith.constant 16 : index
    %c0_171 = arith.constant 0 : index
    %187 = vector.load %arg24[%c16_170, %c0_171] : memref<288x128xbf16, #tpu.memory_space<vmem>>, vector<256x128xbf16>
    tpu.vector_store %arg24[%c16_170, %c0_171], %104 {strides = array<i32>} : memref<288x128xbf16, #tpu.memory_space<vmem>>, vector<256x128xbf16>,
    %c15_172 = arith.constant 15 : index
    %c0_173 = arith.constant 0 : index
    %188 = vector.load %arg24[%c15_172, %c0_173] : memref<288x128xbf16, #tpu.memory_space<vmem>>, vector<256x128xbf16>
    %189 = vector.broadcast %16 : vector<256x1xbf16> to vector<256x128xbf16>
    %190 = arith.mulf %188, %189 : vector<256x128xbf16>
    %c17_174 = arith.constant 17 : index
    %c0_175 = arith.constant 0 : index
    %191 = vector.load %arg24[%c17_174, %c0_175] : memref<288x128xbf16, #tpu.memory_space<vmem>>, vector<256x128xbf16>
    %192 = vector.broadcast %17 : vector<256x1xbf16> to vector<256x128xbf16>
    %193 = arith.mulf %191, %192 : vector<256x128xbf16>
    %194 = arith.maximumf %190, %193 : vector<256x128xbf16>
    %195 = arith.maximumf %104, %194 : vector<256x128xbf16>
    %c16_176 = arith.constant 16 : index
    %c0_177 = arith.constant 0 : index
    %196 = vector.load %arg24[%c16_176, %c0_177] : memref<288x128xbf16, #tpu.memory_space<vmem>>, vector<256x128xbf16>
    tpu.vector_store %arg24[%c16_176, %c0_177], %195 {strides = array<i32>} : memref<288x128xbf16, #tpu.memory_space<vmem>>, vector<256x128xbf16>,
    %c0_178 = arith.constant 0 : index
    %c0_179 = arith.constant 0 : index
    %197 = vector.load %arg24[%c0_178, %c0_179] : memref<288x128xbf16, #tpu.memory_space<vmem>>, vector<256x128xbf16>
    %c32_180 = arith.constant 32 : index
    %c0_181 = arith.constant 0 : index
    %198 = vector.load %arg24[%c32_180, %c0_181] : memref<288x128xbf16, #tpu.memory_space<vmem>>, vector<256x128xbf16>
    %199 = arith.maximumf %197, %198 : vector<256x128xbf16>
    %200 = arith.maximumf %195, %199 : vector<256x128xbf16>
    %201 = tpu.concatenate %137, %186, %200 in 1 : vector<256x80xbf16>, vector<256x48xbf16>, vector<256x128xbf16> -> vector<256x256xbf16>
    %c0_182 = arith.constant 0 : index
    %c0_183 = arith.constant 0 : index
    %202 = vector.load %arg2[%c0_182, %c0_183] : memref<64x256xbf16, #tpu.memory_space<vmem>>, vector<64x256xbf16>
    %cst_184 = arith.constant dense<0.000000e+00> : vector<64x256xf32>
    %203 = tpu.matmul %202, %201, %cst_184 {dimension_numbers = #tpu.dot_dimension_numbers<[1], [0], [0], [1], [0, 0, 1, 1], [], []>} : vector<64x256xbf16>, vector<256x256xbf16>, vector<64x256xf32> -> vector<64x256xf32>
    %c0_185 = arith.constant 0 : index
    %c0_186 = arith.constant 0 : index
    %c0_187 = arith.constant 0 : index
    %204 = vector.load %arg20[%c0_185, %c0_186, %c0_187] : memref<1x64x256xf32, #tpu.memory_space<vmem>>, vector<1x64x256xf32>
    %205 = vector.shape_cast %204 : vector<1x64x256xf32> to vector<64x256xf32>
    %206 = vector.shape_cast %203 : vector<64x256xf32> to vector<1x64x256xf32>
    tpu.vector_store %arg20[%c0_185, %c0_186, %c0_187], %206 {strides = array<i32>} : memref<1x64x256xf32, #tpu.memory_space<vmem>>, vector<1x64x256xf32>,
    return
  }
  func.func @transform_0(%arg0: i32) -> (i32, i32, i32) {
    %c0_i32 = arith.constant 0 : i32
    %c0_i32_0 = arith.constant 0 : i32
    %c0_i32_1 = arith.constant 0 : i32
    return %arg0, %c0_i32, %c0_i32_0 : i32, i32, i32
  }
  func.func @transform_1(%arg0: i32) -> (i32, i32) {
    %c0_i32 = arith.constant 0 : i32
    %c0_i32_0 = arith.constant 0 : i32
    %c0_i32_1 = arith.constant 0 : i32
    return %c0_i32, %c0_i32_0 : i32, i32
  }
  func.func @transform_2(%arg0: i32) -> (i32, i32) {
    %c0_i32 = arith.constant 0 : i32
    %c0_i32_0 = arith.constant 0 : i32
    %c0_i32_1 = arith.constant 0 : i32
    return %c0_i32, %c0_i32_0 : i32, i32
  }
  func.func @transform_3(%arg0: i32) -> (i32, i32) {
    %c0_i32 = arith.constant 0 : i32
    %c0_i32_0 = arith.constant 0 : i32
    %c0_i32_1 = arith.constant 0 : i32
    return %c0_i32, %c0_i32_0 : i32, i32
  }
  func.func @transform_4(%arg0: i32) -> (i32, i32) {
    %c0_i32 = arith.constant 0 : i32
    %c0_i32_0 = arith.constant 0 : i32
    %c0_i32_1 = arith.constant 0 : i32
    return %c0_i32, %c0_i32_0 : i32, i32
  }
  func.func @transform_5(%arg0: i32) -> (i32, i32) {
    %c0_i32 = arith.constant 0 : i32
    %c0_i32_0 = arith.constant 0 : i32
    %c0_i32_1 = arith.constant 0 : i32
    return %c0_i32, %c0_i32_0 : i32, i32
  }
  func.func @transform_6(%arg0: i32) -> (i32, i32) {
    %c0_i32 = arith.constant 0 : i32
    %c0_i32_0 = arith.constant 0 : i32
    %c0_i32_1 = arith.constant 0 : i32
    return %c0_i32, %c0_i32_0 : i32, i32
  }
  func.func @transform_7(%arg0: i32) -> (i32, i32) {
    %c0_i32 = arith.constant 0 : i32
    %c0_i32_0 = arith.constant 0 : i32
    %c0_i32_1 = arith.constant 0 : i32
    return %c0_i32, %c0_i32_0 : i32, i32
  }
  func.func @transform_8(%arg0: i32) -> (i32, i32) {
    %c0_i32 = arith.constant 0 : i32
    %c0_i32_0 = arith.constant 0 : i32
    %c0_i32_1 = arith.constant 0 : i32
    return %c0_i32, %c0_i32_0 : i32, i32
  }
  func.func @transform_9(%arg0: i32) -> (i32, i32) {
    %c0_i32 = arith.constant 0 : i32
    %c0_i32_0 = arith.constant 0 : i32
    %c0_i32_1 = arith.constant 0 : i32
    return %c0_i32, %c0_i32_0 : i32, i32
  }
  func.func @transform_10(%arg0: i32) -> (i32, i32) {
    %c0_i32 = arith.constant 0 : i32
    %c0_i32_0 = arith.constant 0 : i32
    %c0_i32_1 = arith.constant 0 : i32
    return %c0_i32, %c0_i32_0 : i32, i32
  }
  func.func @transform_11(%arg0: i32) -> (i32, i32) {
    %c0_i32 = arith.constant 0 : i32
    %c0_i32_0 = arith.constant 0 : i32
    %c0_i32_1 = arith.constant 0 : i32
    return %c0_i32, %c0_i32_0 : i32, i32
  }
  func.func @transform_12(%arg0: i32) -> (i32, i32) {
    %c0_i32 = arith.constant 0 : i32
    %c0_i32_0 = arith.constant 0 : i32
    %c0_i32_1 = arith.constant 0 : i32
    return %c0_i32, %c0_i32_0 : i32, i32
  }
  func.func @transform_13(%arg0: i32) -> (i32, i32) {
    %c0_i32 = arith.constant 0 : i32
    %c0_i32_0 = arith.constant 0 : i32
    %c0_i32_1 = arith.constant 0 : i32
    return %c0_i32, %c0_i32_0 : i32, i32
  }
  func.func @transform_14(%arg0: i32) -> (i32, i32) {
    %c0_i32 = arith.constant 0 : i32
    %c0_i32_0 = arith.constant 0 : i32
    %c0_i32_1 = arith.constant 0 : i32
    return %c0_i32, %c0_i32_0 : i32, i32
  }
  func.func @transform_15(%arg0: i32) -> (i32, i32) {
    %c0_i32 = arith.constant 0 : i32
    %c0_i32_0 = arith.constant 0 : i32
    %c0_i32_1 = arith.constant 0 : i32
    return %c0_i32, %c0_i32_0 : i32, i32
  }
  func.func @transform_16(%arg0: i32) -> (i32, i32) {
    %c0_i32 = arith.constant 0 : i32
    %c0_i32_0 = arith.constant 0 : i32
    %c0_i32_1 = arith.constant 0 : i32
    return %c0_i32, %c0_i32_0 : i32, i32
  }
  func.func @transform_17(%arg0: i32) -> (i32, i32) {
    %c0_i32 = arith.constant 0 : i32
    %c0_i32_0 = arith.constant 0 : i32
    %c0_i32_1 = arith.constant 0 : i32
    return %c0_i32, %c0_i32_0 : i32, i32
  }
  func.func @transform_18(%arg0: i32) -> (i32, i32) {
    %c0_i32 = arith.constant 0 : i32
    %c0_i32_0 = arith.constant 0 : i32
    %c0_i32_1 = arith.constant 0 : i32
    return %c0_i32, %c0_i32_0 : i32, i32
  }
  func.func @transform_19(%arg0: i32) -> (i32, i32, i32) {
    %c0_i32 = arith.constant 0 : i32
    %c0_i32_0 = arith.constant 0 : i32
    %c0_i32_1 = arith.constant 0 : i32
    return %arg0, %c0_i32, %c0_i32_0 : i32, i32, i32
  }
}

</mosaic_0001>

<bundles_post_ra>
// kernel: incept_block1.1
= control target key start
LH: loop header
LB: loop body
LE: loop exit
PB: predicated region body
PF: predicated region fallthrough
CT: control target
= control target key end

     0   :  { %s20400_s0 = inlined_call_operand.vmem [shape: bf16[2,256,96], index: 0, kind: input, shape index: {}]   ;;  %s20401_s1 = inlined_call_operand.vmem [shape: bf16[64,256], index: 1, kind: input, shape index: {}]   ;;  %s20402_s2 = inlined_call_operand.vmem [shape: bf16[256,2], index: 2, kind: input, shape index: {}]   ;;  %s20403_s3 = inlined_call_operand.vmem [shape: bf16[96,128], index: 3, kind: input, shape index: {}]   ;;  %s20404_s4 = inlined_call_operand.vmem [shape: f32[1,128], index: 4, kind: input, shape index: {}]   ;;  %s20405_s5 = inlined_call_operand.vmem [shape: bf16[288,32], index: 5, kind: input, shape index: {}]   ;;  %s20406_s6 = inlined_call_operand.vmem [shape: f32[1,32], index: 6, kind: input, shape index: {}]   ;;  %s20407_s7 = inlined_call_operand.vmem [shape: bf16[288,48], index: 7, kind: input, shape index: {}]   ;;  %s20408_s8 = inlined_call_operand.vmem [shape: f32[1,48], index: 8, kind: input, shape index: {}]   ;;  %s20409_s9 = inlined_call_operand.vmem [shape: bf16[432,48], index: 9, kind: input, shape index: {}]   ;;  %s20410_s10 = inlined_call_operand.vmem [shape: f32[1,48], index: 10, kind: input, shape index: {}]   ;;  %s20411_s11 = inlined_call_operand.vmem [shape: bf16[128,128], index: 11, kind: input, shape index: {}]   ;;  %s20412_s12 = inlined_call_operand.vmem [shape: f32[1,128], index: 12, kind: input, shape index: {}]   ;;  %s20413_s13 = inlined_call_operand.vmem [shape: bf16[576,80], index: 13, kind: input, shape index: {}]   ;;  %s20414_s14 = inlined_call_operand.vmem [shape: f32[1,80], index: 14, kind: input, shape index: {}]   ;;  %s20415_s15 = inlined_call_operand.vmem [shape: bf16[288,48], index: 15, kind: input, shape index: {}]   ;;  %s20416_s16 = inlined_call_operand.vmem [shape: f32[1,48], index: 16, kind: input, shape index: {}]   ;;  %s20417_s17 = inlined_call_operand.vmem [shape: bf16[432,48], index: 17, kind: input, shape index: {}]   ;;  %s20418_s18 = inlined_call_operand.vmem [shape: f32[1,48], index: 18, kind: input, shape index: {}]   ;;  %s20419_s19 = inlined_call_operand.hbm [shape: f32[2,64,256], index: 19, kind: output, shape index: {}]  }
   0x1   :  { %20613 = sst [smem:[#allocation87_spill]] %s20400_s0 }
   0x2   :  { %20614 = sst [smem:[#allocation88_spill]] %s20401_s1 }
   0x3   :  { %20615 = sst [smem:[#allocation89_spill]] %s20402_s2 }
   0x4   :  { %20616 = sst [smem:[#allocation90_spill]] %s20403_s3 }
   0x5   :  { %20617 = sst [smem:[#allocation91_spill]] %s20404_s4 }
   0x6   :  { %20618 = sst [smem:[#allocation92_spill]] %s20405_s5 }
   0x7   :  { %24 = vsyncpa [#allocation7], 0 }
   0x8   :  { %26 = vsyncpa [#allocation7 + $0x1], 0  ;;  %s14870_s0 = smov 0   ;;  %s14872_s30 = smov 0  }
   0x9   :  { %s14874_s20 = smov 0   ;;  %s14876_s21 = smov 0  }
   0xa LB: > { %20619 = sst [smem:[#allocation9_spill]] %s14745_s0  ;;  %s14891_s1 = sadd.s32 4294967295, %s14757_s21   ;;  %s14757_s21 = sphi %s14876_s21, %s21052_s21   ;;  %s14753_s20 = sphi %s14874_s20, %s21054_s20   ;;  %s14749_s30 = sphi %s14872_s30, %s21056_s30   ;;  %s14745_s0 = sphi %s14870_s0, %s21055_s0  }
   0xb   : > { %20620 = sst [smem:[#allocation10_spill]] %s14753_s20  ;;  %s12952_s22 = sadd.s32 4294967294, %s14757_s21  }
   0xc   : > { %s14895_s2 = sadd.s32 1, %s14757_s21   ;;  %s443_s23 = sadd.s32 1, %s14753_s20 }
   0xd   : > { %20621 = sst [smem:[#allocation11_spill]] %s14895_s2  ;;  %s440_s24 = ssub.s32 %s14757_s21, %s14895_s2 }
   0xe   : > { %p453_p0 = scmp.ne.s32.totalorder %s14753_s20, %s14749_s30  ;;  %p441_p1 = scmp.eq.s32.totalorder %s440_s24, 0 }
   0xf   : > { %p454_p2 = scmp.eq.s32.totalorder %s14891_s1, 1  ;;  %p459_p3 = scmp.ne.s32.totalorder %s14749_s30, %s14745_s0 }
  0x10   : > { %p460_p4 = scmp.eq.s32.totalorder %s12952_s22, 1  ;;  %p12955_p7 = scmp.ge.s32.totalorder %s14757_s21, 1 }
  0x11   : > { %s14906_s25 = scalar_select %p441_p1, %s14753_s20, %s443_s23  }
  0x12   : > { %p14908_p5 = por %p454_p2, %p453_p0  ;;  %p14912_p6 = por %p460_p4, %p459_p3 }
  0x13   : > { %20622 = sst [smem:[#allocation12_spill]] %s14906_s25  ;;  %p540_p8 = scmp.lt.s32.totalorder %s14757_s21, 3 }
  0x14   : > { %s20624_s26 = scalar_select %p14912_p6, 1, 0 }
  0x15   : > { %p541_p9 = pnand %p12955_p7, %p540_p8 }
  0x16   : > { %20625 = sst [smem:[#allocation13_spill]] %s20624_s26 }
  0x17   : > { %544 = sbr.rel (%p541_p9) target bundleno = 3235 (0xca3), region = 96 }
  0x1e   : > { %s20626_s29 = sld [smem:[#allocation90_spill]]  ;;  %p596_p10 = scmp.lt.s32.totalorder %s14891_s1, 1  ;;  %vm602_vm0 = vcmask 785408   ;;  %v14759_v3 = vmov 0   ;;  %v14492_v34 = vld [vmem:[%s20407_s7 + $0x30] sm:$0xff]   ;;  %vm1164_vm1 = vcmask 523520  }
  0x1f   : > { %14466 = vset.pattern.permute.xlu0 %v14759_v3  ;;  %603 = vst.msk [vmem:[#allocation2] sm:$0xff] %vm602_vm0, %v14759_v3  ;;  %604 = vst.msk [vmem:[#allocation2 + $0x8] sm:$0xff] %vm602_vm0, %v14759_v3  ;;  %s20627_s27 = sld [smem:[#allocation87_spill]]  ;;  %14465 = vset.pattern.permute.xlu1 %v14759_v3  ;;  %s20628_s22 = sld [smem:[#allocation89_spill]]  ;;  %v14496_v57 = vld [vmem:[%s20407_s7 + $0x38] sm:$0xff]   ;;  %vm1147_vm2 = vcmask 261120  }
  0x20   : > { %s597_s24 = scalar_select %p596_p10, %s14891_s1, 1  ;;  %605 = vst.msk [vmem:[#allocation2 + $0x80] sm:$0xff] %vm602_vm0, %v14759_v3  ;;  %606 = vst.msk [vmem:[#allocation2 + $0x88] sm:$0xff] %vm602_vm0, %v14759_v3  ;;  %vm1229_vm3 = vcmask 785920   ;;  %vm608_vm4 = vcmask 130048   ;;  %vm617_vm7 = vcmask 523264  }
  0x21   : > { %607 = vst [vmem:[#allocation3] sm:$0xff] %v14759_v3  ;;  %610 = vst [vmem:[#allocation3 + $0x10] sm:$0xff] %v14759_v3  ;;  %s20629_s4 = sld [smem:[#allocation91_spill]]  ;;  %s20630_s5 = sld [smem:[#allocation92_spill]]  ;;  %vm1727_vm5 = vsmask.f32 7424 }
  0x22   : > { %s13490_s2 = sshll.u32 %s597_s24, 7  ;;  %612 = vst [vmem:[#allocation3 + $0x100] sm:$0xff] %v14759_v3  ;;  %614 = vst [vmem:[#allocation3 + $0x110] sm:$0xff] %v14759_v3  ;;  %s20436_s24 = smov 96   ;;  %vm2338_vm6 = vsmask.f32 256 }
  0x23   : > { %616 = vst [vmem:[#allocation4] sm:$0xff] %v14759_v3  ;;  %619 = vst [vmem:[#allocation4 + $0x10] sm:$0xff] %v14759_v3  ;;  %s20534_s0 = smov 64   ;;  %vm4956_vm8 = vcmask 392192   ;;  %s20682_s20 = smov 96   ;;  %vm5037_vm9 = vcmask 785792  }
  0x24   : > { %v14469_v0 = vld [vmem:[%s20626_s29] sm:$0xff]   ;;  %v14470_v1 = vld [vmem:[%s20626_s29 + $0x8] sm:$0xff]   ;;  %v14471_v2 = vld [vmem:[%s20626_s29 + $0x10] sm:$0xff]   ;;  %621 = vst [vmem:[#allocation4 + $0x100] sm:$0xff] %v14759_v3  ;;  %s20532_s25 = smov 48   ;;  %vm5102_vm10 = vcmask 1048320  }
  0x25   : > { %13736 = vmatprep.subr.bf16.mxu0 %v14469_v0  ;;  %623 = vst [vmem:[#allocation4 + $0x110] sm:$0xff] %v14759_v3  ;;  %625 = vst [vmem:[#allocation5] sm:$0xff] %v14759_v3  ;;  %s14936_s28 = scalar_lea.vmem %s20627_s27, %s13490_s2  ;;  %v14472_v5 = vld [vmem:[%s20626_s29 + $0x18] sm:$0xff]   ;;  %v14473_v6 = vld [vmem:[%s20626_s29 + $0x20] sm:$0xff]   ;;  %s20428_s2 = smov 32   ;;  %vm6969_vm11 = vcmask 916480  }
  0x26   : > { %13737 = vmatpush3.bf16.msra.mxu0 %v14469_v0  ;;  %626 = vst [vmem:[#allocation5 + $0x88] sm:$0xff] %v14759_v3  ;;  %v14475_v4 = vld [vmem:[%s14936_s28] sm:$0xff]   ;;  %v14474_v7 = vld [vmem:[%s20626_s29 + $0x28] sm:$0xff]   ;;  %v14477_v11 = vld [vmem:[%s14936_s28 + $0x10] sm:$0xff]   ;;  %s20695_s27 = smov 32   ;;  %s20531_s23 = smov 16  }
  0x27   : > { %13738 = vmatprep.subr.bf16.mxu0 %v14470_v1  ;;  %13748 = vmatprep.mubr.msk.bf16.mxu0 %vm602_vm0, %v14475_v4  ;;  %v14476_v8 = vld [vmem:[%s14936_s28 + $0x8] sm:$0xff]   ;;  %v628_v9 = vld [vmem:[%s20628_s22 + $0x4] sm:$0xf]  ;;  %v627_v10 = vld [vmem:[%s20628_s22] sm:$0xf]  ;;  %vm12314_vm12 = vcmask 1046528  }
  0x28   : > { %1277 = vperm.xlu0 %14466, %v628_v9   ;;  %v630_v12 = vld [vmem:[%s20628_s22 + $0xc] sm:$0xf]  ;;  %v629_v13 = vld [vmem:[%s20628_s22 + $0x8] sm:$0xf]  ;;  %1265 = vperm.xlu1 %14465, %v627_v10   ;;  %v631_v14 = vld [vmem:[%s20628_s22 + $0x10] sm:$0xf] }
  0x29   : > { %v632_v15 = vld [vmem:[%s20628_s22 + $0x14] sm:$0xf]  ;;  %v14478_v16 = vld [vmem:[%s14936_s28 + $0x18] sm:$0xff]   ;;  %v14479_v17 = vld [vmem:[%s14936_s28 + $0x20] sm:$0xff]   ;;  %vm7378_vm13 = vcmask 1048064   ;;  %s14767_s26 = smov 80  }
  0x2a   : > { %13739 = vmatpush3.bf16.msra.mxu0 %v14470_v1  ;;  %v14480_v18 = vld [vmem:[%s14936_s28 + $0x28] sm:$0xff]   ;;  %v14481_v19 = vld [vmem:[%s14936_s28 + $0x30] sm:$0xff]   ;;  %v14482_v20 = vld [vmem:[%s14936_s28 + $0x38] sm:$0xff]   ;;  %vm12674_vm14 = vcmask 654336  }
  0x2b   : > { %13740 = vmatprep.subr.bf16.mxu0 %v14471_v2  ;;  %v14483_v21 = vld [vmem:[%s14936_s28 + $0x40] sm:$0xff]   ;;  %v14484_v22 = vld [vmem:[%s14936_s28 + $0x48] sm:$0xff]   ;;  %v14485_v23 = vld [vmem:[%s14936_s28 + $0x50] sm:$0xff]  }
  0x2c   : > { %1301 = vperm.xlu0 %14466, %v630_v12   ;;  %1289 = vperm.xlu1 %14465, %v629_v13   ;;  %v14486_v24 = vld [vmem:[%s14936_s28 + $0x58] sm:$0xff]   ;;  %v14487_v25 = vld [vmem:[%s14936_s28 + $0x60] sm:$0xff]   ;;  %v14488_v26 = vld [vmem:[%s14936_s28 + $0x68] sm:$0xff]  }
  0x2d   : > { %v14489_v27 = vld [vmem:[%s14936_s28 + $0x70] sm:$0xff]   ;;  %v14490_v28 = vld [vmem:[%s14936_s28 + $0x78] sm:$0xff]   ;;  %v15000_v29 = vld [vmem:[%s20629_s4] ss:$0 sm:$0xff]  ;;  %s14768_s4 = smov [#allocation6]  }
  0x2e   : > { %13741 = vmatpush3.bf16.msra.mxu0 %v14471_v2  ;;  %v14491_v30 = vld [vmem:[%s20630_s5 + $0x30] sm:$0xff]   ;;  %v14493_v37 = vld [vmem:[%s20630_s5 + $0x38] sm:$0xff]   ;;  %v14494_v45 = vld [vmem:[%s20630_s5 + $0x40] sm:$0xff]  }
  0x2f   : > { %13742 = vmatprep.subr.bf16.mxu0 %v14472_v5  ;;  %13780 = vmatprep.subr.bf16.mxu1 %v14491_v30  ;;  %v14495_v53 = vld [vmem:[%s20630_s5 + $0x48] sm:$0xff]   ;;  %v14497_v63 = vld [vmem:[%s20630_s5 + $0x50] sm:$0xff]   ;;  %v14499_v9 = vld [vmem:[%s20630_s5 + $0x58] sm:$0xff]  }
  0x30   : > { %1313 = vperm.xlu0 %14466, %v631_v14   ;;  %1325 = vperm.xlu1 %14465, %v632_v15   ;;  %v14500_v13 = vld [vmem:[%s20407_s7 + $0x48] sm:$0xff]  }
  0x31   : > { %13781 = vmatpush3.bf16.msra.mxu1 %v14491_v30 }
  0x32   : > { %13743 = vmatpush3.bf16.msra.mxu0 %v14472_v5  ;;  %13782 = vmatprep.subr.bf16.mxu1 %v14493_v37 }
  0x33   : > { %13744 = vmatprep.subr.bf16.mxu0 %v14473_v6 }
  0x35   : > { %13783 = vmatpush3.bf16.msra.mxu1 %v14493_v37 }
  0x36   : > { %13745 = vmatpush3.bf16.msra.mxu0 %v14473_v6  ;;  %13784 = vmatprep.subr.bf16.mxu1 %v14494_v45  ;;  %v14498_v6 = vld [vmem:[%s20407_s7 + $0x40] sm:$0xff]  }
  0x37   : > { %13746 = vmatprep.subr.bf16.mxu0 %v14474_v7 }
  0x39   : > { %13785 = vmatpush3.bf16.msra.mxu1 %v14494_v45 }
  0x3a   : > { %13747 = vmatpush3.bf16.msra.mxu0 %v14474_v7  ;;  %13786 = vmatprep.subr.bf16.mxu1 %v14495_v53 }
  0x3b   : > { %13912 = vmatprep.subr.bf16.mxu0 %v14492_v34 }
  0x3d   : > { %13749 = vmatmul.mubr.msk.bf16.vlgmr.msra.gmra.mrb[0].mxu0 %vm602_vm0, %v14476_v8  ;;  %13787 = vmatpush3.bf16.msra.mxu1 %v14495_v53 }
  0x3e   : > { %13752 = vmatprep.mubr.msk.bf16.mxu0 %vm602_vm0, %v14477_v11  ;;  %13913 = vmatpush3.bf16.msra.mxu0 %v14492_v34 }
  0x3f   : > { %13914 = vmatprep.subr.bf16.mxu0 %v14496_v57  ;;  %13788 = vmatprep.subr.bf16.mxu1 %v14497_v63 }
  0x41   : > { %13789 = vmatpush3.bf16.msra.mxu1 %v14497_v63 }
  0x42   : > { %13915 = vmatpush3.bf16.msra.mxu0 %v14496_v57  ;;  %13790 = vmatprep.subr.bf16.mxu1 %v14499_v9 }
  0x43   : > { %13916 = vmatprep.subr.bf16.mxu0 %v14498_v6 }
  0x45   : > { %13753 = vmatmul.mubr.msk.bf16.gmra.mrb[4].mxu0 %vm602_vm0, %v14478_v16  ;;  %13791 = vmatpush3.bf16.msra.mxu1 %v14499_v9 }
  0x46   : > { %13756 = vmatprep.mubr.msk.bf16.mxu0 %vm602_vm0, %v14479_v17  ;;  %13917 = vmatpush3.bf16.msra.mxu0 %v14498_v6 }
  0x47   : > { %13918 = vmatprep.subr.bf16.mxu0 %v14500_v13 }
  0x4a   : > { %13919 = vmatpush3.bf16.msra.mxu0 %v14500_v13 }
  0x4d   : > { %13757 = vmatmul.mubr.msk.bf16.gmra.mrb[8].mxu0 %vm602_vm0, %v14480_v18 }
  0x4e   : > { %13760 = vmatprep.mubr.msk.bf16.mxu0 %vm602_vm0, %v14481_v19 }
  0x55   : > { %13761 = vmatmul.mubr.msk.bf16.gmra.mrb[12].mxu0 %vm602_vm0, %v14482_v20 }
  0x56   : > { %13764 = vmatprep.mubr.msk.bf16.mxu0 %vm602_vm0, %v14483_v21  ;;  %v14501_v21 = vld [vmem:[%s20407_s7 + $0x50] sm:$0xff]  }
  0x57   : > { %13920 = vmatprep.subr.bf16.mxu0 %v14501_v21 }
  0x58   : > { %13921 = vmatpush3.bf16.msra.mxu0 %v14501_v21 }
  0x5d   : > { %13765 = vmatmul.mubr.msk.bf16.gmra.mrb[16].mxu0 %vm602_vm0, %v14484_v22 }
  0x5e   : > { %13768 = vmatprep.mubr.msk.bf16.mxu0 %vm602_vm0, %v14485_v23 }
  0x65   : > { %13769 = vmatmul.mubr.msk.bf16.gmra.mrb[20].mxu0 %vm602_vm0, %v14486_v24 }
  0x66   : > { %13772 = vmatprep.mubr.msk.bf16.mxu0 %vm602_vm0, %v14487_v25 }
  0x6d   : > { %13773 = vmatmul.mubr.msk.bf16.gmra.mrb[24].mxu0 %vm602_vm0, %v14488_v26 }
  0x6e   : > { %13776 = vmatprep.mubr.msk.bf16.mxu0 %vm602_vm0, %v14489_v27 }
  0x75   : > { %13777 = vmatmul.mubr.msk.bf16.gmra.mrb[28].mxu0 %vm602_vm0, %v14490_v28 }
 0x110   : > { %v13750_v31 = vpop.f32.mrb[0].mxu0 }
 0x111   : > { %v917_v32 = vadd.f32 %v13750_v31, %v15000_v29  ;;  %v908_v33 = vpop.f32.mrb[1].mxu0  ;;  %v14502_v31 = vld [vmem:[%s20407_s7 + $0x58] sm:$0xff]  }
 0x112   : > { %v909_v35 = vadd.f32 %v15000_v29, %v908_v33  ;;  %v13751_v36 = vpop.f32.mrb[2].mxu0  ;;  %13922 = vmatprep.subr.bf16.mxu0 %v14502_v31 }
 0x113   : > { %v920_v38 = vadd.f32 %v13751_v36, %v15000_v29  ;;  %v911_v39 = vpop.f32.mrb[3].mxu0  ;;  %v1037_v41 = vmax.f32 %v917_v32, 0.0  ;;  %13923 = vmatpush3.bf16.msra.mxu0 %v14502_v31 }
 0x114   : > { %v912_v40 = vadd.f32 %v15000_v29, %v911_v39  ;;  %v1035_v43 = vmax.f32 %v909_v35, 0.0 }
 0x115   : > { %v1038_v42 = vmax.f32 %v920_v38, 0.0 }
 0x116   : > { %v1036_v44 = vmax.f32 %v912_v40, 0.0 }
 0x117   : > { %v15018_v46 = vpack.c.bf16 %v1038_v42, %v1037_v41 }
 0x118   : > { %v15020_v47 = vpack.c.bf16 %v1036_v44, %v1035_v43  ;;  %v13754_v48 = vpop.f32.mrb[4].mxu0 }
 0x119   : > { %20631 = vst [vmem:[#allocation14_spill] sm:$0xff] %v15018_v46  ;;  %v933_v49 = vadd.f32 %v13754_v48, %v15000_v29  ;;  %1101 = vrot.lane.b32.xlu1 %v15018_v46, %s20436_s24  ;;  %1183 = vrot.lane.b32.xlu0 %v15018_v46, %s20428_s2  ;;  %v924_v50 = vpop.f32.mrb[5].mxu0 }
 0x11a   : > { %20632 = vst [vmem:[#allocation15_spill] sm:$0xff] %v15020_v47  ;;  %v925_v51 = vadd.f32 %v15000_v29, %v924_v50  ;;  %v13755_v52 = vpop.f32.mrb[6].mxu0  ;;  %1165 = vst.msk [vmem:[#allocation2 + $0x8] sm:$0xff] %vm1164_vm1, %v15020_v47 }
 0x11b   : > { %v936_v54 = vadd.f32 %v13755_v52, %v15000_v29  ;;  %v927_v55 = vpop.f32.mrb[7].mxu0  ;;  %v1041_v58 = vmax.f32 %v933_v49, 0.0 }
 0x11c   : > { %v928_v56 = vadd.f32 %v15000_v29, %v927_v55  ;;  %v1039_v60 = vmax.f32 %v925_v51, 0.0 }
 0x11d   : > { %v1042_v59 = vmax.f32 %v936_v54, 0.0  ;;  %3656 = vrot.lane.b32.xlu1 %v15018_v46, %s20534_s0  ;;  %1099 = vrot.lane.b32.xlu0 %v15020_v47, %s20436_s24 }
 0x11e   : > { %v1040_v61 = vmax.f32 %v928_v56, 0.0 }
 0x11f   : > { %v15042_v62 = vpack.c.bf16 %v1042_v59, %v1041_v58 }
 0x120   : > { %v15047_v0 = vpack.c.bf16 %v1040_v61, %v1039_v60  ;;  %v13758_v1 = vpop.f32.mrb[8].mxu0 }
 0x121   : > { %20633 = vst [vmem:[#allocation16_spill] sm:$0xff] %v15042_v62  ;;  %v949_v2 = vadd.f32 %v13758_v1, %v15000_v29  ;;  %v940_v3 = vpop.f32.mrb[9].mxu0  ;;  %3654 = vrot.lane.b32.xlu1 %v15020_v47, %s20534_s0  ;;  %1105 = vrot.lane.b32.xlu0 %v15042_v62, %s20436_s24 }
 0x122   : > { %20634 = vst [vmem:[#allocation17_spill] sm:$0xff] %v15047_v0  ;;  %v941_v4 = vadd.f32 %v15000_v29, %v940_v3  ;;  %v13759_v5 = vpop.f32.mrb[10].mxu0 }
 0x123   : > { %v952_v7 = vadd.f32 %v13759_v5, %v15000_v29  ;;  %v943_v8 = vpop.f32.mrb[11].mxu0  ;;  %v1045_v11 = vmax.f32 %v949_v2, 0.0 }
 0x124   : > { %v944_v10 = vadd.f32 %v15000_v29, %v943_v8  ;;  %v1043_v14 = vmax.f32 %v941_v4, 0.0 }
 0x125   : > { %v1046_v12 = vmax.f32 %v952_v7, 0.0  ;;  %1187 = vrot.lane.b32.xlu1 %v15042_v62, %s20428_s2  ;;  %1103 = vrot.lane.b32.xlu0 %v15047_v0, %s20436_s24 }
 0x126   : > { %v1044_v15 = vmax.f32 %v944_v10, 0.0 }
 0x127   : > { %v15070_v16 = vpack.c.bf16 %v1046_v12, %v1045_v11 }
 0x128   : > { %v15072_v17 = vpack.c.bf16 %v1044_v15, %v1043_v14  ;;  %v13762_v18 = vpop.f32.mrb[12].mxu0 }
 0x129   : > { %20635 = vst [vmem:[#allocation18_spill] sm:$0xff] %v15070_v16  ;;  %v965_v19 = vadd.f32 %v13762_v18, %v15000_v29  ;;  %3660 = vrot.lane.b32.xlu1 %v15042_v62, %s20534_s0  ;;  %1191 = vrot.lane.b32.xlu0 %v15070_v16, %s20428_s2  ;;  %v956_v20 = vpop.f32.mrb[13].mxu0 }
 0x12a   : > { %20636 = vst [vmem:[#allocation19_spill] sm:$0xff] %v15072_v17  ;;  %v957_v22 = vadd.f32 %v15000_v29, %v956_v20  ;;  %v13763_v23 = vpop.f32.mrb[14].mxu0 }
 0x12b   : > { %v1049_v24 = vmax.f32 %v965_v19, 0.0  ;;  %v968_v25 = vadd.f32 %v13763_v23, %v15000_v29  ;;  %v959_v26 = vpop.f32.mrb[15].mxu0 }
 0x12c   : > { %v1047_v27 = vmax.f32 %v957_v22, 0.0  ;;  %v960_v28 = vadd.f32 %v15000_v29, %v959_v26 }
 0x12d   : > { %v1050_v30 = vmax.f32 %v968_v25, 0.0  ;;  %1185 = vrot.lane.b32.xlu1 %v15047_v0, %s20428_s2  ;;  %1109 = vrot.lane.b32.xlu0 %v15070_v16, %s20436_s24 }
 0x12e   : > { %v1048_v32 = vmax.f32 %v960_v28, 0.0 }
 0x12f   : > { %v15092_v33 = vpack.c.bf16 %v1050_v30, %v1049_v24 }
 0x130   : > { %v15094_v34 = vpack.c.bf16 %v1048_v32, %v1047_v27  ;;  %v13766_v35 = vpop.f32.mrb[16].mxu0 }
 0x131   : > { %20637 = vst [vmem:[#allocation20_spill] sm:$0xff] %v15092_v33  ;;  %3658 = vrot.lane.b32.xlu1 %v15047_v0, %s20534_s0  ;;  %1189 = vrot.lane.b32.xlu0 %v15072_v17, %s20428_s2  ;;  %v981_v36 = vadd.f32 %v13766_v35, %v15000_v29  ;;  %v972_v37 = vpop.f32.mrb[17].mxu0 }
 0x132   : > { %20638 = vst [vmem:[#allocation21_spill] sm:$0xff] %v15094_v34  ;;  %v973_v38 = vadd.f32 %v15000_v29, %v972_v37  ;;  %v13767_v39 = vpop.f32.mrb[18].mxu0  ;;  %v15201_v37 = vld [vmem:[%s20628_s22 + $0x1c] sm:$0xf] }
 0x133   : > { %v1053_v40 = vmax.f32 %v981_v36, 0.0  ;;  %v984_v41 = vadd.f32 %v13767_v39, %v15000_v29  ;;  %v975_v42 = vpop.f32.mrb[19].mxu0  ;;  %v15189_v36 = vld [vmem:[%s20628_s22 + $0x18] sm:$0xf]  ;;  %v15219_v39 = vld [vmem:[%s20628_s22 + $0x20] sm:$0xf] }
 0x134   : > { %v1051_v43 = vmax.f32 %v973_v38, 0.0  ;;  %v976_v44 = vadd.f32 %v15000_v29, %v975_v42  ;;  %v15206_v38 = vld [vmem:[%s20630_s5] sm:$0xff]   ;;  %v15236_v42 = vpop.permute.xlu0 %1277 }
 0x135   : > { %3664 = vrot.lane.b32.xlu1 %v15070_v16, %s20534_s0  ;;  %1195 = vrot.lane.b32.xlu0 %v15092_v33, %s20428_s2  ;;  %v1054_v45 = vmax.f32 %v984_v41, 0.0  ;;  %v15232_v41 = vld [vmem:[%s20628_s22 + $0x28] sm:$0xf] }
 0x136   : > { %v1052_v48 = vmax.f32 %v976_v44, 0.0  ;;  %13824 = vmatprep.subr.bf16.mxu1 %v15206_v38  ;;  %v15247_v44 = vld [vmem:[%s20628_s22 + $0x2c] sm:$0xf] }
 0x137   : > { %v15108_v49 = vpack.c.bf16 %v1054_v45, %v1053_v40  ;;  %v15227_v40 = vld [vmem:[%s20628_s22 + $0x24] sm:$0xf]  ;;  %v15252_v45 = vld [vmem:[%s20628_s22 + $0x30] sm:$0xf] }
 0x138   : > { %v15110_v50 = vpack.c.bf16 %v1052_v48, %v1051_v43  ;;  %v13770_v51 = vpop.f32.mrb[20].mxu0  ;;  %v15238_v43 = vpop.permute.xlu1 %1265 }
 0x139   : > { %20639 = vst [vmem:[#allocation22_spill] sm:$0xff] %v15108_v49  ;;  %1107 = vrot.lane.b32.xlu1 %v15072_v17, %s20436_s24  ;;  %1113 = vrot.lane.b32.xlu0 %v15092_v33, %s20436_s24  ;;  %v997_v52 = vadd.f32 %v13770_v51, %v15000_v29  ;;  %v988_v53 = vpop.f32.mrb[21].mxu0  ;;  %v15254_v48 = vpop.permute.xlu0 %1301 }
 0x13a   : > { %20640 = vst [vmem:[#allocation23_spill] sm:$0xff] %v15110_v50  ;;  %v989_v54 = vadd.f32 %v15000_v29, %v988_v53  ;;  %v13771_v55 = vpop.f32.mrb[22].mxu0  ;;  %v15268_v53 = vld [vmem:[%s20628_s22 + $0x38] sm:$0xf] }
 0x13b   : > { %v1057_v56 = vmax.f32 %v997_v52, 0.0  ;;  %v1000_v57 = vadd.f32 %v13771_v55, %v15000_v29  ;;  %v991_v58 = vpop.f32.mrb[23].mxu0  ;;  %v15263_v52 = vld [vmem:[%s20628_s22 + $0x34] sm:$0xf] }
 0x13c   : > { %v1055_v59 = vmax.f32 %v989_v54, 0.0  ;;  %v992_v60 = vadd.f32 %v15000_v29, %v991_v58  ;;  %v15256_v51 = vpop.permute.xlu1 %1289  ;;  %v15291_v58 = vld [vmem:[%s20628_s22 + $0x44] sm:$0xf] }
 0x13d   : > { %3662 = vrot.lane.b32.xlu1 %v15072_v17, %s20534_s0  ;;  %1193 = vrot.lane.b32.xlu0 %v15094_v34, %s20428_s2  ;;  %v1058_v61 = vmax.f32 %v1000_v57, 0.0  ;;  %v15272_v54 = vpop.permute.xlu0 %1313  ;;  %v15284_v57 = vld [vmem:[%s20628_s22 + $0x40] sm:$0xf] }
 0x13e   : > { %v1056_v63 = vmax.f32 %v992_v60, 0.0 }
 0x13f   : > { %v15124_v1 = vpack.c.bf16 %v1058_v61, %v1057_v56  ;;  %v15279_v56 = vld [vmem:[%s20628_s22 + $0x3c] sm:$0xf] }
 0x140   : > { %v15126_v2 = vpack.c.bf16 %v1056_v63, %v1055_v59  ;;  %v13774_v3 = vpop.f32.mrb[24].mxu0  ;;  %v15274_v55 = vpop.permute.xlu1 %1325  ;;  %v15296_v59 = vld [vmem:[%s20628_s22 + $0x48] sm:$0xf]  ;;  %v15310_v63 = vld [vmem:[%s20628_s22 + $0x4c] sm:$0xf] }
 0x141   : > { %20641 = vst [vmem:[#allocation24_spill] sm:$0xff] %v15124_v1  ;;  %3668 = vrot.lane.b32.xlu1 %v15092_v33, %s20534_s0  ;;  %1199 = vrot.lane.b32.xlu0 %v15108_v49, %s20428_s2  ;;  %v1013_v4 = vadd.f32 %v13774_v3, %v15000_v29  ;;  %v1004_v5 = vpop.f32.mrb[25].mxu0  ;;  %v15315_v3 = vld [vmem:[%s20628_s22 + $0x50] sm:$0xf] }
 0x142   : > { %20642 = vst [vmem:[#allocation25_spill] sm:$0xff] %v15126_v2  ;;  %v1005_v6 = vadd.f32 %v15000_v29, %v1004_v5  ;;  %v13775_v7 = vpop.f32.mrb[26].mxu0 }
 0x143   : > { %v1061_v8 = vmax.f32 %v1013_v4, 0.0  ;;  %v1016_v9 = vadd.f32 %v13775_v7, %v15000_v29  ;;  %v1007_v10 = vpop.f32.mrb[27].mxu0  ;;  %v15330_v7 = vld [vmem:[%s20628_s22 + $0x58] sm:$0xf] }
 0x144   : > { %v1059_v11 = vmax.f32 %v1005_v6, 0.0  ;;  %v1008_v12 = vadd.f32 %v15000_v29, %v1007_v10  ;;  %v15325_v6 = vld [vmem:[%s20628_s22 + $0x54] sm:$0xf] }
 0x145   : > { %1111 = vrot.lane.b32.xlu1 %v15094_v34, %s20436_s24  ;;  %1117 = vrot.lane.b32.xlu0 %v15108_v49, %s20436_s24  ;;  %v1062_v13 = vmax.f32 %v1016_v9, 0.0 }
 0x146   : > { %v1060_v14 = vmax.f32 %v1008_v12, 0.0  ;;  %v15355_v12 = vld [vmem:[%s20628_s22 + $0x60] sm:$0xf] }
 0x147   : > { %v15140_v15 = vpack.c.bf16 %v1062_v13, %v1061_v8 }
 0x148   : > { %v15142_v18 = vpack.c.bf16 %v1060_v14, %v1059_v11  ;;  %v13778_v19 = vpop.f32.mrb[28].mxu0  ;;  %v15350_v11 = vld [vmem:[%s20628_s22 + $0x5c] sm:$0xf] }
 0x149   : > { %20643 = vst [vmem:[#allocation26_spill] sm:$0xff] %v15140_v15  ;;  %3666 = vrot.lane.b32.xlu1 %v15094_v34, %s20534_s0  ;;  %1197 = vrot.lane.b32.xlu0 %v15110_v50, %s20428_s2  ;;  %v1029_v20 = vadd.f32 %v13778_v19, %v15000_v29  ;;  %v1020_v21 = vpop.f32.mrb[29].mxu0  ;;  %v15366_v19 = vld [vmem:[%s20628_s22 + $0x64] sm:$0xf] }
 0x14a   : > { %20644 = vst [vmem:[#allocation27_spill] sm:$0xff] %v15142_v18  ;;  %v1021_v22 = vadd.f32 %v15000_v29, %v1020_v21  ;;  %v13779_v23 = vpop.f32.mrb[30].mxu0 }
 0x14b   : > { %v1065_v24 = vmax.f32 %v1029_v20, 0.0  ;;  %v1032_v25 = vadd.f32 %v13779_v23, %v15000_v29  ;;  %v1023_v26 = vpop.f32.mrb[31].mxu0  ;;  %v15371_v20 = vld [vmem:[%s20628_s22 + $0x68] sm:$0xf] }
 0x14c   : > { %v1063_v27 = vmax.f32 %v1021_v22, 0.0  ;;  %v1024_v28 = vadd.f32 %v15000_v29, %v1023_v26  ;;  %v15167_v29 = vld [vmem:[%s20407_s7] sm:$0xff]  }
 0x14d   : > { %3672 = vrot.lane.b32.xlu1 %v15108_v49, %s20534_s0  ;;  %1203 = vrot.lane.b32.xlu0 %v15124_v1, %s20428_s2  ;;  %v1066_v30 = vmax.f32 %v1032_v25, 0.0  ;;  %v15388_v25 = vld [vmem:[%s20628_s22 + $0x70] sm:$0xf] }
 0x14e   : > { %v1064_v31 = vmax.f32 %v1024_v28, 0.0  ;;  %13956 = vmatprep.subr.bf16.mxu0 %v15167_v29 }
 0x14f   : > { %v15156_v32 = vpack.c.bf16 %v1066_v30, %v1065_v24  ;;  %v15383_v24 = vld [vmem:[%s20628_s22 + $0x6c] sm:$0xf]  ;;  %v15408_v30 = vld [vmem:[%s20628_s22 + $0x74] sm:$0xf] }
 0x150   : > { %v15158_v35 = vpack.c.bf16 %v1064_v31, %v1063_v27  ;;  %v15413_v31 = vld [vmem:[%s20628_s22 + $0x78] sm:$0xf] }
 0x151   : > { %20645 = vst [vmem:[#allocation28_spill] sm:$0xff] %v15156_v32  ;;  %1115 = vrot.lane.b32.xlu1 %v15110_v50, %s20436_s24  ;;  %1121 = vrot.lane.b32.xlu0 %v15124_v1, %s20436_s24 }
 0x152   : > { %20646 = vst [vmem:[#allocation29_spill] sm:$0xff] %v15158_v35 }
 0x155   : > { %3670 = vrot.lane.b32.xlu1 %v15110_v50, %s20534_s0  ;;  %1201 = vrot.lane.b32.xlu0 %v15126_v2, %s20428_s2 }
 0x159   : > { %3676 = vrot.lane.b32.xlu1 %v15124_v1, %s20534_s0  ;;  %1207 = vrot.lane.b32.xlu0 %v15140_v15, %s20428_s2 }
 0x15d   : > { %1119 = vrot.lane.b32.xlu1 %v15126_v2, %s20436_s24  ;;  %1125 = vrot.lane.b32.xlu0 %v15140_v15, %s20436_s24 }
 0x161   : > { %3674 = vrot.lane.b32.xlu1 %v15126_v2, %s20534_s0  ;;  %1205 = vrot.lane.b32.xlu0 %v15142_v18, %s20428_s2 }
 0x165   : > { %1337 = vperm.xlu1 %14465, %v15189_v36   ;;  %1181 = vrot.lane.b32.xlu0 %v15020_v47, %s20428_s2 }
 0x169   : > { %1123 = vrot.lane.b32.xlu1 %v15142_v18, %s20436_s24  ;;  %1209 = vrot.lane.b32.xlu0 %v15158_v35, %s20428_s2 }
 0x16d   : > { %3678 = vrot.lane.b32.xlu1 %v15142_v18, %s20534_s0  ;;  %1349 = vperm.xlu0 %14466, %v15201_v37  }
 0x171   : > { %1211 = vrot.lane.b32.xlu1 %v15156_v32, %s20428_s2  ;;  %1127 = vrot.lane.b32.xlu0 %v15158_v35, %s20436_s24  ;;  %s20910_s2 = smov 48  }
 0x175   : > { %3680 = vrot.lane.b32.xlu1 %v15140_v15, %s20534_s0  ;;  %1361 = vperm.xlu0 %14466, %v15219_v39  }
 0x179   : > { %1373 = vperm.xlu1 %14465, %v15227_v40   ;;  %1385 = vperm.xlu0 %14466, %v15232_v41  }
 0x17d   : > { %1129 = vrot.lane.b32.xlu1 %v15156_v32, %s20436_s24  ;;  %3682 = vrot.lane.b32.xlu0 %v15158_v35, %s20534_s0  ;;  %s593_s24 = sand.u32 1, %s14749_s30  }
 0x181   : > { %1397 = vperm.xlu1 %14465, %v15247_v44   ;;  %1409 = vperm.xlu0 %14466, %v15252_v45  }
 0x185   : > { %1421 = vperm.xlu1 %14465, %v15263_v52   ;;  %1433 = vperm.xlu0 %14466, %v15268_v53  }
 0x189   : > { %1445 = vperm.xlu1 %14465, %v15279_v56   ;;  %1457 = vperm.xlu0 %14466, %v15284_v57  }
 0x18b   : > { %v15298_v60 = vpop.permute.xlu1 %1101  ;;  %v1184_v61 = vpop.permute.xlu0 %1183 }
 0x18c   : > { %1149 = vst.msk [vmem:[#allocation2 + $0x18] sm:$0xff] %vm1147_vm2, %v15298_v60 }
 0x18d   : > { %1231 = vst.msk [vmem:[#allocation2 + $0x8] sm:$0xff] %vm1229_vm3, %v1184_v61  ;;  %1469 = vperm.xlu1 %14465, %v15291_v58   ;;  %1481 = vperm.xlu0 %14466, %v15296_v59  }
 0x18e   : > { %1167 = vst.msk [vmem:[#allocation2 + $0x18] sm:$0xff] %vm1164_vm1, %v15047_v0 }
 0x18f   : > { %v3657_v4 = vpop.permute.xlu1 %3656  ;;  %v1100_v5 = vpop.permute.xlu0 %1099 }
 0x190   : > { %1148 = vst.msk [vmem:[#allocation2 + $0x10] sm:$0xff] %vm1147_vm2, %v1100_v5 }
 0x191   : > { %1166 = vst.msk [vmem:[#allocation2 + $0x10] sm:$0xff] %vm1164_vm1, %v15018_v46  ;;  %1493 = vperm.xlu1 %14465, %v15310_v63   ;;  %1505 = vperm.xlu0 %14466, %v15315_v3  }
 0x193   : > { %v3655_v8 = vpop.permute.xlu1 %3654  ;;  %v15332_v9 = vpop.permute.xlu0 %1105 }
 0x194   : > { %v15334_v10 = vld [vmem:[#allocation2 + $0x8] sm:$0xff]  ;;  %1151 = vst.msk [vmem:[#allocation2 + $0x28] sm:$0xff] %vm1147_vm2, %v15332_v9 }
 0x195   : > { %13792 = vmatprep.mubr.msk.bf16.mxu1 %vm602_vm0, %v15334_v10  ;;  %3718 = vst.msk [vmem:[#allocation2 + $0x8] sm:$0xff] %vm1164_vm1, %v1100_v5  ;;  %1169 = vst.msk [vmem:[#allocation2 + $0x28] sm:$0xff] %vm1164_vm1, %v15072_v17  ;;  %1517 = vperm.xlu1 %14465, %v15325_v6  }
 0x196   : > { %3735 = vst.msk [vmem:[#allocation2 + $0x8] sm:$0xff] %vm1229_vm3, %v15018_v46  ;;  %1529 = vperm.xlu0 %14466, %v15330_v7  }
 0x197   : > { %v1188_v13 = vpop.permute.xlu1 %1187  ;;  %v1104_v14 = vpop.permute.xlu0 %1103 }
 0x198   : > { %1233 = vst.msk [vmem:[#allocation2 + $0x18] sm:$0xff] %vm1229_vm3, %v1188_v13  ;;  %v15424_v13 = vld [vmem:[%s20628_s22 + $0x7c] sm:$0xf] }
 0x199   : > { %1150 = vst.msk [vmem:[#allocation2 + $0x20] sm:$0xff] %vm1147_vm2, %v1104_v14  ;;  %1541 = vperm.xlu1 %14465, %v15350_v11  }
 0x19a   : > { %1168 = vst.msk [vmem:[#allocation2 + $0x20] sm:$0xff] %vm1164_vm1, %v15042_v62  ;;  %1553 = vperm.xlu0 %14466, %v15355_v12  }
 0x19b   : > { %v3661_v21 = vpop.permute.xlu1 %3660  ;;  %v1192_v22 = vpop.permute.xlu0 %1191 }
 0x19c   : > { %1235 = vst.msk [vmem:[#allocation2 + $0x28] sm:$0xff] %vm1229_vm3, %v1192_v22 }
 0x19d   : > { %v15374_v23 = vld [vmem:[#allocation2 + $0x8] sm:$0xff]  ;;  %1565 = vperm.xlu1 %14465, %v15366_v19  }
 0x19e   : > { %1577 = vperm.xlu0 %14466, %v15371_v20   ;;  %13924 = vmatprep.mubr.msk.bf16.mxu0 %vm602_vm0, %v15374_v23 }
 0x19f   : > { %v15390_v26 = vld [vmem:[#allocation2 + $0x18] sm:$0xff]  ;;  %v1186_v27 = vpop.permute.xlu1 %1185  ;;  %v15392_v28 = vpop.permute.xlu0 %1109 }
 0x1a0   : > { %3703 = vst.msk [vmem:[#allocation2 + $0x18] sm:$0xff] %vm1147_vm2, %v3657_v4  ;;  %1153 = vst.msk [vmem:[#allocation2 + $0x38] sm:$0xff] %vm1147_vm2, %v15392_v28 }
 0x1a1   : > { %1232 = vst.msk [vmem:[#allocation2 + $0x10] sm:$0xff] %vm1229_vm3, %v1186_v27  ;;  %1589 = vperm.xlu1 %14465, %v15383_v24  }
 0x1a2   : > { %3720 = vst.msk [vmem:[#allocation2 + $0x18] sm:$0xff] %vm1164_vm1, %v1104_v14  ;;  %1171 = vst.msk [vmem:[#allocation2 + $0x38] sm:$0xff] %vm1164_vm1, %v15094_v34  ;;  %1601 = vperm.xlu0 %14466, %v15388_v25  }
 0x1a3   : > { %3737 = vst.msk [vmem:[#allocation2 + $0x18] sm:$0xff] %vm1229_vm3, %v15042_v62  ;;  %v3659_v61 = vpop.permute.xlu1 %3658  ;;  %v1190_v4 = vpop.permute.xlu0 %1189  ;;  %v15415_v5 = vld [vmem:[#allocation2 + $0x28] sm:$0xff] }
 0x1a4   : > { %1234 = vst.msk [vmem:[#allocation2 + $0x20] sm:$0xff] %vm1229_vm3, %v1190_v4  ;;  %v14763_v4 = vmov 1  }
 0x1a5   : > { %3705 = vst.msk [vmem:[#allocation2 + $0x28] sm:$0xff] %vm1147_vm2, %v3661_v21  ;;  %1613 = vperm.xlu1 %14465, %v15408_v30   ;;  %v14507_v21 = vld [vmem:[%s20630_s5 + $0x8] sm:$0xff]  }
 0x1a6   : > { %1625 = vperm.xlu0 %14466, %v15413_v31  }
 0x1a7   : > { %v3665_v14 = vpop.permute.xlu1 %3664  ;;  %v1196_v22 = vpop.permute.xlu0 %1195 }
 0x1a8   : > { %v15426_v27 = vld [vmem:[#allocation2 + $0x10] sm:$0xff]  ;;  %1237 = vst.msk [vmem:[#allocation2 + $0x38] sm:$0xff] %vm1229_vm3, %v1196_v22 }
 0x1a9   : > { %13793 = vmatmul.mubr.msk.bf16.vlgmr.msra.gmra.mrb[0].mxu1 %vm602_vm0, %v15426_v27  ;;  %3702 = vst.msk [vmem:[#allocation2 + $0x10] sm:$0xff] %vm1147_vm2, %v3655_v8  ;;  %1637 = vperm.xlu1 %14465, %v15424_v13   ;;  %v14655_v8 = vld [vmem:[%s20628_s22] sm:$0xf] }
 0x1aa   : > { %3719 = vst.msk [vmem:[#allocation2 + $0x10] sm:$0xff] %vm1164_vm1, %v15298_v60  ;;  %14467 = vset.pattern.permute.xlu0 %v14763_v4  ;;  %13796 = vmatprep.mubr.msk.bf16.mxu1 %vm602_vm0, %v15390_v26  ;;  %v14509_v60 = vld [vmem:[%s20630_s5 + $0x10] sm:$0xff]  }
 0x1ab   : > { %3736 = vst.msk [vmem:[#allocation2 + $0x10] sm:$0xff] %vm1229_vm3, %v15047_v0  ;;  %1907 = vperm.xlu0 %14467, %v14655_v8   ;;  %v1108_v22 = vpop.permute.xlu1 %1107  ;;  %v15445_v62 = vpop.permute.xlu0 %1113  ;;  %v15447_v46 = vld [vmem:[#allocation2 + $0x20] sm:$0xff]  ;;  %13825 = vmatpush3.bf16.msra.mxu1 %v15206_v38 }
 0x1ac   : > { %1152 = vst.msk [vmem:[#allocation2 + $0x30] sm:$0xff] %vm1147_vm2, %v1108_v22  ;;  %1155 = vst.msk [vmem:[#allocation2 + $0x48] sm:$0xff] %vm1147_vm2, %v15445_v62  ;;  %13826 = vmatprep.subr.bf16.mxu1 %v14507_v21  ;;  %v14656_v38 = vld [vmem:[%s20628_s22 + $0x4] sm:$0xf] }
 0x1ad   : > { %3722 = vst.msk [vmem:[#allocation2 + $0x28] sm:$0xff] %vm1164_vm1, %v1108_v22  ;;  %1170 = vst.msk [vmem:[#allocation2 + $0x30] sm:$0xff] %vm1164_vm1, %v15070_v16  ;;  %14468 = vset.pattern.permute.xlu1 %v14763_v4  ;;  %v14504_v4 = vld [vmem:[%s20407_s7 + $0x8] sm:$0xff]  }
 0x1ae   : > { %3704 = vst.msk [vmem:[#allocation2 + $0x20] sm:$0xff] %vm1147_vm2, %v3659_v61  ;;  %1918 = vperm.xlu1 %14468, %v14656_v38   ;;  %v14657_v61 = vld [vmem:[%s20628_s22 + $0xc] sm:$0xf]  ;;  %v14658_v38 = vld [vmem:[%s20628_s22 + $0x8] sm:$0xf] }
 0x1af   : > { %3739 = vst.msk [vmem:[#allocation2 + $0x28] sm:$0xff] %vm1229_vm3, %v15070_v16  ;;  %1940 = vperm.xlu0 %14467, %v14657_v61   ;;  %v3663_v8 = vpop.permute.xlu1 %3662  ;;  %v1194_v22 = vpop.permute.xlu0 %1193  ;;  %v15474_v16 = vld [vmem:[#allocation2 + $0x38] sm:$0xff]  ;;  %13827 = vmatpush3.bf16.msra.mxu1 %v14507_v21 }
 0x1b0   : > { %1173 = vst.msk [vmem:[#allocation2 + $0x48] sm:$0xff] %vm1164_vm1, %v15110_v50  ;;  %3721 = vst.msk [vmem:[#allocation2 + $0x20] sm:$0xff] %vm1164_vm1, %v15332_v9  ;;  %13828 = vmatprep.subr.bf16.mxu1 %v14509_v60  ;;  %v14510_v21 = vld [vmem:[%s20630_s5 + $0x18] sm:$0xff]  }
 0x1b1   : > { %3738 = vst.msk [vmem:[#allocation2 + $0x20] sm:$0xff] %vm1229_vm3, %v15072_v17  ;;  %1236 = vst.msk [vmem:[#allocation2 + $0x30] sm:$0xff] %vm1229_vm3, %v1194_v22  ;;  %13797 = vmatmul.mubr.msk.bf16.gmra.mrb[4].mxu1 %vm602_vm0, %v15447_v46  ;;  %v15498_v17 = vld [vmem:[#allocation2 + $0x18] sm:$0xff] }
 0x1b2   : > { %3707 = vst.msk [vmem:[#allocation2 + $0x38] sm:$0xff] %vm1147_vm2, %v3665_v14  ;;  %13800 = vmatprep.mubr.msk.bf16.mxu1 %vm602_vm0, %v15415_v5  ;;  %v15482_v9 = vld [vmem:[#allocation2 + $0x10] sm:$0xff]  ;;  %1929 = vperm.xlu1 %14468, %v14658_v38  }
 0x1b3   : > { %v14659_v14 = vld [vmem:[%s20628_s22 + $0x14] sm:$0xf]  ;;  %13925 = vmatmul.mubr.msk.bf16.vlgmr.msra.gmra.mrb[32].mxu0 %vm602_vm0, %v15482_v9  ;;  %v3669_v61 = vpop.permute.xlu1 %3668  ;;  %v1200_v22 = vpop.permute.xlu0 %1199  ;;  %13829 = vmatpush3.bf16.msra.mxu1 %v14509_v60 }
 0x1b4   : > { %1962 = vperm.xlu0 %14467, %v14659_v14   ;;  %1239 = vst.msk [vmem:[#allocation2 + $0x48] sm:$0xff] %vm1229_vm3, %v1200_v22  ;;  %13928 = vmatprep.mubr.msk.bf16.mxu0 %vm602_vm0, %v15498_v17  ;;  %v14505_v38 = vld [vmem:[%s20407_s7 + $0x10] sm:$0xff]  }
 0x1b5   : > { %13957 = vmatpush3.bf16.msra.mxu0 %v15167_v29  ;;  %13830 = vmatprep.subr.bf16.mxu1 %v14510_v21  ;;  %v14660_v14 = vld [vmem:[%s20628_s22 + $0x10] sm:$0xf]  ;;  %v14511_v29 = vld [vmem:[%s20630_s5 + $0x20] sm:$0xff]  }
 0x1b6   : > { %13958 = vmatprep.subr.bf16.mxu0 %v14504_v4  ;;  %1951 = vperm.xlu1 %14468, %v14660_v14  }
 0x1b7   : > { %v1112_v60 = vpop.permute.xlu1 %1111  ;;  %v15511_v22 = vpop.permute.xlu0 %1117  ;;  %13831 = vmatpush3.bf16.msra.mxu1 %v14510_v21  ;;  %v15546_v21 = vld [vmem:[#allocation2 + $0x28] sm:$0xff] }
 0x1b8   : > { %1984 = vperm.xlu0 %14467, %v15201_v37   ;;  %v15513_v0 = vld [vmem:[#allocation2 + $0x30] sm:$0xff]  ;;  %1154 = vst.msk [vmem:[#allocation2 + $0x40] sm:$0xff] %vm1147_vm2, %v1112_v60  ;;  %1157 = vst.msk [vmem:[#allocation2 + $0x58] sm:$0xff] %vm1147_vm2, %v15511_v22  ;;  %v14508_v37 = vld [vmem:[%s20407_s7 + $0x18] sm:$0xff]   ;;  %13832 = vmatprep.subr.bf16.mxu1 %v14511_v29 }
 0x1b9   : > { %3724 = vst.msk [vmem:[#allocation2 + $0x38] sm:$0xff] %vm1164_vm1, %v1112_v60  ;;  %13801 = vmatmul.mubr.msk.bf16.gmra.mrb[8].mxu1 %vm602_vm0, %v15513_v0  ;;  %13959 = vmatpush3.bf16.msra.mxu0 %v14504_v4  ;;  %1172 = vst.msk [vmem:[#allocation2 + $0x40] sm:$0xff] %vm1164_vm1, %v15092_v33  ;;  %v14513_v60 = vld [vmem:[%s20630_s5 + $0x28] sm:$0xff]  }
 0x1ba   : > { %3706 = vst.msk [vmem:[#allocation2 + $0x30] sm:$0xff] %vm1147_vm2, %v3663_v8  ;;  %13804 = vmatprep.mubr.msk.bf16.mxu1 %vm602_vm0, %v15474_v16  ;;  %13960 = vmatprep.subr.bf16.mxu0 %v14505_v38  ;;  %v15542_v8 = vld [vmem:[#allocation2 + $0x20] sm:$0xff] }
 0x1bb   : > { %3741 = vst.msk [vmem:[#allocation2 + $0x38] sm:$0xff] %vm1229_vm3, %v15092_v33  ;;  %1973 = vperm.xlu1 %14468, %v15189_v36   ;;  %13929 = vmatmul.mubr.msk.bf16.gmra.mrb[36].mxu0 %vm602_vm0, %v15542_v8  ;;  %v1198_v4 = vpop.permute.xlu0 %1197  ;;  %v15548_v14 = vld [vmem:[#allocation2 + $0x48] sm:$0xff]  ;;  %v14512_v36 = vld [vmem:[%s20407_s7 + $0x20] sm:$0xff]  }
 0x1bc   : > { %1175 = vst.msk [vmem:[#allocation2 + $0x58] sm:$0xff] %vm1164_vm1, %v15126_v2  ;;  %3723 = vst.msk [vmem:[#allocation2 + $0x30] sm:$0xff] %vm1164_vm1, %v15392_v28  ;;  %2006 = vperm.xlu0 %14467, %v15227_v40   ;;  %v3667_v28 = vpop.permute.xlu1 %3666  ;;  %13932 = vmatprep.mubr.msk.bf16.mxu0 %vm602_vm0, %v15546_v21 }
 0x1bd   : > { %3740 = vst.msk [vmem:[#allocation2 + $0x30] sm:$0xff] %vm1229_vm3, %v15094_v34  ;;  %1238 = vst.msk [vmem:[#allocation2 + $0x40] sm:$0xff] %vm1229_vm3, %v1198_v4  ;;  %13961 = vmatpush3.bf16.msra.mxu0 %v14505_v38  ;;  %13833 = vmatpush3.bf16.msra.mxu1 %v14511_v29  ;;  %v15565_v4 = vld [vmem:[%s20630_s5 + $0x60] sm:$0xff]  }
 0x1be   : > { %3709 = vst.msk [vmem:[#allocation2 + $0x48] sm:$0xff] %vm1147_vm2, %v3669_v61  ;;  %13962 = vmatprep.subr.bf16.mxu0 %v14508_v37  ;;  %13834 = vmatprep.subr.bf16.mxu1 %v14513_v60 }
 0x1bf   : > { %1995 = vperm.xlu1 %14468, %v15219_v39   ;;  %v1204_v33 = vpop.permute.xlu0 %1203 }
 0x1c0   : > { %2028 = vperm.xlu0 %14467, %v15247_v44   ;;  %v3673_v40 = vpop.permute.xlu1 %3672  ;;  %1241 = vst.msk [vmem:[#allocation2 + $0x58] sm:$0xff] %vm1229_vm3, %v1204_v33  ;;  %v14514_v33 = vld [vmem:[%s20407_s7 + $0x28] sm:$0xff]  }
 0x1c1   : > { %13963 = vmatpush3.bf16.msra.mxu0 %v14508_v37  ;;  %13835 = vmatpush3.bf16.msra.mxu1 %v14513_v60 }
 0x1c2   : > { %13964 = vmatprep.subr.bf16.mxu0 %v14512_v36  ;;  %v15576_v38 = vld [vmem:[#allocation2 + $0x38] sm:$0xff]  ;;  %13868 = vmatprep.subr.bf16.mxu1 %v15565_v4 }
 0x1c3   : > { %2017 = vperm.xlu1 %14468, %v15232_v41   ;;  %v15574_v44 = vpop.permute.xlu0 %1121 }
 0x1c4   : > { %v15568_v61 = vld [vmem:[#allocation2 + $0x30] sm:$0xff]  ;;  %2050 = vperm.xlu0 %14467, %v15263_v52   ;;  %v1116_v39 = vpop.permute.xlu1 %1115  ;;  %v15578_v29 = vld [vmem:[#allocation2 + $0x40] sm:$0xff]  ;;  %1159 = vst.msk [vmem:[#allocation2 + $0x68] sm:$0xff] %vm1147_vm2, %v15574_v44 }
 0x1c5   : > { %13933 = vmatmul.mubr.msk.bf16.gmra.mrb[40].mxu0 %vm602_vm0, %v15568_v61  ;;  %1156 = vst.msk [vmem:[#allocation2 + $0x50] sm:$0xff] %vm1147_vm2, %v1116_v39  ;;  %13805 = vmatmul.mubr.msk.bf16.gmra.mrb[12].mxu1 %vm602_vm0, %v15578_v29  ;;  %3708 = vst.msk [vmem:[#allocation2 + $0x40] sm:$0xff] %vm1147_vm2, %v3667_v28  ;;  %v14764_v28 = vmov 839922192  }
 0x1c6   : > { %3726 = vst.msk [vmem:[#allocation2 + $0x48] sm:$0xff] %vm1164_vm1, %v1116_v39  ;;  %13936 = vmatprep.mubr.msk.bf16.mxu0 %vm602_vm0, %v15576_v38  ;;  %1174 = vst.msk [vmem:[#allocation2 + $0x50] sm:$0xff] %vm1164_vm1, %v15108_v49  ;;  %13808 = vmatprep.mubr.msk.bf16.mxu1 %vm602_vm0, %v15548_v14  ;;  %v1269_v60 = vunpack.c.l.s4 %v14764_v28  ;;  %v15619_v39 = vld [vmem:[#allocation3] sm:$0xff] }
 0x1c7   : > { %3743 = vst.msk [vmem:[#allocation2 + $0x48] sm:$0xff] %vm1229_vm3, %v15108_v49  ;;  %13965 = vmatpush3.bf16.msra.mxu0 %v14512_v36  ;;  %2039 = vperm.xlu1 %14468, %v15252_v45   ;;  %v1202_v52 = vpop.permute.xlu0 %1201  ;;  %v15607_v37 = vld [vmem:[#allocation2 + $0x58] sm:$0xff]  ;;  %v1271_v45 = vlaneseq }
 0x1c8   : > { %1177 = vst.msk [vmem:[#allocation2 + $0x68] sm:$0xff] %vm1164_vm1, %v15142_v18  ;;  %3725 = vst.msk [vmem:[#allocation2 + $0x40] sm:$0xff] %vm1164_vm1, %v15445_v62  ;;  %2072 = vperm.xlu0 %14467, %v15279_v56   ;;  %v3671_v41 = vpop.permute.xlu1 %3670  ;;  %13966 = vmatprep.subr.bf16.mxu0 %v14514_v33  ;;  %v15612_v62 = vld [vmem:[%s20407_s7 + $0x60] sm:$0xff]  }
 0x1c9   : > { %3742 = vst.msk [vmem:[#allocation2 + $0x40] sm:$0xff] %vm1229_vm3, %v15110_v50  ;;  %1240 = vst.msk [vmem:[#allocation2 + $0x50] sm:$0xff] %vm1229_vm3, %v1202_v52 }
 0x1ca   : > { %3711 = vst.msk [vmem:[#allocation2 + $0x58] sm:$0xff] %vm1147_vm2, %v3673_v40  ;;  %v1272_v40 = vshrl.u32 %v1271_v45, 7 }
 0x1cb   : > { %13967 = vmatpush3.bf16.msra.mxu0 %v14514_v33  ;;  %2061 = vperm.xlu1 %14468, %v15268_v53   ;;  %v1208_v36 = vpop.permute.xlu0 %1207  ;;  %611 = vst.msk [vmem:[#allocation3 + $0x18] sm:$0xff] %vm608_vm4, %v15619_v39  ;;  %609 = vst.msk [vmem:[#allocation3 + $0x8] sm:$0xff] %vm608_vm4, %v15619_v39 }
 0x1cc   : > { %2094 = vperm.xlu0 %14467, %v15291_v58   ;;  %v3677_v56 = vpop.permute.xlu1 %3676  ;;  %14000 = vmatprep.subr.bf16.mxu0 %v15612_v62  ;;  %613 = vst.msk [vmem:[#allocation3 + $0x108] sm:$0xff] %vm608_vm4, %v15619_v39  ;;  %615 = vst.msk [vmem:[#allocation3 + $0x118] sm:$0xff] %vm608_vm4, %v15619_v39  ;;  %v1270_v58 = vunpack.c.0.s8 %v1269_v60 }
 0x1cd   : > { %1243 = vst.msk [vmem:[#allocation2 + $0x68] sm:$0xff] %vm1229_vm3, %v1208_v36 }
 0x1ce   : > { %v15638_v28 = vld [vmem:[#allocation2 + $0x48] sm:$0xff]  ;;  %618 = vst.msk [vmem:[#allocation4 + $0x8] sm:$0xff] %vm617_vm7, %v15619_v39  ;;  %620 = vst.msk [vmem:[#allocation4 + $0x18] sm:$0xff] %vm617_vm7, %v15619_v39 }
 0x1cf   : > { %2083 = vperm.xlu1 %14468, %v15284_v57   ;;  %v15636_v52 = vpop.permute.xlu0 %1125  ;;  %v15661_v57 = vsub.s32 %v1270_v58, %v1272_v40  ;;  %622 = vst.msk [vmem:[#allocation4 + $0x108] sm:$0xff] %vm617_vm7, %v15619_v39  ;;  %624 = vst.msk [vmem:[#allocation4 + $0x118] sm:$0xff] %vm617_vm7, %v15619_v39 }
 0x1d0   : > { %v15630_v53 = vld [vmem:[#allocation2 + $0x40] sm:$0xff]  ;;  %2116 = vperm.xlu0 %14467, %v15310_v63   ;;  %v1120_v33 = vpop.permute.xlu1 %1119  ;;  %v15640_v49 = vld [vmem:[#allocation2 + $0x50] sm:$0xff]  ;;  %1161 = vst.msk [vmem:[#allocation2 + $0x78] sm:$0xff] %vm1147_vm2, %v15636_v52 }
 0x1d1   : > { %13937 = vmatmul.mubr.msk.bf16.gmra.mrb[44].mxu0 %vm602_vm0, %v15630_v53  ;;  %1158 = vst.msk [vmem:[#allocation2 + $0x60] sm:$0xff] %vm1147_vm2, %v1120_v33  ;;  %13809 = vmatmul.mubr.msk.bf16.gmra.mrb[16].mxu1 %vm602_vm0, %v15640_v49  ;;  %3710 = vst.msk [vmem:[#allocation2 + $0x50] sm:$0xff] %vm1147_vm2, %v3671_v41  ;;  %v1274_v60 = vrot.slane %v15238_v43, %v15661_v57  ;;  %v1310_v36 = vrot.slane %v15254_v48, %v15661_v57 }
 0x1d2   : > { %3728 = vst.msk [vmem:[#allocation2 + $0x58] sm:$0xff] %vm1164_vm1, %v1120_v33  ;;  %13940 = vmatprep.mubr.msk.bf16.mxu0 %vm602_vm0, %v15638_v28  ;;  %1176 = vst.msk [vmem:[#allocation2 + $0x60] sm:$0xff] %vm1164_vm1, %v15124_v1  ;;  %13812 = vmatprep.mubr.msk.bf16.mxu1 %vm602_vm0, %v15607_v37  ;;  %v1322_v58 = vrot.slane %v15272_v54, %v15661_v57 }
 0x1d3   : > { %3745 = vst.msk [vmem:[#allocation2 + $0x58] sm:$0xff] %vm1229_vm3, %v15124_v1  ;;  %2105 = vperm.xlu1 %14468, %v15296_v59   ;;  %v1206_v63 = vpop.permute.xlu0 %1205 }
 0x1d4   : > { %1179 = vst.msk [vmem:[#allocation2 + $0x78] sm:$0xff] %vm1164_vm1, %v15158_v35  ;;  %3727 = vst.msk [vmem:[#allocation2 + $0x50] sm:$0xff] %vm1164_vm1, %v15511_v22  ;;  %2138 = vperm.xlu0 %14467, %v15325_v6   ;;  %v15667_v41 = vld [vmem:[#allocation2 + $0x68] sm:$0xff]  ;;  %v1286_v22 = vrot.slane %v15236_v42, %v15661_v57  ;;  %v3675_v42 = vpop.permute.xlu1 %3674 }
 0x1d5   : > { %3744 = vst.msk [vmem:[#allocation2 + $0x50] sm:$0xff] %vm1229_vm3, %v15126_v2  ;;  %1242 = vst.msk [vmem:[#allocation2 + $0x60] sm:$0xff] %vm1229_vm3, %v1206_v63 }
 0x1d6   : > { %3713 = vst.msk [vmem:[#allocation2 + $0x68] sm:$0xff] %vm1147_vm2, %v3677_v56  ;;  %v12998_v45 = vcombine.low %v1274_v60, %v1286_v22  ;;  %v1298_v56 = vrot.slane %v15256_v51, %v15661_v57 }
 0x1d7   : > { %2127 = vperm.xlu1 %14468, %v15315_v3   ;;  %v1182_v59 = vpop.permute.xlu0 %1181 }
 0x1d8   : > { %2160 = vperm.xlu0 %14467, %v15350_v11   ;;  %1230 = vst.msk [vmem:[#allocation2] sm:$0xff] %vm1229_vm3, %v1182_v59  ;;  %v1729_v48 = vshll.u32 %v12998_v45, 16  ;;  %v12999_v51 = vcombine.low %v1298_v56, %v1310_v36 }
 0x1da   : > { %v15688_v43 = vld [vmem:[#allocation2 + $0x58] sm:$0xff]  ;;  %v15707_v11 = vrot.slane %v1729_v48, 1  ;;  %v1740_v22 = vshrl.u32 %v12999_v51, 16 }
 0x1db   : > { %2149 = vperm.xlu1 %14468, %v15330_v7  }
 0x1dc   : > { %v15678_v6 = vld [vmem:[#allocation2 + $0x50] sm:$0xff]  ;;  %2182 = vperm.xlu0 %14467, %v15366_v19   ;;  %v15690_v3 = vld [vmem:[#allocation2 + $0x60] sm:$0xff]  ;;  %20647 = vst [vmem:[#allocation30_spill] sm:$0xff] %v15707_v11  ;;  %v1732_v19 = vshrl.u32 %v12998_v45, 16 }
 0x1dd   : > { %13941 = vmatmul.mubr.msk.bf16.gmra.mrb[48].mxu0 %vm602_vm0, %v15678_v6  ;;  %13813 = vmatmul.mubr.msk.bf16.gmra.mrb[20].mxu1 %vm602_vm0, %v15690_v3  ;;  %3712 = vst.msk [vmem:[#allocation2 + $0x60] sm:$0xff] %vm1147_vm2, %v3675_v42 }
 0x1de   : > { %13944 = vmatprep.mubr.msk.bf16.mxu0 %vm602_vm0, %v15688_v43  ;;  %3729 = vst.msk [vmem:[#allocation2 + $0x60] sm:$0xff] %vm1164_vm1, %v15574_v44  ;;  %13816 = vmatprep.mubr.msk.bf16.mxu1 %vm602_vm0, %v15667_v41  ;;  %v1736_v44 = vshll.u32 %v12999_v51, 16  ;;  %v1734_v33 = vor.u32 %v1732_v19, %v15707_v11 }
 0x1df   : > { %3746 = vst.msk [vmem:[#allocation2 + $0x60] sm:$0xff] %vm1229_vm3, %v15142_v18  ;;  %2171 = vperm.xlu1 %14468, %v15355_v12   ;;  %v1246_v7 = vld [vmem:[#allocation2] sm:$0x80]  ;;  %v1334_v12 = vrot.slane %v15274_v55, %v15661_v57 }
 0x1e0   : > { %2204 = vperm.xlu0 %14467, %v15383_v24   ;;  %3734 = vst.msk [vmem:[#allocation2] sm:$0xff] %vm1229_vm3, %v15020_v47  ;;  %v1738_v63 = vrot.slane %v1736_v44, 1 }
 0x1e2   : > { %v15725_v55 = vsel %vm1727_vm5, %v1734_v33, %v1738_v63  ;;  %v1742_v59 = vor.u32 %v1740_v22, %v1738_v63 }
 0x1e3   : > { %2193 = vperm.xlu1 %14468, %v15371_v20   ;;  %v13000_v20 = vcombine.low %v1322_v58, %v1334_v12  ;;  %20648 = vst [vmem:[#allocation31_spill] sm:$0xff] %v15725_v55  ;;  %v1873_v45 = vmul.bf16 %v15725_v55, %v15334_v10  ;;  %v3768_v22 = vmul.bf16 %v15374_v23, %v15725_v55 }
 0x1e4   : > { %2226 = vperm.xlu0 %14467, %v15408_v30   ;;  %v1338_v40 = vpop.permute.xlu1 %1337  ;;  %v1210_v30 = vpop.permute.xlu0 %1209 }
 0x1e5   : > { %v1346_v36 = vrot.slane %v1338_v40, %v15661_v57  ;;  %v1748_v48 = vshrl.u32 %v13000_v20, 16  ;;  %v2774_v12 = vshrl.u32 %v1873_v45, 16 }
 0x1e6   : > { %v15715_v24 = vld [vmem:[#allocation2 + $0x60] sm:$0xff] }
 0x1e7   : > { %2215 = vperm.xlu1 %14468, %v15388_v25   ;;  %13945 = vmatmul.mubr.msk.bf16.gmra.mrb[52].mxu0 %vm602_vm0, %v15715_v24  ;;  %v1744_v25 = vshll.u32 %v13000_v20, 16 }
 0x1e8   : > { %2248 = vperm.xlu0 %14467, %v15424_v13   ;;  %v1124_v54 = vpop.permute.xlu1 %1123 }
 0x1e9   : > { %1160 = vst.msk [vmem:[#allocation2 + $0x70] sm:$0xff] %vm1147_vm2, %v1124_v54  ;;  %v1746_v42 = vrot.slane %v1744_v25, 1 }
 0x1ea   : > { %3730 = vst.msk [vmem:[#allocation2 + $0x68] sm:$0xff] %vm1164_vm1, %v1124_v54  ;;  %1178 = vst.msk [vmem:[#allocation2 + $0x70] sm:$0xff] %vm1164_vm1, %v15140_v15 }
 0x1eb   : > { %3747 = vst.msk [vmem:[#allocation2 + $0x68] sm:$0xff] %vm1229_vm3, %v15140_v15  ;;  %2237 = vperm.xlu1 %14468, %v15413_v31   ;;  %1244 = vst.msk [vmem:[#allocation2 + $0x70] sm:$0xff] %vm1229_vm3, %v1210_v30  ;;  %v1872_v31 = vmul.bf16 %v15707_v11, %v1246_v7  ;;  %v15743_v58 = vsel %vm1727_vm5, %v1742_v59, %v1746_v42  ;;  %v1750_v20 = vor.u32 %v1748_v48, %v1746_v42 }
 0x1ec   : > { %v3679_v13 = vpop.permute.xlu1 %3678  ;;  %v1350_v60 = vpop.permute.xlu0 %1349  ;;  %20649 = vst [vmem:[#allocation32_spill] sm:$0xff] %v15743_v58  ;;  %v1874_v63 = vmul.bf16 %v15743_v58, %v15426_v27  ;;  %v15765_v59 = vrot.slane %v2774_v12, 7  ;;  %v2777_v48 = vshll.u32 %v1873_v45, 16  ;;  %v15776_v23 = vmul.bf16 %v15482_v9, %v15743_v58 }
 0x1ed   : > { %v1358_v56 = vrot.slane %v1350_v60, %v15661_v57  ;;  %v2770_v54 = vshrl.u32 %v1872_v31, 16  ;;  %v4076_v31 = vshrl.u32 %v3768_v22, 16 }
 0x1ee   : > { %v2782_v42 = vshrl.u32 %v1874_v63, 16 }
 0x1ef   : > { %3684 = vrot.lane.b32.xlu1 %v15156_v32, %s20534_s0  ;;  %v15739_v51 = vcombine.low %v1346_v36, %v1358_v56  ;;  %v3750_v56 = vld [vmem:[#allocation2] sm:$0x80] }
 0x1f0   : > { %v1212_v19 = vpop.permute.xlu1 %1211  ;;  %v1128_v44 = vpop.permute.xlu0 %1127  ;;  %v3767_v15 = vmul.bf16 %v3750_v56, %v15707_v11  ;;  %v2784_v1 = vrot.slane %v2782_v42, 7 }
 0x1f1   : > { %v1752_v33 = vshll.u32 %v15739_v51, 16  ;;  %1245 = vst.msk [vmem:[#allocation2 + $0x78] sm:$0xff] %vm1229_vm3, %v1212_v19 }
 0x1f2   : > { %1162 = vst.msk [vmem:[#allocation2 + $0x80] sm:$0xff] %vm1147_vm2, %v1128_v44  ;;  %v15748_v40 = vld [vmem:[#allocation2 + $0x68] sm:$0xff]  ;;  %v15756_v7 = vld [vmem:[#allocation2 + $0x70] sm:$0xff]  ;;  %v4072_v2 = vshrl.u32 %v3767_v15, 16 }
 0x1f3   : > { %1180 = vst.msk [vmem:[#allocation2 + $0x80] sm:$0xff] %vm1164_vm1, %v15156_v32  ;;  %13948 = vmatprep.mubr.msk.bf16.mxu0 %vm602_vm0, %v15748_v40  ;;  %v1754_v30 = vrot.slane %v1752_v33, 1  ;;  %13817 = vmatmul.mubr.msk.bf16.gmra.mrb[24].mxu1 %vm602_vm0, %v15756_v7 }
 0x1f4   : > { %3714 = vst.msk [vmem:[#allocation2 + $0x70] sm:$0xff] %vm1147_vm2, %v3679_v13  ;;  %v3681_v25 = vpop.permute.xlu1 %3680  ;;  %v1362_v60 = vpop.permute.xlu0 %1361  ;;  %v4074_v47 = vrot.slane %v4072_v2, 7 }
 0x1f5   : > { %3731 = vst.msk [vmem:[#allocation2 + $0x70] sm:$0xff] %vm1164_vm1, %v15636_v52  ;;  %v15768_v36 = vsel %vm1727_vm5, %v1750_v20, %v1754_v30  ;;  %v2772_v52 = vrot.slane %v2770_v54, 7  ;;  %v1370_v18 = vrot.slane %v1362_v60, %v15661_v57  ;;  %v2779_v54 = vor.u32 %v2777_v48, %v15765_v59 }
 0x1f6   : > { %20650 = vst [vmem:[#allocation33_spill] sm:$0xff] %v15768_v36  ;;  %3748 = vst.msk [vmem:[#allocation2 + $0x70] sm:$0xff] %vm1229_vm3, %v15158_v35  ;;  %v1875_v13 = vmul.bf16 %v15768_v36, %v15390_v26  ;;  %v15783_v35 = vmul.bf16 %v15498_v17, %v15768_v36  ;;  %v4084_v17 = vshrl.u32 %v15776_v23, 16 }
 0x1f8   : > { %v1374_v19 = vpop.permute.xlu1 %1373  ;;  %v1386_v12 = vpop.permute.xlu0 %1385  ;;  %v15778_v33 = vld [vmem:[#allocation2 + $0x78] sm:$0xff]  ;;  %v2790_v20 = vshrl.u32 %v1875_v13, 16 }
 0x1f9   : > { %v1382_v45 = vrot.slane %v1374_v19, %v15661_v57  ;;  %13820 = vmatprep.mubr.msk.bf16.mxu1 %vm602_vm0, %v15778_v33  ;;  %3715 = vst.msk [vmem:[#allocation2 + $0x78] sm:$0xff] %vm1147_vm2, %v3681_v25  ;;  %v2780_v25 = vsel %vm2338_vm6, %v2772_v52, %v2779_v54  ;;  %v2785_v19 = vshll.u32 %v1874_v63, 16  ;;  %v2793_v63 = vshll.u32 %v1875_v13, 16 }
 0x1fa   : > { %v15790_v9 = vld [vmem:[#allocation2 + $0x80] sm:$0xff]  ;;  %3732 = vst.msk [vmem:[#allocation2 + $0x78] sm:$0xff] %vm1164_vm1, %v1128_v44  ;;  %v15802_v60 = vrot.slane %v2790_v20, 7  ;;  %v4079_v52 = vshll.u32 %v3768_v22, 16  ;;  %v1394_v22 = vrot.slane %v1386_v12, %v15661_v57 }
 0x1fb   : > { %v15795_v56 = vcombine.low %v1370_v18, %v1382_v45  ;;  %3749 = vst.msk [vmem:[#allocation2 + $0x78] sm:$0xff] %vm1229_vm3, %v15156_v32  ;;  %13821 = vmatmul.mubr.msk.bf16.gmra.mrb[28].mxu1 %vm602_vm0, %v15790_v9  ;;  %v15807_v18 = vrot.slane %v4076_v31, 7  ;;  %v4092_v45 = vshrl.u32 %v15783_v35, 16  ;;  %v1756_v32 = vshrl.u32 %v15739_v51, 16 }
 0x1fc   : > { %v1130_v48 = vpop.permute.xlu1 %1129  ;;  %v3683_v42 = vpop.permute.xlu0 %3682  ;;  %13836 = vmatprep.mubr.msk.bf16.mxu1 %vm602_vm0, %v2780_v25  ;;  %v2787_v20 = vor.u32 %v2785_v19, %v2784_v1  ;;  %v2795_v54 = vor.u32 %v2793_v63, %v15802_v60  ;;  %v4086_v25 = vrot.slane %v4084_v17, 7 }
 0x1fd   : > { %v15805_v44 = vld [vmem:[#allocation2 + $0x70] sm:$0xff]  ;;  %v1760_v50 = vshll.u32 %v15795_v56, 16  ;;  %1163 = vst.msk [vmem:[#allocation2 + $0x88] sm:$0xff] %vm1147_vm2, %v1130_v48  ;;  %3716 = vst.msk [vmem:[#allocation2 + $0x80] sm:$0xff] %vm1147_vm2, %v3683_v42  ;;  %v1758_v15 = vor.u32 %v1756_v32, %v1754_v30  ;;  %v4081_v11 = vor.u32 %v4079_v52, %v15807_v18  ;;  %v15819_v36 = vrot.slane %v4092_v45, 7 }
 0x1fe   : > { %13949 = vmatmul.mubr.msk.bf16.gmra.mrb[56].mxu0 %vm602_vm0, %v15805_v44  ;;  %3733 = vst.msk [vmem:[#allocation2 + $0x80] sm:$0xff] %vm1164_vm1, %v1130_v48  ;;  %v4087_v42 = vshll.u32 %v15776_v23, 16  ;;  %v2788_v2 = vsel %vm2338_vm6, %v15765_v59, %v2787_v20  ;;  %v4095_v23 = vshll.u32 %v15783_v35, 16  ;;  %v2796_v48 = vsel %vm2338_vm6, %v2784_v1, %v2795_v54 }
 0x1ff   : > { %v1762_v31 = vrot.slane %v1760_v50, 1  ;;  %v14520_v50 = vld [vmem:[%s20630_s5 + $0x68] sm:$0xff]   ;;  %v4082_v52 = vsel %vm2338_vm6, %v4074_v47, %v4081_v11  ;;  %v14521_v47 = vld [vmem:[%s20630_s5 + $0x70] sm:$0xff]  }
 0x200   : > { %v1398_v51 = vpop.permute.xlu1 %1397  ;;  %v1410_v34 = vpop.permute.xlu0 %1409  ;;  %v4089_v45 = vor.u32 %v4087_v42, %v4086_v25  ;;  %v4097_v35 = vor.u32 %v4095_v23, %v15819_v36 }
 0x201   : > { %v15823_v13 = vsel %vm1727_vm5, %v1758_v15, %v1762_v31  ;;  %v1406_v32 = vrot.slane %v1398_v51, %v15661_v57 }
 0x202   : > { %20651 = vst [vmem:[#allocation34_spill] sm:$0xff] %v15823_v13  ;;  %v15832_v30 = vld [vmem:[#allocation2 + $0x78] sm:$0xff]  ;;  %v1876_v17 = vmul.bf16 %v15823_v13, %v15447_v46  ;;  %v3771_v19 = vmul.bf16 %v15542_v8, %v15823_v13  ;;  %v1764_v8 = vshrl.u32 %v15795_v56, 16  ;;  %v4090_v13 = vsel %vm2338_vm6, %v15807_v18, %v4089_v45 }
 0x203   : > { %v13003_v12 = vcombine.low %v1394_v22, %v1406_v32  ;;  %13837 = vmatmul.mubr.msk.bf16.vlgmr.msra.gmra.mrb[0].mxu1 %vm602_vm0, %v2788_v2  ;;  %13952 = vmatprep.mubr.msk.bf16.mxu0 %vm602_vm0, %v15832_v30  ;;  %v1418_v22 = vrot.slane %v1410_v34, %v15661_v57 }
 0x204   : > { %v1422_v59 = vpop.permute.xlu1 %1421  ;;  %v1434_v63 = vpop.permute.xlu0 %1433  ;;  %13840 = vmatprep.mubr.msk.bf16.mxu1 %vm602_vm0, %v2796_v48  ;;  %v2798_v20 = vshrl.u32 %v1876_v17, 16  ;;  %v4100_v15 = vshrl.u32 %v3771_v19, 16  ;;  %13869 = vmatpush3.bf16.msra.mxu1 %v15565_v4  ;;  %v2801_v4 = vshll.u32 %v1876_v17, 16  ;;  %v4103_v56 = vshll.u32 %v3771_v19, 16 }
 0x205   : > { %v1768_v51 = vshll.u32 %v13003_v12, 16  ;;  %v1430_v1 = vrot.slane %v1422_v59, %v15661_v57  ;;  %v15850_v54 = vld [vmem:[#allocation2 + $0x80] sm:$0xff]  ;;  %13870 = vmatprep.subr.bf16.mxu1 %v14520_v50  ;;  %v1766_v32 = vor.u32 %v1764_v8, %v1762_v31  ;;  %v1772_v19 = vshrl.u32 %v13003_v12, 16 }
 0x206   : > { %13953 = vmatmul.mubr.msk.bf16.gmra.mrb[60].mxu0 %vm602_vm0, %v15850_v54  ;;  %v15857_v11 = vrot.slane %v2798_v20, 7  ;;  %v15859_v42 = vrot.slane %v4100_v15, 7  ;;  %v4098_v20 = vsel %vm2338_vm6, %v4086_v25, %v4097_v35  ;;  %v1442_v18 = vrot.slane %v1434_v63, %v15661_v57 }
 0x207   : > { %v1770_v34 = vrot.slane %v1768_v51, 1  ;;  %v13004_v2 = vcombine.low %v1418_v22, %v1430_v1  ;;  %13968 = vmatprep.mubr.msk.bf16.mxu0 %vm602_vm0, %v4082_v52  ;;  %v14522_v52 = vld [vmem:[%s20630_s5 + $0x78] sm:$0xff]  }
 0x208   : > { %v1446_v23 = vpop.permute.xlu1 %1445  ;;  %v1458_v48 = vpop.permute.xlu0 %1457  ;;  %v2803_v59 = vor.u32 %v2801_v4, %v15857_v11  ;;  %v4105_v58 = vor.u32 %v4103_v56, %v15859_v42  ;;  %13871 = vmatpush3.bf16.msra.mxu1 %v14520_v50  ;;  %v14516_v56 = vld [vmem:[%s20407_s7 + $0x68] sm:$0xff]  }
 0x209   : > { %v15867_v17 = vsel %vm1727_vm5, %v1766_v32, %v1770_v34  ;;  %v1776_v31 = vshll.u32 %v13004_v2, 16  ;;  %13872 = vmatprep.subr.bf16.mxu1 %v14521_v47  ;;  %v1454_v25 = vrot.slane %v1446_v23, %v15661_v57  ;;  %v1774_v45 = vor.u32 %v1772_v19, %v1770_v34  ;;  %v14524_v23 = vld [vmem:[%s20630_s5 + $0x80] sm:$0xff]  }
 0x20a   : > { %20652 = vst [vmem:[#allocation35_spill] sm:$0xff] %v15867_v17  ;;  %v2804_v50 = vsel %vm2338_vm6, %v15802_v60, %v2803_v59  ;;  %v1877_v12 = vmul.bf16 %v15867_v17, %v15415_v5  ;;  %v1780_v15 = vshrl.u32 %v13004_v2, 16  ;;  %v15890_v8 = vmul.bf16 %v15546_v21, %v15867_v17 }
 0x20b   : > { %v1778_v35 = vrot.slane %v1776_v31, 1  ;;  %13841 = vmatmul.mubr.msk.bf16.gmra.mrb[4].mxu1 %vm602_vm0, %v2804_v50  ;;  %v13005_v51 = vcombine.low %v1442_v18, %v1454_v25  ;;  %v1466_v63 = vrot.slane %v1458_v48, %v15661_v57  ;;  %v4106_v60 = vsel %vm2338_vm6, %v15819_v36, %v4105_v58 }
 0x20c   : > { %v1470_v22 = vpop.permute.xlu1 %1469  ;;  %v1482_v1 = vpop.permute.xlu0 %1481  ;;  %v2806_v4 = vshrl.u32 %v1877_v12, 16  ;;  %13873 = vmatpush3.bf16.msra.mxu1 %v14521_v47  ;;  %v2809_v2 = vshll.u32 %v1877_v12, 16  ;;  %v4108_v31 = vshrl.u32 %v15890_v8, 16  ;;  %v4111_v18 = vshll.u32 %v15890_v8, 16  ;;  %v14525_v8 = vld [vmem:[%s20630_s5 + $0x88] sm:$0xff]   ;;  %s13491_s5 = sshll.u32 %s14891_s1, 11 }
 0x20d   : > { %v15899_v32 = vsel %vm1727_vm5, %v1774_v45, %v1778_v35  ;;  %v1782_v34 = vor.u32 %v1780_v15, %v1778_v35  ;;  %v1478_v21 = vrot.slane %v1470_v22, %v15661_v57  ;;  %13874 = vmatprep.subr.bf16.mxu1 %v14522_v52  ;;  %v1784_v48 = vshll.u32 %v13005_v51, 16  ;;  %v14517_v15 = vld [vmem:[%s20407_s7 + $0x70] sm:$0xff]   ;;  %s20358_s1 = scalar_lea.sflag [#allocation7], %s593_s24 }
 0x20e   : > { %20653 = vst [vmem:[#allocation36_spill] sm:$0xff] %v15899_v32  ;;  %v1490_v58 = vrot.slane %v1482_v1, %v15661_v57  ;;  %13969 = vmatmul.mubr.msk.bf16.vlgmr.msra.gmra.mrb[32].mxu0 %vm602_vm0, %v4090_v13  ;;  %v2808_v36 = vrot.slane %v2806_v4, 7  ;;  %v1878_v47 = vmul.bf16 %v15899_v32, %v15513_v0  ;;  %v1788_v59 = vshrl.u32 %v13005_v51, 16 }
 0x20f   : > { %v13006_v19 = vcombine.low %v1466_v63, %v1478_v21  ;;  %13972 = vmatprep.mubr.msk.bf16.mxu0 %vm602_vm0, %v4098_v20  ;;  %14001 = vmatpush3.bf16.msra.mxu0 %v15612_v62  ;;  %v1786_v25 = vrot.slane %v1784_v48, 1  ;;  %v3773_v13 = vmul.bf16 %v15568_v61, %v15899_v32 }
 0x210   : > { %v1494_v50 = vpop.permute.xlu1 %1493  ;;  %v1506_v12 = vpop.permute.xlu0 %1505  ;;  %v2811_v45 = vor.u32 %v2809_v2, %v2808_v36  ;;  %v2814_v35 = vshrl.u32 %v1878_v47, 16  ;;  %14002 = vmatprep.subr.bf16.mxu0 %v14516_v56  ;;  %13875 = vmatpush3.bf16.msra.mxu1 %v14522_v52  ;;  %v2817_v63 = vshll.u32 %v1878_v47, 16  ;;  %v4110_v2 = vrot.slane %v4108_v31, 7 }
 0x211   : > { %v1792_v20 = vshll.u32 %v13006_v19, 16  ;;  %v1796_v62 = vshrl.u32 %v13006_v19, 16  ;;  %v1502_v51 = vrot.slane %v1494_v50, %v15661_v57  ;;  %13876 = vmatprep.subr.bf16.mxu1 %v14524_v23  ;;  %v15923_v22 = vsel %vm1727_vm5, %v1782_v34, %v1786_v25 }
 0x212   : > { %20654 = vst [vmem:[#allocation37_spill] sm:$0xff] %v15923_v22  ;;  %v1790_v1 = vor.u32 %v1788_v59, %v1786_v25  ;;  %v2812_v61 = vsel %vm2338_vm6, %v15857_v11, %v2811_v45  ;;  %v15927_v4 = vrot.slane %v2814_v35, 7  ;;  %v1879_v48 = vmul.bf16 %v15923_v22, %v15474_v16 }
 0x213   : > { %v1794_v52 = vrot.slane %v1792_v20, 1  ;;  %v13007_v21 = vcombine.low %v1490_v58, %v1502_v51  ;;  %13844 = vmatprep.mubr.msk.bf16.mxu1 %vm602_vm0, %v2812_v61  ;;  %14003 = vmatpush3.bf16.msra.mxu0 %v14516_v56  ;;  %v1514_v47 = vrot.slane %v1506_v12, %v15661_v57  ;;  %v4116_v25 = vshrl.u32 %v3773_v13, 16  ;;  %v14519_v58 = vld [vmem:[%s20407_s7 + $0x78] sm:$0xff]  }
 0x214   : > { %v1518_v19 = vpop.permute.xlu1 %1517  ;;  %v2819_v59 = vor.u32 %v2817_v63, %v15927_v4  ;;  %v15936_v11 = vmul.bf16 %v15576_v38, %v15923_v22  ;;  %14004 = vmatprep.subr.bf16.mxu0 %v14517_v15  ;;  %13877 = vmatpush3.bf16.msra.mxu1 %v14524_v23  ;;  %v4119_v12 = vshll.u32 %v3773_v13, 16  ;;  %v4113_v20 = vor.u32 %v4111_v18, %v4110_v2  ;;  %v14523_v18 = vld [vmem:[%s20407_s7 + $0x80] sm:$0xff]  }
 0x215   : > { %v1530_v34 = vpop.permute.xlu0 %1529  ;;  %v15942_v31 = vsel %vm1727_vm5, %v1790_v1, %v1794_v52  ;;  %v1798_v56 = vor.u32 %v1796_v62, %v1794_v52  ;;  %v1800_v50 = vshll.u32 %v13007_v21, 16  ;;  %13878 = vmatprep.subr.bf16.mxu1 %v14525_v8  ;;  %v1804_v45 = vshrl.u32 %v13007_v21, 16 }
 0x216   : > { %20655 = vst [vmem:[#allocation38_spill] sm:$0xff] %v15942_v31  ;;  %v1526_v35 = vrot.slane %v1518_v19, %v15661_v57  ;;  %13973 = vmatmul.mubr.msk.bf16.gmra.mrb[36].mxu0 %vm602_vm0, %v4106_v60  ;;  %v2820_v38 = vsel %vm2338_vm6, %v2808_v36, %v2819_v59  ;;  %v1538_v63 = vrot.slane %v1530_v34, %v15661_v57  ;;  %v2822_v23 = vshrl.u32 %v1879_v48, 16 }
 0x217   : > { %v1802_v51 = vrot.slane %v1800_v50, 1  ;;  %13845 = vmatmul.mubr.msk.bf16.gmra.mrb[8].mxu1 %vm602_vm0, %v2820_v38  ;;  %v15949_v1 = vrot.slane %v4116_v25, 7  ;;  %14005 = vmatpush3.bf16.msra.mxu0 %v14517_v15  ;;  %v4114_v13 = vsel %vm2338_vm6, %v15859_v42, %v4113_v20  ;;  %v1880_v60 = vmul.bf16 %v15942_v31, %v15578_v29 }
 0x218   : > { %v13008_v62 = vcombine.low %v1514_v47, %v1526_v35  ;;  %v1542_v61 = vpop.permute.xlu1 %1541  ;;  %v4124_v36 = vshrl.u32 %v15936_v11, 16  ;;  %14006 = vmatprep.subr.bf16.mxu0 %v14519_v58  ;;  %13879 = vmatpush3.bf16.msra.mxu1 %v14525_v8  ;;  %v2825_v47 = vshll.u32 %v1879_v48, 16  ;;  %v2824_v59 = vrot.slane %v2822_v23, 7 }
 0x219   : > { %v1554_v52 = vpop.permute.xlu0 %1553  ;;  %v15960_v21 = vsel %vm1727_vm5, %v1798_v56, %v1802_v51  ;;  %v1806_v15 = vor.u32 %v1804_v45, %v1802_v51  ;;  %13976 = vmatprep.mubr.msk.bf16.mxu0 %vm602_vm0, %v4114_v13  ;;  %v1550_v42 = vrot.slane %v1542_v61, %v15661_v57  ;;  %v4121_v25 = vor.u32 %v4119_v12, %v15949_v1  ;;  %v14526_v12 = vld [vmem:[%s20407_s7 + $0x88] sm:$0xff]  }
 0x21a   : > { %20656 = vst [vmem:[#allocation39_spill] sm:$0xff] %v15960_v21  ;;  %v1808_v19 = vshll.u32 %v13008_v62, 16  ;;  %v1562_v34 = vrot.slane %v1554_v52, %v15661_v57  ;;  %5377 = vmatprep.subr.bf16.mxu1 %v15619_v39  ;;  %v1812_v50 = vshrl.u32 %v13008_v62, 16  ;;  %v2830_v8 = vshrl.u32 %v1880_v60, 16 }
 0x21b   : > { %v13009_v35 = vcombine.low %v1538_v63, %v1550_v42  ;;  %v15967_v38 = vrot.slane %v4124_v36, 7  ;;  %14007 = vmatpush3.bf16.msra.mxu0 %v14519_v58  ;;  %v2827_v45 = vor.u32 %v2825_v47, %v2824_v59  ;;  %v4122_v48 = vsel %vm2338_vm6, %v4110_v2, %v4121_v25 }
 0x21c   : > { %v1810_v56 = vrot.slane %v1808_v19, 1  ;;  %v1566_v20 = vpop.permute.xlu1 %1565  ;;  %v2833_v13 = vshll.u32 %v1880_v60, 16  ;;  %14008 = vmatprep.subr.bf16.mxu0 %v14523_v18  ;;  %v4127_v62 = vshll.u32 %v15936_v11, 16  ;;  %v2832_v2 = vrot.slane %v2830_v8, 7 }
 0x21d   : > { %v1578_v51 = vpop.permute.xlu0 %1577  ;;  %v1816_v23 = vshll.u32 %v13009_v35, 16  ;;  %v1820_v61 = vshrl.u32 %v13009_v35, 16  ;;  %v1574_v63 = vrot.slane %v1566_v20, %v15661_v57  ;;  %v2828_v36 = vsel %vm2338_vm6, %v15927_v4, %v2827_v45 }
 0x21e   : > { %v15976_v58 = vsel %vm1727_vm5, %v1806_v15, %v1810_v56  ;;  %v1814_v52 = vor.u32 %v1812_v50, %v1810_v56  ;;  %13977 = vmatmul.mubr.msk.bf16.gmra.mrb[40].mxu0 %vm602_vm0, %v4122_v48  ;;  %13848 = vmatprep.mubr.msk.bf16.mxu1 %vm602_vm0, %v2828_v36  ;;  %v4129_v47 = vor.u32 %v4127_v62, %v15967_v38 }
 0x21f   : > { %20657 = vst [vmem:[#allocation40_spill] sm:$0xff] %v15976_v58  ;;  %v1818_v60 = vrot.slane %v1816_v23, 1  ;;  %v13010_v42 = vcombine.low %v1562_v34, %v1574_v63  ;;  %v1881_v19 = vmul.bf16 %v15960_v21, %v15548_v14  ;;  %14009 = vmatpush3.bf16.msra.mxu0 %v14523_v18  ;;  %v1586_v11 = vrot.slane %v1578_v51, %v15661_v57 }
 0x220   : > { %v2835_v15 = vor.u32 %v2833_v13, %v2832_v2  ;;  %v1590_v25 = vpop.permute.xlu1 %1589  ;;  %v3775_v4 = vmul.bf16 %v15630_v53, %v15942_v31  ;;  %v1882_v35 = vmul.bf16 %v15976_v58, %v15640_v49  ;;  %14010 = vmatprep.subr.bf16.mxu0 %v14526_v12  ;;  %v3776_v18 = vmul.bf16 %v15638_v28, %v15960_v21 }
 0x221   : > { %v1602_v50 = vpop.permute.xlu0 %1601  ;;  %v15991_v34 = vsel %vm1727_vm5, %v1814_v52, %v1818_v60  ;;  %v1822_v8 = vor.u32 %v1820_v61, %v1818_v60  ;;  %v1824_v56 = vshll.u32 %v13010_v42, 16  ;;  %v1828_v45 = vshrl.u32 %v13010_v42, 16 }
 0x222   : > { %20658 = vst [vmem:[#allocation41_spill] sm:$0xff] %v15991_v34  ;;  %v2836_v20 = vsel %vm2338_vm6, %v2824_v59, %v2835_v15  ;;  %v4130_v51 = vsel %vm2338_vm6, %v15949_v1, %v4129_v47  ;;  %v1598_v53 = vrot.slane %v1590_v25, %v15661_v57  ;;  %v1610_v13 = vrot.slane %v1602_v50, %v15661_v57 }
 0x223   : > { %v1826_v48 = vrot.slane %v1824_v56, 1  ;;  %13849 = vmatmul.mubr.msk.bf16.gmra.mrb[12].mxu1 %vm602_vm0, %v2836_v20  ;;  %13980 = vmatprep.mubr.msk.bf16.mxu0 %vm602_vm0, %v4130_v51  ;;  %v2838_v23 = vshrl.u32 %v1881_v19, 16  ;;  %v4132_v61 = vshrl.u32 %v3775_v4, 16  ;;  %v2841_v62 = vshll.u32 %v1881_v19, 16 }
 0x224   : > { %v13011_v63 = vcombine.low %v1586_v11, %v1598_v53  ;;  %v1614_v28 = vpop.permute.xlu1 %1613  ;;  %v4135_v36 = vshll.u32 %v3775_v4, 16  ;;  %v2846_v59 = vshrl.u32 %v1882_v35, 16  ;;  %14011 = vmatpush3.bf16.msra.mxu0 %v14526_v12  ;;  %v2849_v47 = vshll.u32 %v1882_v35, 16 }
 0x225   : > { %v1626_v52 = vpop.permute.xlu0 %1625  ;;  %v16003_v1 = vsel %vm1727_vm5, %v1822_v8, %v1826_v48  ;;  %v2840_v60 = vrot.slane %v2838_v23, 7  ;;  %v1622_v42 = vrot.slane %v1614_v28, %v15661_v57  ;;  %5920 = vmatprep.subr.bf16.mxu0 %v15619_v39  ;;  %v1830_v15 = vor.u32 %v1828_v45, %v1826_v48 }
 0x226   : > { %20659 = vst [vmem:[#allocation42_spill] sm:$0xff] %v16003_v1  ;;  %v1832_v25 = vshll.u32 %v13011_v63, 16  ;;  %v1836_v50 = vshrl.u32 %v13011_v63, 16  ;;  %v4134_v56 = vrot.slane %v4132_v61, 7  ;;  %v2848_v20 = vrot.slane %v2846_v59, 7 }
 0x227   : > { %v2843_v11 = vor.u32 %v2841_v62, %v2840_v60  ;;  %v13012_v19 = vcombine.low %v1610_v13, %v1622_v42  ;;  %v4140_v51 = vshrl.u32 %v3776_v18, 16  ;;  %v1634_v12 = vrot.slane %v1626_v52, %v15661_v57 }
 0x228   : > { %v1834_v4 = vrot.slane %v1832_v25, 1  ;;  %v4137_v53 = vor.u32 %v4135_v36, %v4134_v56  ;;  %v1638_v8 = vpop.permute.xlu1 %1637  ;;  %v1883_v23 = vmul.bf16 %v15991_v34, %v15607_v37  ;;  %v2851_v39 = vor.u32 %v2849_v47, %v2848_v20 }
 0x229   : > { %v2844_v35 = vsel %vm2338_vm6, %v2832_v2, %v2843_v11  ;;  %v1840_v28 = vshll.u32 %v13012_v19, 16  ;;  %v4143_v45 = vshll.u32 %v3776_v18, 16  ;;  %v1844_v13 = vshrl.u32 %v13012_v19, 16 }
 0x22a   : > { %v1908_v48 = vpop.permute.xlu0 %1907  ;;  %v16012_v61 = vsel %vm1727_vm5, %v1830_v15, %v1834_v4  ;;  %13852 = vmatprep.mubr.msk.bf16.mxu1 %vm602_vm0, %v2844_v35  ;;  %v4138_v63 = vsel %vm2338_vm6, %v15967_v38, %v4137_v53  ;;  %v4142_v62 = vrot.slane %v4140_v51, 7  ;;  %v1838_v52 = vor.u32 %v1836_v50, %v1834_v4 }
 0x22b   : > { %20660 = vst [vmem:[#allocation43_spill] sm:$0xff] %v16012_v61  ;;  %v1842_v36 = vrot.slane %v1840_v28, 1  ;;  %13981 = vmatmul.mubr.msk.bf16.gmra.mrb[44].mxu0 %vm602_vm0, %v4138_v63  ;;  %v2852_v2 = vsel %vm2338_vm6, %v2840_v60, %v2851_v39  ;;  %v1646_v59 = vrot.slane %v1638_v8, %v15661_v57  ;;  %v1916_v42 = vrot.slane %v1908_v48, %v15661_v57 }
 0x22c   : > { %13853 = vmatmul.mubr.msk.bf16.gmra.mrb[16].mxu1 %vm602_vm0, %v2852_v2  ;;  %v4145_v18 = vor.u32 %v4143_v45, %v4142_v62  ;;  %v2854_v47 = vshrl.u32 %v1883_v23, 16  ;;  %v3777_v15 = vmul.bf16 %v15678_v6, %v15976_v58  ;;  %v2857_v11 = vshll.u32 %v1883_v23, 16 }
 0x22d   : > { %v1846_v25 = vor.u32 %v1844_v13, %v1842_v36  ;;  %v13013_v38 = vcombine.low %v1634_v12, %v1646_v59  ;;  %v1919_v50 = vpop.permute.xlu1 %1918  ;;  %v1884_v51 = vmul.bf16 %v16003_v1, %v15690_v3 }
 0x22e   : > { %v1941_v19 = vpop.permute.xlu0 %1940  ;;  %v4146_v60 = vsel %vm2338_vm6, %v4134_v56, %v4145_v18  ;;  %v2856_v4 = vrot.slane %v2854_v47, 7  ;;  %v1927_v53 = vrot.slane %v1919_v50, %v15661_v57  ;;  %v4148_v6 = vshrl.u32 %v3777_v15, 16 }
 0x22f   : > { %v1949_v8 = vrot.slane %v1941_v19, %v15661_v57  ;;  %13984 = vmatprep.mubr.msk.bf16.mxu0 %vm602_vm0, %v4146_v60  ;;  %v1848_v35 = vshll.u32 %v13013_v38, 16  ;;  %v1852_v28 = vshrl.u32 %v13013_v38, 16  ;;  %v4151_v39 = vshll.u32 %v3777_v15, 16 }
 0x230   : > { %v2859_v12 = vor.u32 %v2857_v11, %v2856_v4  ;;  %v13014_v23 = vcombine.low %v1916_v42, %v1927_v53  ;;  %v2862_v45 = vshrl.u32 %v1884_v51, 16  ;;  %v2865_v48 = vshll.u32 %v1884_v51, 16 }
 0x231   : > { %v1850_v13 = vrot.slane %v1848_v35, 1  ;;  %v4150_v63 = vrot.slane %v4148_v6, 7  ;;  %v3778_v56 = vmul.bf16 %v15688_v43, %v15991_v34  ;;  %v1930_v2 = vpop.permute.xlu1 %1929  ;;  %v1885_v18 = vmul.bf16 %v16012_v61, %v15667_v41 }
 0x232   : > { %v2860_v47 = vsel %vm2338_vm6, %v2848_v20, %v2859_v12  ;;  %v2340_v50 = vshrl.u32 %v13014_v23, 16  ;;  %v2343_v38 = vshll.u32 %v13014_v23, 16  ;;  %v2864_v19 = vrot.slane %v2862_v45, 7 }
 0x233   : > { %v1963_v59 = vpop.permute.xlu0 %1962  ;;  %v16036_v15 = vsel %vm1727_vm5, %v1838_v52, %v1842_v36  ;;  %v16039_v42 = vsel %vm1727_vm5, %v1846_v25, %v1850_v13  ;;  %13856 = vmatprep.mubr.msk.bf16.mxu1 %vm602_vm0, %v2860_v47  ;;  %v4153_v11 = vor.u32 %v4151_v39, %v4150_v63  ;;  %v4156_v43 = vshrl.u32 %v3778_v56, 16 }
 0x234   : > { %20661 = vst [vmem:[#allocation44_spill] sm:$0xff] %v16036_v15  ;;  %20662 = vst [vmem:[#allocation45_spill] sm:$0xff] %v16039_v42  ;;  %v16042_v51 = vor.u32 %v1852_v28, %v1850_v13  ;;  %v2342_v60 = vrot.slane %v2340_v50, 7  ;;  %v2867_v53 = vor.u32 %v2865_v48, %v2864_v19  ;;  %v1938_v35 = vrot.slane %v1930_v2, %v15661_v57 }
 0x235   : > { %v4154_v20 = vsel %vm2338_vm6, %v4142_v62, %v4153_v11  ;;  %v4158_v6 = vrot.slane %v4156_v43, 7  ;;  %v4159_v12 = vshll.u32 %v3778_v56, 16  ;;  %v2870_v23 = vshrl.u32 %v1885_v18, 16  ;;  %v1952_v52 = vpop.permute.xlu1 %1951 }
 0x236   : > { %20663 = vst [vmem:[#allocation46_spill] sm:$0xff] %v16042_v51  ;;  %v16046_v45 = vor.u32 %v2343_v38, %v2342_v60  ;;  %13985 = vmatmul.mubr.msk.bf16.gmra.mrb[48].mxu0 %vm602_vm0, %v4154_v20  ;;  %v2868_v25 = vsel %vm2338_vm6, %v2856_v4, %v2867_v53  ;;  %v13015_v39 = vcombine.low %v1938_v35, %v1949_v8  ;;  %v2873_v2 = vshll.u32 %v1885_v18, 16 }
 0x237   : > { %v1985_v36 = vpop.permute.xlu0 %1984  ;;  %v1971_v28 = vrot.slane %v1963_v59, %v15661_v57  ;;  %13857 = vmatmul.mubr.msk.bf16.gmra.mrb[20].mxu1 %vm602_vm0, %v2868_v25  ;;  %v4161_v48 = vor.u32 %v4159_v12, %v4158_v6  ;;  %v2872_v13 = vrot.slane %v2870_v23, 7  ;;  %v1960_v62 = vrot.slane %v1952_v52, %v15661_v57 }
 0x238   : > { %20664 = vst [vmem:[#allocation47_spill] sm:$0xff] %v16046_v45  ;;  %v2347_v56 = vshrl.u32 %v13015_v39, 16  ;;  %v2350_v47 = vshll.u32 %v13015_v39, 16  ;;  %v3779_v50 = vmul.bf16 %v15715_v24, %v16003_v1  ;;  %v1886_v38 = vmul.bf16 %v16036_v15, %v15756_v7 }
 0x239   : > { %v4162_v4 = vsel %vm2338_vm6, %v4150_v63, %v4161_v48  ;;  %v2875_v8 = vor.u32 %v2873_v2, %v2872_v13  ;;  %v13016_v11 = vcombine.low %v1960_v62, %v1971_v28  ;;  %v3780_v59 = vmul.bf16 %v15748_v40, %v16012_v61 }
 0x23a   : > { %v1974_v43 = vpop.permute.xlu1 %1973  ;;  %13988 = vmatprep.mubr.msk.bf16.mxu0 %vm602_vm0, %v4162_v4  ;;  %v2349_v18 = vrot.slane %v2347_v56, 7  ;;  %v1993_v35 = vrot.slane %v1985_v36, %v15661_v57  ;;  %v4164_v20 = vshrl.u32 %v3779_v50, 16  ;;  %v2878_v12 = vshrl.u32 %v1886_v38, 16 }
 0x23b   : > { %v2007_v53 = vpop.permute.xlu0 %2006  ;;  %v2876_v24 = vsel %vm2338_vm6, %v2864_v19, %v2875_v8  ;;  %v2355_v23 = vshrl.u32 %v13016_v11, 16  ;;  %v4167_v52 = vshll.u32 %v3779_v50, 16  ;;  %v2881_v25 = vshll.u32 %v1886_v38, 16 }
 0x23c   : > { %v2352_v63 = vor.u32 %v2350_v47, %v2349_v18  ;;  %13860 = vmatprep.mubr.msk.bf16.mxu1 %vm602_vm0, %v2876_v24  ;;  %v4166_v39 = vrot.slane %v4164_v20, 7  ;;  %v2880_v28 = vrot.slane %v2878_v12, 7  ;;  %v4172_v40 = vshrl.u32 %v3780_v59, 16 }
 0x23d   : > { %v2357_v48 = vrot.slane %v2355_v23, 7  ;;  %v2358_v2 = vshll.u32 %v13016_v11, 16  ;;  %v4175_v62 = vshll.u32 %v3780_v59, 16  ;;  %v1982_v56 = vrot.slane %v1974_v43, %v15661_v57 }
 0x23e   : > { %v1996_v4 = vpop.permute.xlu1 %1995  ;;  %v4169_v61 = vor.u32 %v4167_v52, %v4166_v39  ;;  %v2883_v1 = vor.u32 %v2881_v25, %v2880_v28  ;;  %v4174_v34 = vrot.slane %v4172_v40, 7  ;;  %v2015_v19 = vrot.slane %v2007_v53, %v15661_v57 }
 0x23f   : > { %v2029_v36 = vpop.permute.xlu0 %2028  ;;  %v16067_v50 = vsel %vm2338_vm6, %v2342_v60, %v2352_v63  ;;  %v13017_v47 = vcombine.low %v1982_v56, %v1993_v35  ;;  %v1887_v38 = vmul.bf16 %v16039_v42, %v15778_v33  ;;  %v2004_v8 = vrot.slane %v1996_v4, %v15661_v57 }
 0x240   : > { %20665 = vst [vmem:[#allocation48_spill] sm:$0xff] %v16067_v50  ;;  %v2360_v11 = vor.u32 %v2358_v2, %v2357_v48  ;;  %v4170_v59 = vsel %vm2338_vm6, %v4158_v6, %v4169_v61  ;;  %v2884_v43 = vsel %vm2338_vm6, %v2872_v13, %v2883_v1  ;;  %v4177_v20 = vor.u32 %v4175_v62, %v4174_v34 }
 0x241   : > { %13989 = vmatmul.mubr.msk.bf16.gmra.mrb[52].mxu0 %vm602_vm0, %v4170_v59  ;;  %13861 = vmatmul.mubr.msk.bf16.gmra.mrb[24].mxu1 %vm602_vm0, %v2884_v43  ;;  %v2363_v53 = vshrl.u32 %v13017_v47, 16  ;;  %v2366_v12 = vshll.u32 %v13017_v47, 16  ;;  %v2886_v60 = vshrl.u32 %v1887_v38, 16  ;;  %v2037_v35 = vrot.slane %v2029_v36, %v15661_v57 }
 0x242   : > { %v2018_v24 = vpop.permute.xlu1 %2017  ;;  %v4178_v52 = vsel %vm2338_vm6, %v4166_v39, %v4177_v20  ;;  %v2889_v25 = vshll.u32 %v1887_v38, 16  ;;  %v13018_v63 = vcombine.low %v2004_v8, %v2015_v19  ;;  %v3781_v61 = vmul.bf16 %v15805_v44, %v16036_v15 }
 0x243   : > { %v2051_v23 = vpop.permute.xlu0 %2050  ;;  %13992 = vmatprep.mubr.msk.bf16.mxu0 %vm602_vm0, %v4178_v52  ;;  %v2365_v1 = vrot.slane %v2363_v53, 7  ;;  %v2888_v6 = vrot.slane %v2886_v60, 7  ;;  %v1888_v13 = vmul.bf16 %v16042_v51, %v15790_v9  ;;  %v3782_v40 = vmul.bf16 %v15832_v30, %v16039_v42 }
 0x244   : > { %v16086_v2 = vsel %vm2338_vm6, %v2349_v18, %v2360_v11  ;;  %v2371_v62 = vshrl.u32 %v13018_v63, 16  ;;  %v2374_v39 = vshll.u32 %v13018_v63, 16  ;;  %v4180_v56 = vshrl.u32 %v3781_v61, 16 }
 0x245   : > { %20666 = vst [vmem:[#allocation49_spill] sm:$0xff] %v16086_v2  ;;  %v2368_v4 = vor.u32 %v2366_v12, %v2365_v1  ;;  %v2891_v36 = vor.u32 %v2889_v25, %v2888_v6  ;;  %v4183_v19 = vshll.u32 %v3781_v61, 16  ;;  %v2894_v44 = vshrl.u32 %v1888_v13, 16 }
 0x246   : > { %v2040_v47 = vpop.permute.xlu1 %2039  ;;  %v2373_v8 = vrot.slane %v2371_v62, 7  ;;  %v4182_v59 = vrot.slane %v4180_v56, 7  ;;  %v2897_v43 = vshll.u32 %v1888_v13, 16  ;;  %v4188_v20 = vshrl.u32 %v3782_v40, 16 }
 0x247   : > { %v16088_v38 = vpop.permute.xlu0 %2072  ;;  %v2892_v53 = vsel %vm2338_vm6, %v2880_v28, %v2891_v36  ;;  %v2896_v30 = vrot.slane %v2894_v44, 7  ;;  %v4191_v60 = vshll.u32 %v3782_v40, 16  ;;  %v2026_v18 = vrot.slane %v2018_v24, %v15661_v57 }
 0x248   : > { %v16093_v11 = vsel %vm2338_vm6, %v2357_v48, %v2368_v4  ;;  %13864 = vmatprep.mubr.msk.bf16.mxu1 %vm602_vm0, %v2892_v53  ;;  %v2376_v12 = vor.u32 %v2374_v39, %v2373_v8  ;;  %v4185_v52 = vor.u32 %v4183_v19, %v4182_v59  ;;  %v4190_v25 = vrot.slane %v4188_v20, 7 }
 0x249   : > { %20667 = vst [vmem:[#allocation50_spill] sm:$0xff] %v16093_v11  ;;  %v2899_v63 = vor.u32 %v2897_v43, %v2896_v30  ;;  %v13019_v61 = vcombine.low %v2026_v18, %v2037_v35  ;;  %v2483_v13 = vmul.bf16 %v16046_v45, %v15334_v10  ;;  %v2484_v28 = vmul.bf16 %v16067_v50, %v15426_v27  ;;  %v14662_v30 = vld [vmem:[#allocation2 + $0x8] sm:$0xff]  ;;  %v14663_v18 = vld [vmem:[#allocation2 + $0x10] sm:$0xff] }
 0x24a   : > { %v2062_v62 = vpop.permute.xlu1 %2061  ;;  %v4186_v24 = vsel %vm2338_vm6, %v4174_v34, %v4185_v52  ;;  %v4193_v48 = vor.u32 %v4191_v60, %v4190_v25  ;;  %v2059_v56 = vrot.slane %v2051_v23, %v15661_v57  ;;  %v2048_v39 = vrot.slane %v2040_v47, %v15661_v57 }
 0x24b   : > { %v16100_v40 = vpop.permute.xlu0 %2094  ;;  %v16106_v4 = vsel %vm2338_vm6, %v2365_v1, %v2376_v12  ;;  %13993 = vmatmul.mubr.msk.bf16.gmra.mrb[56].mxu0 %vm602_vm0, %v4186_v24  ;;  %v2900_v10 = vsel %vm2338_vm6, %v2888_v6, %v2899_v63  ;;  %v2379_v35 = vshrl.u32 %v13019_v61, 16  ;;  %v2382_v36 = vshll.u32 %v13019_v61, 16 }
 0x24c   : > { %20668 = vst [vmem:[#allocation51_spill] sm:$0xff] %v16106_v4  ;;  %13865 = vmatmul.mubr.msk.bf16.gmra.mrb[28].mxu1 %vm602_vm0, %v2900_v10  ;;  %v4194_v27 = vsel %vm2338_vm6, %v4182_v59, %v4193_v48  ;;  %v3159_v19 = vshrl.u32 %v2483_v13, 16  ;;  %v3161_v34 = vshll.u32 %v2483_v13, 16  ;;  %v3166_v44 = vshll.u32 %v2484_v28, 16 }
 0x24d   : > { %13996 = vmatprep.mubr.msk.bf16.mxu0 %vm602_vm0, %v4194_v27  ;;  %v2381_v23 = vrot.slane %v2379_v35, 7  ;;  %v3170_v47 = vshrl.u32 %v2484_v28, 16  ;;  %v13020_v43 = vcombine.low %v2048_v39, %v2059_v56  ;;  %v3783_v1 = vmul.bf16 %v15850_v54, %v16042_v51 }
 0x24e   : > { %v2084_v20 = vpop.permute.xlu1 %2083  ;;  %v3163_v53 = vrot.slane %v3161_v34, 1  ;;  %v3168_v6 = vrot.slane %v3166_v44, 1  ;;  %v3785_v60 = vmul.bf16 %v14662_v30, %v16046_v45  ;;  %v3786_v59 = vmul.bf16 %v14663_v18, %v16067_v50 }
 0x24f   : > { %v16117_v12 = vpop.permute.xlu0 %2116  ;;  %v2384_v52 = vor.u32 %v2382_v36, %v2381_v23  ;;  %v2387_v63 = vshrl.u32 %v13020_v43, 16  ;;  %v2081_v61 = vrot.slane %v16088_v38, %v15661_v57  ;;  %v4196_v13 = vshrl.u32 %v3783_v1, 16 }
 0x250   : > { %v3164_v28 = vor.u32 %v3163_v53, %v3159_v19  ;;  %v3172_v24 = vor.u32 %v3170_v47, %v3168_v6  ;;  %v2390_v54 = vshll.u32 %v13020_v43, 16  ;;  %v4199_v48 = vshll.u32 %v3783_v1, 16 }
 0x251   : > { %v16121_v56 = vrot.slane %v2387_v63, 7  ;;  %v4198_v39 = vrot.slane %v4196_v13, 7  ;;  %v4461_v10 = vshrl.u32 %v3785_v60, 16  ;;  %v4463_v35 = vshll.u32 %v3785_v60, 16 }
 0x252   : > { %v2106_v27 = vpop.permute.xlu1 %2105  ;;  %v16124_v34 = vsel %vm2338_vm6, %v2373_v8, %v2384_v52  ;;  %v3169_v36 = vsel %vm1727_vm5, %v3164_v28, %v3168_v6  ;;  %v4468_v44 = vshll.u32 %v3786_v59, 16  ;;  %v2485_v38 = vmul.bf16 %v16086_v2, %v15390_v26 }
 0x253   : > { %20669 = vst [vmem:[#allocation52_spill] sm:$0xff] %v16124_v34  ;;  %13880 = vmatprep.mubr.msk.bf16.mxu1 %vm602_vm0, %v3169_v36  ;;  %v2392_v19 = vor.u32 %v2390_v54, %v16121_v56  ;;  %v4201_v47 = vor.u32 %v4199_v48, %v4198_v39  ;;  %v4465_v43 = vrot.slane %v4463_v35, 1  ;;  %v2070_v1 = vrot.slane %v2062_v62, %v15661_v57  ;;  %v16134_v18 = vpop.permute.xlu0 %2138 }
 0x254   : > { %v4470_v53 = vrot.slane %v4468_v44, 1  ;;  %v4472_v30 = vshrl.u32 %v3786_v59, 16  ;;  %v3174_v60 = vshll.u32 %v2485_v38, 16  ;;  %v2486_v8 = vmul.bf16 %v16093_v11, %v15447_v46  ;;  %v14664_v44 = vld [vmem:[#allocation2 + $0x18] sm:$0xff] }
 0x255   : > { %v4202_v6 = vsel %vm2338_vm6, %v4190_v25, %v4201_v47  ;;  %v4466_v52 = vor.u32 %v4465_v43, %v4461_v10  ;;  %v13021_v26 = vcombine.low %v2070_v1, %v2081_v61  ;;  %v2103_v63 = vrot.slane %v16100_v40, %v15661_v57 }
 0x256   : > { %v16139_v13 = vpop.permute.xlu1 %2127  ;;  %v16142_v28 = vsel %vm2338_vm6, %v2381_v23, %v2392_v19  ;;  %13997 = vmatmul.mubr.msk.bf16.gmra.mrb[60].mxu0 %vm602_vm0, %v4202_v6  ;;  %v3176_v62 = vrot.slane %v3174_v60, 1  ;;  %v3178_v59 = vshrl.u32 %v2485_v38, 16  ;;  %v3182_v54 = vshll.u32 %v2486_v8, 16  ;;  %v14665_v19 = vld [vmem:[#allocation2 + $0x20] sm:$0xff] }
 0x257   : > { %20670 = vst [vmem:[#allocation53_spill] sm:$0xff] %v16142_v28  ;;  %v4471_v46 = vsel %vm1727_vm5, %v4466_v52, %v4470_v53  ;;  %v4474_v48 = vor.u32 %v4472_v30, %v4470_v53  ;;  %v2395_v39 = vshrl.u32 %v13021_v26, 16  ;;  %v2092_v25 = vrot.slane %v2084_v20, %v15661_v57  ;;  %v16162_v30 = vpop.permute.xlu0 %2160 }
 0x258   : > { %14012 = vmatprep.mubr.msk.bf16.mxu0 %vm602_vm0, %v4471_v46  ;;  %v3177_v40 = vsel %vm1727_vm5, %v3172_v24, %v3176_v62  ;;  %v2398_v61 = vshll.u32 %v13021_v26, 16  ;;  %v3180_v10 = vor.u32 %v3178_v59, %v3176_v62  ;;  %v3184_v35 = vrot.slane %v3182_v54, 1 }
 0x259   : > { %13881 = vmatmul.mubr.msk.bf16.vlgmr.msra.gmra.mrb[0].mxu1 %vm602_vm0, %v3177_v40  ;;  %v2397_v23 = vrot.slane %v2395_v39, 7  ;;  %v13022_v36 = vcombine.low %v2092_v25, %v2103_v63  ;;  %v3787_v38 = vmul.bf16 %v14664_v44, %v16086_v2  ;;  %v16152_v47 = vmul.bf16 %v14665_v19, %v16093_v11 }
 0x25a   : > { %v16154_v43 = vpop.permute.xlu1 %2149  ;;  %v3185_v20 = vsel %vm1727_vm5, %v3180_v10, %v3184_v35  ;;  %v2125_v24 = vrot.slane %v16117_v12, %v15661_v57  ;;  %v2487_v1 = vmul.bf16 %v16106_v4, %v15415_v5  ;;  %v2114_v53 = vrot.slane %v2106_v27, %v15661_v57 }
 0x25b   : > { %v2400_v60 = vor.u32 %v2398_v61, %v2397_v23  ;;  %13884 = vmatprep.mubr.msk.bf16.mxu1 %vm602_vm0, %v3185_v20  ;;  %v2403_v6 = vshrl.u32 %v13022_v36, 16  ;;  %v4476_v52 = vshll.u32 %v3787_v38, 16  ;;  %v3186_v26 = vshrl.u32 %v2486_v8, 16 }
 0x25c   : > { %v2406_v63 = vshll.u32 %v13022_v36, 16  ;;  %v4480_v62 = vshrl.u32 %v3787_v38, 16  ;;  %v4484_v59 = vshll.u32 %v16152_v47, 16  ;;  %v3190_v54 = vshll.u32 %v2487_v1, 16 }
 0x25d   : > { %v2405_v46 = vrot.slane %v2403_v6, 7  ;;  %v4478_v12 = vrot.slane %v4476_v52, 1  ;;  %v3188_v39 = vor.u32 %v3186_v26, %v3184_v35  ;;  %v13023_v25 = vcombine.low %v2114_v53, %v2125_v24  ;;  %v2183_v24 = vpop.permute.xlu0 %2182  ;;  %v14666_v26 = vld [vmem:[#allocation2 + $0x28] sm:$0xff] }
 0x25e   : > { %v16166_v5 = vpop.permute.xlu1 %2171  ;;  %v16170_v27 = vsel %vm2338_vm6, %v16121_v56, %v2400_v60  ;;  %v4486_v40 = vrot.slane %v4484_v59, 1  ;;  %v3192_v61 = vrot.slane %v3190_v54, 1  ;;  %v2488_v8 = vmul.bf16 %v16124_v34, %v15513_v0 }
 0x25f   : > { %20671 = vst [vmem:[#allocation54_spill] sm:$0xff] %v16170_v27  ;;  %v2408_v10 = vor.u32 %v2406_v63, %v2405_v46  ;;  %v4479_v36 = vsel %vm1727_vm5, %v4474_v48, %v4478_v12  ;;  %v4482_v44 = vor.u32 %v4480_v62, %v4478_v12  ;;  %v2411_v38 = vshrl.u32 %v13023_v25, 16  ;;  %v14667_v12 = vld [vmem:[#allocation2 + $0x30] sm:$0xff] }
 0x260   : > { %14013 = vmatmul.mubr.msk.bf16.vlgmr.msra.gmra.mrb[32].mxu0 %vm602_vm0, %v4479_v36  ;;  %v3193_v35 = vsel %vm1727_vm5, %v3188_v39, %v3192_v61  ;;  %v2147_v19 = vrot.slane %v16134_v18, %v15661_v57  ;;  %v3194_v20 = vshrl.u32 %v2487_v1, 16  ;;  %v3198_v56 = vshll.u32 %v2488_v8, 16 }
 0x261   : > { %v4487_v53 = vsel %vm1727_vm5, %v4482_v44, %v4486_v40  ;;  %13885 = vmatmul.mubr.msk.bf16.gmra.mrb[4].mxu1 %vm602_vm0, %v3193_v35  ;;  %v16181_v0 = vrot.slane %v2411_v38, 7  ;;  %v2414_v60 = vshll.u32 %v13023_v25, 16  ;;  %v2136_v48 = vrot.slane %v16139_v13, %v15661_v57 }
 0x262   : > { %v16185_v6 = vpop.permute.xlu1 %2193  ;;  %v16188_v52 = vsel %vm2338_vm6, %v2397_v23, %v2408_v10  ;;  %14016 = vmatprep.mubr.msk.bf16.mxu0 %vm602_vm0, %v4487_v53  ;;  %v3196_v18 = vor.u32 %v3194_v20, %v3192_v61  ;;  %v3200_v1 = vrot.slane %v3198_v56, 1  ;;  %v3789_v63 = vmul.bf16 %v14666_v26, %v16106_v4  ;;  %v16206_v53 = vpop.permute.xlu0 %2204 }
 0x263   : > { %v2416_v62 = vor.u32 %v2414_v60, %v16181_v0  ;;  %v13024_v59 = vcombine.low %v2136_v48, %v2147_v19  ;;  %v2169_v54 = vrot.slane %v16162_v30, %v15661_v57  ;;  %v3790_v13 = vmul.bf16 %v14667_v12, %v16124_v34 }
 0x264   : > { %v3201_v39 = vsel %vm1727_vm5, %v3196_v18, %v3200_v1  ;;  %v4488_v23 = vshrl.u32 %v16152_v47, 16  ;;  %v4492_v25 = vshll.u32 %v3789_v63, 16  ;;  %v2489_v61 = vmul.bf16 %v16142_v28, %v15474_v16 }
 0x265   : > { %v16201_v10 = vsel %vm2338_vm6, %v2405_v46, %v2416_v62  ;;  %13888 = vmatprep.mubr.msk.bf16.mxu1 %vm602_vm0, %v3201_v39  ;;  %v2419_v36 = vshrl.u32 %v13024_v59, 16  ;;  %v2422_v44 = vshll.u32 %v13024_v59, 16  ;;  %v4496_v38 = vshrl.u32 %v3789_v63, 16 }
 0x266   : > { %20672 = vst [vmem:[#allocation55_spill] sm:$0xff] %v16201_v10  ;;  %v16204_v30 = vpop.permute.xlu1 %2215  ;;  %v4490_v35 = vor.u32 %v4488_v23, %v4486_v40  ;;  %v4494_v19 = vrot.slane %v4492_v25, 1  ;;  %v4500_v20 = vshll.u32 %v3790_v13, 16  ;;  %v3206_v56 = vshll.u32 %v2489_v61, 16 }
 0x267   : > { %v2421_v47 = vrot.slane %v2419_v36, 7  ;;  %v3202_v60 = vshrl.u32 %v2488_v8, 16  ;;  %v2158_v16 = vrot.slane %v16154_v43, %v15661_v57  ;;  %v2490_v46 = vmul.bf16 %v16170_v27, %v15578_v29 }
 0x268   : > { %v4495_v48 = vsel %vm1727_vm5, %v4490_v35, %v4494_v19  ;;  %v4498_v18 = vor.u32 %v4496_v38, %v4494_v19  ;;  %v4502_v26 = vrot.slane %v4500_v20, 1  ;;  %v2191_v63 = vrot.slane %v2183_v24, %v15661_v57  ;;  %v14668_v35 = vld [vmem:[#allocation2 + $0x38] sm:$0xff]  ;;  %v2227_v19 = vpop.permute.xlu0 %2226 }
 0x269   : > { %v2424_v40 = vor.u32 %v2422_v44, %v2421_v47  ;;  %14017 = vmatmul.mubr.msk.bf16.gmra.mrb[36].mxu0 %vm602_vm0, %v4495_v48  ;;  %v3204_v62 = vor.u32 %v3202_v60, %v3200_v1  ;;  %v3208_v59 = vrot.slane %v3206_v56, 1  ;;  %v13025_v12 = vcombine.low %v2158_v16, %v2169_v54  ;;  %v14669_v56 = vld [vmem:[#allocation2 + $0x40] sm:$0xff]  ;;  %v16229_v48 = vld [vmem:[#allocation2 + $0x88] sm:$0x1] }
 0x26a   : > { %v16215_v39 = vpop.permute.xlu1 %2237  ;;  %v4503_v8 = vsel %vm1727_vm5, %v4498_v18, %v4502_v26  ;;  %v3210_v43 = vshrl.u32 %v2489_v61, 16  ;;  %v3214_v23 = vshll.u32 %v2490_v46, 16  ;;  %v2180_v29 = vrot.slane %v16166_v5, %v15661_v57 }
 0x26b   : > { %14020 = vmatprep.mubr.msk.bf16.mxu0 %vm602_vm0, %v4503_v8  ;;  %v3209_v25 = vsel %vm1727_vm5, %v3204_v62, %v3208_v59  ;;  %v2427_v24 = vshrl.u32 %v13025_v12, 16  ;;  %v2430_v36 = vshll.u32 %v13025_v12, 16  ;;  %v2213_v1 = vrot.slane %v16206_v53, %v15661_v57 }
 0x26c   : > { %13889 = vmatmul.mubr.msk.bf16.gmra.mrb[8].mxu1 %vm602_vm0, %v3209_v25  ;;  %v3212_v54 = vor.u32 %v3210_v43, %v3208_v59  ;;  %v3216_v44 = vrot.slane %v3214_v23, 1  ;;  %v13026_v38 = vcombine.low %v2180_v29, %v2191_v63  ;;  %v3791_v61 = vmul.bf16 %v14668_v35, %v16142_v28 }
 0x26d   : > { %v2429_v20 = vrot.slane %v2427_v24, 7  ;;  %v4504_v5 = vshrl.u32 %v3790_v13, 16  ;;  %v3792_v60 = vmul.bf16 %v14669_v56, %v16170_v27  ;;  %v2491_v16 = vmul.bf16 %v16188_v52, %v15548_v14 }
 0x26e   : > { %v3685_v53 = vpop.permute.xlu1 %3684  ;;  %v16233_v18 = vsel %vm2338_vm6, %v16181_v0, %v2424_v40  ;;  %v3217_v63 = vsel %vm1727_vm5, %v3212_v54, %v3216_v44  ;;  %v2435_v62 = vshrl.u32 %v13026_v38, 16  ;;  %v4508_v59 = vshll.u32 %v3791_v61, 16 }
 0x26f   : > { %20673 = vst [vmem:[#allocation56_spill] sm:$0xff] %v16233_v18  ;;  %3717 = vst.msk [vmem:[#allocation2 + $0x88] sm:$0xff] %vm1147_vm2, %v3685_v53  ;;  %v2432_v13 = vor.u32 %v2430_v36, %v2429_v20  ;;  %13892 = vmatprep.mubr.msk.bf16.mxu1 %vm602_vm0, %v3217_v63  ;;  %v2438_v12 = vshll.u32 %v13026_v38, 16  ;;  %v4506_v8 = vor.u32 %v4504_v5, %v4502_v26  ;;  %v4516_v43 = vshll.u32 %v3792_v60, 16  ;;  %v2249_v26 = vpop.permute.xlu0 %2248 }
 0x270   : > { %v2437_v14 = vrot.slane %v2435_v62, 7  ;;  %v4510_v23 = vrot.slane %v4508_v59, 1  ;;  %v4512_v29 = vshrl.u32 %v3791_v61, 16  ;;  %v3222_v25 = vshll.u32 %v2491_v16, 16 }
 0x271   : > { %v16239_v24 = vsel %vm2338_vm6, %v2421_v47, %v2432_v13  ;;  %v4518_v0 = vrot.slane %v4516_v43, 1  ;;  %v3218_v40 = vshrl.u32 %v2490_v46, 16  ;;  %v2202_v54 = vrot.slane %v16185_v6, %v15661_v57 }
 0x272   : > { %20674 = vst [vmem:[#allocation57_spill] sm:$0xff] %v16239_v24  ;;  %v2440_v35 = vor.u32 %v2438_v12, %v2437_v14  ;;  %v4511_v36 = vsel %vm1727_vm5, %v4506_v8, %v4510_v23  ;;  %v4514_v56 = vor.u32 %v4512_v29, %v4510_v23  ;;  %v2235_v38 = vrot.slane %v2227_v19, %v15661_v57  ;;  %v14670_v12 = vld [vmem:[#allocation2 + $0x48] sm:$0xff]  ;;  %v14671_v23 = vld [vmem:[#allocation2 + $0x50] sm:$0xff] }
 0x273   : > { %14021 = vmatmul.mubr.msk.bf16.gmra.mrb[40].mxu0 %vm602_vm0, %v4511_v36  ;;  %v3220_v5 = vor.u32 %v3218_v40, %v3216_v44  ;;  %v3224_v61 = vrot.slane %v3222_v25, 1  ;;  %v13027_v53 = vcombine.low %v2202_v54, %v2213_v1  ;;  %v2492_v47 = vmul.bf16 %v16201_v10, %v15640_v49 }
 0x274   : > { %v16249_v46 = vsel %vm2338_vm6, %v2429_v20, %v2440_v35  ;;  %v4519_v6 = vsel %vm1727_vm5, %v4514_v56, %v4518_v0  ;;  %v3226_v63 = vshrl.u32 %v2491_v16, 16  ;;  %v2224_v62 = vrot.slane %v16204_v30, %v15661_v57 }
 0x275   : > { %20675 = vst [vmem:[#allocation58_spill] sm:$0xff] %v16249_v46  ;;  %14024 = vmatprep.mubr.msk.bf16.mxu0 %vm602_vm0, %v4519_v6  ;;  %v3225_v19 = vsel %vm1727_vm5, %v3220_v5, %v3224_v61  ;;  %v2443_v59 = vshrl.u32 %v13027_v53, 16  ;;  %v2446_v44 = vshll.u32 %v13027_v53, 16  ;;  %v2257_v1 = vrot.slane %v2249_v26, %v15661_v57 }
 0x276   : > { %13893 = vmatmul.mubr.msk.bf16.gmra.mrb[12].mxu1 %vm602_vm0, %v3225_v19  ;;  %v3228_v49 = vor.u32 %v3226_v63, %v3224_v61  ;;  %v3230_v13 = vshll.u32 %v2492_v47, 16  ;;  %v13028_v20 = vcombine.low %v2224_v62, %v2235_v38  ;;  %v3793_v8 = vmul.bf16 %v14670_v12, %v16188_v52 }
 0x277   : > { %v2445_v16 = vrot.slane %v2443_v59, 7  ;;  %v4520_v43 = vshrl.u32 %v3792_v60, 16  ;;  %v3794_v30 = vmul.bf16 %v14671_v23, %v16201_v10  ;;  %v2493_v29 = vmul.bf16 %v16233_v18, %v15607_v37 }
 0x278   : > { %v3232_v25 = vrot.slane %v3230_v13, 1  ;;  %v2451_v40 = vshrl.u32 %v13028_v20, 16  ;;  %v2454_v54 = vshll.u32 %v13028_v20, 16  ;;  %v3234_v35 = vshrl.u32 %v2492_v47, 16  ;;  %v14672_v20 = vld [vmem:[#allocation2 + $0x58] sm:$0xff] }
 0x279   : > { %v2448_v36 = vor.u32 %v2446_v44, %v2445_v16  ;;  %v4522_v56 = vor.u32 %v4520_v43, %v4518_v0  ;;  %v4524_v26 = vshll.u32 %v3793_v8, 16  ;;  %v4532_v5 = vshll.u32 %v3794_v30, 16 }
 0x27a   : > { %v3233_v38 = vsel %vm1727_vm5, %v3228_v49, %v3232_v25  ;;  %v2453_v61 = vrot.slane %v2451_v40, 7  ;;  %v4528_v53 = vshrl.u32 %v3793_v8, 16  ;;  %v3238_v6 = vshll.u32 %v2493_v29, 16  ;;  %v14673_v40 = vld [vmem:[#allocation2 + $0x60] sm:$0xff] }
 0x27b   : > { %13896 = vmatprep.mubr.msk.bf16.mxu1 %vm602_vm0, %v3233_v38  ;;  %v4526_v60 = vrot.slane %v4524_v26, 1  ;;  %v4534_v63 = vrot.slane %v4532_v5, 1  ;;  %v3236_v62 = vor.u32 %v3234_v35, %v3232_v25  ;;  %v2246_v37 = vrot.slane %v16215_v39, %v15661_v57 }
 0x27c   : > { %v16267_v19 = vsel %vm2338_vm6, %v2437_v14, %v2448_v36  ;;  %v3240_v47 = vrot.slane %v3238_v6, 1  ;;  %v2494_v0 = vmul.bf16 %v16239_v24, %v15690_v3  ;;  %v3242_v59 = vshrl.u32 %v2493_v29, 16 }
 0x27d   : > { %20676 = vst [vmem:[#allocation59_spill] sm:$0xff] %v16267_v19  ;;  %v4527_v44 = vsel %vm1727_vm5, %v4522_v56, %v4526_v60  ;;  %v4530_v49 = vor.u32 %v4528_v53, %v4526_v60  ;;  %v13029_v13 = vcombine.low %v2246_v37, %v2257_v1  ;;  %v3795_v12 = vmul.bf16 %v14672_v20, %v16233_v18 }
 0x27e   : > { %v2456_v8 = vor.u32 %v2454_v54, %v2453_v61  ;;  %14025 = vmatmul.mubr.msk.bf16.gmra.mrb[44].mxu0 %vm602_vm0, %v4527_v44  ;;  %v3241_v57 = vsel %vm1727_vm5, %v3236_v62, %v3240_v47  ;;  %v3244_v39 = vor.u32 %v3242_v59, %v3240_v47  ;;  %v3246_v14 = vshll.u32 %v2494_v0, 16 }
 0x27f   : > { %v4535_v43 = vsel %vm1727_vm5, %v4530_v49, %v4534_v63  ;;  %13897 = vmatmul.mubr.msk.bf16.gmra.mrb[16].mxu1 %vm602_vm0, %v3241_v57  ;;  %v2459_v3 = vshrl.u32 %v13029_v13, 16  ;;  %v2462_v23 = vshll.u32 %v13029_v13, 16  ;;  %v4536_v29 = vshrl.u32 %v3794_v30, 16  ;;  %v14674_v13 = vld [vmem:[#allocation2 + $0x68] sm:$0xff] }
 0x280   : > { %14028 = vmatprep.mubr.msk.bf16.mxu0 %vm602_vm0, %v4535_v43  ;;  %v3248_v1 = vrot.slane %v3246_v14, 1  ;;  %v4540_v25 = vshll.u32 %v3795_v12, 16  ;;  %v3796_v54 = vmul.bf16 %v14673_v40, %v16239_v24  ;;  %v4544_v35 = vshrl.u32 %v3795_v12, 16  ;;  %v14675_v12 = vld [vmem:[#allocation2 + $0x70] sm:$0xff] }
 0x281   : > { %v16279_v36 = vrot.slane %v2459_v3, 7  ;;  %v4538_v56 = vor.u32 %v4536_v29, %v4534_v63  ;;  %v2495_v26 = vmul.bf16 %v16249_v46, %v15667_v41  ;;  %v3250_v5 = vshrl.u32 %v2494_v0, 16 }
 0x282   : > { %v3249_v38 = vsel %vm1727_vm5, %v3244_v39, %v3248_v1  ;;  %v4542_v53 = vrot.slane %v4540_v25, 1  ;;  %v4548_v6 = vshll.u32 %v3796_v54, 16  ;;  %v2496_v30 = vmul.bf16 %v16267_v19, %v15756_v7 }
 0x283   : > { %20677 = vst [vmem:[#allocation60_spill] sm:$0xff] %v16279_v36  ;;  %v16287_v60 = vsel %vm2338_vm6, %v2445_v16, %v2456_v8  ;;  %v2464_v62 = vor.u32 %v2462_v23, %v16279_v36  ;;  %13900 = vmatprep.mubr.msk.bf16.mxu1 %vm602_vm0, %v3249_v38  ;;  %v3254_v37 = vshll.u32 %v2495_v26, 16  ;;  %v3252_v0 = vor.u32 %v3250_v5, %v3248_v1  ;;  %v14676_v5 = vld [vmem:[#allocation2 + $0x78] sm:$0xff] }
 0x284   : > { %20678 = vst [vmem:[#allocation61_spill] sm:$0xff] %v16287_v60  ;;  %v4543_v63 = vsel %vm1727_vm5, %v4538_v56, %v4542_v53  ;;  %v4546_v47 = vor.u32 %v4544_v35, %v4542_v53  ;;  %v4550_v41 = vrot.slane %v4548_v6, 1  ;;  %v3258_v44 = vshrl.u32 %v2495_v26, 16 }
 0x285   : > { %v3256_v59 = vrot.slane %v3254_v37, 1  ;;  %v3262_v49 = vshll.u32 %v2496_v30, 16  ;;  %v3797_v20 = vmul.bf16 %v14674_v13, %v16249_v46  ;;  %v16294_v7 = vsel %vm2338_vm6, %v2453_v61, %v2464_v62 }
 0x286   : > { %20679 = vst [vmem:[#allocation62_spill] sm:$0xff] %v16294_v7  ;;  %14029 = vmatmul.mubr.msk.bf16.gmra.mrb[48].mxu0 %vm602_vm0, %v4543_v63  ;;  %v4551_v16 = vsel %vm1727_vm5, %v4546_v47, %v4550_v41  ;;  %v3798_v8 = vmul.bf16 %v14675_v12, %v16267_v19  ;;  %v2497_v57 = vmul.bf16 %v16287_v60, %v15778_v33  ;;  %v4552_v61 = vshrl.u32 %v3796_v54, 16  ;;  %v14677_v47 = vld [vmem:[#allocation2 + $0x80] sm:$0xff] }
 0x287   : > { %14032 = vmatprep.mubr.msk.bf16.mxu0 %vm602_vm0, %v4551_v16  ;;  %v3257_v39 = vsel %vm1727_vm5, %v3252_v0, %v3256_v59  ;;  %v3260_v14 = vor.u32 %v3258_v44, %v3256_v59  ;;  %v3264_v43 = vrot.slane %v3262_v49, 1  ;;  %v4556_v3 = vshll.u32 %v3797_v20, 16 }
 0x288   : > { %13901 = vmatmul.mubr.msk.bf16.gmra.mrb[20].mxu1 %vm602_vm0, %v3257_v39  ;;  %v4564_v23 = vshll.u32 %v3798_v8, 16  ;;  %v3266_v29 = vshrl.u32 %v2496_v30, 16  ;;  %v3270_v40 = vshll.u32 %v2497_v57, 16  ;;  %v2498_v35 = vmul.bf16 %v16294_v7, %v15790_v9 }
 0x289   : > { %v3265_v1 = vsel %vm1727_vm5, %v3260_v14, %v3264_v43  ;;  %v4558_v25 = vrot.slane %v4556_v3, 1  ;;  %v4554_v33 = vor.u32 %v4552_v61, %v4550_v41  ;;  %v4560_v56 = vshrl.u32 %v3797_v20, 16  ;;  %v3784_v20 = vld [vmem:[#allocation2 + $0x88] sm:$0x1] }
 0x28a   : > { %13904 = vmatprep.mubr.msk.bf16.mxu1 %vm602_vm0, %v3265_v1  ;;  %v4566_v26 = vrot.slane %v4564_v23, 1  ;;  %v3799_v38 = vmul.bf16 %v14676_v5, %v16287_v60  ;;  %v3268_v53 = vor.u32 %v3266_v29, %v3264_v43  ;;  %v3272_v6 = vrot.slane %v3270_v40, 1 }
 0x28b   : > { %v3274_v54 = vshrl.u32 %v2497_v57, 16  ;;  %v3278_v62 = vshll.u32 %v2498_v35, 16  ;;  %v2499_v30 = vmul.bf16 %v16279_v36, %v16229_v48  ;;  %v4562_v37 = vor.u32 %v4560_v56, %v4558_v25 }
 0x28c   : > { %v4572_v63 = vshll.u32 %v3799_v38, 16  ;;  %v3800_v9 = vmul.bf16 %v14677_v47, %v16294_v7  ;;  %v4559_v0 = vsel %vm1727_vm5, %v4554_v33, %v4558_v25  ;;  %v3273_v41 = vsel %vm1727_vm5, %v3268_v53, %v3272_v6  ;;  %v16332_v53 = vld [vmem:[#allocation3] sm:$0xff]  ;;  %v16362_v47 = vld [vmem:[%s20406_s6] ss:$0 sm:$0xff] }
 0x28d   : > { %v3276_v59 = vor.u32 %v3274_v54, %v3272_v6  ;;  %v3280_v44 = vrot.slane %v3278_v62, 1  ;;  %v4567_v49 = vsel %vm1727_vm5, %v4562_v37, %v4566_v26  ;;  %v4568_v12 = vshrl.u32 %v3798_v8, 16  ;;  %v14528_v6 = vld [vmem:[%s20409_s9 + $0x50] sm:$0xff]   ;;  %v14529_v54 = vld [vmem:[%s20409_s9 + $0x58] sm:$0xff]   ;;  %v14530_v62 = vld [vmem:[%s20409_s9 + $0x60] sm:$0xff]  }
 0x28e   : > { %14033 = vmatmul.mubr.msk.bf16.gmra.mrb[52].mxu0 %vm602_vm0, %v4559_v0  ;;  %v4580_v13 = vshll.u32 %v3800_v9, 16  ;;  %v4574_v16 = vrot.slane %v4572_v63, 1  ;;  %v3282_v57 = vshrl.u32 %v2498_v35, 16  ;;  %v3286_v39 = vshll.u32 %v2499_v30, 16  ;;  %v14531_v30 = vld [vmem:[%s20409_s9 + $0x68] sm:$0xff]   ;;  %v14532_v37 = vld [vmem:[%s20409_s9 + $0x70] sm:$0xff]  }
 0x28f   : > { %14036 = vmatprep.mubr.msk.bf16.mxu0 %vm602_vm0, %v4567_v49  ;;  %v3281_v48 = vsel %vm1727_vm5, %v3276_v59, %v3280_v44  ;;  %v3801_v14 = vmul.bf16 %v3784_v20, %v16279_v36  ;;  %v4576_v43 = vshrl.u32 %v3799_v38, 16  ;;  %v4570_v61 = vor.u32 %v4568_v12, %v4566_v26  ;;  %v14527_v38 = vld [vmem:[%s20409_s9 + $0x48] sm:$0xff]   ;;  %v14533_v63 = vld [vmem:[%s20409_s9 + $0x78] sm:$0xff]   ;;  %v16371_v12 = vld [vmem:[%s20408_s8] ss:$0 sm:$0xff] }
 0x290   : > { %13905 = vmatmul.mubr.msk.bf16.gmra.mrb[24].mxu1 %vm602_vm0, %v3273_v41  ;;  %v4582_v3 = vrot.slane %v4580_v13, 1  ;;  %v3284_v23 = vor.u32 %v3282_v57, %v3280_v44  ;;  %v3288_v25 = vrot.slane %v3286_v39, 1  ;;  %v4584_v35 = vshrl.u32 %v3800_v9, 16  ;;  %v14534_v57 = vld [vmem:[%s20409_s9 + $0x80] sm:$0xff]  }
 0x291   : > { %13908 = vmatprep.mubr.msk.bf16.mxu1 %vm602_vm0, %v3281_v48  ;;  %v4578_v29 = vor.u32 %v4576_v43, %v4574_v16  ;;  %v4575_v1 = vsel %vm1727_vm5, %v4570_v61, %v4574_v16  ;;  %v4588_v40 = vshll.u32 %v3801_v14, 16  ;;  %5378 = vmatpush1.bf16.msra.mxu1 %v14527_v38 }
 0x292   : > { %v3289_v8 = vsel %vm1727_vm5, %v3284_v23, %v3288_v25  ;;  %v4586_v56 = vor.u32 %v4584_v35, %v4582_v3  ;;  %5379 = vmatprep.subr.bf16.mxu1 %v16332_v53  ;;  %v14535_v25 = vld [vmem:[%s20409_s9 + $0x88] sm:$0xff]  }
 0x293   : > { %v4583_v33 = vsel %vm1727_vm5, %v4578_v29, %v4582_v3  ;;  %v4590_v5 = vrot.slane %v4588_v40, 1 }
 0x295   : > { %v4591_v26 = vsel %vm1727_vm5, %v4586_v56, %v4590_v5  ;;  %5380 = vmatpush1.bf16.msra.mxu1 %v14528_v6 }
 0x296   : > { %14037 = vmatmul.mubr.msk.bf16.gmra.mrb[56].mxu0 %vm602_vm0, %v4575_v1  ;;  %5381 = vmatprep.subr.bf16.mxu1 %v16332_v53 }
 0x297   : > { %14040 = vmatprep.mubr.msk.bf16.mxu0 %vm602_vm0, %v4583_v33 }
 0x298   : > { %13909 = vmatmul.mubr.msk.bf16.gmra.mrb[28].mxu1 %vm602_vm0, %v3289_v8 }
 0x299   : > { %5382 = vmatpush1.bf16.msra.mxu1 %v14529_v54 }
 0x29a   : > { %5383 = vmatprep.subr.bf16.mxu1 %v16332_v53 }
 0x29d   : > { %5384 = vmatpush1.bf16.msra.mxu1 %v14530_v62 }
 0x29e   : > { %14041 = vmatmul.mubr.msk.bf16.gmra.mrb[60].mxu0 %vm602_vm0, %v4591_v26  ;;  %5385 = vmatprep.subr.bf16.mxu1 %v16332_v53 }
 0x2a1   : > { %5386 = vmatpush1.bf16.msra.mxu1 %v14531_v30 }
 0x2a2   : > { %5387 = vmatprep.subr.bf16.mxu1 %v16332_v53 }
 0x2a5   : > { %5388 = vmatpush1.bf16.msra.mxu1 %v14532_v37 }
 0x2a6   : > { %5389 = vmatprep.subr.bf16.mxu1 %v16332_v53 }
 0x2a9   : > { %5390 = vmatpush1.bf16.msra.mxu1 %v14533_v63 }
 0x2aa   : > { %5391 = vmatprep.subr.bf16.mxu1 %v16332_v53 }
 0x2ad   : > { %5392 = vmatpush1.bf16.msra.mxu1 %v14534_v57 }
 0x2ae   : > { %5393 = vmatprep.subr.bf16.mxu1 %v16332_v53 }
 0x2b1   : > { %5394 = vmatpush1.bf16.msra.mxu1 %v14535_v25 }
 0x2b2   : > { %6481 = vmatprep.subr.bf16.mxu1 %v16332_v53 }
 0x32c   : > { %v13882_v9 = vpop.f32.mrb[0].mxu1 }
 0x32d   : > { %v3576_v0 = vadd.f32 %v13882_v9, %v16362_v47  ;;  %v3408_v41 = vpop.f32.mrb[1].mxu1 }
 0x32e   : > { %v3574_v59 = vadd.f32 %v16362_v47, %v3408_v41  ;;  %v13883_v44 = vpop.f32.mrb[2].mxu1 }
 0x32f   : > { %v3577_v49 = vadd.f32 %v13883_v44, %v16362_v47  ;;  %v3411_v13 = vpop.f32.mrb[3].mxu1  ;;  %v3608_v48 = vmax.f32 %v3576_v0, 0.0 }
 0x330   : > { %v3575_v20 = vadd.f32 %v16362_v47, %v3411_v13  ;;  %v3606_v39 = vmax.f32 %v3574_v59, 0.0 }
 0x331   : > { %v3609_v16 = vmax.f32 %v3577_v49, 0.0 }
 0x332   : > { %v3607_v14 = vmax.f32 %v3575_v20, 0.0 }
 0x333   : > { %v16376_v43 = vpack.c.bf16 %v3609_v16, %v3608_v48  ;;  %v14014_v3 = vpop.f32.mrb[32].mxu0 }
 0x334   : > { %v16378_v61 = vpack.c.bf16 %v3607_v14, %v3606_v39  ;;  %v4878_v23 = vadd.f32 %v14014_v3, %v16371_v12  ;;  %v4710_v29 = vpop.f32.mrb[33].mxu0  ;;  %v13886_v1 = vpop.f32.mrb[4].mxu1 }
 0x335   : > { %v4876_v40 = vadd.f32 %v16371_v12, %v4710_v29  ;;  %v3580_v33 = vadd.f32 %v13886_v1, %v16362_v47  ;;  %v14015_v8 = vpop.f32.mrb[34].mxu0  ;;  %v3424_v35 = vpop.f32.mrb[5].mxu1 }
 0x336   : > { %v4879_v56 = vadd.f32 %v14015_v8, %v16371_v12  ;;  %v3578_v5 = vadd.f32 %v16362_v47, %v3424_v35  ;;  %v4713_v26 = vpop.f32.mrb[35].mxu0  ;;  %v13887_v38 = vpop.f32.mrb[6].mxu1  ;;  %v4910_v30 = vmax.f32 %v4878_v23, 0.0 }
 0x337   : > { %v4877_v6 = vadd.f32 %v16371_v12, %v4713_v26  ;;  %v3581_v54 = vadd.f32 %v13887_v38, %v16362_v47  ;;  %v3427_v62 = vpop.f32.mrb[7].mxu1  ;;  %v4908_v9 = vmax.f32 %v4876_v40, 0.0  ;;  %v3612_v0 = vmax.f32 %v3580_v33, 0.0 }
 0x338   : > { %v4911_v37 = vmax.f32 %v4879_v56, 0.0  ;;  %v3579_v63 = vadd.f32 %v16362_v47, %v3427_v62  ;;  %v3610_v49 = vmax.f32 %v3578_v5, 0.0 }
 0x339   : > { %v4909_v41 = vmax.f32 %v4877_v6, 0.0  ;;  %v3613_v59 = vmax.f32 %v3581_v54, 0.0 }
 0x33a   : > { %v4941_v44 = vpack.c.bf16 %v4911_v37, %v4910_v30  ;;  %v3611_v13 = vmax.f32 %v3579_v63, 0.0 }
 0x33b   : > { %v16393_v20 = vpack.c.bf16 %v4909_v41, %v4908_v9  ;;  %v16395_v48 = vpack.c.bf16 %v3613_v59, %v3612_v0 }
 0x33c   : > { %v16397_v16 = vpack.c.bf16 %v3611_v13, %v3610_v49  ;;  %v14018_v57 = vpop.f32.mrb[36].mxu0  ;;  %5056 = vrot.lane.b32.xlu1 %v4941_v44, %s20682_s20  ;;  %4958 = vst.msk [vmem:[#allocation3 + $0x30] sm:$0xff] %vm4956_vm8, %v4941_v44 }
 0x33d   : > { %20680 = vst [vmem:[#allocation63_spill] sm:$0xff] %v16395_v48  ;;  %v4882_v39 = vadd.f32 %v14018_v57, %v16371_v12  ;;  %v4726_v14 = vpop.f32.mrb[37].mxu0  ;;  %4989 = vrot.lane.b32.xlu0 %v16393_v20, %s20532_s25  ;;  %4957 = vst.msk [vmem:[#allocation3 + $0x20] sm:$0xff] %vm4956_vm8, %v16393_v20 }
 0x33e   : > { %20681 = vst [vmem:[#allocation64_spill] sm:$0xff] %v16397_v16  ;;  %v4880_v3 = vadd.f32 %v16371_v12, %v4726_v14  ;;  %v14019_v23 = vpop.f32.mrb[38].mxu0 }
 0x33f   : > { %v13890_v29 = vpop.f32.mrb[8].mxu1  ;;  %v4883_v1 = vadd.f32 %v14019_v23, %v16371_v12  ;;  %v4729_v25 = vpop.f32.mrb[39].mxu0  ;;  %v4914_v35 = vmax.f32 %v4882_v39, 0.0 }
 0x340   : > { %v3584_v40 = vadd.f32 %v13890_v29, %v16362_v47  ;;  %v3440_v33 = vpop.f32.mrb[9].mxu1  ;;  %v4881_v8 = vadd.f32 %v16371_v12, %v4729_v25  ;;  %v4912_v38 = vmax.f32 %v4880_v3, 0.0 }
 0x341   : > { %v4915_v56 = vmax.f32 %v4883_v1, 0.0  ;;  %v3582_v5 = vadd.f32 %v16362_v47, %v3440_v33  ;;  %v13891_v26 = vpop.f32.mrb[10].mxu1  ;;  %4991 = vrot.lane.b32.xlu0 %v4941_v44, %s20532_s25 }
 0x342   : > { %v4913_v6 = vmax.f32 %v4881_v8, 0.0  ;;  %v3585_v54 = vadd.f32 %v13891_v26, %v16362_v47  ;;  %v3443_v62 = vpop.f32.mrb[11].mxu1  ;;  %v3616_v63 = vmax.f32 %v3584_v40, 0.0 }
 0x343   : > { %v4943_v30 = vpack.c.bf16 %v4915_v56, %v4914_v35  ;;  %v3583_v37 = vadd.f32 %v16362_v47, %v3443_v62  ;;  %v3614_v41 = vmax.f32 %v3582_v5, 0.0 }
 0x344   : > { %v4942_v9 = vpack.c.bf16 %v4913_v6, %v4912_v38  ;;  %v3617_v0 = vmax.f32 %v3585_v54, 0.0 }
 0x345   : > { %v3615_v59 = vmax.f32 %v3583_v37, 0.0  ;;  %4960 = vst.msk [vmem:[#allocation3 + $0x50] sm:$0xff] %vm4956_vm8, %v4943_v30 }
 0x346   : > { %v16415_v49 = vpack.c.bf16 %v3617_v0, %v3616_v63  ;;  %v14022_v13 = vpop.f32.mrb[40].mxu0  ;;  %4993 = vrot.lane.b32.xlu0 %v4942_v9, %s20532_s25  ;;  %5058 = vrot.lane.b32.xlu1 %v4942_v9, %s20682_s20  ;;  %4959 = vst.msk [vmem:[#allocation3 + $0x40] sm:$0xff] %vm4956_vm8, %v4942_v9 }
 0x347   : > { %v16420_v44 = vpack.c.bf16 %v3615_v59, %v3614_v41  ;;  %v4886_v57 = vadd.f32 %v14022_v13, %v16371_v12  ;;  %v4742_v39 = vpop.f32.mrb[41].mxu0 }
 0x348   : > { %20683 = vst [vmem:[#allocation65_spill] sm:$0xff] %v16415_v49  ;;  %v4884_v14 = vadd.f32 %v16371_v12, %v4742_v39  ;;  %v14023_v3 = vpop.f32.mrb[42].mxu0  ;;  %v20699_v49 = vld [vmem:[#allocation30_spill] sm:$0xff] }
 0x349   : > { %20684 = vst [vmem:[#allocation66_spill] sm:$0xff] %v16420_v44  ;;  %v13894_v23 = vpop.f32.mrb[12].mxu1  ;;  %v4887_v29 = vadd.f32 %v14023_v3, %v16371_v12  ;;  %v4745_v1 = vpop.f32.mrb[43].mxu0  ;;  %v4918_v8 = vmax.f32 %v4886_v57, 0.0 }
 0x34a   : > { %v3588_v25 = vadd.f32 %v13894_v23, %v16362_v47  ;;  %v3456_v40 = vpop.f32.mrb[13].mxu1  ;;  %v4885_v33 = vadd.f32 %v16371_v12, %v4745_v1  ;;  %4995 = vrot.lane.b32.xlu0 %v4943_v30, %s20532_s25  ;;  %5060 = vrot.lane.b32.xlu1 %v4943_v30, %s20682_s20  ;;  %v4916_v26 = vmax.f32 %v4884_v14, 0.0 }
 0x34b   : > { %v4919_v35 = vmax.f32 %v4887_v29, 0.0  ;;  %v3586_v56 = vadd.f32 %v16362_v47, %v3456_v40  ;;  %v13895_v5 = vpop.f32.mrb[14].mxu1 }
 0x34c   : > { %v4917_v38 = vmax.f32 %v4885_v33, 0.0  ;;  %v3589_v6 = vadd.f32 %v13895_v5, %v16362_v47  ;;  %v3459_v54 = vpop.f32.mrb[15].mxu1  ;;  %v3620_v63 = vmax.f32 %v3588_v25, 0.0 }
 0x34d   : > { %v4945_v62 = vpack.c.bf16 %v4919_v35, %v4918_v8  ;;  %v3587_v37 = vadd.f32 %v16362_v47, %v3459_v54  ;;  %v3618_v41 = vmax.f32 %v3586_v56, 0.0 }
 0x34e   : > { %v4944_v9 = vpack.c.bf16 %v4917_v38, %v4916_v26  ;;  %v3621_v0 = vmax.f32 %v3589_v6, 0.0 }
 0x34f   : > { %v3619_v59 = vmax.f32 %v3587_v37, 0.0  ;;  %4962 = vst.msk [vmem:[#allocation3 + $0x70] sm:$0xff] %vm4956_vm8, %v4945_v62 }
 0x350   : > { %v16433_v30 = vpack.c.bf16 %v3621_v0, %v3620_v63  ;;  %4997 = vrot.lane.b32.xlu0 %v4944_v9, %s20532_s25  ;;  %5062 = vrot.lane.b32.xlu1 %v4944_v9, %s20682_s20  ;;  %4961 = vst.msk [vmem:[#allocation3 + $0x60] sm:$0xff] %vm4956_vm8, %v4944_v9 }
 0x351   : > { %v16438_v13 = vpack.c.bf16 %v3619_v59, %v3618_v41  ;;  %v14026_v57 = vpop.f32.mrb[44].mxu0 }
 0x352   : > { %20685 = vst [vmem:[#allocation67_spill] sm:$0xff] %v16433_v30  ;;  %v4890_v39 = vadd.f32 %v14026_v57, %v16371_v12  ;;  %v4758_v14 = vpop.f32.mrb[45].mxu0  ;;  %v13898_v3 = vpop.f32.mrb[16].mxu1 }
 0x353   : > { %20686 = vst [vmem:[#allocation68_spill] sm:$0xff] %v16438_v13  ;;  %v4888_v23 = vadd.f32 %v16371_v12, %v4758_v14  ;;  %v3592_v29 = vadd.f32 %v13898_v3, %v16362_v47  ;;  %v14027_v1 = vpop.f32.mrb[46].mxu0  ;;  %v3472_v25 = vpop.f32.mrb[17].mxu1 }
 0x354   : > { %v4891_v40 = vadd.f32 %v14027_v1, %v16371_v12  ;;  %v3590_v33 = vadd.f32 %v16362_v47, %v3472_v25  ;;  %v4761_v8 = vpop.f32.mrb[47].mxu0  ;;  %v13899_v35 = vpop.f32.mrb[18].mxu1  ;;  %4999 = vrot.lane.b32.xlu0 %v4945_v62, %s20532_s25  ;;  %5064 = vrot.lane.b32.xlu1 %v4945_v62, %s20682_s20  ;;  %v4922_v38 = vmax.f32 %v4890_v39, 0.0 }
 0x355   : > { %v4889_v56 = vadd.f32 %v16371_v12, %v4761_v8  ;;  %v3593_v5 = vadd.f32 %v13899_v35, %v16362_v47  ;;  %v3475_v26 = vpop.f32.mrb[19].mxu1  ;;  %v4920_v37 = vmax.f32 %v4888_v23, 0.0  ;;  %v3624_v63 = vmax.f32 %v3592_v29, 0.0 }
 0x356   : > { %v4923_v6 = vmax.f32 %v4891_v40, 0.0  ;;  %v3591_v54 = vadd.f32 %v16362_v47, %v3475_v26  ;;  %v3622_v59 = vmax.f32 %v3590_v33, 0.0 }
 0x357   : > { %v4921_v9 = vmax.f32 %v4889_v56, 0.0  ;;  %v3625_v0 = vmax.f32 %v3593_v5, 0.0 }
 0x358   : > { %v4947_v41 = vpack.c.bf16 %v4923_v6, %v4922_v38  ;;  %v3623_v57 = vmax.f32 %v3591_v54, 0.0 }
 0x359   : > { %v4946_v14 = vpack.c.bf16 %v4921_v9, %v4920_v37  ;;  %v16450_v3 = vpack.c.bf16 %v3625_v0, %v3624_v63  ;;  %v14030_v62 = vpop.f32.mrb[48].mxu0  ;;  %v14538_v9 = vld [vmem:[%s20409_s9] sm:$0xff]  }
 0x35a   : > { %v16452_v1 = vpack.c.bf16 %v3623_v57, %v3622_v59  ;;  %v4894_v25 = vadd.f32 %v14030_v62, %v16371_v12  ;;  %v4774_v8 = vpop.f32.mrb[49].mxu0  ;;  %4964 = vst.msk [vmem:[#allocation3 + $0x90] sm:$0xff] %vm4956_vm8, %v4947_v41  ;;  %5921 = vmatpush1.bf16.msra.mxu0 %v14538_v9 }
 0x35b   : > { %20687 = vst [vmem:[#allocation69_spill] sm:$0xff] %v16450_v3  ;;  %v4892_v39 = vadd.f32 %v16371_v12, %v4774_v8  ;;  %5001 = vrot.lane.b32.xlu0 %v4946_v14, %s20532_s25  ;;  %5066 = vrot.lane.b32.xlu1 %v4946_v14, %s20682_s20  ;;  %v13902_v23 = vpop.f32.mrb[20].mxu1  ;;  %v14031_v29 = vpop.f32.mrb[50].mxu0  ;;  %4963 = vst.msk [vmem:[#allocation3 + $0x80] sm:$0xff] %vm4956_vm8, %v4946_v14 }
 0x35c   : > { %20688 = vst [vmem:[#allocation70_spill] sm:$0xff] %v16452_v1  ;;  %v3596_v40 = vadd.f32 %v13902_v23, %v16362_v47  ;;  %v4895_v33 = vadd.f32 %v14031_v29, %v16371_v12  ;;  %v3488_v35 = vpop.f32.mrb[21].mxu1  ;;  %v4777_v56 = vpop.f32.mrb[51].mxu0  ;;  %v4926_v6 = vmax.f32 %v4894_v25, 0.0  ;;  %5922 = vmatprep.subr.bf16.mxu0 %v16332_v53  ;;  %v20698_v1 = vld [vmem:[#allocation33_spill] sm:$0xff] }
 0x35d   : > { %v3594_v5 = vadd.f32 %v16362_v47, %v3488_v35  ;;  %v4893_v26 = vadd.f32 %v16371_v12, %v4777_v56  ;;  %v13903_v38 = vpop.f32.mrb[22].mxu1  ;;  %v4924_v0 = vmax.f32 %v4892_v39, 0.0 }
 0x35e   : > { %v4927_v54 = vmax.f32 %v4895_v33, 0.0  ;;  %v3597_v37 = vadd.f32 %v13903_v38, %v16362_v47  ;;  %v3491_v63 = vpop.f32.mrb[23].mxu1  ;;  %v3628_v14 = vmax.f32 %v3596_v40, 0.0 }
 0x35f   : > { %v4925_v59 = vmax.f32 %v4893_v26, 0.0  ;;  %v3595_v57 = vadd.f32 %v16362_v47, %v3491_v63  ;;  %5003 = vrot.lane.b32.xlu0 %v4947_v41, %s20532_s25  ;;  %5068 = vrot.lane.b32.xlu1 %v4947_v41, %s20682_s20  ;;  %v3626_v25 = vmax.f32 %v3594_v5, 0.0  ;;  %v14540_v41 = vld [vmem:[%s20409_s9 + $0x8] sm:$0xff]  }
 0x360   : > { %v4949_v62 = vpack.c.bf16 %v4927_v54, %v4926_v6  ;;  %v3629_v8 = vmax.f32 %v3597_v37, 0.0  ;;  %5923 = vmatpush1.bf16.msra.mxu0 %v14540_v41 }
 0x361   : > { %v4948_v23 = vpack.c.bf16 %v4925_v59, %v4924_v0  ;;  %v3627_v29 = vmax.f32 %v3595_v57, 0.0  ;;  %v14034_v33 = vpop.f32.mrb[52].mxu0  ;;  %5924 = vmatprep.subr.bf16.mxu0 %v16332_v53 }
 0x362   : > { %v16472_v35 = vpack.c.bf16 %v3629_v8, %v3628_v14  ;;  %v4898_v39 = vadd.f32 %v14034_v33, %v16371_v12  ;;  %v4790_v56 = vpop.f32.mrb[53].mxu0  ;;  %4966 = vst.msk [vmem:[#allocation3 + $0xb0] sm:$0xff] %vm4956_vm8, %v4949_v62 }
 0x363   : > { %v16479_v40 = vpack.c.bf16 %v3627_v29, %v3626_v25  ;;  %v4896_v5 = vadd.f32 %v16371_v12, %v4790_v56  ;;  %5005 = vrot.lane.b32.xlu0 %v4948_v23, %s20532_s25  ;;  %5070 = vrot.lane.b32.xlu1 %v4948_v23, %s20682_s20  ;;  %v13906_v26 = vpop.f32.mrb[24].mxu1  ;;  %v14035_v38 = vpop.f32.mrb[54].mxu0  ;;  %4965 = vst.msk [vmem:[#allocation3 + $0xa0] sm:$0xff] %vm4956_vm8, %v4948_v23  ;;  %v14541_v23 = vld [vmem:[%s20409_s9 + $0x10] sm:$0xff]  }
 0x364   : > { %20689 = vst [vmem:[#allocation71_spill] sm:$0xff] %v16472_v35  ;;  %v3600_v6 = vadd.f32 %v13906_v26, %v16362_v47  ;;  %v4899_v54 = vadd.f32 %v14035_v38, %v16371_v12  ;;  %v3504_v37 = vpop.f32.mrb[25].mxu1  ;;  %v4793_v63 = vpop.f32.mrb[55].mxu0  ;;  %v4930_v57 = vmax.f32 %v4898_v39, 0.0  ;;  %5925 = vmatpush1.bf16.msra.mxu0 %v14541_v23 }
 0x365   : > { %20690 = vst [vmem:[#allocation72_spill] sm:$0xff] %v16479_v40  ;;  %v3598_v9 = vadd.f32 %v16362_v47, %v3504_v37  ;;  %v4897_v0 = vadd.f32 %v16371_v12, %v4793_v63  ;;  %v13907_v59 = vpop.f32.mrb[26].mxu1  ;;  %v4928_v29 = vmax.f32 %v4896_v5, 0.0  ;;  %5926 = vmatprep.subr.bf16.mxu0 %v16332_v53 }
 0x366   : > { %v4931_v14 = vmax.f32 %v4899_v54, 0.0  ;;  %v3601_v8 = vadd.f32 %v13907_v59, %v16362_v47  ;;  %v3507_v25 = vpop.f32.mrb[27].mxu1  ;;  %v3632_v41 = vmax.f32 %v3600_v6, 0.0 }
 0x367   : > { %v4929_v33 = vmax.f32 %v4897_v0, 0.0  ;;  %v3599_v56 = vadd.f32 %v16362_v47, %v3507_v25  ;;  %5007 = vrot.lane.b32.xlu0 %v4949_v62, %s20532_s25  ;;  %5072 = vrot.lane.b32.xlu1 %v4949_v62, %s20682_s20  ;;  %v3630_v39 = vmax.f32 %v3598_v9, 0.0  ;;  %v14542_v62 = vld [vmem:[%s20409_s9 + $0x18] sm:$0xff]  }
 0x368   : > { %v4951_v26 = vpack.c.bf16 %v4931_v14, %v4930_v57  ;;  %v3633_v38 = vmax.f32 %v3601_v8, 0.0  ;;  %5927 = vmatpush1.bf16.msra.mxu0 %v14542_v62 }
 0x369   : > { %v4950_v54 = vpack.c.bf16 %v4929_v33, %v4928_v29  ;;  %v3631_v37 = vmax.f32 %v3599_v56, 0.0  ;;  %v14038_v63 = vpop.f32.mrb[56].mxu0  ;;  %5928 = vmatprep.subr.bf16.mxu0 %v16332_v53 }
 0x36a   : > { %v16498_v59 = vpack.c.bf16 %v3633_v38, %v3632_v41  ;;  %v4902_v5 = vadd.f32 %v14038_v63, %v16371_v12  ;;  %v4806_v0 = vpop.f32.mrb[57].mxu0  ;;  %4968 = vst.msk [vmem:[#allocation3 + $0xd0] sm:$0xff] %vm4956_vm8, %v4951_v26 }
 0x36b   : > { %v16505_v6 = vpack.c.bf16 %v3631_v37, %v3630_v39  ;;  %v4900_v9 = vadd.f32 %v16371_v12, %v4806_v0  ;;  %5009 = vrot.lane.b32.xlu0 %v4950_v54, %s20532_s25  ;;  %5074 = vrot.lane.b32.xlu1 %v4950_v54, %s20682_s20  ;;  %v13910_v57 = vpop.f32.mrb[28].mxu1  ;;  %v14039_v14 = vpop.f32.mrb[58].mxu0  ;;  %4967 = vst.msk [vmem:[#allocation3 + $0xc0] sm:$0xff] %vm4956_vm8, %v4950_v54  ;;  %v14543_v54 = vld [vmem:[%s20409_s9 + $0x20] sm:$0xff]  }
 0x36c   : > { %20691 = vst [vmem:[#allocation73_spill] sm:$0xff] %v16498_v59  ;;  %v3604_v8 = vadd.f32 %v13910_v57, %v16362_v47  ;;  %v4903_v25 = vadd.f32 %v14039_v14, %v16371_v12  ;;  %v3520_v23 = vpop.f32.mrb[29].mxu1  ;;  %v4809_v29 = vpop.f32.mrb[59].mxu0  ;;  %v4934_v38 = vmax.f32 %v4902_v5, 0.0  ;;  %5929 = vmatpush1.bf16.msra.mxu0 %v14543_v54  ;;  %v14546_v54 = vld [vmem:[%s20409_s9 + $0x30] sm:$0xff]  }
 0x36d   : > { %20692 = vst [vmem:[#allocation74_spill] sm:$0xff] %v16505_v6  ;;  %v3602_v33 = vadd.f32 %v16362_v47, %v3520_v23  ;;  %v4901_v56 = vadd.f32 %v16371_v12, %v4809_v29  ;;  %v13911_v41 = vpop.f32.mrb[30].mxu1  ;;  %v4932_v0 = vmax.f32 %v4900_v9, 0.0  ;;  %5930 = vmatprep.subr.bf16.mxu0 %v16332_v53 }
 0x36e   : > { %v4935_v39 = vmax.f32 %v4903_v25, 0.0  ;;  %v3605_v37 = vadd.f32 %v13911_v41, %v16362_v47  ;;  %v3523_v63 = vpop.f32.mrb[31].mxu1  ;;  %v3636_v14 = vmax.f32 %v3604_v8, 0.0 }
 0x36f   : > { %v4933_v57 = vmax.f32 %v4901_v56, 0.0  ;;  %v3603_v62 = vadd.f32 %v16362_v47, %v3523_v63  ;;  %5011 = vrot.lane.b32.xlu0 %v4951_v26, %s20532_s25  ;;  %5076 = vrot.lane.b32.xlu1 %v4951_v26, %s20682_s20  ;;  %v3634_v5 = vmax.f32 %v3602_v33, 0.0  ;;  %v14545_v47 = vld [vmem:[%s20409_s9 + $0x28] sm:$0xff]  }
 0x370   : > { %v4953_v23 = vpack.c.bf16 %v4935_v39, %v4934_v38  ;;  %v3637_v29 = vmax.f32 %v3605_v37, 0.0  ;;  %5931 = vmatpush1.bf16.msra.mxu0 %v14545_v47 }
 0x371   : > { %v4952_v25 = vpack.c.bf16 %v4933_v57, %v4932_v0  ;;  %v3635_v41 = vmax.f32 %v3603_v62, 0.0  ;;  %v14042_v59 = vpop.f32.mrb[60].mxu0  ;;  %5932 = vmatprep.subr.bf16.mxu0 %v16332_v53 }
 0x372   : > { %v16524_v6 = vpack.c.bf16 %v3637_v29, %v3636_v14  ;;  %v4906_v9 = vadd.f32 %v14042_v59, %v16371_v12  ;;  %v4822_v56 = vpop.f32.mrb[61].mxu0  ;;  %4970 = vst.msk [vmem:[#allocation3 + $0xf0] sm:$0xff] %vm4956_vm8, %v4953_v23 }
 0x373   : > { %v16531_v26 = vpack.c.bf16 %v3635_v41, %v3634_v5  ;;  %v4904_v8 = vadd.f32 %v16371_v12, %v4822_v56  ;;  %5013 = vrot.lane.b32.xlu0 %v4952_v25, %s20532_s25  ;;  %5078 = vrot.lane.b32.xlu1 %v4952_v25, %s20682_s20  ;;  %v14043_v33 = vpop.f32.mrb[62].mxu0  ;;  %4969 = vst.msk [vmem:[#allocation3 + $0xe0] sm:$0xff] %vm4956_vm8, %v4952_v25  ;;  %v14537_v56 = vld [vmem:[%s20409_s9 + $0x98] sm:$0xff]  }
 0x374   : > { %20693 = vst [vmem:[#allocation75_spill] sm:$0xff] %v16524_v6  ;;  %v4907_v59 = vadd.f32 %v14043_v33, %v16371_v12  ;;  %v4825_v38 = vpop.f32.mrb[63].mxu0  ;;  %v4938_v37 = vmax.f32 %v4906_v9, 0.0  ;;  %5933 = vmatpush1.bf16.msra.mxu0 %v14546_v54  ;;  %v14539_v33 = vld [vmem:[%s20409_s9 + $0xa0] sm:$0xff]  }
 0x375   : > { %20694 = vst [vmem:[#allocation76_spill] sm:$0xff] %v16531_v26  ;;  %v4905_v39 = vadd.f32 %v16371_v12, %v4825_v38  ;;  %v4936_v0 = vmax.f32 %v4904_v8, 0.0  ;;  %5934 = vmatprep.subr.bf16.mxu0 %v16332_v53  ;;  %v14547_v12 = vld [vmem:[%s20409_s9 + $0x38] sm:$0xff]  }
 0x376   : > { %v4939_v63 = vmax.f32 %v4907_v59, 0.0 }
 0x377   : > { %v4937_v57 = vmax.f32 %v4905_v39, 0.0  ;;  %5015 = vrot.lane.b32.xlu0 %v4953_v23, %s20532_s25  ;;  %5080 = vrot.lane.b32.xlu1 %v4953_v23, %s20682_s20  ;;  %v14549_v23 = vld [vmem:[%s20409_s9 + $0x40] sm:$0xff]  }
 0x378   : > { %v4955_v62 = vpack.c.bf16 %v4939_v63, %v4938_v37  ;;  %5935 = vmatpush1.bf16.msra.mxu0 %v14547_v12  ;;  %v14544_v63 = vld [vmem:[%s20409_s9 + $0xa8] sm:$0xff]  }
 0x379   : > { %v4954_v14 = vpack.c.bf16 %v4937_v57, %v4936_v0  ;;  %5936 = vmatprep.subr.bf16.mxu0 %v16332_v53 }
 0x37a   : > { %4972 = vst.msk [vmem:[#allocation3 + $0x110] sm:$0xff] %vm4956_vm8, %v4955_v62 }
 0x37b   : > { %4971 = vst.msk [vmem:[#allocation3 + $0x100] sm:$0xff] %vm4956_vm8, %v4954_v14  ;;  %5017 = vrot.lane.b32.xlu0 %v4954_v14, %s20532_s25  ;;  %5082 = vrot.lane.b32.xlu1 %v4954_v14, %s20682_s20 }
 0x37c   : > { %5937 = vmatpush1.bf16.msra.mxu0 %v14549_v23  ;;  %v14550_v23 = vld [vmem:[%s20409_s9 + $0xb8] sm:$0xff]  }
 0x37f   : > { %5054 = vrot.lane.b32.xlu0 %v16393_v20, %s20682_s20  ;;  %5084 = vrot.lane.b32.xlu1 %v4955_v62, %s20682_s20 }
 0x383   : > { %5019 = vrot.lane.b32.xlu1 %v4955_v62, %s20532_s25  ;;  %6777 = vrot.lane.b32.xlu0 %v16378_v61, %s20695_s27  ;;  %v14536_v61 = vld [vmem:[%s20409_s9 + $0x90] sm:$0xff]  }
 0x384   : > { %v14548_v62 = vld [vmem:[%s20409_s9 + $0xb0] sm:$0xff]  }
 0x387   : > { %6779 = vrot.lane.b32.xlu1 %v16376_v43, %s20695_s27 }
 0x3ae   : > { %v5057_v29 = vpop.permute.xlu1 %5056 }
 0x3af   : > { %5106 = vst.msk [vmem:[#allocation3 + $0x18] sm:$0xff] %vm608_vm4, %v5057_v29  ;;  %v4990_v5 = vpop.permute.xlu0 %4989 }
 0x3b0   : > { %5038 = vst.msk [vmem:[#allocation3 + $0x10] sm:$0xff] %vm5037_vm9, %v4990_v5 }
 0x3b1   : > { %5105 = vst.msk [vmem:[#allocation3 + $0x10] sm:$0xff] %vm5102_vm10, %v5057_v29 }
 0x3b3   : > { %v4992_v20 = vpop.permute.xlu0 %4991 }
 0x3b4   : > { %5039 = vst.msk [vmem:[#allocation3 + $0x20] sm:$0xff] %vm5037_vm9, %v4992_v20  ;;  %v14551_v20 = vld [vmem:[%s20409_s9 + $0xc0] sm:$0xff]  }
 0x3b6   : > { %v16569_v25 = vld [vmem:[#allocation3 + $0x18] sm:$0xff] }
 0x3b7   : > { %13173 = vmatprep.mubr.msk.bf16.mxu1 %vm608_vm4, %v16569_v25 }
 0x3b8   : > { %v4994_v43 = vpop.permute.xlu0 %4993  ;;  %v5059_v41 = vpop.permute.xlu1 %5058  ;;  %v16576_v9 = vld [vmem:[#allocation3 + $0x10] sm:$0xff] }
 0x3b9   : > { %5040 = vst.msk [vmem:[#allocation3 + $0x30] sm:$0xff] %vm5037_vm9, %v4994_v43  ;;  %5410 = vmatmul.mubr.bf16.vlgmr.msra.gmra.mrb[32].mxu1 %v16576_v9 }
 0x3ba   : > { %5107 = vst.msk [vmem:[#allocation3 + $0x20] sm:$0xff] %vm5102_vm10, %v5059_v41  ;;  %6482 = vmatpush1.bf16.msra.mxu1 %v14536_v61 }
 0x3bb   : > { %5108 = vst.msk [vmem:[#allocation3 + $0x28] sm:$0xff] %vm608_vm4, %v5059_v41  ;;  %6483 = vmatprep.subr.bf16.mxu1 %v16332_v53 }
 0x3bc   : > { %v4996_v47 = vpop.permute.xlu0 %4995  ;;  %v5061_v8 = vpop.permute.xlu1 %5060 }
 0x3bd   : > { %5041 = vst.msk [vmem:[#allocation3 + $0x40] sm:$0xff] %vm5037_vm9, %v4996_v47  ;;  %v14552_v47 = vld [vmem:[%s20409_s9 + $0xc8] sm:$0xff]  }
 0x3be   : > { %5109 = vst.msk [vmem:[#allocation3 + $0x30] sm:$0xff] %vm5102_vm10, %v5061_v8  ;;  %6484 = vmatpush1.bf16.msra.mxu1 %v14537_v56 }
 0x3bf   : > { %5110 = vst.msk [vmem:[#allocation3 + $0x38] sm:$0xff] %vm608_vm4, %v5061_v8  ;;  %6485 = vmatprep.subr.bf16.mxu1 %v16332_v53 }
 0x3c1   : > { %v16595_v38 = vld [vmem:[#allocation3 + $0x20] sm:$0xff] }
 0x3c2   : > { %v16593_v59 = vld [vmem:[#allocation3 + $0x28] sm:$0xff]  ;;  %v4998_v39 = vpop.permute.xlu0 %4997  ;;  %v5063_v37 = vpop.permute.xlu1 %5062  ;;  %6486 = vmatpush1.bf16.msra.mxu1 %v14539_v33 }
 0x3c3   : > { %13174 = vmatprep.mubr.msk.bf16.mxu1 %vm608_vm4, %v16593_v59  ;;  %5042 = vst.msk [vmem:[#allocation3 + $0x50] sm:$0xff] %vm5037_vm9, %v4998_v39  ;;  %6487 = vmatprep.subr.bf16.mxu1 %v16332_v53  ;;  %v14553_v39 = vld [vmem:[%s20409_s9 + $0xd0] sm:$0xff]  }
 0x3c4   : > { %5418 = vmatmul.mubr.bf16.gmra.mrb[36].mxu1 %v16595_v38  ;;  %5111 = vst.msk [vmem:[#allocation3 + $0x40] sm:$0xff] %vm5102_vm10, %v5063_v37 }
 0x3c5   : > { %5112 = vst.msk [vmem:[#allocation3 + $0x48] sm:$0xff] %vm608_vm4, %v5063_v37  ;;  %v16618_v14 = vld [vmem:[#allocation3 + $0x30] sm:$0xff] }
 0x3c6   : > { %v16606_v54 = vld [vmem:[#allocation3 + $0x38] sm:$0xff]  ;;  %v5000_v0 = vpop.permute.xlu0 %4999  ;;  %v5065_v57 = vpop.permute.xlu1 %5064  ;;  %6488 = vmatpush1.bf16.msra.mxu1 %v14544_v63 }
 0x3c7   : > { %13175 = vmatprep.mubr.msk.bf16.mxu1 %vm608_vm4, %v16606_v54  ;;  %5043 = vst.msk [vmem:[#allocation3 + $0x60] sm:$0xff] %vm5037_vm9, %v5000_v0  ;;  %6489 = vmatprep.subr.bf16.mxu1 %v16332_v53  ;;  %v5176_v30 = vmul.bf16 %v16606_v54, %v20698_v1 }
 0x3c8   : > { %5113 = vst.msk [vmem:[#allocation3 + $0x50] sm:$0xff] %vm5102_vm10, %v5065_v57 }
 0x3c9   : > { %5114 = vst.msk [vmem:[#allocation3 + $0x58] sm:$0xff] %vm608_vm4, %v5065_v57  ;;  %v5587_v46 = vshrl.u32 %v5176_v30, 16 }
 0x3ca   : > { %6490 = vmatpush1.bf16.msra.mxu1 %v14548_v62 }
 0x3cb   : > { %6491 = vmatprep.subr.bf16.mxu1 %v16332_v53  ;;  %v16635_v41 = vld [vmem:[#allocation3 + $0x40] sm:$0xff] }
 0x3cc   : > { %5426 = vmatmul.mubr.bf16.gmra.mrb[40].mxu1 %v16618_v14  ;;  %v16621_v12 = vld [vmem:[#allocation3 + $0x48] sm:$0xff] }
 0x3cd   : > { %13176 = vmatprep.mubr.msk.bf16.mxu1 %vm608_vm4, %v16621_v12  ;;  %v5002_v29 = vpop.permute.xlu0 %5001  ;;  %v5067_v5 = vpop.permute.xlu1 %5066 }
 0x3ce   : > { %5044 = vst.msk [vmem:[#allocation3 + $0x70] sm:$0xff] %vm5037_vm9, %v5002_v29  ;;  %6492 = vmatpush1.bf16.msra.mxu1 %v14550_v23 }
 0x3cf   : > { %5115 = vst.msk [vmem:[#allocation3 + $0x60] sm:$0xff] %vm5102_vm10, %v5067_v5  ;;  %6493 = vmatprep.subr.bf16.mxu1 %v16332_v53  ;;  %v16656_v0 = vld [vmem:[#allocation3 + $0x50] sm:$0xff] }
 0x3d0   : > { %5116 = vst.msk [vmem:[#allocation3 + $0x68] sm:$0xff] %vm608_vm4, %v5067_v5  ;;  %v16642_v56 = vld [vmem:[#allocation3 + $0x58] sm:$0xff] }
 0x3d1   : > { %v5004_v61 = vpop.permute.xlu0 %5003  ;;  %v5069_v43 = vpop.permute.xlu1 %5068 }
 0x3d2   : > { %5045 = vst.msk [vmem:[#allocation3 + $0x80] sm:$0xff] %vm5037_vm9, %v5004_v61  ;;  %6494 = vmatpush1.bf16.msra.mxu1 %v14551_v20 }
 0x3d3   : > { %5117 = vst.msk [vmem:[#allocation3 + $0x70] sm:$0xff] %vm5102_vm10, %v5069_v43  ;;  %6495 = vmatprep.subr.bf16.mxu1 %v16332_v53 }
 0x3d4   : > { %5118 = vst.msk [vmem:[#allocation3 + $0x78] sm:$0xff] %vm608_vm4, %v5069_v43  ;;  %5434 = vmatmul.mubr.bf16.gmra.mrb[44].mxu1 %v16635_v41 }
 0x3d5   : > { %13177 = vmatprep.mubr.msk.bf16.mxu1 %vm608_vm4, %v16642_v56  ;;  %v5006_v8 = vpop.permute.xlu0 %5005  ;;  %v5071_v33 = vpop.permute.xlu1 %5070 }
 0x3d6   : > { %5046 = vst.msk [vmem:[#allocation3 + $0x90] sm:$0xff] %vm5037_vm9, %v5006_v8  ;;  %6496 = vmatpush1.bf16.msra.mxu1 %v14552_v47  ;;  %v16671_v20 = vld [vmem:[#allocation3 + $0x60] sm:$0xff] }
 0x3d7   : > { %5119 = vst.msk [vmem:[#allocation3 + $0x80] sm:$0xff] %vm5102_vm10, %v5071_v33  ;;  %6497 = vmatprep.subr.bf16.mxu1 %v16332_v53  ;;  %v16663_v57 = vld [vmem:[#allocation3 + $0x68] sm:$0xff] }
 0x3d8   : > { %5120 = vst.msk [vmem:[#allocation3 + $0x88] sm:$0xff] %vm608_vm4, %v5071_v33 }
 0x3d9   : > { %v5008_v37 = vpop.permute.xlu0 %5007  ;;  %v5073_v63 = vpop.permute.xlu1 %5072 }
 0x3da   : > { %5047 = vst.msk [vmem:[#allocation3 + $0xa0] sm:$0xff] %vm5037_vm9, %v5008_v37  ;;  %6498 = vmatpush1.bf16.msra.mxu1 %v14553_v39  ;;  %v16684_v33 = vld [vmem:[#allocation3 + $0x70] sm:$0xff] }
 0x3db   : > { %5121 = vst.msk [vmem:[#allocation3 + $0x90] sm:$0xff] %vm5102_vm10, %v5073_v63  ;;  %8244 = vmatprep.subr.bf16.mxu1 %v16332_v53  ;;  %v16677_v61 = vld [vmem:[#allocation3 + $0x78] sm:$0xff] }
 0x3dc   : > { %5122 = vst.msk [vmem:[#allocation3 + $0x98] sm:$0xff] %vm608_vm4, %v5073_v63  ;;  %5442 = vmatmul.mubr.bf16.gmra.mrb[48].mxu1 %v16656_v0 }
 0x3dd   : > { %13178 = vmatprep.mubr.msk.bf16.mxu1 %vm608_vm4, %v16663_v57  ;;  %v5010_v62 = vpop.permute.xlu0 %5009  ;;  %v5075_v23 = vpop.permute.xlu1 %5074 }
 0x3de   : > { %5048 = vst.msk [vmem:[#allocation3 + $0xb0] sm:$0xff] %vm5037_vm9, %v5010_v62  ;;  %v5172_v62 = vmul.bf16 %v16569_v25, %v15725_v55 }
 0x3df   : > { %5123 = vst.msk [vmem:[#allocation3 + $0xa0] sm:$0xff] %vm5102_vm10, %v5075_v23  ;;  %v16690_v39 = vld [vmem:[#allocation3 + $0x88] sm:$0xff] }
 0x3e0   : > { %5124 = vst.msk [vmem:[#allocation3 + $0xa8] sm:$0xff] %vm608_vm4, %v5075_v23  ;;  %v5171_v23 = vmul.bf16 %v16576_v9, %v15725_v55  ;;  %v5558_v48 = vshll.u32 %v5172_v62, 16 }
 0x3e1   : > { %v5012_v29 = vpop.permute.xlu0 %5011  ;;  %v5077_v5 = vpop.permute.xlu1 %5076 }
 0x3e2   : > { %5049 = vst.msk [vmem:[#allocation3 + $0xc0] sm:$0xff] %vm5037_vm9, %v5012_v29  ;;  %v16717_v35 = vld [vmem:[#allocation3 + $0x90] sm:$0xff]  ;;  %v5546_v16 = vshll.u32 %v5171_v23, 16 }
 0x3e3   : > { %5125 = vst.msk [vmem:[#allocation3 + $0xb0] sm:$0xff] %vm5102_vm10, %v5077_v5 }
 0x3e4   : > { %5126 = vst.msk [vmem:[#allocation3 + $0xb8] sm:$0xff] %vm608_vm4, %v5077_v5  ;;  %5450 = vmatmul.mubr.bf16.gmra.mrb[52].mxu1 %v16671_v20 }
 0x3e5   : > { %13179 = vmatprep.mubr.msk.bf16.mxu1 %vm608_vm4, %v16677_v61  ;;  %v5014_v53 = vpop.permute.xlu0 %5013  ;;  %v5079_v43 = vpop.permute.xlu1 %5078 }
 0x3e6   : > { %5050 = vst.msk [vmem:[#allocation3 + $0xd0] sm:$0xff] %vm5037_vm9, %v5014_v53  ;;  %v16701_v53 = vld [vmem:[#allocation3 + $0x80] sm:$0xff] }
 0x3e7   : > { %5127 = vst.msk [vmem:[#allocation3 + $0xc0] sm:$0xff] %vm5102_vm10, %v5079_v43  ;;  %v16722_v13 = vld [vmem:[#allocation3 + $0xa8] sm:$0xff] }
 0x3e8   : > { %5128 = vst.msk [vmem:[#allocation3 + $0xc8] sm:$0xff] %vm608_vm4, %v5079_v43  ;;  %v20696_v43 = vld [vmem:[#allocation32_spill] sm:$0xff] }
 0x3e9   : > { %v5016_v47 = vpop.permute.xlu0 %5015  ;;  %v5081_v8 = vpop.permute.xlu1 %5080 }
 0x3ea   : > { %5051 = vst.msk [vmem:[#allocation3 + $0xe0] sm:$0xff] %vm5037_vm9, %v5016_v47  ;;  %v5174_v47 = vmul.bf16 %v16593_v59, %v20696_v43 }
 0x3eb   : > { %5129 = vst.msk [vmem:[#allocation3 + $0xd0] sm:$0xff] %vm5102_vm10, %v5081_v8 }
 0x3ec   : > { %5130 = vst.msk [vmem:[#allocation3 + $0xd8] sm:$0xff] %vm608_vm4, %v5081_v8  ;;  %5458 = vmatmul.mubr.bf16.gmra.mrb[56].mxu1 %v16684_v33  ;;  %v16710_v8 = vld [vmem:[#allocation3 + $0x98] sm:$0xff]  ;;  %v5571_v6 = vshrl.u32 %v5174_v47, 16 }
 0x3ed   : > { %13180 = vmatprep.mubr.msk.bf16.mxu1 %vm608_vm4, %v16690_v39  ;;  %v5018_v37 = vpop.permute.xlu0 %5017  ;;  %v5083_v63 = vpop.permute.xlu1 %5082  ;;  %20697 = vst [vmem:[#allocation77_spill] sm:$0xff] %v16710_v8 }
 0x3ee   : > { %5052 = vst.msk [vmem:[#allocation3 + $0xf0] sm:$0xff] %vm5037_vm9, %v5018_v37  ;;  %v5555_v37 = vshrl.u32 %v5172_v62, 16  ;;  %v16733_v62 = vld [vmem:[#allocation3 + $0xa0] sm:$0xff] }
 0x3ef   : > { %5131 = vst.msk [vmem:[#allocation3 + $0xe0] sm:$0xff] %vm5102_vm10, %v5083_v63 }
 0x3f0   : > { %5132 = vst.msk [vmem:[#allocation3 + $0xe8] sm:$0xff] %vm608_vm4, %v5083_v63  ;;  %v5543_v63 = vshrl.u32 %v5171_v23, 16  ;;  %v5557_v26 = vrot.slane %v5555_v37, 7  ;;  %v5573_v37 = vrot.slane %v5571_v6, 7  ;;  %v5175_v6 = vmul.bf16 %v16618_v14, %v20698_v1  ;;  %v20700_v23 = vld [vmem:[#allocation34_spill] sm:$0xff] }
 0x3f1   : > { %v5055_v29 = vpop.permute.xlu0 %5054  ;;  %v5085_v5 = vpop.permute.xlu1 %5084 }
 0x3f2   : > { %5103 = vst.msk [vmem:[#allocation3] sm:$0xff] %vm5102_vm10, %v5055_v29  ;;  %5133 = vst.msk [vmem:[#allocation3 + $0xf0] sm:$0xff] %vm5102_vm10, %v5085_v5  ;;  %v5545_v3 = vrot.slane %v5543_v63, 7  ;;  %v5560_v7 = vor.u32 %v5558_v48, %v5557_v26  ;;  %v5178_v48 = vmul.bf16 %v16621_v12, %v20700_v23 }
 0x3f3   : > { %5104 = vst.msk [vmem:[#allocation3 + $0x8] sm:$0xff] %vm608_vm4, %v5055_v29  ;;  %5134 = vst.msk [vmem:[#allocation3 + $0xf8] sm:$0xff] %vm608_vm4, %v5085_v5  ;;  %v5173_v29 = vmul.bf16 %v16595_v38, %v20696_v43  ;;  %v5574_v43 = vshll.u32 %v5174_v47, 16 }
 0x3f4   : > { %5466 = vmatmul.mubr.bf16.gmra.mrb[60].mxu1 %v16701_v53  ;;  %v5548_v60 = vor.u32 %v5546_v16, %v5545_v3  ;;  %v16739_v16 = vld [vmem:[#allocation3 + $0xb8] sm:$0xff] }
 0x3f5   : > { %13181 = vmatprep.mubr.msk.bf16.mxu1 %vm608_vm4, %v16710_v8  ;;  %v5020_v55 = vpop.permute.xlu1 %5019  ;;  %v5563_v19 = vshrl.u32 %v5173_v29, 16  ;;  %v5576_v10 = vor.u32 %v5574_v43, %v5573_v37  ;;  %v5603_v43 = vshrl.u32 %v5178_v48, 16 }
 0x3f6   : > { %5053 = vst.msk [vmem:[#allocation3 + $0x100] sm:$0xff] %vm5037_vm9, %v5020_v55 }
 0x3f9   : > { %v5135_v40 = vld [vmem:[#allocation3] sm:$0x80] }
 0x3fa   : > { %v5136_v5 = vld [vmem:[#allocation3 + $0x8] sm:$0x80]  ;;  %v5169_v55 = vmul.bf16 %v5135_v40, %v20699_v49 }
 0x3fb   : > { %v5170_v44 = vmul.bf16 %v5136_v5, %v20699_v49  ;;  %v16809_v49 = vld [vmem:[#allocation3 + $0xf0] sm:$0xff] }
 0x3fc   : > { %5474 = vmatmul.mubr.bf16.gmra.mrb[64].mxu1 %v16717_v35  ;;  %v5539_v63 = vshrl.u32 %v5169_v55, 16  ;;  %v5177_v55 = vmul.bf16 %v16635_v41, %v20700_v23  ;;  %20701 = vst [vmem:[#allocation78_spill] sm:$0xff] %v16809_v49 }
 0x3fd   : > { %13182 = vmatprep.mubr.msk.bf16.mxu1 %vm608_vm4, %v16722_v13  ;;  %v5551_v36 = vshrl.u32 %v5170_v44, 16  ;;  %v5565_v44 = vrot.slane %v5563_v19, 7  ;;  %v5579_v19 = vshrl.u32 %v5175_v6, 16 }
 0x3fe   : > { %v5541_v18 = vrot.slane %v5539_v63, 7 }
 0x3ff   : > { %v5553_v24 = vrot.slane %v5551_v36, 7  ;;  %v5577_v36 = vsel %vm2338_vm6, %v5557_v26, %v5576_v10  ;;  %v16747_v26 = vld [vmem:[#allocation3 + $0xb0] sm:$0xff]  ;;  %v5581_v63 = vrot.slane %v5579_v19, 7  ;;  %v5179_v19 = vmul.bf16 %v16656_v0, %v15867_v17 }
 0x400   : > { %v5549_v40 = vsel %vm2338_vm6, %v5541_v18, %v5548_v60  ;;  %v5566_v18 = vshll.u32 %v5173_v29, 16  ;;  %v5590_v60 = vshll.u32 %v5176_v30, 16  ;;  %v16753_v30 = vld [vmem:[#allocation3 + $0xc8] sm:$0xff]  ;;  %v5605_v29 = vrot.slane %v5603_v43, 7 }
 0x401   : > { %v5561_v5 = vsel %vm2338_vm6, %v5553_v24, %v5560_v7  ;;  %v5589_v24 = vrot.slane %v5587_v46, 7  ;;  %v5180_v46 = vmul.bf16 %v16642_v56, %v15867_v17  ;;  %v5182_v43 = vmul.bf16 %v16663_v57, %v15899_v32 }
 0x402   : > { %13198 = vmatprep.mubr.msk.bf16.mxu0 %vm608_vm4, %v5561_v5  ;;  %v5568_v7 = vor.u32 %v5566_v18, %v5565_v44  ;;  %v5595_v18 = vshrl.u32 %v5177_v55, 16 }
 0x403   : > { %5953 = vmatmul.mubr.bf16.vlgmr.msra.gmra.mrb[64].mxu0 %v5549_v40  ;;  %v5592_v47 = vor.u32 %v5590_v60, %v5589_v24  ;;  %v5606_v40 = vshll.u32 %v5178_v48, 16  ;;  %v5619_v60 = vshrl.u32 %v5180_v46, 16 }
 0x404   : > { %5482 = vmatmul.mubr.bf16.gmra.mrb[68].mxu1 %v16733_v62  ;;  %13199 = vmatprep.mubr.msk.bf16.mxu0 %vm608_vm4, %v5577_v36  ;;  %v5569_v10 = vsel %vm2338_vm6, %v5545_v3, %v5568_v7  ;;  %v5582_v3 = vshll.u32 %v5175_v6, 16  ;;  %v16767_v6 = vld [vmem:[#allocation3 + $0xd8] sm:$0xff] }
 0x405   : > { %13183 = vmatprep.mubr.msk.bf16.mxu1 %vm608_vm4, %v16739_v16  ;;  %v5593_v5 = vsel %vm2338_vm6, %v5573_v37, %v5592_v47  ;;  %v5608_v7 = vor.u32 %v5606_v40, %v5605_v29  ;;  %v16761_v47 = vld [vmem:[#allocation3 + $0xc0] sm:$0xff]  ;;  %v5621_v48 = vrot.slane %v5619_v60, 7  ;;  %v5184_v60 = vmul.bf16 %v16677_v61, %v15923_v22 }
 0x406   : > { %v5584_v36 = vor.u32 %v5582_v3, %v5581_v63  ;;  %v5622_v3 = vshll.u32 %v5180_v46, 16 }
 0x408   : > { %v5585_v37 = vsel %vm2338_vm6, %v5565_v44, %v5584_v36  ;;  %v5598_v44 = vshll.u32 %v5177_v55, 16  ;;  %v5611_v36 = vshrl.u32 %v5179_v19, 16  ;;  %v5624_v17 = vor.u32 %v5622_v3, %v5621_v48  ;;  %v16781_v55 = vld [vmem:[#allocation3 + $0xe8] sm:$0xff] }
 0x40a   : > { %v5613_v23 = vrot.slane %v5611_v36, 7  ;;  %v5651_v36 = vshrl.u32 %v5184_v60, 16 }
 0x40b   : > { %5961 = vmatmul.mubr.bf16.gmra.mrb[68].mxu0 %v5569_v10  ;;  %v5597_v10 = vrot.slane %v5595_v18, 7  ;;  %v5635_v18 = vshrl.u32 %v5182_v43, 16 }
 0x40c   : > { %5490 = vmatmul.mubr.bf16.gmra.mrb[72].mxu1 %v16747_v26  ;;  %13200 = vmatprep.mubr.msk.bf16.mxu0 %vm608_vm4, %v5593_v5  ;;  %v5609_v5 = vsel %vm2338_vm6, %v5589_v24, %v5608_v7  ;;  %v16775_v7 = vld [vmem:[#allocation3 + $0xd0] sm:$0xff] }
 0x40d   : > { %13184 = vmatprep.mubr.msk.bf16.mxu1 %vm608_vm4, %v16753_v30  ;;  %v5600_v40 = vor.u32 %v5598_v44, %v5597_v10  ;;  %v5637_v46 = vrot.slane %v5635_v18, 7  ;;  %v5638_v44 = vshll.u32 %v5182_v43, 16  ;;  %v5186_v18 = vmul.bf16 %v16690_v39, %v15942_v31 }
 0x40e   : > { %v5653_v43 = vrot.slane %v5651_v36, 7  ;;  %v5205_v36 = vmul.bf16 %v16576_v9, %v16046_v45 }
 0x40f   : > { %v5601_v24 = vsel %vm2338_vm6, %v5581_v63, %v5600_v40  ;;  %v5614_v63 = vshll.u32 %v5179_v19, 16  ;;  %v16795_v19 = vld [vmem:[#allocation3 + $0xf8] sm:$0xff] }
 0x411   : > { %v5616_v3 = vor.u32 %v5614_v63, %v5613_v23  ;;  %v5206_v63 = vmul.bf16 %v16569_v25, %v16046_v45 }
 0x413   : > { %5969 = vmatmul.mubr.bf16.gmra.mrb[72].mxu0 %v5585_v37  ;;  %v5181_v37 = vmul.bf16 %v16671_v20, %v15899_v32  ;;  %v5640_v32 = vor.u32 %v5638_v44, %v5637_v46  ;;  %v5654_v44 = vshll.u32 %v5184_v60, 16  ;;  %v5188_v60 = vmul.bf16 %v16710_v8, %v15960_v21 }
 0x414   : > { %5498 = vmatmul.mubr.bf16.gmra.mrb[76].mxu1 %v16761_v47  ;;  %13201 = vmatprep.mubr.msk.bf16.mxu0 %vm608_vm4, %v5609_v5  ;;  %v5625_v5 = vsel %vm2338_vm6, %v5605_v29, %v5624_v17  ;;  %v5617_v17 = vsel %vm2338_vm6, %v5597_v10, %v5616_v3  ;;  %v16789_v29 = vld [vmem:[#allocation3 + $0xe0] sm:$0xff]  ;;  %v6112_v45 = vshrl.u32 %v5206_v63, 16 }
 0x415   : > { %13185 = vmatprep.mubr.msk.bf16.mxu1 %vm608_vm4, %v16767_v6  ;;  %v5627_v40 = vshrl.u32 %v5181_v37, 16  ;;  %v5630_v10 = vshll.u32 %v5181_v37, 16  ;;  %v5683_v51 = vshrl.u32 %v5188_v60, 16 }
 0x417   : > { %v5629_v1 = vrot.slane %v5627_v40, 7 }
 0x419   : > { %v5632_v3 = vor.u32 %v5630_v10, %v5629_v1 }
 0x41b   : > { %5977 = vmatmul.mubr.bf16.gmra.mrb[76].mxu0 %v5601_v24  ;;  %v5183_v24 = vmul.bf16 %v16684_v33, %v15923_v22  ;;  %v6114_v22 = vshll.u32 %v5206_v63, 16  ;;  %v5633_v37 = vsel %vm2338_vm6, %v5613_v23, %v5632_v3  ;;  %v6102_v23 = vshll.u32 %v5205_v36, 16 }
 0x41c   : > { %5506 = vmatmul.mubr.bf16.gmra.mrb[80].mxu1 %v16775_v7  ;;  %13202 = vmatprep.mubr.msk.bf16.mxu0 %vm608_vm4, %v5625_v5  ;;  %v5641_v5 = vsel %vm2338_vm6, %v5621_v48, %v5640_v32  ;;  %v5208_v32 = vmul.bf16 %v16593_v59, %v16067_v50  ;;  %v5667_v48 = vshrl.u32 %v5186_v18, 16  ;;  %v16822_v3 = vmul.bf16 %v16595_v38, %v16067_v50 }
 0x41d   : > { %13186 = vmatprep.mubr.msk.bf16.mxu1 %vm608_vm4, %v16781_v55  ;;  %v5643_v40 = vshrl.u32 %v5183_v24, 16  ;;  %v6104_v8 = vrot.slane %v6102_v23, 1  ;;  %v5187_v38 = vmul.bf16 %v16717_v35, %v15960_v21  ;;  %v6100_v23 = vshrl.u32 %v5205_v36, 16 }
 0x41e   : > { %v5669_v10 = vrot.slane %v5667_v48, 7  ;;  %v6119_v9 = vshll.u32 %v5208_v32, 16 }
 0x41f   : > { %v5645_v25 = vrot.slane %v5643_v40, 7  ;;  %v5670_v40 = vshll.u32 %v5186_v18, 16 }
 0x423   : > { %5985 = vmatmul.mubr.bf16.gmra.mrb[80].mxu0 %v5617_v17  ;;  %v5656_v17 = vor.u32 %v5654_v44, %v5653_v43  ;;  %v16815_v44 = vld [vmem:[#allocation3 + $0x108] sm:$0xff] }
 0x424   : > { %5514 = vmatmul.mubr.bf16.gmra.mrb[84].mxu1 %v16789_v29  ;;  %13203 = vmatprep.mubr.msk.bf16.mxu0 %vm608_vm4, %v5641_v5  ;;  %v5185_v5 = vmul.bf16 %v16701_v53, %v15942_v31  ;;  %20702 = vst [vmem:[#allocation79_spill] sm:$0xff] %v16815_v44  ;;  %v5646_v31 = vshll.u32 %v5183_v24, 16  ;;  %v6121_v24 = vrot.slane %v6119_v9, 1  ;;  %v5685_v9 = vrot.slane %v5683_v51, 7 }
 0x425   : > { %13187 = vmatprep.mubr.msk.bf16.mxu1 %vm608_vm4, %v16795_v19  ;;  %v5657_v59 = vsel %vm2338_vm6, %v5637_v46, %v5656_v17  ;;  %v16826_v46 = vmul.bf16 %v16606_v54, %v16086_v2 }
 0x426   : > { %v5648_v48 = vor.u32 %v5646_v31, %v5645_v25  ;;  %v5659_v17 = vshrl.u32 %v5185_v5, 16  ;;  %v5190_v31 = vmul.bf16 %v16722_v13, %v15976_v58 }
 0x427   : > { %v6135_v54 = vshll.u32 %v16826_v46, 16 }
 0x428   : > { %v5649_v18 = vsel %vm2338_vm6, %v5629_v1, %v5648_v48  ;;  %v5661_v50 = vrot.slane %v5659_v17, 7  ;;  %v5662_v1 = vshll.u32 %v5185_v5, 16  ;;  %v5686_v48 = vshll.u32 %v5188_v60, 16 }
 0x429   : > { %v6131_v17 = vshrl.u32 %v5208_v32, 16  ;;  %v5699_v51 = vshrl.u32 %v5190_v31, 16 }
 0x42a   : > { %v5688_v21 = vor.u32 %v5686_v48, %v5685_v9 }
 0x42b   : > { %5993 = vmatmul.mubr.bf16.gmra.mrb[84].mxu0 %v5633_v37  ;;  %v6116_v37 = vrot.slane %v6114_v22, 1  ;;  %v16832_v22 = vld [vmem:[#allocation3 + $0x100] sm:$0xff] }
 0x42c   : > { %5522 = vmatmul.mubr.bf16.gmra.mrb[88].mxu1 %v16809_v49  ;;  %13204 = vmatprep.mubr.msk.bf16.mxu0 %vm608_vm4, %v5657_v59  ;;  %v5672_v59 = vor.u32 %v5670_v40, %v5669_v10  ;;  %v6107_v49 = vshll.u32 %v16822_v3, 16  ;;  %20703 = vst [vmem:[#allocation80_spill] sm:$0xff] %v16832_v22 }
 0x42d   : > { %13188 = vmatprep.mubr.msk.bf16.mxu1 %vm608_vm4, %v16815_v44  ;;  %v6117_v44 = vor.u32 %v6116_v37, %v6112_v45  ;;  %v16844_v37 = vmul.bf16 %v16618_v14, %v16086_v2  ;;  %v5189_v14 = vmul.bf16 %v16733_v62, %v15976_v58 }
 0x42e   : > { %v5673_v63 = vsel %vm2338_vm6, %v5653_v43, %v5672_v59  ;;  %v6109_v40 = vrot.slane %v6107_v49, 1  ;;  %v6137_v43 = vrot.slane %v6135_v54, 1  ;;  %v5675_v59 = vshrl.u32 %v5187_v38, 16  ;;  %v20704_v54 = vld [vmem:[#allocation41_spill] sm:$0xff] }
 0x42f   : > { %v6122_v45 = vsel %vm1727_vm5, %v6117_v44, %v6121_v24  ;;  %v5212_v44 = vmul.bf16 %v16621_v12, %v16093_v11  ;;  %v6127_v49 = vshll.u32 %v16844_v37, 16  ;;  %v5689_v12 = vsel %vm2338_vm6, %v5669_v10, %v5688_v21 }
 0x430   : > { %v5677_v60 = vrot.slane %v5675_v59, 7  ;;  %v16867_v21 = vmul.bf16 %v16642_v56, %v16106_v4 }
 0x431   : > { %v6129_v48 = vrot.slane %v6127_v49, 1 }
 0x432   : > { %v6167_v56 = vshll.u32 %v16867_v21, 16 }
 0x433   : > { %6001 = vmatmul.mubr.bf16.gmra.mrb[88].mxu0 %v5649_v18  ;;  %v5664_v18 = vor.u32 %v5662_v1, %v5661_v50  ;;  %v5678_v1 = vshll.u32 %v5187_v38, 16 }
 0x434   : > { %5530 = vmatmul.mubr.bf16.gmra.mrb[92].mxu1 %v16832_v22  ;;  %13205 = vmatprep.mubr.msk.bf16.mxu0 %vm608_vm4, %v5673_v63  ;;  %v6105_v63 = vor.u32 %v6104_v8, %v6100_v23  ;;  %v6133_v22 = vor.u32 %v6131_v17, %v6121_v24  ;;  %v5701_v8 = vrot.slane %v5699_v51, 7  ;;  %v6151_v24 = vshll.u32 %v5212_v44, 16 }
 0x435   : > { %13223 = vmatprep.mubr.msk.bf16.mxu1 %vm608_vm4, %v6122_v45  ;;  %v5665_v36 = vsel %vm2338_vm6, %v5645_v25, %v5664_v18  ;;  %v5192_v45 = vmul.bf16 %v16739_v16, %v20704_v54  ;;  %v16861_v25 = vmul.bf16 %v16635_v41, %v16093_v11  ;;  %v6123_v23 = vshrl.u32 %v16822_v3, 16 }
 0x436   : > { %v6110_v5 = vsel %vm1727_vm5, %v6105_v63, %v6109_v40  ;;  %v6138_v32 = vsel %vm1727_vm5, %v6133_v22, %v6137_v43  ;;  %v5702_v22 = vshll.u32 %v5190_v31, 16  ;;  %v6147_v17 = vshrl.u32 %v16826_v46, 16 }
 0x437   : > { %v5680_v10 = vor.u32 %v5678_v1, %v5677_v60  ;;  %v5691_v18 = vshrl.u32 %v5189_v14, 16  ;;  %v5715_v59 = vshrl.u32 %v5192_v45, 16  ;;  %v6125_v63 = vor.u32 %v6123_v23, %v6109_v40 }
 0x438   : > { %v5704_v51 = vor.u32 %v5702_v22, %v5701_v8  ;;  %v6153_v38 = vrot.slane %v6151_v24, 1  ;;  %v6149_v41 = vor.u32 %v6147_v17, %v6137_v43  ;;  %v6143_v31 = vshll.u32 %v16861_v25, 16 }
 0x439   : > { %v5191_v3 = vmul.bf16 %v16747_v26, %v20704_v54  ;;  %v5681_v46 = vsel %vm2338_vm6, %v5661_v50, %v5680_v10  ;;  %v5693_v49 = vrot.slane %v5691_v18, 7  ;;  %v5717_v43 = vrot.slane %v5715_v59, 7 }
 0x43a   : > { %v5705_v40 = vsel %vm2338_vm6, %v5685_v9, %v5704_v51  ;;  %v5694_v24 = vshll.u32 %v5189_v14, 16  ;;  %v16883_v50 = vmul.bf16 %v16656_v0, %v16106_v4  ;;  %v5718_v1 = vshll.u32 %v5192_v45, 16 }
 0x43b   : > { %6009 = vmatmul.mubr.bf16.gmra.mrb[92].mxu0 %v5665_v36  ;;  %v20705_v36 = vld [vmem:[#allocation42_spill] sm:$0xff]  ;;  %v6139_v22 = vshrl.u32 %v16844_v37, 16  ;;  %v16888_v23 = vmul.bf16 %v16663_v57, %v16124_v34  ;;  %v6145_v17 = vrot.slane %v6143_v31, 1  ;;  %v5707_v10 = vshrl.u32 %v5191_v3, 16  ;;  %v20706_v31 = vld [vmem:[#allocation43_spill] sm:$0xff] }
 0x43c   : > { %6514 = vmatmul.mubr.bf16.vlgmr.msra.gmra.mrb[96].mxu1 %v6110_v5  ;;  %13206 = vmatprep.mubr.msk.bf16.mxu0 %vm608_vm4, %v5689_v12  ;;  %v6130_v5 = vsel %vm1727_vm5, %v6125_v63, %v6129_v48  ;;  %v6154_v12 = vsel %vm1727_vm5, %v6149_v41, %v6153_v38  ;;  %v5696_v9 = vor.u32 %v5694_v24, %v5693_v49  ;;  %v6163_v18 = vshrl.u32 %v5212_v44, 16 }
 0x43d   : > { %13224 = vmatprep.mubr.msk.bf16.mxu1 %vm608_vm4, %v6138_v32  ;;  %v5194_v32 = vmul.bf16 %v16753_v30, %v20705_v36  ;;  %v5720_v51 = vor.u32 %v5718_v1, %v5717_v43  ;;  %v6169_v63 = vrot.slane %v6167_v56, 1  ;;  %v5193_v14 = vmul.bf16 %v16761_v47, %v20705_v36 }
 0x43e   : > { %v6165_v0 = vor.u32 %v6163_v18, %v6153_v38  ;;  %v6159_v45 = vshll.u32 %v16883_v50, 16  ;;  %v5697_v37 = vsel %vm2338_vm6, %v5677_v60, %v5696_v9  ;;  %v5709_v57 = vrot.slane %v5707_v10, 7 }
 0x43f   : > { %v5731_v59 = vshrl.u32 %v5194_v32, 16  ;;  %v5196_v44 = vmul.bf16 %v16767_v6, %v20706_v31  ;;  %v5721_v56 = vsel %vm2338_vm6, %v5701_v8, %v5720_v51  ;;  %v5710_v60 = vshll.u32 %v5191_v3, 16 }
 0x440   : > { %v5734_v38 = vshll.u32 %v5194_v32, 16  ;;  %v6161_v24 = vrot.slane %v6159_v45, 1  ;;  %v5723_v1 = vshrl.u32 %v5193_v14, 16  ;;  %v16906_v9 = vmul.bf16 %v16671_v20, %v16124_v34 }
 0x441   : > { %v5712_v8 = vor.u32 %v5710_v60, %v5709_v57  ;;  %v5218_v18 = vmul.bf16 %v16677_v61, %v16142_v28  ;;  %v5198_v61 = vmul.bf16 %v16781_v55, %v16036_v15 }
 0x443   : > { %6017 = vmatmul.mubr.bf16.gmra.mrb[96].mxu0 %v5681_v46  ;;  %v6183_v46 = vshll.u32 %v16888_v23, 16  ;;  %v5713_v45 = vsel %vm2338_vm6, %v5693_v49, %v5712_v8  ;;  %v5750_v49 = vshll.u32 %v5196_v44, 16 }
 0x444   : > { %6522 = vmatmul.mubr.bf16.gmra.mrb[100].mxu1 %v6130_v5  ;;  %13207 = vmatprep.mubr.msk.bf16.mxu0 %vm608_vm4, %v5705_v40  ;;  %v6141_v5 = vor.u32 %v6139_v22, %v6129_v48  ;;  %v6170_v48 = vsel %vm1727_vm5, %v6165_v0, %v6169_v63  ;;  %v5733_v40 = vrot.slane %v5731_v59, 7  ;;  %v6179_v22 = vshrl.u32 %v16867_v21, 16 }
 0x445   : > { %13225 = vmatprep.mubr.msk.bf16.mxu1 %vm608_vm4, %v6154_v12  ;;  %v6155_v12 = vshrl.u32 %v16861_v25, 16  ;;  %v6185_v10 = vrot.slane %v6183_v46, 1  ;;  %v5747_v59 = vshrl.u32 %v5196_v44, 16  ;;  %v5725_v25 = vrot.slane %v5723_v1, 7 }
 0x446   : > { %v6146_v41 = vsel %vm1727_vm5, %v6141_v5, %v6145_v17  ;;  %v5736_v51 = vor.u32 %v5734_v38, %v5733_v40  ;;  %v6181_v3 = vor.u32 %v6179_v22, %v6169_v63  ;;  %v5726_v0 = vshll.u32 %v5193_v14, 16 }
 0x447   : > { %v6157_v5 = vor.u32 %v6155_v12, %v6145_v17  ;;  %v5195_v21 = vmul.bf16 %v16775_v7, %v20706_v31  ;;  %v5749_v63 = vrot.slane %v5747_v59, 7  ;;  %v6195_v14 = vshrl.u32 %v16888_v23, 16 }
 0x448   : > { %v6186_v20 = vsel %vm1727_vm5, %v6181_v3, %v6185_v10  ;;  %v5737_v17 = vsel %vm2338_vm6, %v5717_v43, %v5736_v51  ;;  %v5728_v46 = vor.u32 %v5726_v0, %v5725_v25  ;;  %v16929_v43 = vmul.bf16 %v16690_v39, %v16170_v27 }
 0x449   : > { %v6162_v32 = vsel %vm1727_vm5, %v6157_v5, %v6161_v24  ;;  %v5739_v38 = vshrl.u32 %v5195_v21, 16  ;;  %v5763_v12 = vshrl.u32 %v5198_v61, 16  ;;  %v5752_v1 = vor.u32 %v5750_v49, %v5749_v63 }
 0x44a   : > { %v5197_v23 = vmul.bf16 %v16789_v29, %v16036_v15  ;;  %v5729_v44 = vsel %vm2338_vm6, %v5709_v57, %v5728_v46  ;;  %v6197_v59 = vor.u32 %v6195_v14, %v6185_v10  ;;  %v5742_v57 = vshll.u32 %v5195_v21, 16  ;;  %v20708_v21 = vld [vmem:[#allocation78_spill] sm:$0xff] }
 0x44b   : > { %6025 = vmatmul.mubr.bf16.gmra.mrb[100].mxu0 %v5697_v37  ;;  %v6175_v37 = vshll.u32 %v16906_v9, 16  ;;  %v5741_v51 = vrot.slane %v5739_v38, 7  ;;  %v5753_v39 = vsel %vm2338_vm6, %v5733_v40, %v5752_v1  ;;  %v5765_v3 = vrot.slane %v5763_v12, 7 }
 0x44c   : > { %6530 = vmatmul.mubr.bf16.gmra.mrb[104].mxu1 %v6146_v41  ;;  %13208 = vmatprep.mubr.msk.bf16.mxu0 %vm608_vm4, %v5721_v56  ;;  %v6199_v41 = vshll.u32 %v5218_v18, 16  ;;  %v16924_v56 = vmul.bf16 %v16684_v33, %v16142_v28  ;;  %v5200_v33 = vmul.bf16 %v16795_v19, %v16039_v42  ;;  %v6211_v10 = vshrl.u32 %v5218_v18, 16 }
 0x44d   : > { %13226 = vmatprep.mubr.msk.bf16.mxu1 %vm608_vm4, %v6170_v48  ;;  %v6171_v48 = vshrl.u32 %v16883_v50, 16  ;;  %v6177_v60 = vrot.slane %v6175_v37, 1  ;;  %v16945_v0 = vmul.bf16 %v16701_v53, %v16170_v27  ;;  %v6187_v40 = vshrl.u32 %v16906_v9, 16 }
 0x44e   : > { %v6201_v22 = vrot.slane %v6199_v41, 1  ;;  %v6191_v5 = vshll.u32 %v16924_v56, 16  ;;  %v20707_v41 = vld [vmem:[#allocation77_spill] sm:$0xff]  ;;  %v5779_v49 = vshrl.u32 %v5200_v33, 16  ;;  %v5199_v18 = vmul.bf16 %v20708_v21, %v16039_v42 }
 0x44f   : > { %v6173_v8 = vor.u32 %v6171_v48, %v6161_v24  ;;  %v5222_v14 = vmul.bf16 %v20707_v41, %v16188_v52  ;;  %v6189_v38 = vor.u32 %v6187_v40, %v6177_v60  ;;  %v6207_v9 = vshll.u32 %v16945_v0, 16 }
 0x450   : > { %v6202_v24 = vsel %vm1727_vm5, %v6197_v59, %v6201_v22  ;;  %v6193_v37 = vrot.slane %v6191_v5, 1  ;;  %v6213_v12 = vor.u32 %v6211_v10, %v6201_v22  ;;  %v5781_v59 = vrot.slane %v5779_v49, 7  ;;  %v20709_v5 = vld [vmem:[#allocation46_spill] sm:$0xff] }
 0x451   : > { %v6178_v50 = vsel %vm1727_vm5, %v6173_v8, %v6177_v60  ;;  %v5758_v60 = vshll.u32 %v5197_v23, 16  ;;  %v5782_v22 = vshll.u32 %v5200_v33, 16  ;;  %v5771_v10 = vshrl.u32 %v5199_v18, 16 }
 0x453   : > { %6033 = vmatmul.mubr.bf16.gmra.mrb[104].mxu0 %v5713_v45  ;;  %v5766_v45 = vshll.u32 %v5198_v61, 16  ;;  %v6194_v61 = vsel %vm1727_vm5, %v6189_v38, %v6193_v37 }
 0x454   : > { %6538 = vmatmul.mubr.bf16.gmra.mrb[108].mxu1 %v6162_v32  ;;  %13209 = vmatprep.mubr.msk.bf16.mxu0 %vm608_vm4, %v5737_v17  ;;  %v6215_v32 = vshll.u32 %v16929_v43, 16  ;;  %v5755_v17 = vshrl.u32 %v5197_v23, 16 }
 0x455   : > { %13227 = vmatprep.mubr.msk.bf16.mxu1 %vm608_vm4, %v6186_v20  ;;  %v5744_v20 = vor.u32 %v5742_v57, %v5741_v51  ;;  %v5768_v46 = vor.u32 %v5766_v45, %v5765_v3  ;;  %v6209_v57 = vrot.slane %v6207_v9, 1  ;;  %v6227_v45 = vshrl.u32 %v16929_v43, 16 }
 0x456   : > { %v6217_v48 = vrot.slane %v6215_v32, 1  ;;  %v5757_v1 = vrot.slane %v5755_v17, 7  ;;  %v5784_v17 = vor.u32 %v5782_v22, %v5781_v59 }
 0x457   : > { %v5745_v53 = vsel %vm2338_vm6, %v5725_v25, %v5744_v20  ;;  %v5769_v8 = vsel %vm2338_vm6, %v5749_v63, %v5768_v46  ;;  %v5221_v25 = vmul.bf16 %v16717_v35, %v16188_v52  ;;  %v6203_v63 = vshrl.u32 %v16924_v56, 16  ;;  %v20711_v20 = vld [vmem:[#allocation55_spill] sm:$0xff]  ;;  %v20712_v35 = vld [vmem:[#allocation80_spill] sm:$0xff] }
 0x458   : > { %v5760_v32 = vor.u32 %v5758_v60, %v5757_v1  ;;  %v5224_v40 = vmul.bf16 %v16722_v13, %v20711_v20  ;;  %v5201_v33 = vmul.bf16 %v20712_v35, %v20709_v5  ;;  %v6229_v46 = vor.u32 %v6227_v45, %v6217_v48 }
 0x459   : > { %v6205_v23 = vor.u32 %v6203_v63, %v6193_v37  ;;  %v5773_v56 = vrot.slane %v5771_v10, 7  ;;  %v5785_v43 = vsel %vm2338_vm6, %v5765_v3, %v5784_v17  ;;  %v5774_v37 = vshll.u32 %v5199_v18, 16  ;;  %v20713_v3 = vld [vmem:[#allocation56_spill] sm:$0xff] }
 0x45a   : > { %v5761_v38 = vsel %vm2338_vm6, %v5741_v51, %v5760_v32  ;;  %v6243_v60 = vshrl.u32 %v5222_v14, 16  ;;  %v5226_v22 = vmul.bf16 %v16739_v16, %v20713_v3  ;;  %v5790_v16 = vshll.u32 %v5201_v33, 16 }
 0x45b   : > { %6041 = vmatmul.mubr.bf16.gmra.mrb[108].mxu0 %v5729_v44  ;;  %v6218_v44 = vsel %vm1727_vm5, %v6213_v12, %v6217_v48  ;;  %v6210_v12 = vsel %vm1727_vm5, %v6205_v23, %v6209_v57  ;;  %v5223_v48 = vmul.bf16 %v16733_v62, %v20711_v20  ;;  %v5776_v9 = vor.u32 %v5774_v37, %v5773_v56 }
 0x45c   : > { %6546 = vmatmul.mubr.bf16.gmra.mrb[112].mxu1 %v6178_v50  ;;  %13210 = vmatprep.mubr.msk.bf16.mxu0 %vm608_vm4, %v5753_v39  ;;  %v6231_v50 = vshll.u32 %v5222_v14, 16  ;;  %v20710_v39 = vld [vmem:[#allocation79_spill] sm:$0xff] }
 0x45d   : > { %13228 = vmatprep.mubr.msk.bf16.mxu1 %vm608_vm4, %v6202_v24  ;;  %v5202_v24 = vmul.bf16 %v20710_v39, %v20709_v5  ;;  %v5777_v18 = vsel %vm2338_vm6, %v5757_v1, %v5776_v9  ;;  %v6275_v9 = vshrl.u32 %v5226_v22, 16 }
 0x45e   : > { %v6233_v41 = vrot.slane %v6231_v50, 1  ;;  %v5787_v50 = vshrl.u32 %v5201_v33, 16 }
 0x45f   : > { %v5795_v49 = vshrl.u32 %v5202_v24, 16  ;;  %v5798_v32 = vshll.u32 %v5202_v24, 16  ;;  %v5225_v24 = vmul.bf16 %v16747_v26, %v20713_v3 }
 0x460   : > { %v6234_v13 = vsel %vm1727_vm5, %v6229_v46, %v6233_v41  ;;  %v6245_v17 = vor.u32 %v6243_v60, %v6233_v41  ;;  %v5789_v62 = vrot.slane %v5787_v50, 7  ;;  %v6263_v46 = vshll.u32 %v5226_v22, 16 }
 0x461   : > { %v5797_v51 = vrot.slane %v5795_v49, 7  ;;  %v6239_v49 = vshll.u32 %v5223_v48, 16 }
 0x462   : > { %v5792_v1 = vor.u32 %v5790_v16, %v5789_v62 }
 0x463   : > { %6049 = vmatmul.mubr.bf16.gmra.mrb[112].mxu0 %v5745_v53  ;;  %v6223_v53 = vshll.u32 %v5221_v25, 16  ;;  %v5800_v45 = vor.u32 %v5798_v32, %v5797_v51  ;;  %v6241_v41 = vrot.slane %v6239_v49, 1  ;;  %v6255_v51 = vshll.u32 %v5225_v24, 16 }
 0x464   : > { %6554 = vmatmul.mubr.bf16.gmra.mrb[116].mxu1 %v6194_v61  ;;  %13211 = vmatprep.mubr.msk.bf16.mxu0 %vm608_vm4, %v5769_v8  ;;  %v6247_v61 = vshll.u32 %v5224_v40, 16  ;;  %v6219_v8 = vshrl.u32 %v16945_v0, 16 }
 0x465   : > { %13229 = vmatprep.mubr.msk.bf16.mxu1 %vm608_vm4, %v6218_v44  ;;  %v6225_v44 = vrot.slane %v6223_v53, 1  ;;  %v5801_v0 = vsel %vm2338_vm6, %v5781_v59, %v5800_v45  ;;  %v6265_v59 = vrot.slane %v6263_v46, 1 }
 0x466   : > { %v6249_v63 = vrot.slane %v6247_v61, 1  ;;  %v6221_v10 = vor.u32 %v6219_v8, %v6209_v57  ;;  %v6235_v57 = vshrl.u32 %v5221_v25, 16  ;;  %v5793_v61 = vsel %vm2338_vm6, %v5773_v56, %v5792_v1  ;;  %v20715_v8 = vld [vmem:[#allocation58_spill] sm:$0xff] }
 0x467   : > { %v6277_v60 = vor.u32 %v6275_v9, %v6265_v59 }
 0x468   : > { %v6226_v23 = vsel %vm1727_vm5, %v6221_v10, %v6225_v44  ;;  %v6250_v14 = vsel %vm1727_vm5, %v6245_v17, %v6249_v63 }
 0x46b   : > { %6057 = vmatmul.mubr.bf16.gmra.mrb[116].mxu0 %v5761_v38  ;;  %v6259_v38 = vshrl.u32 %v5224_v40, 16  ;;  %v6251_v40 = vshrl.u32 %v5223_v48, 16  ;;  %v6267_v48 = vshrl.u32 %v5225_v24, 16 }
 0x46c   : > { %6562 = vmatmul.mubr.bf16.gmra.mrb[120].mxu1 %v6210_v12  ;;  %13212 = vmatprep.mubr.msk.bf16.mxu0 %vm608_vm4, %v5785_v43  ;;  %v20714_v12 = vld [vmem:[#allocation57_spill] sm:$0xff]  ;;  %v6237_v43 = vor.u32 %v6235_v57, %v6225_v44  ;;  %v5230_v44 = vmul.bf16 %v16767_v6, %v20715_v8 }
 0x46d   : > { %13230 = vmatprep.mubr.msk.bf16.mxu1 %vm608_vm4, %v6234_v13  ;;  %v5228_v53 = vmul.bf16 %v16753_v30, %v20714_v12  ;;  %v6261_v13 = vor.u32 %v6259_v38, %v6249_v63  ;;  %v5227_v25 = vmul.bf16 %v16761_v47, %v20714_v12  ;;  %v6257_v30 = vrot.slane %v6255_v51, 1  ;;  %v20717_v38 = vld [vmem:[#allocation61_spill] sm:$0xff] }
 0x46e   : > { %v6242_v37 = vsel %vm1727_vm5, %v6237_v43, %v6241_v41  ;;  %v6253_v50 = vor.u32 %v6251_v40, %v6241_v41  ;;  %v6295_v45 = vshll.u32 %v5230_v44, 16  ;;  %v5229_v47 = vmul.bf16 %v16775_v7, %v20715_v8 }
 0x46f   : > { %v6266_v33 = vsel %vm1727_vm5, %v6261_v13, %v6265_v59  ;;  %v6279_v26 = vshll.u32 %v5228_v53, 16  ;;  %v6271_v63 = vshll.u32 %v5227_v25, 16  ;;  %v6291_v17 = vshrl.u32 %v5228_v53, 16 }
 0x470   : > { %v6258_v32 = vsel %vm1727_vm5, %v6253_v50, %v6257_v30  ;;  %v6269_v62 = vor.u32 %v6267_v48, %v6257_v30  ;;  %v6283_v57 = vshrl.u32 %v5227_v25, 16  ;;  %v6307_v41 = vshrl.u32 %v5230_v44, 16 }
 0x471   : > { %v6281_v56 = vrot.slane %v6279_v26, 1  ;;  %v6273_v22 = vrot.slane %v6271_v63, 1  ;;  %v5234_v53 = vmul.bf16 %v16795_v19, %v20717_v38  ;;  %v5233_v25 = vmul.bf16 %v20708_v21, %v20717_v38 }
 0x472   : > { %v6299_v19 = vshrl.u32 %v5229_v47, 16 }
 0x473   : > { %6065 = vmatmul.mubr.bf16.gmra.mrb[120].mxu0 %v5777_v18  ;;  %v6282_v10 = vsel %vm1727_vm5, %v6277_v60, %v6281_v56  ;;  %v20716_v18 = vld [vmem:[#allocation59_spill] sm:$0xff]  ;;  %v6293_v49 = vor.u32 %v6291_v17, %v6281_v56 }
 0x474   : > { %6570 = vmatmul.mubr.bf16.gmra.mrb[124].mxu1 %v6226_v23  ;;  %13213 = vmatprep.mubr.msk.bf16.mxu0 %vm608_vm4, %v5801_v0  ;;  %v5232_v6 = vmul.bf16 %v16781_v55, %v20716_v18  ;;  %v6297_v23 = vrot.slane %v6295_v45, 1  ;;  %v6274_v0 = vsel %vm1727_vm5, %v6269_v62, %v6273_v22  ;;  %v5231_v7 = vmul.bf16 %v16789_v29, %v20716_v18 }
 0x475   : > { %13231 = vmatprep.mubr.msk.bf16.mxu1 %vm608_vm4, %v6250_v14  ;;  %v6287_v14 = vshll.u32 %v5229_v47, 16  ;;  %v6327_v29 = vshll.u32 %v5234_v53, 16  ;;  %v6339_v47 = vshrl.u32 %v5234_v53, 16  ;;  %v14554_v53 = vld [vmem:[%s20411_s11] sm:$0xff]  }
 0x476   : > { %v6298_v46 = vsel %vm1727_vm5, %v6293_v49, %v6297_v23  ;;  %v6311_v16 = vshll.u32 %v5232_v6, 16  ;;  %v6323_v9 = vshrl.u32 %v5232_v6, 16  ;;  %v6315_v62 = vshrl.u32 %v5231_v7, 16  ;;  %14044 = vmatprep.subr.bf16.mxu0 %v14554_v53 }
 0x477   : > { %v6289_v55 = vrot.slane %v6287_v14, 1  ;;  %v6329_v56 = vrot.slane %v6327_v29, 1  ;;  %14045 = vmatpush3.bf16.msra.mxu0 %v14554_v53 }
 0x478   : > { %v6313_v43 = vrot.slane %v6311_v16, 1 }
 0x479   : > { %v6301_v60 = vor.u32 %v6299_v19, %v6289_v55  ;;  %v6341_v14 = vor.u32 %v6339_v47, %v6329_v56 }
 0x47a   : > { %v6325_v45 = vor.u32 %v6323_v9, %v6313_v43 }
 0x47b   : > { %6073 = vmatmul.mubr.bf16.gmra.mrb[124].mxu0 %v5793_v61  ;;  %v6285_v61 = vor.u32 %v6283_v57, %v6273_v22  ;;  %v6319_v22 = vshll.u32 %v5233_v25, 16 }
 0x47c   : > { %6578 = vmatmul.mubr.bf16.gmra.mrb[128].mxu1 %v6242_v37  ;;  %v6309_v37 = vor.u32 %v6307_v41, %v6297_v23  ;;  %v6330_v21 = vsel %vm1727_vm5, %v6325_v45, %v6329_v56 }
 0x47d   : > { %13232 = vmatprep.mubr.msk.bf16.mxu1 %vm608_vm4, %v6266_v33  ;;  %v6290_v51 = vsel %vm1727_vm5, %v6285_v61, %v6289_v55  ;;  %v6303_v33 = vshll.u32 %v5231_v7, 16  ;;  %v6321_v49 = vrot.slane %v6319_v22, 1  ;;  %v20719_v55 = vld [vmem:[#allocation60_spill] sm:$0xff] }
 0x47e   : > { %v6314_v26 = vsel %vm1727_vm5, %v6309_v37, %v6313_v43  ;;  %v5203_v37 = vld [vmem:[#allocation3 + $0x110] sm:$0x1] }
 0x47f   : > { %v6305_v30 = vrot.slane %v6303_v33, 1  ;;  %v6331_v33 = vshrl.u32 %v5233_v25, 16 }
 0x481   : > { %v6306_v48 = vsel %vm1727_vm5, %v6301_v60, %v6305_v30  ;;  %v6317_v16 = vor.u32 %v6315_v62, %v6305_v30  ;;  %v6333_v9 = vor.u32 %v6331_v33, %v6321_v49 }
 0x484   : > { %6586 = vmatmul.mubr.bf16.gmra.mrb[132].mxu1 %v6258_v32  ;;  %v20718_v32 = vld [vmem:[#allocation62_spill] sm:$0xff] }
 0x485   : > { %13233 = vmatprep.mubr.msk.bf16.mxu1 %vm608_vm4, %v6282_v10  ;;  %v5236_v63 = vmul.bf16 %v20710_v39, %v20718_v32  ;;  %v5235_v6 = vmul.bf16 %v20712_v35, %v20718_v32  ;;  %v5204_v39 = vld [vmem:[#allocation3 + $0x118] sm:$0x1]  ;;  %v6322_v35 = vsel %vm1727_vm5, %v6317_v16, %v6321_v49 }
 0x486   : > { %v5238_v41 = vmul.bf16 %v5204_v39, %v20719_v55  ;;  %v14555_v49 = vld [vmem:[%s20411_s11 + $0x8] sm:$0xff]  }
 0x487   : > { %v6343_v17 = vshll.u32 %v5236_v63, 16  ;;  %v6335_v43 = vshll.u32 %v5235_v6, 16  ;;  %v6347_v45 = vshrl.u32 %v5235_v6, 16  ;;  %14046 = vmatprep.subr.bf16.mxu0 %v14555_v49 }
 0x488   : > { %v6359_v61 = vshll.u32 %v5238_v41, 16  ;;  %14047 = vmatpush3.bf16.msra.mxu0 %v14555_v49 }
 0x489   : > { %v6345_v57 = vrot.slane %v6343_v17, 1 }
 0x48a   : > { %v6361_v60 = vrot.slane %v6359_v61, 1 }
 0x48b   : > { %v6346_v7 = vsel %vm1727_vm5, %v6341_v14, %v6345_v57 }
 0x48c   : > { %6594 = vmatmul.mubr.bf16.gmra.mrb[136].mxu1 %v6274_v0  ;;  %v17008_v1 = vpop.f32.mrb[32].mxu1 }
 0x48d   : > { %13234 = vmatprep.mubr.msk.bf16.mxu1 %vm608_vm4, %v6298_v46  ;;  %v5413_v24 = vpop.f32.mrb[33].mxu1 }
 0x48e   : > { %v17014_v59 = vpop.f32.mrb[34].mxu1 }
 0x48f   : > { %v5416_v13 = vpop.f32.mrb[35].mxu1 }
 0x490   : > { %v6355_v13 = vshrl.u32 %v5236_v63, 16 }
 0x492   : > { %v6357_v19 = vor.u32 %v6355_v13, %v6345_v57 }
 0x494   : > { %6602 = vmatmul.mubr.bf16.gmra.mrb[140].mxu1 %v6290_v51  ;;  %v6362_v63 = vsel %vm1727_vm5, %v6357_v19, %v6361_v60  ;;  %v14557_v19 = vld [vmem:[%s20411_s11 + $0x18] sm:$0xff]  }
 0x495   : > { %13235 = vmatprep.mubr.msk.bf16.mxu1 %vm608_vm4, %v6314_v26  ;;  %v6337_v26 = vrot.slane %v6335_v43, 1 }
 0x497   : > { %v17021_v40 = vpop.f32.mrb[36].mxu1  ;;  %v6349_v22 = vor.u32 %v6347_v45, %v6337_v26 }
 0x498   : > { %v5421_v44 = vpop.f32.mrb[37].mxu1 }
 0x499   : > { %v17023_v50 = vpop.f32.mrb[38].mxu1  ;;  %v5237_v44 = vmul.bf16 %v5203_v37, %v20719_v55 }
 0x49a   : > { %v5424_v10 = vpop.f32.mrb[39].mxu1 }
 0x49b   : > { %v6338_v10 = vsel %vm1727_vm5, %v6333_v9, %v6337_v26 }
 0x49c   : > { %6610 = vmatmul.mubr.bf16.gmra.mrb[144].mxu1 %v6306_v48  ;;  %v6351_v48 = vshll.u32 %v5237_v44, 16 }
 0x49d   : > { %13236 = vmatprep.mubr.msk.bf16.mxu1 %vm608_vm4, %v6330_v21 }
 0x49e   : > { %v6353_v17 = vrot.slane %v6351_v48, 1 }
 0x49f   : > { %v17032_v23 = vpop.f32.mrb[40].mxu1 }
 0x4a0   : > { %v5429_v0 = vpop.f32.mrb[41].mxu1  ;;  %v6354_v39 = vsel %vm1727_vm5, %v6349_v22, %v6353_v17 }
 0x4a1   : > { %v17034_v46 = vpop.f32.mrb[42].mxu1 }
 0x4a2   : > { %v5432_v24 = vpop.f32.mrb[43].mxu1 }
 0x4a4   : > { %6618 = vmatmul.mubr.bf16.gmra.mrb[148].mxu1 %v6322_v35  ;;  %v14556_v35 = vld [vmem:[%s20411_s11 + $0x10] sm:$0xff]  }
 0x4a5   : > { %13237 = vmatprep.mubr.msk.bf16.mxu1 %vm608_vm4, %v6346_v7  ;;  %14048 = vmatprep.subr.bf16.mxu0 %v14556_v35 }
 0x4a6   : > { %14049 = vmatpush3.bf16.msra.mxu0 %v14556_v35 }
 0x4a7   : > { %v17043_v51 = vpop.f32.mrb[44].mxu1  ;;  %14050 = vmatprep.subr.bf16.mxu0 %v14557_v19 }
 0x4a8   : > { %v5437_v29 = vpop.f32.mrb[45].mxu1 }
 0x4a9   : > { %v17045_v30 = vpop.f32.mrb[46].mxu1 }
 0x4aa   : > { %v5440_v56 = vpop.f32.mrb[47].mxu1  ;;  %14051 = vmatpush3.bf16.msra.mxu0 %v14557_v19 }
 0x4ac   : > { %6626 = vmatmul.mubr.bf16.gmra.mrb[152].mxu1 %v6338_v10 }
 0x4ad   : > { %13238 = vmatprep.mubr.msk.bf16.mxu1 %vm608_vm4, %v6362_v63 }
 0x4af   : > { %v17051_v25 = vpop.f32.mrb[48].mxu1 }
 0x4b0   : > { %v5445_v21 = vpop.f32.mrb[49].mxu1 }
 0x4b1   : > { %v17053_v47 = vpop.f32.mrb[50].mxu1 }
 0x4b2   : > { %v5448_v62 = vpop.f32.mrb[51].mxu1 }
 0x4b4   : > { %6634 = vmatmul.mubr.bf16.gmra.mrb[156].mxu1 %v6354_v39 }
 0x4b7   : > { %v17059_v0 = vpop.f32.mrb[52].mxu1 }
 0x4b8   : > { %v5453_v6 = vpop.f32.mrb[53].mxu1 }
 0x4b9   : > { %v17061_v14 = vpop.f32.mrb[54].mxu1 }
 0x4ba   : > { %v5456_v16 = vpop.f32.mrb[55].mxu1 }
 0x4bf   : > { %v17063_v24 = vpop.f32.mrb[56].mxu1 }
 0x4c0   : > { %v5461_v57 = vpop.f32.mrb[57].mxu1 }
 0x4c1   : > { %v17065_v41 = vpop.f32.mrb[58].mxu1 }
 0x4c2   : > { %v5464_v53 = vpop.f32.mrb[59].mxu1 }
 0x4c7   : > { %v17070_v43 = vpop.f32.mrb[60].mxu1 }
 0x4c8   : > { %v5469_v7 = vpop.f32.mrb[61].mxu1 }
 0x4c9   : > { %v17072_v13 = vpop.f32.mrb[62].mxu1 }
 0x4ca   : > { %v5472_v61 = vpop.f32.mrb[63].mxu1 }
 0x4cf   : > { %v17074_v37 = vpop.f32.mrb[64].mxu1 }
 0x4d0   : > { %v5477_v33 = vpop.f32.mrb[65].mxu1 }
 0x4d1   : > { %v17076_v26 = vpop.f32.mrb[66].mxu1 }
 0x4d2   : > { %v5480_v29 = vpop.f32.mrb[67].mxu1 }
 0x4d6   : > { %v5954_v9 = vpop.f32.mrb[64].mxu0 }
 0x4d7   : > { %v17081_v44 = vpop.f32.mrb[68].mxu1  ;;  %v5956_v56 = vpop.f32.mrb[65].mxu0  ;;  %v17084_v10 = vadd.f32 %v5954_v9, %v17008_v1  ;;  %v14558_v1 = vld [vmem:[%s20411_s11 + $0x20] sm:$0xff]  }
 0x4d8   : > { %v5485_v60 = vpop.f32.mrb[69].mxu1  ;;  %v5957_v63 = vpop.f32.mrb[66].mxu0  ;;  %14052 = vmatprep.subr.bf16.mxu0 %v14558_v1 }
 0x4d9   : > { %v17086_v45 = vpop.f32.mrb[70].mxu1  ;;  %v5959_v48 = vpop.f32.mrb[67].mxu0  ;;  %v17089_v21 = vadd.f32 %v5957_v63, %v17014_v59  ;;  %14053 = vmatpush3.bf16.msra.mxu0 %v14558_v1 }
 0x4da   : > { %v5488_v22 = vpop.f32.mrb[71].mxu1 }
 0x4de   : > { %v5962_v17 = vpop.f32.mrb[68].mxu0 }
 0x4df   : > { %v17091_v62 = vpop.f32.mrb[72].mxu1  ;;  %v5964_v49 = vpop.f32.mrb[69].mxu0  ;;  %v17094_v6 = vadd.f32 %v5962_v17, %v17021_v40 }
 0x4e0   : > { %v5493_v39 = vpop.f32.mrb[73].mxu1  ;;  %v5965_v16 = vpop.f32.mrb[70].mxu0 }
 0x4e1   : > { %v17099_v57 = vpop.f32.mrb[74].mxu1  ;;  %v5967_v53 = vpop.f32.mrb[71].mxu0  ;;  %v17102_v59 = vadd.f32 %v5965_v16, %v17023_v50 }
 0x4e2   : > { %v5496_v35 = vpop.f32.mrb[75].mxu1 }
 0x4e6   : > { %v5970_v7 = vpop.f32.mrb[72].mxu0 }
 0x4e7   : > { %v17104_v61 = vpop.f32.mrb[76].mxu1  ;;  %v5972_v33 = vpop.f32.mrb[73].mxu0  ;;  %v17107_v29 = vadd.f32 %v5970_v7, %v17032_v23  ;;  %v14559_v23 = vld [vmem:[%s20411_s11 + $0x28] sm:$0xff]  }
 0x4e8   : > { %v5501_v40 = vpop.f32.mrb[77].mxu1  ;;  %v5973_v19 = vpop.f32.mrb[74].mxu0  ;;  %14054 = vmatprep.subr.bf16.mxu0 %v14559_v23 }
 0x4e9   : > { %v17109_v9 = vpop.f32.mrb[78].mxu1  ;;  %v5975_v56 = vpop.f32.mrb[75].mxu0  ;;  %v17112_v63 = vadd.f32 %v5973_v19, %v17034_v46  ;;  %14055 = vmatpush3.bf16.msra.mxu0 %v14559_v23 }
 0x4ea   : > { %v5504_v60 = vpop.f32.mrb[79].mxu1 }
 0x4ee   : > { %v5978_v50 = vpop.f32.mrb[76].mxu0 }
 0x4ef   : > { %v17114_v48 = vpop.f32.mrb[80].mxu1  ;;  %v5980_v22 = vpop.f32.mrb[77].mxu0  ;;  %v17117_v49 = vadd.f32 %v5978_v50, %v17043_v51 }
 0x4f0   : > { %v5509_v17 = vpop.f32.mrb[81].mxu1  ;;  %v5981_v39 = vpop.f32.mrb[78].mxu0 }
 0x4f1   : > { %v17122_v1 = vpop.f32.mrb[82].mxu1  ;;  %v5983_v16 = vpop.f32.mrb[79].mxu0  ;;  %v17125_v46 = vadd.f32 %v5981_v39, %v17045_v30 }
 0x4f2   : > { %v5512_v53 = vpop.f32.mrb[83].mxu1 }
 0x4f6   : > { %v5986_v35 = vpop.f32.mrb[80].mxu0 }
 0x4f7   : > { %v17127_v7 = vpop.f32.mrb[84].mxu1  ;;  %v5988_v33 = vpop.f32.mrb[81].mxu0  ;;  %v17130_v40 = vadd.f32 %v5986_v35, %v17051_v25  ;;  %v14560_v25 = vld [vmem:[%s20411_s11 + $0x30] sm:$0xff]  }
 0x4f8   : > { %v5517_v51 = vpop.f32.mrb[85].mxu1  ;;  %v5989_v19 = vpop.f32.mrb[82].mxu0  ;;  %14056 = vmatprep.subr.bf16.mxu0 %v14560_v25 }
 0x4f9   : > { %v17132_v56 = vpop.f32.mrb[86].mxu1  ;;  %v5991_v60 = vpop.f32.mrb[83].mxu0  ;;  %v17135_v22 = vadd.f32 %v5989_v19, %v17053_v47  ;;  %14057 = vmatpush3.bf16.msra.mxu0 %v14560_v25  ;;  %v17163_v25 = vld [vmem:[%s20410_s10] ss:$0 sm:$0xff] }
 0x4fa   : > { %v5520_v50 = vpop.f32.mrb[87].mxu1 }
 0x4fe   : > { %v5994_v30 = vpop.f32.mrb[84].mxu0 }
 0x4ff   : > { %v17137_v17 = vpop.f32.mrb[88].mxu1  ;;  %v5996_v23 = vpop.f32.mrb[85].mxu0  ;;  %v17140_v16 = vadd.f32 %v5994_v30, %v17059_v0 }
 0x500   : > { %v5525_v39 = vpop.f32.mrb[89].mxu1  ;;  %v5997_v53 = vpop.f32.mrb[86].mxu0 }
 0x501   : > { %v17145_v35 = vpop.f32.mrb[90].mxu1  ;;  %v5999_v33 = vpop.f32.mrb[87].mxu0  ;;  %v17148_v47 = vadd.f32 %v5997_v53, %v17061_v14 }
 0x502   : > { %v5528_v51 = vpop.f32.mrb[91].mxu1 }
 0x506   : > { %v6002_v19 = vpop.f32.mrb[88].mxu0 }
 0x507   : > { %v17150_v60 = vpop.f32.mrb[92].mxu1  ;;  %v6004_v50 = vpop.f32.mrb[89].mxu0  ;;  %v17153_v30 = vadd.f32 %v6002_v19, %v17063_v24 }
 0x508   : > { %v5533_v0 = vpop.f32.mrb[93].mxu1  ;;  %v6005_v23 = vpop.f32.mrb[90].mxu0 }
 0x509   : > { %v17155_v39 = vpop.f32.mrb[94].mxu1  ;;  %v6007_v5 = vpop.f32.mrb[91].mxu0  ;;  %v17158_v33 = vadd.f32 %v6005_v23, %v17065_v41 }
 0x50a   : > { %v5536_v42 = vpop.f32.mrb[95].mxu1 }
 0x50b   : > { %v14561_v42 = vld [vmem:[%s20411_s11 + $0x38] sm:$0xff]  }
 0x50c   : > { %14058 = vmatprep.subr.bf16.mxu0 %v14561_v42 }
 0x50d   : > { %14059 = vmatpush3.bf16.msra.mxu0 %v14561_v42 }
 0x50e   : > { %v6010_v14 = vpop.f32.mrb[92].mxu0 }
 0x50f   : > { %v6515_v53 = vpop.f32.mrb[96].mxu1  ;;  %v6012_v51 = vpop.f32.mrb[93].mxu0  ;;  %v17167_v19 = vadd.f32 %v6010_v14, %v17070_v43 }
 0x510   : > { %v6642_v50 = vadd.f32 %v6515_v53, %v17084_v10  ;;  %v6517_v24 = vpop.f32.mrb[97].mxu1  ;;  %v6013_v5 = vpop.f32.mrb[94].mxu0  ;;  %v17178_v10 = vld [vmem:[#allocation4] sm:$0xff] }
 0x511   : > { %v6518_v41 = vpop.f32.mrb[98].mxu1  ;;  %v6015_v0 = vpop.f32.mrb[95].mxu0  ;;  %v17175_v51 = vadd.f32 %v6013_v5, %v17072_v13  ;;  %7683 = vmatprep.subr.bf16.mxu0 %v17178_v10 }
 0x512   : > { %v6681_v23 = vadd.f32 %v17163_v25, %v6642_v50  ;;  %v6643_v32 = vadd.f32 %v6518_v41, %v17089_v21  ;;  %v6520_v55 = vpop.f32.mrb[99].mxu1 }
 0x514   : > { %v6682_v43 = vadd.f32 %v17163_v25, %v6643_v32  ;;  %v6713_v14 = vmax.f32 %v6681_v23, 0.0 }
 0x516   : > { %v6714_v53 = vmax.f32 %v6682_v43, 0.0  ;;  %v6018_v24 = vpop.f32.mrb[96].mxu0 }
 0x517   : > { %v6523_v0 = vpop.f32.mrb[100].mxu1  ;;  %v6020_v50 = vpop.f32.mrb[97].mxu0  ;;  %v17183_v13 = vadd.f32 %v6018_v24, %v17074_v37  ;;  %v20720_v37 = vld [vmem:[#allocation15_spill] sm:$0xff] }
 0x518   : > { %v6745_v15 = vpack.c.bf16 %v6714_v53, %v6713_v14  ;;  %v6644_v21 = vadd.f32 %v6523_v0, %v17094_v6  ;;  %v6525_v55 = vpop.f32.mrb[101].mxu1  ;;  %v6021_v5 = vpop.f32.mrb[98].mxu0 }
 0x519   : > { %v6526_v42 = vpop.f32.mrb[102].mxu1  ;;  %v6023_v41 = vpop.f32.mrb[99].mxu0  ;;  %v17189_v43 = vadd.f32 %v6021_v5, %v17076_v26 }
 0x51a   : > { %v6683_v32 = vadd.f32 %v17163_v25, %v6644_v21  ;;  %v6645_v38 = vadd.f32 %v6526_v42, %v17102_v59  ;;  %6825 = vrot.lane.b32.xlu0 %v6745_v15, %s20534_s0  ;;  %v6528_v23 = vpop.f32.mrb[103].mxu1 }
 0x51c   : > { %v6684_v14 = vadd.f32 %v17163_v25, %v6645_v38  ;;  %v6715_v6 = vmax.f32 %v6683_v32, 0.0  ;;  %v20721_v32 = vld [vmem:[#allocation64_spill] sm:$0xff] }
 0x51e   : > { %v6716_v53 = vmax.f32 %v6684_v14, 0.0  ;;  %6857 = vrot.lane.b32.xlu0 %v20720_v37, %s20531_s23  ;;  %v6026_v24 = vpop.f32.mrb[100].mxu0 }
 0x51f   : > { %v6531_v0 = vpop.f32.mrb[104].mxu1  ;;  %v6028_v21 = vpop.f32.mrb[101].mxu0  ;;  %v17196_v15 = vadd.f32 %v6026_v24, %v17081_v44 }
 0x520   : > { %v6746_v50 = vpack.c.bf16 %v6716_v53, %v6715_v6  ;;  %v6646_v59 = vadd.f32 %v6531_v0, %v17107_v29  ;;  %v6533_v55 = vpop.f32.mrb[105].mxu1  ;;  %v6029_v26 = vpop.f32.mrb[102].mxu0  ;;  %v20722_v53 = vld [vmem:[#allocation14_spill] sm:$0xff] }
 0x521   : > { %v6534_v5 = vpop.f32.mrb[106].mxu1  ;;  %v6031_v42 = vpop.f32.mrb[103].mxu0  ;;  %v17204_v14 = vadd.f32 %v6029_v26, %v17086_v45 }
 0x522   : > { %v6685_v38 = vadd.f32 %v17163_v25, %v6646_v59  ;;  %v6647_v41 = vadd.f32 %v6534_v5, %v17112_v63  ;;  %6781 = vrot.lane.b32.xlu0 %v20721_v32, %s20695_s27  ;;  %6827 = vrot.lane.b32.xlu1 %v6746_v50, %s20534_s0  ;;  %v6536_v23 = vpop.f32.mrb[107].mxu1 }
 0x524   : > { %v6686_v29 = vadd.f32 %v17163_v25, %v6647_v41  ;;  %v6717_v44 = vmax.f32 %v6685_v38, 0.0  ;;  %v20723_v41 = vld [vmem:[#allocation63_spill] sm:$0xff] }
 0x526   : > { %v6718_v6 = vmax.f32 %v6686_v29, 0.0  ;;  %6859 = vrot.lane.b32.xlu1 %v20722_v53, %s20531_s23  ;;  %v6034_v24 = vpop.f32.mrb[104].mxu0 }
 0x527   : > { %v6539_v0 = vpop.f32.mrb[108].mxu1  ;;  %v6036_v63 = vpop.f32.mrb[105].mxu0  ;;  %v17211_v50 = vadd.f32 %v6034_v24, %v17091_v62 }
 0x528   : > { %v6747_v21 = vpack.c.bf16 %v6718_v6, %v6717_v44  ;;  %v6648_v59 = vadd.f32 %v6539_v0, %v17117_v49  ;;  %v6541_v55 = vpop.f32.mrb[109].mxu1  ;;  %v6037_v5 = vpop.f32.mrb[106].mxu0  ;;  %v20724_v44 = vld [vmem:[#allocation17_spill] sm:$0xff] }
 0x529   : > { %v6542_v45 = vpop.f32.mrb[110].mxu1  ;;  %v6039_v26 = vpop.f32.mrb[107].mxu0  ;;  %v17219_v23 = vadd.f32 %v6037_v5, %v17099_v57 }
 0x52a   : > { %v6687_v42 = vadd.f32 %v17163_v25, %v6648_v59  ;;  %v6649_v38 = vadd.f32 %v6542_v45, %v17125_v46  ;;  %6783 = vrot.lane.b32.xlu1 %v20723_v41, %s20695_s27  ;;  %6829 = vrot.lane.b32.xlu0 %v6747_v21, %s20534_s0  ;;  %v6544_v32 = vpop.f32.mrb[111].mxu1 }
 0x52c   : > { %v6688_v49 = vadd.f32 %v17163_v25, %v6649_v38  ;;  %v6719_v62 = vmax.f32 %v6687_v42, 0.0  ;;  %v20725_v42 = vld [vmem:[#allocation66_spill] sm:$0xff] }
 0x52e   : > { %v6720_v29 = vmax.f32 %v6688_v49, 0.0  ;;  %6861 = vrot.lane.b32.xlu0 %v20724_v44, %s20531_s23  ;;  %v6042_v6 = vpop.f32.mrb[108].mxu0  ;;  %v20726_v49 = vld [vmem:[#allocation16_spill] sm:$0xff] }
 0x52f   : > { %v6547_v24 = vpop.f32.mrb[112].mxu1  ;;  %v6044_v46 = vpop.f32.mrb[109].mxu0  ;;  %v17226_v21 = vadd.f32 %v6042_v6, %v17104_v61 }
 0x530   : > { %v6748_v0 = vpack.c.bf16 %v6720_v29, %v6719_v62  ;;  %v6650_v63 = vadd.f32 %v6547_v24, %v17130_v40  ;;  %v6549_v59 = vpop.f32.mrb[113].mxu1  ;;  %v6045_v55 = vpop.f32.mrb[110].mxu0 }
 0x531   : > { %v6550_v57 = vpop.f32.mrb[114].mxu1  ;;  %v6047_v5 = vpop.f32.mrb[111].mxu0  ;;  %v17234_v41 = vadd.f32 %v6045_v55, %v17109_v9 }
 0x532   : > { %v6689_v45 = vadd.f32 %v17163_v25, %v6650_v63  ;;  %v6651_v26 = vadd.f32 %v6550_v57, %v17135_v22  ;;  %6785 = vrot.lane.b32.xlu0 %v20725_v42, %s20695_s27  ;;  %6831 = vrot.lane.b32.xlu1 %v6748_v0, %s20534_s0  ;;  %v6552_v38 = vpop.f32.mrb[115].mxu1  ;;  %v20727_v5 = vld [vmem:[#allocation65_spill] sm:$0xff] }
 0x533   : > { %v20728_v38 = vld [vmem:[#allocation19_spill] sm:$0xff] }
 0x534   : > { %v6690_v40 = vadd.f32 %v17163_v25, %v6651_v26  ;;  %v6721_v61 = vmax.f32 %v6689_v45, 0.0 }
 0x536   : > { %v6722_v32 = vmax.f32 %v6690_v40, 0.0  ;;  %6863 = vrot.lane.b32.xlu1 %v20726_v49, %s20531_s23  ;;  %v6050_v62 = vpop.f32.mrb[112].mxu0 }
 0x537   : > { %v6555_v29 = vpop.f32.mrb[116].mxu1  ;;  %v6052_v22 = vpop.f32.mrb[113].mxu0  ;;  %v17241_v0 = vadd.f32 %v6050_v62, %v17114_v48 }
 0x538   : > { %v6749_v6 = vpack.c.bf16 %v6722_v32, %v6721_v61  ;;  %v6652_v24 = vadd.f32 %v6555_v29, %v17140_v16  ;;  %v6557_v46 = vpop.f32.mrb[117].mxu1  ;;  %v6053_v63 = vpop.f32.mrb[114].mxu0 }
 0x539   : > { %v6558_v9 = vpop.f32.mrb[118].mxu1  ;;  %v6055_v59 = vpop.f32.mrb[115].mxu0  ;;  %v17249_v26 = vadd.f32 %v6053_v63, %v17122_v1 }
 0x53a   : > { %v6691_v55 = vadd.f32 %v17163_v25, %v6652_v24  ;;  %v6653_v57 = vadd.f32 %v6558_v9, %v17148_v47  ;;  %6787 = vrot.lane.b32.xlu1 %v20727_v5, %s20695_s27  ;;  %6833 = vrot.lane.b32.xlu0 %v6749_v6, %s20534_s0  ;;  %v6560_v45 = vpop.f32.mrb[119].mxu1  ;;  %v20729_v9 = vld [vmem:[#allocation68_spill] sm:$0xff]  ;;  %v20730_v5 = vld [vmem:[#allocation18_spill] sm:$0xff] }
 0x53c   : > { %v6692_v16 = vadd.f32 %v17163_v25, %v6653_v57  ;;  %v6723_v48 = vmax.f32 %v6691_v55, 0.0 }
 0x53e   : > { %v6724_v42 = vmax.f32 %v6692_v16, 0.0  ;;  %6865 = vrot.lane.b32.xlu0 %v20728_v38, %s20531_s23  ;;  %v6058_v40 = vpop.f32.mrb[116].mxu0 }
 0x53f   : > { %v6563_v61 = vpop.f32.mrb[120].mxu1  ;;  %v6060_v47 = vpop.f32.mrb[117].mxu0  ;;  %v17256_v6 = vadd.f32 %v6058_v40, %v17127_v7 }
 0x540   : > { %v6750_v32 = vpack.c.bf16 %v6724_v42, %v6723_v48  ;;  %v6654_v62 = vadd.f32 %v6563_v61, %v17153_v30  ;;  %v6565_v29 = vpop.f32.mrb[121].mxu1  ;;  %v6061_v22 = vpop.f32.mrb[118].mxu0 }
 0x541   : > { %v6566_v1 = vpop.f32.mrb[122].mxu1  ;;  %v6063_v24 = vpop.f32.mrb[119].mxu0  ;;  %v17264_v55 = vadd.f32 %v6061_v22, %v17132_v56  ;;  %v20731_v22 = vld [vmem:[#allocation67_spill] sm:$0xff] }
 0x542   : > { %v6693_v46 = vadd.f32 %v17163_v25, %v6654_v62  ;;  %v6655_v63 = vadd.f32 %v6566_v1, %v17158_v33  ;;  %6789 = vrot.lane.b32.xlu0 %v20729_v9, %s20695_s27  ;;  %6835 = vrot.lane.b32.xlu1 %v6750_v32, %s20534_s0  ;;  %v6568_v59 = vpop.f32.mrb[123].mxu1 }
 0x544   : > { %v6694_v30 = vadd.f32 %v17163_v25, %v6655_v63  ;;  %v6725_v7 = vmax.f32 %v6693_v46, 0.0  ;;  %v20732_v63 = vld [vmem:[#allocation21_spill] sm:$0xff] }
 0x546   : > { %v6726_v57 = vmax.f32 %v6694_v30, 0.0  ;;  %6867 = vrot.lane.b32.xlu1 %v20730_v5, %s20531_s23  ;;  %v6066_v45 = vpop.f32.mrb[120].mxu0 }
 0x547   : > { %v6571_v16 = vpop.f32.mrb[124].mxu1  ;;  %v6068_v33 = vpop.f32.mrb[121].mxu0  ;;  %v17271_v61 = vadd.f32 %v6066_v45, %v17137_v17 }
 0x548   : > { %v6751_v48 = vpack.c.bf16 %v6726_v57, %v6725_v7  ;;  %v6656_v42 = vadd.f32 %v6571_v16, %v17167_v19  ;;  %v6573_v40 = vpop.f32.mrb[125].mxu1  ;;  %v6069_v32 = vpop.f32.mrb[122].mxu0 }
 0x549   : > { %v6574_v56 = vpop.f32.mrb[126].mxu1  ;;  %v6071_v47 = vpop.f32.mrb[123].mxu0  ;;  %v17279_v24 = vadd.f32 %v6069_v32, %v17145_v35  ;;  %v20733_v40 = vld [vmem:[#allocation70_spill] sm:$0xff] }
 0x54a   : > { %v6695_v62 = vadd.f32 %v17163_v25, %v6656_v42  ;;  %v6657_v29 = vadd.f32 %v6574_v56, %v17175_v51  ;;  %6791 = vrot.lane.b32.xlu1 %v20731_v22, %s20695_s27  ;;  %6837 = vrot.lane.b32.xlu0 %v6751_v48, %s20534_s0  ;;  %v6576_v1 = vpop.f32.mrb[127].mxu1 }
 0x54c   : > { %v6696_v19 = vadd.f32 %v17163_v25, %v6657_v29  ;;  %v6727_v17 = vmax.f32 %v6695_v62, 0.0  ;;  %v20734_v62 = vld [vmem:[#allocation20_spill] sm:$0xff] }
 0x54e   : > { %v6728_v46 = vmax.f32 %v6696_v19, 0.0  ;;  %6869 = vrot.lane.b32.xlu0 %v20732_v63, %s20531_s23  ;;  %v6074_v9 = vpop.f32.mrb[124].mxu0 }
 0x54f   : > { %v6579_v59 = vpop.f32.mrb[128].mxu1  ;;  %v6076_v51 = vpop.f32.mrb[125].mxu0  ;;  %v17286_v45 = vadd.f32 %v6074_v9, %v17150_v60 }
 0x550   : > { %v6752_v30 = vpack.c.bf16 %v6728_v46, %v6727_v17  ;;  %v6658_v7 = vadd.f32 %v6579_v59, %v17183_v13  ;;  %v6581_v57 = vpop.f32.mrb[129].mxu1  ;;  %v6077_v16 = vpop.f32.mrb[126].mxu0 }
 0x551   : > { %v6582_v35 = vpop.f32.mrb[130].mxu1  ;;  %v6079_v48 = vpop.f32.mrb[127].mxu0  ;;  %v17294_v56 = vadd.f32 %v6077_v16, %v17155_v39  ;;  %v20735_v39 = vld [vmem:[#allocation69_spill] sm:$0xff] }
 0x552   : > { %v6697_v33 = vadd.f32 %v17163_v25, %v6658_v7  ;;  %v6659_v42 = vadd.f32 %v6582_v35, %v17189_v43  ;;  %6793 = vrot.lane.b32.xlu0 %v20733_v40, %s20695_s27  ;;  %6839 = vrot.lane.b32.xlu1 %v6752_v30, %s20534_s0  ;;  %v6584_v32 = vpop.f32.mrb[131].mxu1  ;;  %v20736_v7 = vld [vmem:[#allocation23_spill] sm:$0xff] }
 0x554   : > { %v6698_v13 = vadd.f32 %v17163_v25, %v6659_v42  ;;  %v6729_v60 = vmax.f32 %v6697_v33, 0.0  ;;  %v20737_v42 = vld [vmem:[#allocation72_spill] sm:$0xff] }
 0x556   : > { %v6730_v47 = vmax.f32 %v6698_v13, 0.0  ;;  %6871 = vrot.lane.b32.xlu1 %v20734_v62, %s20531_s23 }
 0x557   : > { %v6587_v29 = vpop.f32.mrb[132].mxu1 }
 0x558   : > { %v6753_v22 = vpack.c.bf16 %v6730_v47, %v6729_v60  ;;  %v6660_v43 = vadd.f32 %v6587_v29, %v17196_v15  ;;  %v6589_v1 = vpop.f32.mrb[133].mxu1  ;;  %v20738_v47 = vld [vmem:[#allocation22_spill] sm:$0xff] }
 0x559   : > { %v6590_v19 = vpop.f32.mrb[134].mxu1 }
 0x55a   : > { %v6699_v17 = vadd.f32 %v17163_v25, %v6660_v43  ;;  %v6661_v46 = vadd.f32 %v6590_v19, %v17204_v14  ;;  %6795 = vrot.lane.b32.xlu1 %v20735_v39, %s20695_s27  ;;  %6841 = vrot.lane.b32.xlu0 %v6753_v22, %s20534_s0  ;;  %v6592_v9 = vpop.f32.mrb[135].mxu1 }
 0x55c   : > { %v6700_v59 = vadd.f32 %v17163_v25, %v6661_v46  ;;  %v6731_v30 = vmax.f32 %v6699_v17, 0.0  ;;  %v20739_v17 = vld [vmem:[#allocation71_spill] sm:$0xff] }
 0x55e   : > { %v6732_v51 = vmax.f32 %v6700_v59, 0.0  ;;  %6873 = vrot.lane.b32.xlu0 %v20736_v7, %s20531_s23 }
 0x55f   : > { %v6595_v15 = vpop.f32.mrb[136].mxu1 }
 0x560   : > { %v6754_v57 = vpack.c.bf16 %v6732_v51, %v6731_v30  ;;  %v6662_v16 = vadd.f32 %v6595_v15, %v17211_v50  ;;  %v6597_v35 = vpop.f32.mrb[137].mxu1  ;;  %v20740_v30 = vld [vmem:[#allocation25_spill] sm:$0xff] }
 0x561   : > { %v6598_v48 = vpop.f32.mrb[138].mxu1 }
 0x562   : > { %v6701_v14 = vadd.f32 %v17163_v25, %v6662_v16  ;;  %v6663_v33 = vadd.f32 %v6598_v48, %v17219_v23  ;;  %6797 = vrot.lane.b32.xlu0 %v20737_v42, %s20695_s27  ;;  %6843 = vrot.lane.b32.xlu1 %v6754_v57, %s20534_s0  ;;  %v6600_v40 = vpop.f32.mrb[139].mxu1  ;;  %v20741_v48 = vld [vmem:[#allocation74_spill] sm:$0xff] }
 0x564   : > { %v6702_v32 = vadd.f32 %v17163_v25, %v6663_v33  ;;  %v6733_v13 = vmax.f32 %v6701_v14, 0.0 }
 0x566   : > { %v6734_v60 = vmax.f32 %v6702_v32, 0.0  ;;  %6875 = vrot.lane.b32.xlu1 %v20738_v47, %s20531_s23  ;;  %v20742_v32 = vld [vmem:[#allocation24_spill] sm:$0xff] }
 0x567   : > { %v6603_v50 = vpop.f32.mrb[140].mxu1 }
 0x568   : > { %v6755_v29 = vpack.c.bf16 %v6734_v60, %v6733_v13  ;;  %v6664_v22 = vadd.f32 %v6603_v50, %v17226_v21  ;;  %v6605_v43 = vpop.f32.mrb[141].mxu1 }
 0x569   : > { %v6606_v1 = vpop.f32.mrb[142].mxu1  ;;  %v20743_v43 = vld [vmem:[#allocation73_spill] sm:$0xff] }
 0x56a   : > { %v6703_v23 = vadd.f32 %v17163_v25, %v6664_v22  ;;  %v6665_v19 = vadd.f32 %v6606_v1, %v17234_v41  ;;  %6799 = vrot.lane.b32.xlu1 %v20739_v17, %s20695_s27  ;;  %6845 = vrot.lane.b32.xlu0 %v6755_v29, %s20534_s0  ;;  %v6608_v46 = vpop.f32.mrb[143].mxu1 }
 0x56b   : > { %v20744_v46 = vld [vmem:[#allocation27_spill] sm:$0xff] }
 0x56c   : > { %v6704_v39 = vadd.f32 %v17163_v25, %v6665_v19  ;;  %v6735_v9 = vmax.f32 %v6703_v23, 0.0 }
 0x56e   : > { %v6736_v59 = vmax.f32 %v6704_v39, 0.0  ;;  %6877 = vrot.lane.b32.xlu0 %v20740_v30, %s20531_s23 }
 0x56f   : > { %v6611_v21 = vpop.f32.mrb[144].mxu1 }
 0x570   : > { %v6756_v51 = vpack.c.bf16 %v6736_v59, %v6735_v9  ;;  %v6666_v15 = vadd.f32 %v6611_v21, %v17241_v0  ;;  %v6613_v57 = vpop.f32.mrb[145].mxu1 }
 0x571   : > { %v6614_v16 = vpop.f32.mrb[146].mxu1  ;;  %v20745_v57 = vld [vmem:[#allocation76_spill] sm:$0xff] }
 0x572   : > { %v6705_v41 = vadd.f32 %v17163_v25, %v6666_v15  ;;  %v6667_v35 = vadd.f32 %v6614_v16, %v17249_v26  ;;  %6801 = vrot.lane.b32.xlu0 %v20741_v48, %s20695_s27  ;;  %6847 = vrot.lane.b32.xlu1 %v6756_v51, %s20534_s0  ;;  %v6616_v14 = vpop.f32.mrb[147].mxu1  ;;  %v20746_v48 = vld [vmem:[#allocation26_spill] sm:$0xff] }
 0x573   : > { %v6778_v14 = vpop.permute.xlu0 %6777 }
 0x574   : > { %v6706_v33 = vadd.f32 %v17163_v25, %v6667_v35  ;;  %v6737_v42 = vmax.f32 %v6705_v41, 0.0 }
 0x576   : > { %v6738_v40 = vmax.f32 %v6706_v33, 0.0  ;;  %6879 = vrot.lane.b32.xlu1 %v20742_v32, %s20531_s23 }
 0x577   : > { %v6619_v0 = vpop.f32.mrb[148].mxu1 }
 0x578   : > { %v6757_v13 = vpack.c.bf16 %v6738_v40, %v6737_v42  ;;  %v6668_v60 = vadd.f32 %v6619_v0, %v17256_v6  ;;  %v6621_v50 = vpop.f32.mrb[149].mxu1 }
 0x579   : > { %v6622_v29 = vpop.f32.mrb[150].mxu1 }
 0x57a   : > { %v6707_v26 = vadd.f32 %v17163_v25, %v6668_v60  ;;  %v6669_v22 = vadd.f32 %v6622_v29, %v17264_v55  ;;  %6803 = vrot.lane.b32.xlu1 %v20743_v43, %s20695_s27  ;;  %6849 = vrot.lane.b32.xlu0 %v6757_v13, %s20534_s0  ;;  %v6624_v1 = vpop.f32.mrb[151].mxu1  ;;  %v20747_v60 = vld [vmem:[#allocation75_spill] sm:$0xff] }
 0x57b   : > { %v20748_v1 = vld [vmem:[#allocation29_spill] sm:$0xff] }
 0x57c   : > { %v6708_v23 = vadd.f32 %v17163_v25, %v6669_v22  ;;  %v6739_v19 = vmax.f32 %v6707_v26, 0.0 }
 0x57e   : > { %v6740_v17 = vmax.f32 %v6708_v23, 0.0  ;;  %6881 = vrot.lane.b32.xlu0 %v20744_v46, %s20531_s23  ;;  %v6780_v23 = vpop.permute.xlu1 %6779 }
 0x57f   : > { %v6627_v6 = vpop.f32.mrb[152].mxu1 }
 0x580   : > { %v6758_v39 = vpack.c.bf16 %v6740_v17, %v6739_v19  ;;  %v6670_v9 = vadd.f32 %v6627_v6, %v17271_v61  ;;  %v6629_v59 = vpop.f32.mrb[153].mxu1 }
 0x581   : > { %v6630_v21 = vpop.f32.mrb[154].mxu1 }
 0x582   : > { %v6709_v55 = vadd.f32 %v17163_v25, %v6670_v9  ;;  %v6671_v51 = vadd.f32 %v6630_v21, %v17279_v24  ;;  %6851 = vrot.lane.b32.xlu1 %v6758_v39, %s20534_s0  ;;  %v6632_v15 = vpop.f32.mrb[155].mxu1  ;;  %6805 = vrot.lane.b32.xlu0 %v20745_v57, %s20695_s27  ;;  %v20749_v39 = vld [vmem:[#allocation28_spill] sm:$0xff]  ;;  %v20750_v57 = vld [vmem:[#allocation47_spill] sm:$0xff] }
 0x584   : > { %v6710_v16 = vadd.f32 %v17163_v25, %v6671_v51  ;;  %v6741_v41 = vmax.f32 %v6709_v55, 0.0 }
 0x586   : > { %v6742_v35 = vmax.f32 %v6710_v16, 0.0  ;;  %6883 = vrot.lane.b32.xlu1 %v20746_v48, %s20531_s23 }
 0x587   : > { %v6635_v61 = vpop.f32.mrb[156].mxu1 }
 0x588   : > { %v6759_v33 = vpack.c.bf16 %v6742_v35, %v6741_v41  ;;  %v6672_v42 = vadd.f32 %v6635_v61, %v17286_v45  ;;  %v6637_v40 = vpop.f32.mrb[157].mxu1  ;;  %v6891_v45 = vsel %vm1147_vm2, %v20720_v37, %v6778_v14  ;;  %v6894_v37 = vsel %vm1147_vm2, %v20722_v53, %v6780_v23  ;;  %v12229_v14 = vld [vmem:[#allocation5] sm:$0x80] }
 0x589   : > { %v6638_v24 = vpop.f32.mrb[158].mxu1 }
 0x58a   : > { %v6711_v0 = vadd.f32 %v17163_v25, %v6672_v42  ;;  %v6673_v13 = vadd.f32 %v6638_v24, %v17294_v56  ;;  %6807 = vrot.lane.b32.xlu1 %v20747_v60, %s20695_s27  ;;  %v6640_v50 = vpop.f32.mrb[159].mxu1  ;;  %6853 = vrot.lane.b32.xlu0 %v6759_v33, %s20534_s0  ;;  %v20751_v24 = vld [vmem:[#allocation48_spill] sm:$0xff]  ;;  %s20780_s27 = smov 64  }
 0x58c   : > { %v6712_v29 = vadd.f32 %v17163_v25, %v6673_v13  ;;  %v6826_v26 = vpop.permute.xlu0 %6825  ;;  %v6743_v22 = vmax.f32 %v6711_v0, 0.0  ;;  %v20752_v13 = vld [vmem:[#allocation30_spill] sm:$0xff] }
 0x58d   : > { %v6938_v19 = vsel %vm617_vm7, %v6891_v45, %v6826_v26  ;;  %v12246_v60 = vmul.bf16 %v12229_v14, %v20752_v13  ;;  %v20755_v14 = vld [vmem:[#allocation32_spill] sm:$0xff] }
 0x58e   : > { %v6744_v43 = vmax.f32 %v6712_v29, 0.0  ;;  %6885 = vrot.lane.b32.xlu0 %v20748_v1, %s20531_s23  ;;  %v20753_v29 = vld [vmem:[#allocation31_spill] sm:$0xff] }
 0x590   : > { %v6760_v56 = vpack.c.bf16 %v6744_v43, %v6743_v22  ;;  %v6858_v17 = vpop.permute.xlu0 %6857 }
 0x591   : > { %v17366_v6 = vsel %vm6969_vm11, %v6938_v19, %v6858_v17 }
 0x592   : > { %14060 = vmatprep.mubr.bf16.mxu0 %v17366_v6  ;;  %12213 = vst [vmem:[#allocation5 + $0x8] sm:$0xff] %v17366_v6  ;;  %6855 = vrot.lane.b32.xlu1 %v6760_v56, %s20534_s0 }
 0x594   : > { %v6828_v25 = vpop.permute.xlu1 %6827  ;;  %v6782_v9 = vpop.permute.xlu0 %6781 }
 0x595   : > { %v6940_v59 = vsel %vm617_vm7, %v6894_v37, %v6828_v25  ;;  %v6897_v41 = vsel %vm1147_vm2, %v20724_v44, %v6782_v9 }
 0x596   : > { %6887 = vrot.lane.b32.xlu1 %v20749_v39, %s20531_s23  ;;  %s21022_s23 = sld [smem:[#allocation88_spill]] }
 0x598   : > { %v6860_v21 = vpop.permute.xlu1 %6859 }
 0x599   : > { %v17377_v55 = vsel %vm6969_vm11, %v6940_v59, %v6860_v21  ;;  %v12230_v51 = vld [vmem:[#allocation5 + $0x8] sm:$0xff] }
 0x59a   : > { %12214 = vst [vmem:[#allocation5 + $0x10] sm:$0xff] %v17377_v55  ;;  %14061 = vmatmul.mubr.bf16.vlgmr.msra.gmra.mrb[128].mxu0 %v17377_v55  ;;  %v12280_v16 = vmul.bf16 %v12230_v51, %v20750_v57  ;;  %v12247_v26 = vmul.bf16 %v12230_v51, %v20753_v29 }
 0x59c   : > { %v6830_v15 = vpop.permute.xlu0 %6829  ;;  %v6784_v35 = vpop.permute.xlu1 %6783  ;;  %v12315_v40 = vrot.slane %v12280_v16, 1 }
 0x59d   : > { %v6942_v53 = vsel %vm617_vm7, %v6897_v41, %v6830_v15  ;;  %v6900_v45 = vsel %vm1147_vm2, %v20726_v49, %v6784_v35 }
 0x59e   : > { %v12365_v22 = vmax.bf16 %v12315_v40, %v12246_v60 }
 0x5a0   : > { %v6862_v61 = vpop.permute.xlu0 %6861  ;;  %v12383_v9 = vshrl.u32 %v12365_v22, 16 }
 0x5a1   : > { %v17386_v33 = vsel %vm6969_vm11, %v6942_v53, %v6862_v61  ;;  %v12231_v42 = vld [vmem:[#allocation5 + $0x10] sm:$0xff]  ;;  %v20754_v53 = vld [vmem:[#allocation33_spill] sm:$0xff] }
 0x5a2   : > { %14064 = vmatprep.mubr.bf16.mxu0 %v17386_v33  ;;  %12215 = vst [vmem:[#allocation5 + $0x18] sm:$0xff] %v17386_v33  ;;  %v12281_v0 = vmul.bf16 %v12231_v42, %v20751_v24  ;;  %v12249_v61 = vmul.bf16 %v17386_v33, %v20754_v53 }
 0x5a4   : > { %v6832_v44 = vpop.permute.xlu1 %6831  ;;  %v12316_v50 = vrot.slane %v12281_v0, 1  ;;  %v6786_v56 = vpop.permute.xlu0 %6785  ;;  %v12385_v0 = vrot.slane %v12383_v9, 7 }
 0x5a5   : > { %v6944_v19 = vsel %vm617_vm7, %v6900_v45, %v6832_v44  ;;  %v6903_v22 = vsel %vm1147_vm2, %v20728_v38, %v6786_v56 }
 0x5a6   : > { %v12317_v43 = vsel %vm12314_vm12, %v12315_v40, %v12316_v50  ;;  %v12248_v40 = vmul.bf16 %v12231_v42, %v20755_v14 }
 0x5a7   : > { %v12366_v23 = vmax.bf16 %v12317_v43, %v12247_v26 }
 0x5a8   : > { %v6864_v17 = vpop.permute.xlu1 %6863 }
 0x5a9   : > { %v17398_v25 = vsel %vm6969_vm11, %v6944_v19, %v6864_v17  ;;  %v12265_v37 = vld [vmem:[#allocation5 + $0x18] sm:$0xff]  ;;  %v12387_v59 = vshrl.u32 %v12366_v23, 16  ;;  %v12390_v49 = vshll.u32 %v12366_v23, 16 }
 0x5aa   : > { %14065 = vmatmul.mubr.bf16.gmra.mrb[132].mxu0 %v17398_v25  ;;  %v12283_v21 = vmul.bf16 %v17398_v25, %v16093_v11  ;;  %v12282_v51 = vmul.bf16 %v12265_v37, %v16086_v2 }
 0x5ab   : > { %v12389_v15 = vrot.slane %v12387_v59, 7 }
 0x5ac   : > { %v12320_v16 = vrot.slane %v12283_v21, 1  ;;  %v6834_v41 = vpop.permute.xlu0 %6833  ;;  %v12318_v35 = vrot.slane %v12282_v51, 1  ;;  %v6788_v19 = vpop.permute.xlu1 %6787 }
 0x5ad   : > { %v12392_v60 = vor.u32 %v12390_v49, %v12389_v15  ;;  %v6946_v17 = vsel %vm617_vm7, %v6903_v22, %v6834_v41 }
 0x5ae   : > { %v12319_v44 = vsel %vm12314_vm12, %v12316_v50, %v12318_v35  ;;  %v12321_v26 = vsel %vm12314_vm12, %v12318_v35, %v12320_v16 }
 0x5af   : > { %v12367_v43 = vmax.bf16 %v12319_v44, %v12248_v40  ;;  %v12368_v45 = vmax.bf16 %v12321_v26, %v12249_v61  ;;  %v12393_v23 = vsel %vm2338_vm6, %v12385_v0, %v12392_v60  ;;  %v20756_v61 = vld [vmem:[#allocation34_spill] sm:$0xff]  ;;  %v6906_v44 = vsel %vm1147_vm2, %v20730_v5, %v6788_v19 }
 0x5b0   : > { %v6866_v37 = vpop.permute.xlu0 %6865  ;;  %v12530_v59 = vmax.bf16 %v12393_v23, %v17366_v6  ;;  %v12250_v6 = vmul.bf16 %v17398_v25, %v20756_v61 }
 0x5b1   : > { %v17415_v42 = vsel %vm6969_vm11, %v6946_v17, %v6866_v37  ;;  %v12395_v9 = vshrl.u32 %v12367_v43, 16  ;;  %v12403_v50 = vshrl.u32 %v12368_v45, 16  ;;  %v12398_v21 = vshll.u32 %v12367_v43, 16 }
 0x5b2   : > { %14068 = vmatprep.mubr.bf16.mxu0 %v17415_v42  ;;  %v12284_v38 = vmul.bf16 %v17415_v42, %v16106_v4  ;;  %12546 = vst [vmem:[#allocation5 + $0x8] sm:$0xff] %v12530_v59  ;;  %v12406_v49 = vshll.u32 %v12368_v45, 16 }
 0x5b3   : > { %v12397_v56 = vrot.slane %v12395_v9, 7  ;;  %v12405_v51 = vrot.slane %v12403_v50, 7 }
 0x5b4   : > { %v12322_v35 = vrot.slane %v12284_v38, 1  ;;  %v6836_v41 = vpop.permute.xlu1 %6835  ;;  %v6790_v43 = vpop.permute.xlu0 %6789 }
 0x5b5   : > { %v12400_v40 = vor.u32 %v12398_v21, %v12397_v56  ;;  %v12408_v0 = vor.u32 %v12406_v49, %v12405_v51  ;;  %v6948_v45 = vsel %vm617_vm7, %v6906_v44, %v6836_v41  ;;  %v20758_v41 = vld [vmem:[#allocation35_spill] sm:$0xff] }
 0x5b6   : > { %v12323_v60 = vsel %vm12314_vm12, %v12320_v16, %v12322_v35 }
 0x5b7   : > { %v12369_v26 = vmax.bf16 %v12323_v60, %v12250_v6  ;;  %v12401_v22 = vsel %vm2338_vm6, %v12389_v15, %v12400_v40  ;;  %v12409_v23 = vsel %vm2338_vm6, %v12397_v56, %v12408_v0  ;;  %v6909_v40 = vsel %vm1147_vm2, %v20732_v63, %v6790_v43  ;;  %v20759_v43 = vld [vmem:[#allocation36_spill] sm:$0xff] }
 0x5b8   : > { %v6868_v17 = vpop.permute.xlu1 %6867  ;;  %v12531_v37 = vmax.bf16 %v12401_v22, %v17377_v55  ;;  %v12532_v9 = vmax.bf16 %v12409_v23, %v17386_v33  ;;  %v12251_v55 = vmul.bf16 %v17415_v42, %v20758_v41 }
 0x5b9   : > { %v12411_v50 = vshrl.u32 %v12369_v26, 16  ;;  %v6986_v38 = vsel %vm6969_vm11, %v6948_v45, %v6868_v17  ;;  %v12414_v19 = vshll.u32 %v12369_v26, 16 }
 0x5ba   : > { %14069 = vmatmul.mubr.bf16.gmra.mrb[136].mxu0 %v6986_v38  ;;  %v12285_v16 = vmul.bf16 %v6986_v38, %v16124_v34  ;;  %12547 = vst [vmem:[#allocation5 + $0x10] sm:$0xff] %v12531_v37  ;;  %12548 = vst [vmem:[#allocation5 + $0x18] sm:$0xff] %v12532_v9  ;;  %v12594_v5 = vmax.bf16 %v17178_v10, %v12531_v37  ;;  %v12252_v9 = vmul.bf16 %v6986_v38, %v20759_v43 }
 0x5bb   : > { %v12413_v15 = vrot.slane %v12411_v50, 7 }
 0x5bc   : > { %v12324_v56 = vrot.slane %v12285_v16, 1  ;;  %v6838_v21 = vpop.permute.xlu0 %6837  ;;  %v17433_v49 = vmax.bf16 %v12594_v5, %v12530_v59  ;;  %v6792_v44 = vpop.permute.xlu1 %6791 }
 0x5bd   : > { %v12416_v33 = vor.u32 %v12414_v19, %v12413_v15  ;;  %v6950_v10 = vsel %vm617_vm7, %v6909_v40, %v6838_v21  ;;  %v6912_v16 = vsel %vm1147_vm2, %v20734_v62, %v6792_v44 }
 0x5be   : > { %20757 = vst [vmem:[#allocation77_spill] sm:$0xff] %v17433_v49  ;;  %v12325_v6 = vsel %vm12314_vm12, %v12322_v35, %v12324_v56 }
 0x5bf   : > { %v12370_v0 = vmax.bf16 %v12325_v6, %v12251_v55  ;;  %v12417_v60 = vsel %vm2338_vm6, %v12405_v51, %v12416_v33 }
 0x5c0   : > { %v6870_v26 = vpop.permute.xlu0 %6869  ;;  %v12533_v22 = vmax.bf16 %v12417_v60, %v17398_v25 }
 0x5c1   : > { %v12419_v59 = vshrl.u32 %v12370_v0, 16  ;;  %v6989_v23 = vsel %vm6969_vm11, %v6950_v10, %v6870_v26  ;;  %v12422_v17 = vshll.u32 %v12370_v0, 16  ;;  %v12579_v0 = vld [vmem:[#allocation5 + $0x18] sm:$0xff] }
 0x5c2   : > { %14072 = vmatprep.mubr.bf16.mxu0 %v6989_v23  ;;  %v12286_v45 = vmul.bf16 %v6989_v23, %v16142_v28  ;;  %12549 = vst [vmem:[#allocation5 + $0x20] sm:$0xff] %v12533_v22 }
 0x5c3   : > { %v12421_v35 = vrot.slane %v12419_v59, 7 }
 0x5c4   : > { %v12326_v37 = vrot.slane %v12286_v45, 1  ;;  %v6840_v63 = vpop.permute.xlu1 %6839  ;;  %v6794_v19 = vpop.permute.xlu0 %6793 }
 0x5c5   : > { %v12424_v51 = vor.u32 %v12422_v17, %v12421_v35  ;;  %v6952_v21 = vsel %vm617_vm7, %v6912_v16, %v6840_v63 }
 0x5c6   : > { %v12327_v50 = vsel %vm12314_vm12, %v12324_v56, %v12326_v37 }
 0x5c7   : > { %v12371_v25 = vmax.bf16 %v12327_v50, %v12252_v9  ;;  %v12425_v5 = vsel %vm2338_vm6, %v12413_v15, %v12424_v51  ;;  %v20761_v15 = vld [vmem:[#allocation37_spill] sm:$0xff] }
 0x5c8   : > { %v6872_v55 = vpop.permute.xlu1 %6871  ;;  %v12534_v33 = vmax.bf16 %v12425_v5, %v17415_v42  ;;  %v12253_v45 = vmul.bf16 %v6989_v23, %v20761_v15  ;;  %v6915_v42 = vsel %vm1147_vm2, %v20736_v7, %v6794_v19 }
 0x5c9   : > { %v12427_v6 = vshrl.u32 %v12371_v25, 16  ;;  %v6992_v40 = vsel %vm6969_vm11, %v6952_v21, %v6872_v55  ;;  %v12430_v26 = vshll.u32 %v12371_v25, 16  ;;  %v12580_v55 = vld [vmem:[#allocation5 + $0x20] sm:$0xff] }
 0x5ca   : > { %14073 = vmatmul.mubr.bf16.gmra.mrb[140].mxu0 %v6992_v40  ;;  %v12287_v60 = vmul.bf16 %v6992_v40, %v16170_v27  ;;  %v12597_v56 = vmax.bf16 %v12579_v0, %v12534_v33 }
 0x5cb   : > { %v12429_v10 = vrot.slane %v12427_v6, 7 }
 0x5cc   : > { %v12328_v62 = vrot.slane %v12287_v60, 1  ;;  %v6842_v44 = vpop.permute.xlu0 %6841  ;;  %v17454_v59 = vmax.bf16 %v12597_v56, %v12533_v22  ;;  %v6796_v50 = vpop.permute.xlu1 %6795 }
 0x5cd   : > { %v12432_v17 = vor.u32 %v12430_v26, %v12429_v10  ;;  %v6954_v16 = vsel %vm617_vm7, %v6915_v42, %v6842_v44 }
 0x5ce   : > { %20760 = vst [vmem:[#allocation78_spill] sm:$0xff] %v17454_v59  ;;  %v12329_v63 = vsel %vm12314_vm12, %v12326_v37, %v12328_v62 }
 0x5cf   : > { %v12372_v9 = vmax.bf16 %v12329_v63, %v12253_v45  ;;  %v12433_v51 = vsel %vm2338_vm6, %v12421_v35, %v12432_v17  ;;  %v20763_v35 = vld [vmem:[#allocation38_spill] sm:$0xff] }
 0x5d0   : > { %v6874_v5 = vpop.permute.xlu0 %6873  ;;  %v12535_v25 = vmax.bf16 %v12433_v51, %v6986_v38  ;;  %v12254_v26 = vmul.bf16 %v6992_v40, %v20763_v35  ;;  %v6918_v38 = vsel %vm1147_vm2, %v20738_v47, %v6796_v50  ;;  %v20765_v50 = vld [vmem:[#allocation39_spill] sm:$0xff] }
 0x5d1   : > { %v12435_v21 = vshrl.u32 %v12372_v9, 16  ;;  %v6995_v22 = vsel %vm6969_vm11, %v6954_v16, %v6874_v5  ;;  %v12438_v60 = vshll.u32 %v12372_v9, 16 }
 0x5d2   : > { %14076 = vmatprep.mubr.bf16.mxu0 %v6995_v22  ;;  %v12288_v6 = vmul.bf16 %v6995_v22, %v16188_v52  ;;  %v12598_v0 = vmax.bf16 %v12580_v55, %v12535_v25 }
 0x5d3   : > { %v12437_v37 = vrot.slane %v12435_v21, 7 }
 0x5d4   : > { %v12330_v56 = vrot.slane %v12288_v6, 1  ;;  %v6844_v7 = vpop.permute.xlu1 %6843  ;;  %v17464_v19 = vmax.bf16 %v12598_v0, %v12534_v33  ;;  %v6798_v42 = vpop.permute.xlu0 %6797 }
 0x5d5   : > { %v12440_v45 = vor.u32 %v12438_v60, %v12437_v37  ;;  %v6956_v51 = vsel %vm617_vm7, %v6918_v38, %v6844_v7 }
 0x5d6   : > { %20762 = vst [vmem:[#allocation79_spill] sm:$0xff] %v17464_v19  ;;  %v12331_v44 = vsel %vm12314_vm12, %v12328_v62, %v12330_v56 }
 0x5d7   : > { %v12373_v17 = vmax.bf16 %v12331_v44, %v12254_v26  ;;  %v12441_v63 = vsel %vm2338_vm6, %v12429_v10, %v12440_v45  ;;  %v12255_v10 = vmul.bf16 %v6995_v22, %v20765_v50 }
 0x5d8   : > { %v6876_v16 = vpop.permute.xlu1 %6875  ;;  %v12536_v9 = vmax.bf16 %v12441_v63, %v6989_v23  ;;  %v6921_v23 = vsel %vm1147_vm2, %v20740_v30, %v6798_v42 }
 0x5d9   : > { %v12443_v5 = vshrl.u32 %v12373_v17, 16  ;;  %v6998_v21 = vsel %vm6969_vm11, %v6956_v51, %v6876_v16  ;;  %v12446_v62 = vshll.u32 %v12373_v17, 16 }
 0x5da   : > { %14077 = vmatmul.mubr.bf16.gmra.mrb[144].mxu0 %v6998_v21  ;;  %v12289_v55 = vmul.bf16 %v6998_v21, %v20711_v20  ;;  %v12599_v6 = vmax.bf16 %v12536_v9, %v12534_v33 }
 0x5db   : > { %v12445_v0 = vrot.slane %v12443_v5, 7 }
 0x5dc   : > { %v12332_v60 = vrot.slane %v12289_v55, 1  ;;  %v6846_v19 = vpop.permute.xlu0 %6845  ;;  %v17474_v47 = vmax.bf16 %v12599_v6, %v12535_v25  ;;  %v6800_v38 = vpop.permute.xlu1 %6799 }
 0x5dd   : > { %v12448_v26 = vor.u32 %v12446_v62, %v12445_v0  ;;  %v6958_v33 = vsel %vm617_vm7, %v6921_v23, %v6846_v19 }
 0x5de   : > { %20764 = vst [vmem:[#allocation80_spill] sm:$0xff] %v17474_v47  ;;  %v12333_v7 = vsel %vm12314_vm12, %v12330_v56, %v12332_v60 }
 0x5df   : > { %v12374_v45 = vmax.bf16 %v12333_v7, %v12255_v10  ;;  %v12449_v44 = vsel %vm2338_vm6, %v12437_v37, %v12448_v26  ;;  %v12256_v37 = vmul.bf16 %v6998_v21, %v15976_v58 }
 0x5e0   : > { %v6878_v63 = vpop.permute.xlu0 %6877  ;;  %v12537_v17 = vmax.bf16 %v12449_v44, %v6992_v40  ;;  %v6924_v40 = vsel %vm1147_vm2, %v20742_v32, %v6800_v38 }
 0x5e1   : > { %v12451_v51 = vshrl.u32 %v12374_v45, 16  ;;  %v7001_v16 = vsel %vm6969_vm11, %v6958_v33, %v6878_v63  ;;  %v12454_v56 = vshll.u32 %v12374_v45, 16 }
 0x5e2   : > { %14080 = vmatprep.mubr.bf16.mxu0 %v7001_v16  ;;  %v12290_v5 = vmul.bf16 %v7001_v16, %v20713_v3  ;;  %v12600_v55 = vmax.bf16 %v12537_v17, %v12535_v25 }
 0x5e3   : > { %v12453_v6 = vrot.slane %v12451_v51, 7 }
 0x5e4   : > { %v12334_v62 = vrot.slane %v12290_v5, 1  ;;  %v6848_v47 = vpop.permute.xlu1 %6847  ;;  %v17484_v30 = vmax.bf16 %v12600_v55, %v12536_v9  ;;  %v6802_v7 = vpop.permute.xlu0 %6801 }
 0x5e5   : > { %v12456_v42 = vor.u32 %v12454_v56, %v12453_v6  ;;  %v6960_v25 = vsel %vm617_vm7, %v6924_v40, %v6848_v47 }
 0x5e6   : > { %20766 = vst [vmem:[#allocation15_spill] sm:$0xff] %v17484_v30  ;;  %v12335_v19 = vsel %vm12314_vm12, %v12332_v60, %v12334_v62 }
 0x5e7   : > { %v12375_v10 = vmax.bf16 %v12335_v19, %v12256_v37  ;;  %v12457_v26 = vsel %vm2338_vm6, %v12445_v0, %v12456_v42  ;;  %v12257_v0 = vmul.bf16 %v7001_v16, %v20704_v54 }
 0x5e8   : > { %v6880_v23 = vpop.permute.xlu1 %6879  ;;  %v12538_v45 = vmax.bf16 %v12457_v26, %v6995_v22  ;;  %v6927_v22 = vsel %vm1147_vm2, %v20744_v46, %v6802_v7 }
 0x5e9   : > { %v12459_v44 = vshrl.u32 %v12375_v10, 16  ;;  %v7004_v33 = vsel %vm6969_vm11, %v6960_v25, %v6880_v23  ;;  %v12462_v60 = vshll.u32 %v12375_v10, 16 }
 0x5ea   : > { %14081 = vmatmul.mubr.bf16.gmra.mrb[148].mxu0 %v7004_v33  ;;  %v12291_v63 = vmul.bf16 %v7004_v33, %v20714_v12  ;;  %v12601_v51 = vmax.bf16 %v12538_v45, %v12536_v9 }
 0x5eb   : > { %v12461_v5 = vrot.slane %v12459_v44, 7 }
 0x5ec   : > { %v12336_v55 = vrot.slane %v12291_v63, 1  ;;  %v6850_v56 = vpop.permute.xlu0 %6849  ;;  %v17494_v32 = vmax.bf16 %v12601_v51, %v12537_v17  ;;  %v6804_v19 = vpop.permute.xlu1 %6803 }
 0x5ed   : > { %v12464_v38 = vor.u32 %v12462_v60, %v12461_v5  ;;  %v6962_v9 = vsel %vm617_vm7, %v6927_v22, %v6850_v56 }
 0x5ee   : > { %20767 = vst [vmem:[#allocation64_spill] sm:$0xff] %v17494_v32  ;;  %v12337_v47 = vsel %vm12314_vm12, %v12334_v62, %v12336_v55 }
 0x5ef   : > { %v12376_v37 = vmax.bf16 %v12337_v47, %v12257_v0  ;;  %v12465_v42 = vsel %vm2338_vm6, %v12453_v6, %v12464_v38  ;;  %v12258_v6 = vmul.bf16 %v7004_v33, %v20705_v36 }
 0x5f0   : > { %v6882_v40 = vpop.permute.xlu0 %6881  ;;  %v12539_v10 = vmax.bf16 %v12465_v42, %v6998_v21  ;;  %v6930_v21 = vsel %vm1147_vm2, %v20746_v48, %v6804_v19 }
 0x5f1   : > { %v12467_v26 = vshrl.u32 %v12376_v37, 16  ;;  %v7007_v25 = vsel %vm6969_vm11, %v6962_v9, %v6882_v40  ;;  %v12470_v62 = vshll.u32 %v12376_v37, 16 }
 0x5f2   : > { %14084 = vmatprep.mubr.bf16.mxu0 %v7007_v25  ;;  %v12292_v23 = vmul.bf16 %v7007_v25, %v20715_v8  ;;  %v12602_v44 = vmax.bf16 %v12539_v10, %v12537_v17 }
 0x5f3   : > { %v12469_v63 = vrot.slane %v12467_v26, 7 }
 0x5f4   : > { %v6852_v51 = vpop.permute.xlu1 %6851  ;;  %v12338_v60 = vrot.slane %v12292_v23, 1  ;;  %v17504_v46 = vmax.bf16 %v12602_v44, %v12538_v45  ;;  %v6806_v17 = vpop.permute.xlu0 %6805 }
 0x5f5   : > { %v12472_v7 = vor.u32 %v12470_v62, %v12469_v63  ;;  %v6964_v47 = vsel %vm617_vm7, %v6930_v21, %v6852_v51  ;;  %v6933_v51 = vsel %vm1147_vm2, %v20748_v1, %v6806_v17 }
 0x5f6   : > { %20768 = vst [vmem:[#allocation14_spill] sm:$0xff] %v17504_v46  ;;  %v12339_v56 = vsel %vm12314_vm12, %v12336_v55, %v12338_v60 }
 0x5f7   : > { %v12377_v0 = vmax.bf16 %v12339_v56, %v12258_v6  ;;  %v12473_v38 = vsel %vm2338_vm6, %v12461_v5, %v12472_v7 }
 0x5f8   : > { %v6884_v22 = vpop.permute.xlu1 %6883  ;;  %v17512_v37 = vmax.bf16 %v12473_v38, %v7001_v16  ;;  %v12259_v16 = vmul.bf16 %v7007_v25, %v20706_v31 }
 0x5f9   : > { %v17515_v42 = vsel %vm6969_vm11, %v6964_v47, %v6884_v22  ;;  %v12475_v9 = vshrl.u32 %v12377_v0, 16  ;;  %v12478_v40 = vshll.u32 %v12377_v0, 16  ;;  %v20770_v22 = vld [vmem:[#allocation61_spill] sm:$0xff] }
 0x5fa   : > { %14085 = vmatmul.mubr.bf16.gmra.mrb[152].mxu0 %v17515_v42  ;;  %v12293_v55 = vmul.bf16 %v17515_v42, %v20716_v18  ;;  %v12603_v48 = vmax.bf16 %v17512_v37, %v12538_v45 }
 0x5fb   : > { %v12477_v19 = vrot.slane %v12475_v9, 7 }
 0x5fc   : > { %v6854_v5 = vpop.permute.xlu0 %6853  ;;  %v12340_v26 = vrot.slane %v12293_v55, 1  ;;  %v17521_v23 = vmax.bf16 %v12603_v48, %v12539_v10  ;;  %v6808_v56 = vpop.permute.xlu1 %6807 }
 0x5fd   : > { %v12480_v44 = vor.u32 %v12478_v40, %v12477_v19  ;;  %v6966_v45 = vsel %vm617_vm7, %v6933_v51, %v6854_v5  ;;  %v12279_v5 = vld [vmem:[#allocation5 + $0x88] sm:$0x1] }
 0x5fe   : > { %20769 = vst [vmem:[#allocation63_spill] sm:$0xff] %v17521_v23  ;;  %v12341_v62 = vsel %vm12314_vm12, %v12338_v60, %v12340_v26 }
 0x5ff   : > { %v12378_v6 = vmax.bf16 %v12341_v62, %v12259_v16  ;;  %v12481_v7 = vsel %vm2338_vm6, %v12469_v63, %v12480_v44  ;;  %v6936_v62 = vsel %vm1147_vm2, %v20749_v39, %v6808_v56  ;;  %v14563_v39 = vld [vmem:[%s20413_s13 + $0x8] sm:$0xff]   ;;  %v17557_v56 = vld [vmem:[#allocation4] sm:$0xff] }
 0x600   : > { %v6886_v21 = vpop.permute.xlu0 %6885  ;;  %v17529_v0 = vmax.bf16 %v12481_v7, %v7004_v33  ;;  %v20772_v33 = vld [vmem:[#allocation44_spill] sm:$0xff] }
 0x601   : > { %v17532_v38 = vsel %vm6969_vm11, %v6966_v45, %v6886_v21  ;;  %v12483_v47 = vshrl.u32 %v12378_v6, 16  ;;  %v12486_v9 = vshll.u32 %v12378_v6, 16  ;;  %v12260_v40 = vmul.bf16 %v17515_v42, %v20772_v33  ;;  %v14562_v6 = vld [vmem:[%s20413_s13] sm:$0xff]   ;;  %v20773_v21 = vld [vmem:[#allocation60_spill] sm:$0xff] }
 0x602   : > { %14088 = vmatprep.mubr.bf16.mxu0 %v17532_v38  ;;  %v12294_v60 = vmul.bf16 %v17532_v38, %v20770_v22  ;;  %v12604_v1 = vmax.bf16 %v17529_v0, %v12539_v10  ;;  %8245 = vmatpush1.bf16.msra.mxu1 %v14562_v6 }
 0x603   : > { %v12485_v17 = vrot.slane %v12483_v47, 7  ;;  %v12296_v47 = vmul.bf16 %v12279_v5, %v20773_v21  ;;  %8246 = vmatprep.subr.bf16.mxu1 %v17557_v56 }
 0x604   : > { %v6856_v63 = vpop.permute.xlu1 %6855  ;;  %v12342_v55 = vrot.slane %v12294_v60, 1  ;;  %v17539_v48 = vmax.bf16 %v12604_v1, %v17512_v37 }
 0x605   : > { %v12488_v16 = vor.u32 %v12486_v9, %v12485_v17  ;;  %v6968_v7 = vsel %vm617_vm7, %v6936_v62, %v6856_v63  ;;  %v20776_v62 = vld [vmem:[#allocation46_spill] sm:$0xff] }
 0x606   : > { %20771 = vst [vmem:[#allocation17_spill] sm:$0xff] %v17539_v48  ;;  %v12343_v44 = vsel %vm12314_vm12, %v12340_v26, %v12342_v55  ;;  %8247 = vmatpush1.bf16.msra.mxu1 %v14563_v39 }
 0x607   : > { %v12379_v51 = vmax.bf16 %v12343_v44, %v12260_v40  ;;  %v12489_v10 = vsel %vm2338_vm6, %v12477_v19, %v12488_v16  ;;  %v20774_v19 = vld [vmem:[#allocation62_spill] sm:$0xff]  ;;  %v20775_v16 = vld [vmem:[#allocation45_spill] sm:$0xff]  ;;  %8248 = vmatprep.subr.bf16.mxu1 %v17557_v56 }
 0x608   : > { %v6888_v45 = vpop.permute.xlu1 %6887  ;;  %v12542_v60 = vmax.bf16 %v12489_v10, %v7007_v25  ;;  %v12346_v25 = vrot.slane %v12296_v47, 1  ;;  %v12261_v44 = vmul.bf16 %v17532_v38, %v20775_v16 }
 0x609   : > { %v7016_v1 = vsel %vm6969_vm11, %v6968_v7, %v6888_v45  ;;  %v12491_v9 = vshrl.u32 %v12379_v51, 16  ;;  %v12494_v40 = vshll.u32 %v12379_v51, 16 }
 0x60a   : > { %14089 = vmatmul.mubr.bf16.gmra.mrb[156].mxu0 %v7016_v1  ;;  %v12295_v26 = vmul.bf16 %v7016_v1, %v20774_v19  ;;  %12558 = vst [vmem:[#allocation5 + $0x68] sm:$0xff] %v12542_v60  ;;  %v12262_v10 = vmul.bf16 %v7016_v1, %v20776_v62 }
 0x60b   : > { %v12493_v63 = vrot.slane %v12491_v9, 7 }
 0x60c   : > { %v12344_v5 = vrot.slane %v12295_v26, 1 }
 0x60d   : > { %v12496_v6 = vor.u32 %v12494_v40, %v12493_v63 }
 0x60e   : > { %v12345_v7 = vsel %vm12314_vm12, %v12342_v55, %v12344_v5  ;;  %v12347_v45 = vsel %vm12314_vm12, %v12344_v5, %v12346_v25 }
 0x60f   : > { %v12380_v48 = vmax.bf16 %v12345_v7, %v12261_v44  ;;  %v12381_v23 = vmax.bf16 %v12347_v45, %v12262_v10  ;;  %v12497_v9 = vsel %vm2338_vm6, %v12485_v17, %v12496_v6  ;;  %v14571_v7 = vld [vmem:[%s20413_s13 + $0x70] sm:$0xff]   ;;  %v14573_v45 = vld [vmem:[%s20413_s13 + $0x78] sm:$0xff]  }
 0x610   : > { %v12543_v51 = vmax.bf16 %v12497_v9, %v17515_v42  ;;  %v14564_v42 = vld [vmem:[%s20413_s13 + $0x10] sm:$0xff]   ;;  %v14575_v9 = vld [vmem:[%s20413_s13 + $0x40] sm:$0xff]  }
 0x611   : > { %v12499_v47 = vshrl.u32 %v12380_v48, 16  ;;  %v12507_v26 = vshrl.u32 %v12381_v23, 16  ;;  %v12589_v46 = vld [vmem:[#allocation5 + $0x68] sm:$0xff]  ;;  %v12502_v39 = vshll.u32 %v12380_v48, 16  ;;  %v12510_v55 = vshll.u32 %v12381_v23, 16  ;;  %8249 = vmatpush1.bf16.msra.mxu1 %v14564_v42  ;;  %v14568_v48 = vld [vmem:[%s20413_s13 + $0x30] sm:$0xff]  }
 0x612   : > { %12559 = vst [vmem:[#allocation5 + $0x70] sm:$0xff] %v12543_v51  ;;  %v12605_v32 = vmax.bf16 %v12589_v46, %v17512_v37  ;;  %8250 = vmatprep.subr.bf16.mxu1 %v17557_v56  ;;  %v14565_v23 = vld [vmem:[%s20413_s13 + $0x18] sm:$0xff]   ;;  %v14574_v51 = vld [vmem:[%s20413_s13 + $0x80] sm:$0xff]  }
 0x613   : > { %v12501_v40 = vrot.slane %v12499_v47, 7  ;;  %v12509_v30 = vrot.slane %v12507_v26, 7  ;;  %v14576_v47 = vld [vmem:[%s20413_s13 + $0x88] sm:$0xff]   ;;  %v14577_v26 = vld [vmem:[%s20413_s13 + $0x90] sm:$0xff]  }
 0x614   : > { %v17570_v5 = vmax.bf16 %v12605_v32, %v17529_v0 }
 0x615   : > { %v12504_v25 = vor.u32 %v12502_v39, %v12501_v40  ;;  %v12512_v44 = vor.u32 %v12510_v55, %v12509_v30  ;;  %8251 = vmatpush1.bf16.msra.mxu1 %v14565_v23  ;;  %v14579_v39 = vld [vmem:[%s20413_s13 + $0x48] sm:$0xff]   ;;  %v14580_v55 = vld [vmem:[%s20413_s13 + $0xa0] sm:$0xff]  }
 0x616   : > { %20777 = vst [vmem:[#allocation66_spill] sm:$0xff] %v17570_v5  ;;  %8252 = vmatprep.subr.bf16.mxu1 %v17557_v56 }
 0x617   : > { %v12505_v10 = vsel %vm2338_vm6, %v12493_v63, %v12504_v25  ;;  %v12513_v17 = vsel %vm2338_vm6, %v12501_v40, %v12512_v44  ;;  %v14572_v63 = vld [vmem:[%s20413_s13 + $0x38] sm:$0xff]   ;;  %v14583_v25 = vld [vmem:[%s20413_s13 + $0x50] sm:$0xff]   ;;  %v17651_v44 = vld [vmem:[%s20412_s12] ss:$0 sm:$0xff] }
 0x618   : > { %v12544_v6 = vmax.bf16 %v12505_v10, %v17532_v38  ;;  %v12545_v46 = vmax.bf16 %v12513_v17, %v7016_v1  ;;  %v14566_v38 = vld [vmem:[%s20413_s13 + $0x20] sm:$0xff]   ;;  %v14570_v1 = vld [vmem:[%s20413_s13 + $0x68] sm:$0xff]   ;;  %v14578_v40 = vld [vmem:[%s20413_s13 + $0x98] sm:$0xff]  }
 0x619   : > { %v12590_v37 = vld [vmem:[#allocation5 + $0x70] sm:$0xff]  ;;  %8253 = vmatpush1.bf16.msra.mxu1 %v14566_v38  ;;  %v14581_v10 = vld [vmem:[%s20413_s13 + $0xa8] sm:$0xff]   ;;  %v14582_v38 = vld [vmem:[%s20413_s13 + $0xb0] sm:$0xff]  }
 0x61a   : > { %12560 = vst [vmem:[#allocation5 + $0x78] sm:$0xff] %v12544_v6  ;;  %12561 = vst [vmem:[#allocation5 + $0x80] sm:$0xff] %v12545_v46  ;;  %v12606_v32 = vmax.bf16 %v12590_v37, %v17529_v0  ;;  %8254 = vmatprep.subr.bf16.mxu1 %v17557_v56  ;;  %v14567_v0 = vld [vmem:[%s20413_s13 + $0x28] sm:$0xff]  }
 0x61c   : > { %v17580_v30 = vmax.bf16 %v12606_v32, %v12542_v60  ;;  %v14569_v60 = vld [vmem:[%s20413_s13 + $0x60] sm:$0xff]  }
 0x61d   : > { %8255 = vmatpush1.bf16.msra.mxu1 %v14567_v0  ;;  %7684 = vmatpush1.bf16.msra.mxu0 %v14569_v60 }
 0x61e   : > { %20778 = vst [vmem:[#allocation16_spill] sm:$0xff] %v17580_v30  ;;  %8256 = vmatprep.subr.bf16.mxu1 %v17557_v56  ;;  %7685 = vmatprep.subr.bf16.mxu0 %v17557_v56 }
 0x621   : > { %8257 = vmatpush1.bf16.msra.mxu1 %v14568_v48  ;;  %7686 = vmatpush1.bf16.msra.mxu0 %v14570_v1 }
 0x622   : > { %8258 = vmatprep.subr.bf16.mxu1 %v17557_v56  ;;  %7687 = vmatprep.subr.bf16.mxu0 %v17557_v56 }
 0x625   : > { %8259 = vmatpush1.bf16.msra.mxu1 %v14572_v63  ;;  %7688 = vmatpush1.bf16.msra.mxu0 %v14571_v7 }
 0x626   : > { %8260 = vmatprep.subr.bf16.mxu1 %v17557_v56  ;;  %7689 = vmatprep.subr.bf16.mxu0 %v17557_v56 }
 0x629   : > { %7690 = vmatpush1.bf16.msra.mxu0 %v14573_v45  ;;  %8261 = vmatpush1.bf16.msra.mxu1 %v14575_v9  ;;  %v14584_v45 = vld [vmem:[%s20413_s13 + $0xb8] sm:$0xff]  }
 0x62a   : > { %7691 = vmatprep.subr.bf16.mxu0 %v17557_v56  ;;  %8262 = vmatprep.subr.bf16.mxu1 %v17557_v56 }
 0x62d   : > { %7692 = vmatpush1.bf16.msra.mxu0 %v14574_v51  ;;  %8263 = vmatpush1.bf16.msra.mxu1 %v14579_v39  ;;  %v14585_v51 = vld [vmem:[%s20413_s13 + $0x58] sm:$0xff]  }
 0x62e   : > { %7693 = vmatprep.subr.bf16.mxu0 %v17557_v56  ;;  %8264 = vmatprep.subr.bf16.mxu1 %v17557_v56 }
 0x631   : > { %7694 = vmatpush1.bf16.msra.mxu0 %v14576_v47  ;;  %8265 = vmatpush1.bf16.msra.mxu1 %v14583_v25  ;;  %v17697_v25 = vld [vmem:[%s20415_s15 + $0x30] sm:$0xff]  }
 0x632   : > { %7695 = vmatprep.subr.bf16.mxu0 %v17557_v56  ;;  %8266 = vmatprep.subr.bf16.mxu1 %v17557_v56 }
 0x635   : > { %7696 = vmatpush1.bf16.msra.mxu0 %v14577_v26  ;;  %8267 = vmatpush1.bf16.msra.mxu1 %v14585_v51 }
 0x636   : > { %7697 = vmatprep.subr.bf16.mxu0 %v17557_v56  ;;  %14092 = vmatprep.subr.bf16.mxu1 %v17697_v25 }
 0x639   : > { %7698 = vmatpush1.bf16.msra.mxu0 %v14578_v40 }
 0x63a   : > { %7699 = vmatprep.subr.bf16.mxu0 %v17557_v56 }
 0x63d   : > { %7700 = vmatpush1.bf16.msra.mxu0 %v14580_v55 }
 0x63e   : > { %7701 = vmatprep.subr.bf16.mxu0 %v17557_v56 }
 0x641   : > { %7702 = vmatpush1.bf16.msra.mxu0 %v14581_v10 }
 0x642   : > { %7703 = vmatprep.subr.bf16.mxu0 %v17557_v56 }
 0x645   : > { %7704 = vmatpush1.bf16.msra.mxu0 %v14582_v38 }
 0x646   : > { %7705 = vmatprep.subr.bf16.mxu0 %v17557_v56 }
 0x649   : > { %7706 = vmatpush1.bf16.msra.mxu0 %v14584_v45 }
 0x64a   : > { %8829 = vmatprep.subr.bf16.mxu0 %v17557_v56 }
 0x66d   : > { %v14062_v17 = vpop.f32.mrb[128].mxu0 }
 0x66e   : > { %v7132_v42 = vadd.f32 %v14062_v17, %v17651_v44  ;;  %v7123_v6 = vpop.f32.mrb[129].mxu0 }
 0x66f   : > { %v7124_v46 = vadd.f32 %v17651_v44, %v7123_v6  ;;  %v14063_v37 = vpop.f32.mrb[130].mxu0 }
 0x670   : > { %v7135_v32 = vadd.f32 %v14063_v37, %v17651_v44  ;;  %v7126_v23 = vpop.f32.mrb[131].mxu0  ;;  %v7252_v48 = vmax.f32 %v7132_v42, 0.0 }
 0x671   : > { %v7127_v0 = vadd.f32 %v17651_v44, %v7126_v23  ;;  %v7250_v1 = vmax.f32 %v7124_v46, 0.0 }
 0x672   : > { %v7253_v60 = vmax.f32 %v7135_v32, 0.0 }
 0x673   : > { %v7251_v63 = vmax.f32 %v7127_v0, 0.0 }
 0x674   : > { %v17666_v7 = vpack.c.bf16 %v7253_v60, %v7252_v48 }
 0x675   : > { %v17671_v9 = vpack.c.bf16 %v7251_v63, %v7250_v1 }
 0x676   : > { %20779 = vst [vmem:[#allocation65_spill] sm:$0xff] %v17666_v7  ;;  %7396 = vst.msk [vmem:[#allocation4 + $0x18] sm:$0xff] %vm617_vm7, %v17666_v7  ;;  %7332 = vrot.lane.b32.xlu1 %v17666_v7, %s20780_s27 }
 0x677   : > { %7299 = vst.msk [vmem:[#allocation4 + $0x30] sm:$0xff] %vm617_vm7, %v17666_v7  ;;  %7395 = vst.msk [vmem:[#allocation4 + $0x8] sm:$0xff] %vm617_vm7, %v17671_v9  ;;  %7330 = vrot.lane.b32.xlu0 %v17671_v9, %s20780_s27 }
 0x678   : > { %9189 = vst.msk [vmem:[#allocation2] sm:$0xff] %vm1229_vm3, %v17671_v9 }
 0x679   : > { %7298 = vst.msk [vmem:[#allocation4 + $0x20] sm:$0xff] %vm617_vm7, %v17671_v9 }
 0x67d   : > { %v14066_v47 = vpop.f32.mrb[132].mxu0  ;;  %v7414_v26 = vld [vmem:[#allocation4 + $0x18] sm:$0xff] }
 0x67e   : > { %v7139_v40 = vpop.f32.mrb[133].mxu0  ;;  %v7448_v39 = vmul.bf16 %v7414_v26, %v20753_v29  ;;  %13261 = vmatprep.mubr.msk.bf16.mxu0 %vm617_vm7, %v7414_v26  ;;  %v7412_v55 = vld [vmem:[#allocation4 + $0x8] sm:$0x80]  ;;  %v7148_v10 = vadd.f32 %v14066_v47, %v17651_v44 }
 0x67f   : > { %v7140_v17 = vadd.f32 %v17651_v44, %v7139_v40  ;;  %v14067_v42 = vpop.f32.mrb[134].mxu0  ;;  %v7446_v6 = vmul.bf16 %v7412_v55, %v20752_v13 }
 0x680   : > { %v7861_v46 = vshrl.u32 %v7448_v39, 16  ;;  %v7142_v37 = vpop.f32.mrb[135].mxu0  ;;  %v7151_v32 = vadd.f32 %v14067_v42, %v17651_v44  ;;  %v7864_v0 = vshll.u32 %v7448_v39, 16  ;;  %v7256_v60 = vmax.f32 %v7148_v10, 0.0 }
 0x681   : > { %v7143_v23 = vadd.f32 %v17651_v44, %v7142_v37  ;;  %v7857_v48 = vshrl.u32 %v7446_v6, 16  ;;  %v7254_v1 = vmax.f32 %v7140_v17, 0.0 }
 0x682   : > { %v17705_v38 = vrot.slane %v7861_v46, 7  ;;  %v7257_v63 = vmax.f32 %v7151_v32, 0.0 }
 0x683   : > { %v7255_v45 = vmax.f32 %v7143_v23, 0.0  ;;  %v7859_v51 = vrot.slane %v7857_v48, 7 }
 0x684   : > { %v7866_v47 = vor.u32 %v7864_v0, %v17705_v38  ;;  %v17708_v26 = vpack.c.bf16 %v7257_v63, %v7256_v60 }
 0x685   : > { %v17710_v40 = vpack.c.bf16 %v7255_v45, %v7254_v1 }
 0x686   : > { %20781 = vst [vmem:[#allocation19_spill] sm:$0xff] %v17708_v26  ;;  %v7867_v55 = vsel %vm2338_vm6, %v7859_v51, %v7866_v47  ;;  %7398 = vst.msk [vmem:[#allocation4 + $0x38] sm:$0xff] %vm617_vm7, %v17708_v26  ;;  %7336 = vrot.lane.b32.xlu1 %v17708_v26, %s20780_s27 }
 0x687   : > { %20782 = vst [vmem:[#allocation68_spill] sm:$0xff] %v17710_v40  ;;  %7301 = vst.msk [vmem:[#allocation4 + $0x50] sm:$0xff] %vm617_vm7, %v17708_v26  ;;  %13289 = vmatprep.mubr.msk.bf16.mxu1 %vm617_vm7, %v7867_v55  ;;  %7334 = vrot.lane.b32.xlu0 %v17710_v40, %s20780_s27 }
 0x688   : > { %7397 = vst.msk [vmem:[#allocation4 + $0x28] sm:$0xff] %vm617_vm7, %v17710_v40  ;;  %7300 = vst.msk [vmem:[#allocation4 + $0x40] sm:$0xff] %vm617_vm7, %v17710_v40 }
 0x68d   : > { %v14070_v39 = vpop.f32.mrb[136].mxu0 }
 0x68e   : > { %v7164_v10 = vadd.f32 %v14070_v39, %v17651_v44  ;;  %v7155_v17 = vpop.f32.mrb[137].mxu0 }
 0x68f   : > { %v7156_v42 = vadd.f32 %v17651_v44, %v7155_v17  ;;  %v14071_v6 = vpop.f32.mrb[138].mxu0 }
 0x690   : > { %v7167_v46 = vadd.f32 %v14071_v6, %v17651_v44  ;;  %v7158_v37 = vpop.f32.mrb[139].mxu0  ;;  %v7260_v23 = vmax.f32 %v7164_v10, 0.0 }
 0x691   : > { %v7159_v32 = vadd.f32 %v17651_v44, %v7158_v37  ;;  %v7258_v48 = vmax.f32 %v7156_v42, 0.0 }
 0x692   : > { %v7261_v0 = vmax.f32 %v7167_v46, 0.0 }
 0x693   : > { %v7259_v60 = vmax.f32 %v7159_v32, 0.0 }
 0x694   : > { %v17730_v1 = vpack.c.bf16 %v7261_v0, %v7260_v23 }
 0x695   : > { %v17732_v63 = vpack.c.bf16 %v7259_v60, %v7258_v48 }
 0x696   : > { %20783 = vst [vmem:[#allocation18_spill] sm:$0xff] %v17730_v1  ;;  %7400 = vst.msk [vmem:[#allocation4 + $0x58] sm:$0xff] %vm617_vm7, %v17730_v1  ;;  %7340 = vrot.lane.b32.xlu1 %v17730_v1, %s20780_s27 }
 0x697   : > { %20784 = vst [vmem:[#allocation67_spill] sm:$0xff] %v17732_v63  ;;  %7303 = vst.msk [vmem:[#allocation4 + $0x70] sm:$0xff] %vm617_vm7, %v17730_v1  ;;  %7338 = vrot.lane.b32.xlu0 %v17732_v63, %s20780_s27 }
 0x698   : > { %7399 = vst.msk [vmem:[#allocation4 + $0x48] sm:$0xff] %vm617_vm7, %v17732_v63  ;;  %7302 = vst.msk [vmem:[#allocation4 + $0x60] sm:$0xff] %vm617_vm7, %v17732_v63 }
 0x69d   : > { %v14074_v45 = vpop.f32.mrb[140].mxu0 }
 0x69e   : > { %v7180_v51 = vadd.f32 %v14074_v45, %v17651_v44  ;;  %v7171_v47 = vpop.f32.mrb[141].mxu0 }
 0x69f   : > { %v7172_v55 = vadd.f32 %v17651_v44, %v7171_v47  ;;  %v14075_v39 = vpop.f32.mrb[142].mxu0 }
 0x6a0   : > { %v7183_v10 = vadd.f32 %v14075_v39, %v17651_v44  ;;  %v7174_v17 = vpop.f32.mrb[143].mxu0  ;;  %v7264_v6 = vmax.f32 %v7180_v51, 0.0 }
 0x6a1   : > { %v7175_v42 = vadd.f32 %v17651_v44, %v7174_v17  ;;  %v7262_v37 = vmax.f32 %v7172_v55, 0.0 }
 0x6a2   : > { %v7265_v46 = vmax.f32 %v7183_v10, 0.0 }
 0x6a3   : > { %v7263_v32 = vmax.f32 %v7175_v42, 0.0 }
 0x6a4   : > { %v17750_v23 = vpack.c.bf16 %v7265_v46, %v7264_v6 }
 0x6a5   : > { %v17752_v0 = vpack.c.bf16 %v7263_v32, %v7262_v37 }
 0x6a6   : > { %7402 = vst.msk [vmem:[#allocation4 + $0x78] sm:$0xff] %vm617_vm7, %v17750_v23  ;;  %7305 = vst.msk [vmem:[#allocation4 + $0x90] sm:$0xff] %vm617_vm7, %v17750_v23  ;;  %7344 = vrot.lane.b32.xlu1 %v17750_v23, %s20780_s27 }
 0x6a7   : > { %7401 = vst.msk [vmem:[#allocation4 + $0x68] sm:$0xff] %vm617_vm7, %v17752_v0  ;;  %7304 = vst.msk [vmem:[#allocation4 + $0x80] sm:$0xff] %vm617_vm7, %v17752_v0  ;;  %7342 = vrot.lane.b32.xlu0 %v17752_v0, %s20780_s27 }
 0x6ad   : > { %v14078_v48 = vpop.f32.mrb[144].mxu0 }
 0x6ae   : > { %v7196_v60 = vadd.f32 %v14078_v48, %v17651_v44  ;;  %v7187_v45 = vpop.f32.mrb[145].mxu0 }
 0x6af   : > { %v7188_v51 = vadd.f32 %v17651_v44, %v7187_v45  ;;  %v14079_v47 = vpop.f32.mrb[146].mxu0 }
 0x6b0   : > { %v7199_v55 = vadd.f32 %v14079_v47, %v17651_v44  ;;  %v7190_v39 = vpop.f32.mrb[147].mxu0  ;;  %v7268_v17 = vmax.f32 %v7196_v60, 0.0 }
 0x6b1   : > { %v7191_v10 = vadd.f32 %v17651_v44, %v7190_v39  ;;  %v7266_v6 = vmax.f32 %v7188_v51, 0.0 }
 0x6b2   : > { %v7269_v42 = vmax.f32 %v7199_v55, 0.0 }
 0x6b3   : > { %v7267_v46 = vmax.f32 %v7191_v10, 0.0 }
 0x6b4   : > { %v17770_v37 = vpack.c.bf16 %v7269_v42, %v7268_v17 }
 0x6b5   : > { %v17772_v32 = vpack.c.bf16 %v7267_v46, %v7266_v6 }
 0x6b6   : > { %7404 = vst.msk [vmem:[#allocation4 + $0x98] sm:$0xff] %vm617_vm7, %v17770_v37  ;;  %7307 = vst.msk [vmem:[#allocation4 + $0xb0] sm:$0xff] %vm617_vm7, %v17770_v37  ;;  %7348 = vrot.lane.b32.xlu1 %v17770_v37, %s20780_s27 }
 0x6b7   : > { %7403 = vst.msk [vmem:[#allocation4 + $0x88] sm:$0xff] %vm617_vm7, %v17772_v32  ;;  %7306 = vst.msk [vmem:[#allocation4 + $0xa0] sm:$0xff] %vm617_vm7, %v17772_v32  ;;  %7346 = vrot.lane.b32.xlu0 %v17772_v32, %s20780_s27 }
 0x6bd   : > { %v14082_v48 = vpop.f32.mrb[148].mxu0 }
 0x6be   : > { %v7212_v60 = vadd.f32 %v14082_v48, %v17651_v44  ;;  %v7203_v45 = vpop.f32.mrb[149].mxu0 }
 0x6bf   : > { %v7204_v51 = vadd.f32 %v17651_v44, %v7203_v45  ;;  %v14083_v47 = vpop.f32.mrb[150].mxu0 }
 0x6c0   : > { %v7215_v55 = vadd.f32 %v14083_v47, %v17651_v44  ;;  %v7206_v39 = vpop.f32.mrb[151].mxu0  ;;  %v7272_v17 = vmax.f32 %v7212_v60, 0.0 }
 0x6c1   : > { %v7207_v10 = vadd.f32 %v17651_v44, %v7206_v39  ;;  %v7270_v6 = vmax.f32 %v7204_v51, 0.0 }
 0x6c2   : > { %v7273_v42 = vmax.f32 %v7215_v55, 0.0 }
 0x6c3   : > { %v7271_v46 = vmax.f32 %v7207_v10, 0.0 }
 0x6c4   : > { %v17790_v30 = vpack.c.bf16 %v7273_v42, %v7272_v17 }
 0x6c5   : > { %v17792_v5 = vpack.c.bf16 %v7271_v46, %v7270_v6 }
 0x6c6   : > { %20785 = vst [vmem:[#allocation21_spill] sm:$0xff] %v17790_v30  ;;  %7406 = vst.msk [vmem:[#allocation4 + $0xb8] sm:$0xff] %vm617_vm7, %v17790_v30  ;;  %7352 = vrot.lane.b32.xlu1 %v17790_v30, %s20780_s27 }
 0x6c7   : > { %7309 = vst.msk [vmem:[#allocation4 + $0xd0] sm:$0xff] %vm617_vm7, %v17790_v30  ;;  %7405 = vst.msk [vmem:[#allocation4 + $0xa8] sm:$0xff] %vm617_vm7, %v17792_v5  ;;  %7350 = vrot.lane.b32.xlu0 %v17792_v5, %s20780_s27 }
 0x6c8   : > { %7308 = vst.msk [vmem:[#allocation4 + $0xc0] sm:$0xff] %vm617_vm7, %v17792_v5 }
 0x6cd   : > { %v14086_v48 = vpop.f32.mrb[152].mxu0 }
 0x6ce   : > { %v7228_v60 = vadd.f32 %v14086_v48, %v17651_v44  ;;  %v7219_v45 = vpop.f32.mrb[153].mxu0 }
 0x6cf   : > { %v7220_v51 = vadd.f32 %v17651_v44, %v7219_v45  ;;  %v14087_v47 = vpop.f32.mrb[154].mxu0 }
 0x6d0   : > { %v7231_v55 = vadd.f32 %v14087_v47, %v17651_v44  ;;  %v7222_v39 = vpop.f32.mrb[155].mxu0  ;;  %v7276_v17 = vmax.f32 %v7228_v60, 0.0 }
 0x6d1   : > { %v7223_v10 = vadd.f32 %v17651_v44, %v7222_v39  ;;  %v7274_v6 = vmax.f32 %v7220_v51, 0.0 }
 0x6d2   : > { %v7277_v42 = vmax.f32 %v7231_v55, 0.0 }
 0x6d3   : > { %v7275_v46 = vmax.f32 %v7223_v10, 0.0 }
 0x6d4   : > { %v17810_v59 = vpack.c.bf16 %v7277_v42, %v7276_v17 }
 0x6d5   : > { %v17812_v49 = vpack.c.bf16 %v7275_v46, %v7274_v6 }
 0x6d6   : > { %20786 = vst [vmem:[#allocation70_spill] sm:$0xff] %v17810_v59  ;;  %7408 = vst.msk [vmem:[#allocation4 + $0xd8] sm:$0xff] %vm617_vm7, %v17810_v59  ;;  %7356 = vrot.lane.b32.xlu1 %v17810_v59, %s20780_s27 }
 0x6d7   : > { %7311 = vst.msk [vmem:[#allocation4 + $0xf0] sm:$0xff] %vm617_vm7, %v17810_v59  ;;  %7407 = vst.msk [vmem:[#allocation4 + $0xc8] sm:$0xff] %vm617_vm7, %v17812_v49  ;;  %7354 = vrot.lane.b32.xlu0 %v17812_v49, %s20780_s27 }
 0x6d8   : > { %7310 = vst.msk [vmem:[#allocation4 + $0xe0] sm:$0xff] %vm617_vm7, %v17812_v49 }
 0x6dd   : > { %v14090_v48 = vpop.f32.mrb[156].mxu0 }
 0x6de   : > { %v7244_v60 = vadd.f32 %v14090_v48, %v17651_v44  ;;  %v7235_v45 = vpop.f32.mrb[157].mxu0 }
 0x6df   : > { %v7236_v51 = vadd.f32 %v17651_v44, %v7235_v45  ;;  %v14091_v47 = vpop.f32.mrb[158].mxu0 }
 0x6e0   : > { %v7247_v55 = vadd.f32 %v14091_v47, %v17651_v44  ;;  %v7238_v39 = vpop.f32.mrb[159].mxu0  ;;  %v7280_v17 = vmax.f32 %v7244_v60, 0.0  ;;  %v17848_v60 = vld [vmem:[#allocation4 + $0x28] sm:$0xff] }
 0x6e1   : > { %v7239_v10 = vadd.f32 %v17651_v44, %v7238_v39  ;;  %v7278_v6 = vmax.f32 %v7236_v51, 0.0  ;;  %20788 = vst [vmem:[#allocation69_spill] sm:$0xff] %v17848_v60  ;;  %v7450_v45 = vmul.bf16 %v17848_v60, %v20755_v14  ;;  %v7411_v51 = vld [vmem:[#allocation4] sm:$0x80] }
 0x6e2   : > { %v7281_v42 = vmax.f32 %v7247_v55, 0.0  ;;  %v7445_v47 = vmul.bf16 %v7411_v51, %v20752_v13 }
 0x6e3   : > { %v7279_v46 = vmax.f32 %v7239_v10, 0.0  ;;  %v7877_v55 = vshrl.u32 %v7450_v45, 16  ;;  %v17863_v10 = vld [vmem:[#allocation4 + $0x38] sm:$0xff] }
 0x6e4   : > { %v17830_v21 = vpack.c.bf16 %v7281_v42, %v7280_v17  ;;  %v7845_v51 = vshrl.u32 %v7445_v47, 16 }
 0x6e5   : > { %v17832_v22 = vpack.c.bf16 %v7279_v46, %v7278_v6 }
 0x6e6   : > { %20787 = vst [vmem:[#allocation20_spill] sm:$0xff] %v17830_v21  ;;  %7313 = vst.msk [vmem:[#allocation4 + $0x110] sm:$0xff] %vm617_vm7, %v17830_v21  ;;  %7360 = vrot.lane.b32.xlu1 %v17830_v21, %s20780_s27 }
 0x6e7   : > { %7410 = vst.msk [vmem:[#allocation4 + $0xf8] sm:$0xff] %vm617_vm7, %v17830_v21  ;;  %7409 = vst.msk [vmem:[#allocation4 + $0xe8] sm:$0xff] %vm617_vm7, %v17832_v22  ;;  %7358 = vrot.lane.b32.xlu0 %v17832_v22, %s20780_s27  ;;  %s20349_s27 = scalar_lea.hbm %s20419_s19, %s13491_s5 }
 0x6e8   : > { %7312 = vst.msk [vmem:[#allocation4 + $0x100] sm:$0xff] %vm617_vm7, %v17832_v22  ;;  %v7333_v44 = vpop.permute.xlu1 %7332 }
 0x6e9   : > { %7380 = vst.msk [vmem:[#allocation4 + $0x20] sm:$0xff] %vm7378_vm13, %v7333_v44  ;;  %v7331_v48 = vpop.permute.xlu0 %7330 }
 0x6ea   : > { %9110 = vst.msk [vmem:[#allocation2 + $0x18] sm:$0xff] %vm1147_vm2, %v7333_v44  ;;  %9109 = vst.msk [vmem:[#allocation2 + $0x10] sm:$0xff] %vm1147_vm2, %v7331_v48  ;;  %9127 = vrot.lane.b32.xlu1 %v17666_v7, %s20682_s20 }
 0x6eb   : > { %7379 = vst.msk [vmem:[#allocation4 + $0x10] sm:$0xff] %vm7378_vm13, %v7331_v48  ;;  %9125 = vrot.lane.b32.xlu0 %v17671_v9, %s20682_s20  ;;  %v14590_v9 = vld [vmem:[%s20413_s13 + $0xc0] sm:$0xff]   ;;  %v7452_v48 = vmul.bf16 %v17863_v10, %v20754_v53 }
 0x6ee   : > { %9131 = vrot.lane.b32.xlu1 %v17708_v26, %s20682_s20 }
 0x6ef   : > { %9129 = vrot.lane.b32.xlu0 %v17710_v40, %s20682_s20 }
 0x6f0   : > { %v7415_v39 = vld [vmem:[#allocation4 + $0x20] sm:$0xff] }
 0x6f1   : > { %v17869_v42 = vmul.bf16 %v7415_v39, %v20751_v24  ;;  %v7449_v44 = vmul.bf16 %v7415_v39, %v20755_v14 }
 0x6f2   : > { %v7413_v17 = vld [vmem:[#allocation4 + $0x10] sm:$0xff]  ;;  %9135 = vrot.lane.b32.xlu1 %v17730_v1, %s20682_s20  ;;  %v17882_v1 = vrot.slane %v7877_v55, 7  ;;  %v7893_v55 = vshrl.u32 %v7452_v48, 16 }
 0x6f3   : > { %v7447_v6 = vmul.bf16 %v7413_v17, %v20753_v29  ;;  %v7481_v46 = vmul.bf16 %v7413_v17, %v20750_v57  ;;  %7716 = vmatmul.mubr.bf16.vlgmr.msra.gmra.mrb[160].mxu0 %v7413_v17  ;;  %9133 = vrot.lane.b32.xlu0 %v17732_v63, %s20682_s20  ;;  %v8437_v29 = vshll.u32 %v17869_v42, 16  ;;  %v14591_v17 = vld [vmem:[%s20413_s13 + $0xc8] sm:$0xff]   ;;  %v7880_v63 = vshll.u32 %v7450_v45, 16 }
 0x6f4   : > { %13262 = vmatprep.mubr.msk.bf16.mxu0 %vm617_vm7, %v17848_v60  ;;  %8830 = vmatpush1.bf16.msra.mxu0 %v14590_v9  ;;  %v7869_v47 = vshrl.u32 %v7449_v44, 16  ;;  %v7847_v9 = vrot.slane %v7845_v51, 7 }
 0x6f5   : > { %v7849_v13 = vshrl.u32 %v7447_v6, 16  ;;  %v8432_v26 = vshll.u32 %v7481_v46, 16  ;;  %8831 = vmatprep.subr.bf16.mxu0 %v17557_v56  ;;  %v7852_v14 = vshll.u32 %v7447_v6, 16  ;;  %v8430_v7 = vshrl.u32 %v7481_v46, 16  ;;  %v17902_v46 = vld [vmem:[#allocation4 + $0x48] sm:$0xff] }
 0x6f6   : > { %9139 = vrot.lane.b32.xlu1 %v17750_v23, %s20682_s20  ;;  %v17895_v24 = vrot.slane %v8437_v29, 1  ;;  %v7882_v40 = vor.u32 %v7880_v63, %v17882_v1 }
 0x6f7   : > { %v17889_v19 = vrot.slane %v7849_v13, 7  ;;  %v8434_v60 = vrot.slane %v8432_v26, 1  ;;  %9137 = vrot.lane.b32.xlu0 %v17752_v0, %s20682_s20  ;;  %v14592_v13 = vld [vmem:[%s20413_s13 + $0xd0] sm:$0xff]  }
 0x6f8   : > { %8832 = vmatpush1.bf16.msra.mxu0 %v14591_v17  ;;  %v7337_v6 = vpop.permute.xlu1 %7336  ;;  %v7883_v51 = vsel %vm2338_vm6, %v17705_v38, %v7882_v40  ;;  %v7454_v17 = vmul.bf16 %v17902_v46, %v20756_v61  ;;  %v14588_v38 = vld [vmem:[%s20415_s15 + $0x40] sm:$0xff]  }
 0x6f9   : > { %v7854_v45 = vor.u32 %v7852_v14, %v17889_v19  ;;  %v8435_v26 = vor.u32 %v8434_v60, %v8430_v7  ;;  %8833 = vmatprep.subr.bf16.mxu0 %v17557_v56  ;;  %7382 = vst.msk [vmem:[#allocation4 + $0x40] sm:$0xff] %vm7378_vm13, %v7337_v6  ;;  %v7335_v29 = vpop.permute.xlu0 %7334  ;;  %v14587_v7 = vld [vmem:[%s20415_s15 + $0x38] sm:$0xff]   ;;  %v17919_v60 = vrot.slane %v7869_v47, 7 }
 0x6fa   : > { %9112 = vst.msk [vmem:[#allocation2 + $0x28] sm:$0xff] %vm1147_vm2, %v7337_v6  ;;  %9143 = vrot.lane.b32.xlu1 %v17770_v37, %s20682_s20  ;;  %9111 = vst.msk [vmem:[#allocation2 + $0x20] sm:$0xff] %vm1147_vm2, %v7335_v29  ;;  %v14593_v47 = vld [vmem:[%s20413_s13 + $0xd8] sm:$0xff]  }
 0x6fb   : > { %7724 = vmatmul.mubr.bf16.gmra.mrb[164].mxu0 %v7415_v39  ;;  %v7855_v14 = vsel %vm2338_vm6, %v7847_v9, %v7854_v45  ;;  %v17915_v63 = vsel %vm1727_vm5, %v8435_v26, %v17895_v24  ;;  %7381 = vst.msk [vmem:[#allocation4 + $0x30] sm:$0xff] %vm7378_vm13, %v7335_v29  ;;  %9141 = vrot.lane.b32.xlu0 %v17772_v32, %s20682_s20  ;;  %v17925_v39 = vrot.slane %v7893_v55, 7  ;;  %v7872_v9 = vshll.u32 %v7449_v44, 16  ;;  %v14589_v29 = vld [vmem:[%s20415_s15 + $0x48] sm:$0xff]  }
 0x6fc   : > { %20789 = vst [vmem:[#allocation23_spill] sm:$0xff] %v17915_v63  ;;  %13263 = vmatprep.mubr.msk.bf16.mxu0 %vm617_vm7, %v17863_v10  ;;  %8277 = vmatmul.mubr.bf16.vlgmr.msra.gmra.mrb[160].mxu1 %v7855_v14  ;;  %v7896_v45 = vshll.u32 %v7452_v48, 16  ;;  %v7909_v44 = vshrl.u32 %v7454_v17, 16  ;;  %v17946_v48 = vld [vmem:[#allocation4 + $0x58] sm:$0xff] }
 0x6fd   : > { %8834 = vmatpush1.bf16.msra.mxu0 %v14592_v13  ;;  %13290 = vmatprep.mubr.msk.bf16.mxu1 %vm617_vm7, %v7883_v51  ;;  %v7874_v40 = vor.u32 %v7872_v9, %v17919_v60  ;;  %v8453_v9 = vshrl.u32 %v17869_v42, 16  ;;  %v7912_v42 = vshll.u32 %v7454_v17, 16 }
 0x6fe   : > { %14093 = vmatpush3.bf16.msra.mxu1 %v17697_v25  ;;  %9147 = vrot.lane.b32.xlu1 %v17790_v30, %s20682_s20  ;;  %v7898_v55 = vor.u32 %v7896_v45, %v17925_v39  ;;  %v17972_v45 = vrot.slane %v7909_v44, 7  ;;  %v17990_v30 = vld [vmem:[#allocation4 + $0x68] sm:$0xff] }
 0x6ff   : > { %14094 = vmatprep.subr.bf16.mxu1 %v14587_v7  ;;  %9145 = vrot.lane.b32.xlu0 %v17792_v5, %s20682_s20  ;;  %v7875_v51 = vsel %vm2338_vm6, %v17889_v19, %v7874_v40 }
 0x700   : > { %8835 = vmatprep.subr.bf16.mxu0 %v17557_v56  ;;  %v7419_v25 = vld [vmem:[#allocation4 + $0x40] sm:$0xff] }
 0x701   : > { %8836 = vmatpush1.bf16.msra.mxu0 %v14593_v47  ;;  %v17952_v26 = vmul.bf16 %v7419_v25, %v20756_v61  ;;  %v17955_v6 = vmul.bf16 %v7419_v25, %v16093_v11  ;;  %v14594_v47 = vld [vmem:[%s20413_s13 + $0xe0] sm:$0xff]   ;;  %v7456_v61 = vmul.bf16 %v17946_v48, %v20758_v41 }
 0x702   : > { %14095 = vmatpush3.bf16.msra.mxu1 %v14587_v7  ;;  %8837 = vmatprep.subr.bf16.mxu0 %v17557_v56  ;;  %v7417_v13 = vld [vmem:[#allocation4 + $0x30] sm:$0xff] }
 0x703   : > { %9151 = vrot.lane.b32.xlu1 %v17810_v59, %s20682_s20  ;;  %14096 = vmatprep.subr.bf16.mxu1 %v14588_v38  ;;  %v7451_v14 = vmul.bf16 %v7417_v13, %v20754_v53  ;;  %v7485_v7 = vmul.bf16 %v7417_v13, %v16086_v2  ;;  %v8473_v40 = vshll.u32 %v17955_v6, 16  ;;  %v7901_v44 = vshrl.u32 %v17952_v26, 16 }
 0x704   : > { %7732 = vmatmul.mubr.bf16.gmra.mrb[168].mxu0 %v7417_v13  ;;  %9149 = vrot.lane.b32.xlu0 %v17812_v49, %s20682_s20  ;;  %v7899_v13 = vsel %vm2338_vm6, %v17882_v1, %v7898_v55  ;;  %v14595_v1 = vld [vmem:[%s20415_s15 + $0x50] sm:$0xff]   ;;  %v8455_v55 = vor.u32 %v8453_v9, %v17895_v24  ;;  %v14596_v9 = vld [vmem:[%s20413_s13 + $0xe8] sm:$0xff]  }
 0x705   : > { %13264 = vmatprep.mubr.msk.bf16.mxu0 %vm617_vm7, %v17902_v46  ;;  %8285 = vmatmul.mubr.bf16.gmra.mrb[164].mxu1 %v7875_v51  ;;  %v7885_v53 = vshrl.u32 %v7451_v14, 16  ;;  %v8457_v19 = vshll.u32 %v7485_v7, 16  ;;  %v7888_v59 = vshll.u32 %v7451_v14, 16  ;;  %v8469_v63 = vshrl.u32 %v7485_v7, 16 }
 0x706   : > { %13291 = vmatprep.mubr.msk.bf16.mxu1 %vm617_vm7, %v7899_v13  ;;  %14097 = vmatpush3.bf16.msra.mxu1 %v14588_v38  ;;  %v7925_v13 = vshrl.u32 %v7456_v61, 16 }
 0x707   : > { %9155 = vrot.lane.b32.xlu1 %v17830_v21, %s20682_s20  ;;  %14098 = vmatprep.subr.bf16.mxu1 %v14589_v29  ;;  %v7887_v51 = vrot.slane %v7885_v53, 7  ;;  %v8459_v17 = vrot.slane %v8457_v19, 1  ;;  %v7914_v21 = vor.u32 %v7912_v42, %v17972_v45  ;;  %v14601_v19 = vld [vmem:[%s20415_s15 + $0x58] sm:$0xff]  }
 0x708   : > { %9153 = vrot.lane.b32.xlu0 %v17832_v22, %s20682_s20  ;;  %8838 = vmatpush1.bf16.msra.mxu0 %v14594_v47  ;;  %v7341_v38 = vpop.permute.xlu1 %7340  ;;  %v8475_v47 = vrot.slane %v8473_v40, 1  ;;  %v18017_v42 = vrot.slane %v7925_v13, 7 }
 0x709   : > { %8839 = vmatprep.subr.bf16.mxu0 %v17557_v56  ;;  %7384 = vst.msk [vmem:[#allocation4 + $0x60] sm:$0xff] %vm7378_vm13, %v7341_v38  ;;  %v7339_v24 = vpop.permute.xlu0 %7338  ;;  %v7890_v53 = vor.u32 %v7888_v59, %v7887_v51  ;;  %v17996_v14 = vsel %vm1727_vm5, %v8455_v55, %v8459_v17  ;;  %v8471_v7 = vor.u32 %v8469_v63, %v8459_v17  ;;  %v18006_v59 = vrot.slane %v7901_v44, 7  ;;  %v14597_v55 = vld [vmem:[%s20413_s13 + $0xf0] sm:$0xff]   ;;  %v18029_v17 = vld [vmem:[%s20415_s15] sm:$0xff]  }
 0x70a   : > { %9114 = vst.msk [vmem:[#allocation2 + $0x38] sm:$0xff] %vm1147_vm2, %v7341_v38  ;;  %14099 = vmatpush3.bf16.msra.mxu1 %v14589_v29  ;;  %20790 = vst [vmem:[#allocation72_spill] sm:$0xff] %v17996_v14  ;;  %v7458_v29 = vmul.bf16 %v17990_v30, %v20759_v43  ;;  %v7904_v44 = vshll.u32 %v17952_v26, 16 }
 0x70b   : > { %7383 = vst.msk [vmem:[#allocation4 + $0x50] sm:$0xff] %vm7378_vm13, %v7339_v24  ;;  %14100 = vmatprep.subr.bf16.mxu1 %v14595_v1  ;;  %v7891_v63 = vsel %vm2338_vm6, %v17919_v60, %v7890_v53  ;;  %v18013_v40 = vsel %vm1727_vm5, %v8471_v7, %v8475_v47  ;;  %v7928_v60 = vshll.u32 %v7456_v61, 16  ;;  %20792 = vst [vmem:[#allocation71_spill] sm:$0xff] %v18029_v17 }
 0x70c   : > { %9113 = vst.msk [vmem:[#allocation2 + $0x30] sm:$0xff] %vm1147_vm2, %v7339_v24  ;;  %7740 = vmatmul.mubr.bf16.gmra.mrb[172].mxu0 %v7419_v25  ;;  %20791 = vst [vmem:[#allocation22_spill] sm:$0xff] %v18013_v40  ;;  %v7915_v25 = vsel %vm2338_vm6, %v17925_v39, %v7914_v21  ;;  %v7941_v38 = vshrl.u32 %v7458_v29, 16  ;;  %v7906_v21 = vor.u32 %v7904_v44, %v18006_v59  ;;  %v18032_v39 = vld [vmem:[#allocation4 + $0x78] sm:$0xff]  ;;  %v14599_v40 = vld [vmem:[%s20413_s13 + $0x100] sm:$0xff]  }
 0x70d   : > { %13265 = vmatprep.mubr.msk.bf16.mxu0 %vm617_vm7, %v17946_v48  ;;  %8293 = vmatmul.mubr.bf16.gmra.mrb[168].mxu1 %v7891_v63  ;;  %20793 = vst [vmem:[#allocation25_spill] sm:$0xff] %v18032_v39  ;;  %v7930_v61 = vor.u32 %v7928_v60, %v18017_v42  ;;  %v18043_v7 = vmul.bf16 %v18032_v39, %v20761_v15  ;;  %v8485_v63 = vshrl.u32 %v17955_v6, 16 }
 0x70e   : > { %13292 = vmatprep.mubr.msk.bf16.mxu1 %vm617_vm7, %v7915_v25  ;;  %14101 = vmatpush3.bf16.msra.mxu1 %v14595_v1  ;;  %v18050_v25 = vrot.slane %v7941_v38, 7 }
 0x70f   : > { %8840 = vmatpush1.bf16.msra.mxu0 %v14596_v9  ;;  %14102 = vmatprep.subr.bf16.mxu1 %v14601_v19  ;;  %v14598_v9 = vld [vmem:[%s20413_s13 + $0xf8] sm:$0xff]   ;;  %v8487_v38 = vor.u32 %v8485_v63, %v8475_v47  ;;  %v14600_v63 = vld [vmem:[%s20413_s13 + $0x108] sm:$0xff]  }
 0x710   : > { %8841 = vmatprep.subr.bf16.mxu0 %v17557_v56  ;;  %v7423_v26 = vld [vmem:[#allocation4 + $0x60] sm:$0xff] }
 0x711   : > { %v18037_v13 = vmul.bf16 %v7423_v26, %v16124_v34  ;;  %v7457_v44 = vmul.bf16 %v7423_v26, %v20759_v43 }
 0x712   : > { %v7421_v1 = vld [vmem:[#allocation4 + $0x50] sm:$0xff]  ;;  %14103 = vmatpush3.bf16.msra.mxu1 %v14601_v19  ;;  %v7907_v19 = vsel %vm2338_vm6, %v7887_v51, %v7906_v21 }
 0x713   : > { %v7455_v24 = vmul.bf16 %v7421_v1, %v20758_v41  ;;  %v7489_v53 = vmul.bf16 %v7421_v1, %v16106_v4  ;;  %8842 = vmatpush1.bf16.msra.mxu0 %v14597_v55  ;;  %14136 = vmatprep.subr.bf16.mxu1 %v18029_v17  ;;  %v7931_v55 = vsel %vm2338_vm6, %v17972_v45, %v7930_v61  ;;  %v8505_v6 = vshll.u32 %v18037_v13, 16 }
 0x714   : > { %7748 = vmatmul.mubr.bf16.gmra.mrb[176].mxu0 %v7421_v1  ;;  %8843 = vmatprep.subr.bf16.mxu0 %v17557_v56  ;;  %v7944_v1 = vshll.u32 %v7458_v29, 16  ;;  %v7933_v14 = vshrl.u32 %v7457_v44, 16 }
 0x715   : > { %v7917_v60 = vshrl.u32 %v7455_v24, 16  ;;  %v8489_v41 = vshll.u32 %v7489_v53, 16  ;;  %13266 = vmatprep.mubr.msk.bf16.mxu0 %vm617_vm7, %v17990_v30  ;;  %8301 = vmatmul.mubr.bf16.gmra.mrb[172].mxu1 %v7907_v19  ;;  %v7920_v21 = vshll.u32 %v7455_v24, 16  ;;  %v8501_v43 = vshrl.u32 %v7489_v53, 16 }
 0x716   : > { %13293 = vmatprep.mubr.msk.bf16.mxu1 %vm617_vm7, %v7931_v55  ;;  %v7957_v19 = vshrl.u32 %v18043_v7, 16  ;;  %v7946_v45 = vor.u32 %v7944_v1, %v18050_v25  ;;  %v18067_v55 = vld [vmem:[#allocation4 + $0x88] sm:$0xff]  ;;  %v8507_v53 = vrot.slane %v8505_v6, 1 }
 0x717   : > { %v7919_v51 = vrot.slane %v7917_v60, 7  ;;  %8844 = vmatpush1.bf16.msra.mxu0 %v14598_v9  ;;  %v8491_v17 = vrot.slane %v8489_v41, 1  ;;  %20794 = vst [vmem:[#allocation74_spill] sm:$0xff] %v18067_v55  ;;  %v7462_v60 = vmul.bf16 %v18067_v55, %v20763_v35 }
 0x718   : > { %8845 = vmatprep.subr.bf16.mxu0 %v17557_v56  ;;  %v7345_v29 = vpop.permute.xlu1 %7344  ;;  %v18089_v6 = vrot.slane %v7957_v19, 7 }
 0x719   : > { %v7922_v61 = vor.u32 %v7920_v21, %v7919_v51  ;;  %v18070_v47 = vsel %vm1727_vm5, %v8487_v38, %v8491_v17  ;;  %v8503_v24 = vor.u32 %v8501_v43, %v8491_v17  ;;  %7386 = vst.msk [vmem:[#allocation4 + $0x80] sm:$0xff] %vm7378_vm13, %v7345_v29  ;;  %v7343_v41 = vpop.permute.xlu0 %7342  ;;  %v7935_v17 = vrot.slane %v7933_v14, 7  ;;  %v14602_v14 = vld [vmem:[%s20413_s13 + $0x110] sm:$0xff]   ;;  %v18098_v38 = vld [vmem:[#allocation4 + $0x98] sm:$0xff] }
 0x71a   : > { %20795 = vst [vmem:[#allocation24_spill] sm:$0xff] %v18070_v47  ;;  %9116 = vst.msk [vmem:[#allocation2 + $0x48] sm:$0xff] %vm1147_vm2, %v7345_v29  ;;  %v14681_v21 = vld [vmem:[#allocation4] sm:$0xff] }
 0x71b   : > { %7385 = vst.msk [vmem:[#allocation4 + $0x70] sm:$0xff] %vm7378_vm13, %v7343_v41  ;;  %v7923_v9 = vsel %vm2338_vm6, %v18006_v59, %v7922_v61  ;;  %8846 = vmatpush1.bf16.msra.mxu0 %v14599_v40  ;;  %v18082_v43 = vsel %vm1727_vm5, %v8503_v24, %v8507_v53  ;;  %v7947_v59 = vsel %vm2338_vm6, %v18017_v42, %v7946_v45  ;;  %v7936_v40 = vshll.u32 %v7457_v44, 16  ;;  %v14603_v24 = vld [vmem:[%s20413_s13 + $0x118] sm:$0xff]  }
 0x71c   : > { %9115 = vst.msk [vmem:[#allocation2 + $0x40] sm:$0xff] %vm1147_vm2, %v7343_v41  ;;  %20796 = vst [vmem:[#allocation73_spill] sm:$0xff] %v18082_v43  ;;  %7756 = vmatmul.mubr.bf16.gmra.mrb[180].mxu0 %v7423_v26  ;;  %8847 = vmatprep.subr.bf16.mxu0 %v17557_v56  ;;  %v7960_v26 = vshll.u32 %v18043_v7, 16  ;;  %v7973_v56 = vshrl.u32 %v7462_v60, 16  ;;  %v7464_v61 = vmul.bf16 %v18098_v38, %v20765_v50  ;;  %v8517_v41 = vshrl.u32 %v18037_v13, 16 }
 0x71d   : > { %13267 = vmatprep.mubr.msk.bf16.mxu0 %vm617_vm7, %v18032_v39  ;;  %8309 = vmatmul.mubr.bf16.gmra.mrb[176].mxu1 %v7923_v9  ;;  %v7938_v1 = vor.u32 %v7936_v40, %v7935_v17  ;;  %v7976_v13 = vshll.u32 %v7462_v60, 16  ;;  %v18123_v39 = vld [vmem:[#allocation4 + $0xa8] sm:$0xff] }
 0x71e   : > { %13294 = vmatprep.mubr.msk.bf16.mxu1 %vm617_vm7, %v7947_v59  ;;  %v7962_v19 = vor.u32 %v7960_v26, %v18089_v6  ;;  %v18112_v9 = vrot.slane %v7973_v56, 7  ;;  %v8519_v56 = vor.u32 %v8517_v41, %v8507_v53  ;;  %v7989_v47 = vshrl.u32 %v7464_v61, 16 }
 0x71f   : > { %8848 = vmatpush1.bf16.msra.mxu0 %v14600_v63  ;;  %v7939_v63 = vsel %vm2338_vm6, %v7919_v51, %v7938_v1 }
 0x720   : > { %8849 = vmatprep.subr.bf16.mxu0 %v14681_v21  ;;  %v7427_v29 = vld [vmem:[#allocation4 + $0x80] sm:$0xff] }
 0x721   : > { %v18102_v44 = vmul.bf16 %v7427_v29, %v16170_v27  ;;  %v7461_v59 = vmul.bf16 %v7427_v29, %v20763_v35  ;;  %v7978_v27 = vor.u32 %v7976_v13, %v18112_v9 }
 0x722   : > { %v7425_v42 = vld [vmem:[#allocation4 + $0x70] sm:$0xff] }
 0x723   : > { %v7459_v7 = vmul.bf16 %v7425_v42, %v20761_v15  ;;  %v7493_v45 = vmul.bf16 %v7425_v42, %v16142_v28  ;;  %8850 = vmatpush1.bf16.msra.mxu0 %v14602_v14  ;;  %v7963_v14 = vsel %vm2338_vm6, %v18050_v25, %v7962_v19  ;;  %v8537_v15 = vshll.u32 %v18102_v44, 16 }
 0x724   : > { %7764 = vmatmul.mubr.bf16.gmra.mrb[184].mxu0 %v7425_v42  ;;  %8851 = vmatprep.subr.bf16.mxu0 %v14681_v21  ;;  %v7965_v43 = vshrl.u32 %v7461_v59, 16  ;;  %v7968_v41 = vshll.u32 %v7461_v59, 16 }
 0x725   : > { %v7949_v40 = vshrl.u32 %v7459_v7, 16  ;;  %v8521_v26 = vshll.u32 %v7493_v45, 16  ;;  %13268 = vmatprep.mubr.msk.bf16.mxu0 %vm617_vm7, %v18067_v55  ;;  %8317 = vmatmul.mubr.bf16.gmra.mrb[180].mxu1 %v7939_v63  ;;  %v7952_v51 = vshll.u32 %v7459_v7, 16  ;;  %v8533_v1 = vshrl.u32 %v7493_v45, 16 }
 0x726   : > { %13295 = vmatprep.mubr.msk.bf16.mxu1 %vm617_vm7, %v7963_v14  ;;  %v8539_v19 = vrot.slane %v8537_v15, 1  ;;  %v7967_v45 = vrot.slane %v7965_v43, 7  ;;  %v7991_v15 = vrot.slane %v7989_v47, 7 }
 0x727   : > { %v7951_v42 = vrot.slane %v7949_v40, 7  ;;  %8852 = vmatpush1.bf16.msra.mxu0 %v14603_v24  ;;  %v8523_v35 = vrot.slane %v8521_v26, 1  ;;  %v7979_v24 = vsel %vm2338_vm6, %v18089_v6, %v7978_v27  ;;  %v18143_v26 = vld [vmem:[#allocation4 + $0xb8] sm:$0xff]  ;;  %v8549_v6 = vshrl.u32 %v18102_v44, 16 }
 0x728   : > { %10829 = vmatprep.subr.bf16.mxu0 %v14681_v21  ;;  %v7349_v63 = vpop.permute.xlu1 %7348  ;;  %v7970_v40 = vor.u32 %v7968_v41, %v7967_v45  ;;  %v7468_v27 = vmul.bf16 %v18143_v26, %v20704_v54 }
 0x729   : > { %v7954_v55 = vor.u32 %v7952_v51, %v7951_v42  ;;  %v18126_v25 = vsel %vm1727_vm5, %v8519_v56, %v8523_v35  ;;  %v8535_v60 = vor.u32 %v8533_v1, %v8523_v35  ;;  %7388 = vst.msk [vmem:[#allocation4 + $0xa0] sm:$0xff] %vm7378_vm13, %v7349_v63  ;;  %v7347_v53 = vpop.permute.xlu0 %7346  ;;  %v7466_v35 = vmul.bf16 %v18123_v39, %v15976_v58 }
 0x72a   : > { %9118 = vst.msk [vmem:[#allocation2 + $0x58] sm:$0xff] %vm1147_vm2, %v7349_v63  ;;  %9117 = vst.msk [vmem:[#allocation2 + $0x50] sm:$0xff] %vm1147_vm2, %v7347_v53  ;;  %v7971_v59 = vsel %vm2338_vm6, %v7951_v42, %v7970_v40  ;;  %v8551_v44 = vor.u32 %v8549_v6, %v8539_v19  ;;  %v8021_v40 = vshrl.u32 %v7468_v27, 16 }
 0x72b   : > { %7387 = vst.msk [vmem:[#allocation4 + $0x90] sm:$0xff] %vm7378_vm13, %v7347_v53  ;;  %v7955_v21 = vsel %vm2338_vm6, %v7935_v17, %v7954_v55  ;;  %v18134_v7 = vsel %vm1727_vm5, %v8535_v60, %v8539_v19  ;;  %v7992_v55 = vshll.u32 %v7464_v61, 16  ;;  %v8005_v17 = vshrl.u32 %v7466_v35, 16 }
 0x72c   : > { %20797 = vst [vmem:[#allocation27_spill] sm:$0xff] %v18134_v7  ;;  %7772 = vmatmul.mubr.bf16.gmra.mrb[188].mxu0 %v7427_v29 }
 0x72d   : > { %13269 = vmatprep.mubr.msk.bf16.mxu0 %vm617_vm7, %v18098_v38  ;;  %8325 = vmatmul.mubr.bf16.gmra.mrb[184].mxu1 %v7955_v21  ;;  %v7994_v43 = vor.u32 %v7992_v55, %v7991_v15  ;;  %v8007_v61 = vrot.slane %v8005_v17, 7  ;;  %v8008_v21 = vshll.u32 %v7466_v35, 16 }
 0x72e   : > { %13296 = vmatprep.mubr.msk.bf16.mxu1 %vm617_vm7, %v7979_v24 }
 0x72f   : > { %v7995_v60 = vsel %vm2338_vm6, %v18112_v9, %v7994_v43 }
 0x730   : > { %v7431_v29 = vld [vmem:[#allocation4 + $0xa0] sm:$0xff] }
 0x731   : > { %v18146_v13 = vmul.bf16 %v7431_v29, %v20711_v20  ;;  %v7465_v51 = vmul.bf16 %v7431_v29, %v15976_v58 }
 0x732   : > { %v7429_v14 = vld [vmem:[#allocation4 + $0x90] sm:$0xff] }
 0x733   : > { %v7463_v47 = vmul.bf16 %v7429_v14, %v20765_v50  ;;  %v7497_v56 = vmul.bf16 %v7429_v14, %v16188_v52  ;;  %v8569_v53 = vshll.u32 %v18146_v13, 16  ;;  %v7997_v17 = vshrl.u32 %v7465_v51, 16 }
 0x734   : > { %7780 = vmatmul.mubr.bf16.gmra.mrb[192].mxu0 %v7429_v14  ;;  %v8010_v14 = vor.u32 %v8008_v21, %v8007_v61 }
 0x735   : > { %v7981_v1 = vshrl.u32 %v7463_v47, 16  ;;  %v8553_v63 = vshll.u32 %v7497_v56, 16  ;;  %13270 = vmatprep.mubr.msk.bf16.mxu0 %vm617_vm7, %v18123_v39  ;;  %8333 = vmatmul.mubr.bf16.gmra.mrb[188].mxu1 %v7971_v59  ;;  %v7984_v41 = vshll.u32 %v7463_v47, 16  ;;  %v8565_v42 = vshrl.u32 %v7497_v56, 16  ;;  %v18161_v59 = vld [vmem:[#allocation4 + $0xc8] sm:$0xff] }
 0x736   : > { %13297 = vmatprep.mubr.msk.bf16.mxu1 %vm617_vm7, %v7995_v60  ;;  %v8571_v50 = vrot.slane %v8569_v53, 1  ;;  %20798 = vst [vmem:[#allocation76_spill] sm:$0xff] %v18161_v59  ;;  %v7999_v56 = vrot.slane %v7997_v17, 7  ;;  %v7470_v6 = vmul.bf16 %v18161_v59, %v20705_v36  ;;  %v8024_v60 = vshll.u32 %v7468_v27, 16  ;;  %v18180_v53 = vld [vmem:[#allocation4 + $0xd8] sm:$0xff] }
 0x737   : > { %v7983_v24 = vrot.slane %v7981_v1, 7  ;;  %v8555_v55 = vrot.slane %v8553_v63, 1  ;;  %v8023_v1 = vrot.slane %v8021_v40, 7  ;;  %v8000_v63 = vshll.u32 %v7465_v51, 16  ;;  %20801 = vst [vmem:[#allocation29_spill] sm:$0xff] %v18180_v53 }
 0x738   : > { %v7353_v58 = vpop.permute.xlu1 %7352  ;;  %v8581_v51 = vshrl.u32 %v18146_v13, 16 }
 0x739   : > { %v7986_v7 = vor.u32 %v7984_v41, %v7983_v24  ;;  %v18164_v9 = vsel %vm1727_vm5, %v8551_v44, %v8555_v55  ;;  %v8567_v43 = vor.u32 %v8565_v42, %v8555_v55  ;;  %7390 = vst.msk [vmem:[#allocation4 + $0xc0] sm:$0xff] %vm7378_vm13, %v7353_v58  ;;  %v7351_v19 = vpop.permute.xlu0 %7350 }
 0x73a   : > { %20799 = vst [vmem:[#allocation26_spill] sm:$0xff] %v18164_v9  ;;  %9120 = vst.msk [vmem:[#allocation2 + $0x68] sm:$0xff] %vm1147_vm2, %v7353_v58  ;;  %v8011_v58 = vsel %vm2338_vm6, %v7991_v15, %v8010_v14  ;;  %v7472_v15 = vmul.bf16 %v18180_v53, %v20706_v31 }
 0x73b   : > { %7389 = vst.msk [vmem:[#allocation4 + $0xb0] sm:$0xff] %vm7378_vm13, %v7351_v19  ;;  %v7987_v35 = vsel %vm2338_vm6, %v7967_v45, %v7986_v7  ;;  %v18172_v47 = vsel %vm1727_vm5, %v8567_v43, %v8571_v50  ;;  %v8037_v7 = vshrl.u32 %v7470_v6, 16  ;;  %v8002_v45 = vor.u32 %v8000_v63, %v7999_v56 }
 0x73c   : > { %9119 = vst.msk [vmem:[#allocation2 + $0x60] sm:$0xff] %vm1147_vm2, %v7351_v19  ;;  %20800 = vst [vmem:[#allocation75_spill] sm:$0xff] %v18172_v47  ;;  %7788 = vmatmul.mubr.bf16.gmra.mrb[196].mxu0 %v7431_v29  ;;  %v8026_v29 = vor.u32 %v8024_v60, %v8023_v1  ;;  %v8040_v63 = vshll.u32 %v7470_v6, 16 }
 0x73d   : > { %13271 = vmatprep.mubr.msk.bf16.mxu0 %vm617_vm7, %v18143_v26  ;;  %8341 = vmatmul.mubr.bf16.gmra.mrb[192].mxu1 %v7987_v35  ;;  %v8039_v27 = vrot.slane %v8037_v7, 7  ;;  %v8003_v17 = vsel %vm2338_vm6, %v7983_v24, %v8002_v45 }
 0x73e   : > { %13298 = vmatprep.mubr.msk.bf16.mxu1 %vm617_vm7, %v8011_v58  ;;  %v8027_v19 = vsel %vm2338_vm6, %v8007_v61, %v8026_v29  ;;  %v8583_v58 = vor.u32 %v8581_v51, %v8571_v50  ;;  %v18200_v29 = vld [vmem:[#allocation4 + $0xe8] sm:$0xff] }
 0x73f   : > { %20803 = vst [vmem:[#allocation81_spill] sm:$0xff] %v18200_v29  ;;  %v7474_v51 = vmul.bf16 %v18200_v29, %v20772_v33 }
 0x740   : > { %v7435_v21 = vld [vmem:[#allocation4 + $0xc0] sm:$0xff] }
 0x741   : > { %v18183_v41 = vmul.bf16 %v7435_v21, %v20714_v12  ;;  %v7469_v40 = vmul.bf16 %v7435_v21, %v20705_v36  ;;  %v8042_v36 = vor.u32 %v8040_v63, %v8039_v27  ;;  %v18216_v63 = vld [vmem:[#allocation4 + $0xf8] sm:$0xff] }
 0x742   : > { %v7433_v44 = vld [vmem:[#allocation4 + $0xb0] sm:$0xff]  ;;  %20805 = vst [vmem:[#allocation83_spill] sm:$0xff] %v18216_v63 }
 0x743   : > { %v7467_v42 = vmul.bf16 %v7433_v44, %v20704_v54  ;;  %v7501_v55 = vmul.bf16 %v7433_v44, %v20713_v3  ;;  %v8601_v35 = vshll.u32 %v18183_v41, 16  ;;  %v8029_v45 = vshrl.u32 %v7469_v40, 16 }
 0x744   : > { %7796 = vmatmul.mubr.bf16.gmra.mrb[200].mxu0 %v7433_v44  ;;  %v8053_v44 = vshrl.u32 %v7472_v15, 16 }
 0x745   : > { %v8013_v14 = vshrl.u32 %v7467_v42, 16  ;;  %v8585_v43 = vshll.u32 %v7501_v55, 16  ;;  %13272 = vmatprep.mubr.msk.bf16.mxu0 %vm617_vm7, %v18161_v59  ;;  %8349 = vmatmul.mubr.bf16.gmra.mrb[196].mxu1 %v8003_v17  ;;  %v8016_v60 = vshll.u32 %v7467_v42, 16  ;;  %v8597_v24 = vshrl.u32 %v7501_v55, 16 }
 0x746   : > { %13299 = vmatprep.mubr.msk.bf16.mxu1 %vm617_vm7, %v8027_v19  ;;  %v8603_v59 = vrot.slane %v8601_v35, 1  ;;  %v8031_v55 = vrot.slane %v8029_v45, 7  ;;  %v8032_v19 = vshll.u32 %v7469_v40, 16  ;;  %v8056_v35 = vshll.u32 %v7472_v15, 16 }
 0x747   : > { %v8015_v13 = vrot.slane %v8013_v14, 7  ;;  %v8587_v7 = vrot.slane %v8585_v43, 1  ;;  %v8055_v14 = vrot.slane %v8053_v44, 7  ;;  %v8043_v43 = vsel %vm2338_vm6, %v8023_v1, %v8042_v36 }
 0x748   : > { %v7357_v17 = vpop.permute.xlu1 %7356  ;;  %v7476_v36 = vmul.bf16 %v18216_v63, %v20775_v16  ;;  %v8613_v1 = vshrl.u32 %v18183_v41, 16 }
 0x749   : > { %v18198_v54 = vsel %vm1727_vm5, %v8583_v58, %v8587_v7  ;;  %v8599_v47 = vor.u32 %v8597_v24, %v8587_v7  ;;  %v8018_v61 = vor.u32 %v8016_v60, %v8015_v13  ;;  %7392 = vst.msk [vmem:[#allocation4 + $0xe0] sm:$0xff] %vm7378_vm13, %v7357_v17  ;;  %v7355_v50 = vpop.permute.xlu0 %7354  ;;  %v8034_v58 = vor.u32 %v8032_v19, %v8031_v55 }
 0x74a   : > { %20802 = vst [vmem:[#allocation28_spill] sm:$0xff] %v18198_v54  ;;  %9122 = vst.msk [vmem:[#allocation2 + $0x78] sm:$0xff] %vm1147_vm2, %v7357_v17  ;;  %v8072_v19 = vshll.u32 %v7474_v51, 16 }
 0x74b   : > { %7391 = vst.msk [vmem:[#allocation4 + $0xd0] sm:$0xff] %vm7378_vm13, %v7355_v50  ;;  %v18207_v6 = vsel %vm1727_vm5, %v8599_v47, %v8603_v59  ;;  %v8019_v42 = vsel %vm2338_vm6, %v7999_v56, %v8018_v61  ;;  %v8069_v47 = vshrl.u32 %v7474_v51, 16  ;;  %v8058_v56 = vor.u32 %v8056_v35, %v8055_v14 }
 0x74c   : > { %9121 = vst.msk [vmem:[#allocation2 + $0x70] sm:$0xff] %vm1147_vm2, %v7355_v50  ;;  %20804 = vst [vmem:[#allocation82_spill] sm:$0xff] %v18207_v6  ;;  %7804 = vmatmul.mubr.bf16.gmra.mrb[204].mxu0 %v7435_v21  ;;  %v8035_v40 = vsel %vm2338_vm6, %v8015_v13, %v8034_v58 }
 0x74d   : > { %13273 = vmatprep.mubr.msk.bf16.mxu0 %vm617_vm7, %v18180_v53  ;;  %8357 = vmatmul.mubr.bf16.gmra.mrb[200].mxu1 %v8019_v42  ;;  %v18226_v15 = vrot.slane %v8069_v47, 7  ;;  %v8059_v50 = vsel %vm2338_vm6, %v8039_v27, %v8058_v56 }
 0x74e   : > { %13300 = vmatprep.mubr.msk.bf16.mxu1 %vm617_vm7, %v8043_v43  ;;  %v8615_v43 = vor.u32 %v8613_v1, %v8603_v59 }
 0x750   : > { %v7439_v21 = vld [vmem:[#allocation4 + $0xe0] sm:$0xff] }
 0x751   : > { %v18219_v7 = vmul.bf16 %v7439_v21, %v20716_v18  ;;  %v7473_v44 = vmul.bf16 %v7439_v21, %v20772_v33  ;;  %v8074_v33 = vor.u32 %v8072_v19, %v18226_v15  ;;  %v8088_v19 = vshll.u32 %v7476_v36, 16 }
 0x752   : > { %v7437_v60 = vld [vmem:[#allocation4 + $0xd0] sm:$0xff] }
 0x753   : > { %v7471_v24 = vmul.bf16 %v7437_v60, %v20706_v31  ;;  %v7505_v45 = vmul.bf16 %v7437_v60, %v20715_v8  ;;  %v8633_v42 = vshll.u32 %v18219_v7, 16  ;;  %v8061_v58 = vshrl.u32 %v7473_v44, 16 }
 0x754   : > { %7812 = vmatmul.mubr.bf16.gmra.mrb[208].mxu0 %v7437_v60  ;;  %v8085_v60 = vshrl.u32 %v7476_v36, 16 }
 0x755   : > { %v8045_v17 = vshrl.u32 %v7471_v24, 16  ;;  %v8617_v61 = vshll.u32 %v7505_v45, 16  ;;  %13274 = vmatprep.mubr.msk.bf16.mxu0 %vm617_vm7, %v18200_v29  ;;  %8365 = vmatmul.mubr.bf16.gmra.mrb[204].mxu1 %v8035_v40  ;;  %v8048_v35 = vshll.u32 %v7471_v24, 16  ;;  %v8629_v13 = vshrl.u32 %v7505_v45, 16  ;;  %v18247_v45 = vld [vmem:[#allocation4 + $0x108] sm:$0xff] }
 0x756   : > { %13301 = vmatprep.mubr.msk.bf16.mxu1 %vm617_vm7, %v8059_v50  ;;  %v8635_v27 = vrot.slane %v8633_v42, 1  ;;  %20808 = vst [vmem:[#allocation86_spill] sm:$0xff] %v18247_v45  ;;  %v18249_v1 = vrot.slane %v8061_v58, 7  ;;  %v14682_v50 = vld [vmem:[#allocation4 + $0x18] sm:$0xff] }
 0x757   : > { %v8047_v41 = vrot.slane %v8045_v17, 7  ;;  %v8619_v47 = vrot.slane %v8617_v61, 1  ;;  %v18253_v17 = vrot.slane %v8085_v60, 7  ;;  %v8075_v61 = vsel %vm2338_vm6, %v8055_v14, %v8074_v33  ;;  %v20810_v33 = vld [vmem:[#allocation48_spill] sm:$0xff]  ;;  %v20811_v14 = vld [vmem:[#allocation69_spill] sm:$0xff] }
 0x758   : > { %v7361_v6 = vpop.permute.xlu1 %7360  ;;  %v18257_v42 = vmul.bf16 %v14682_v50, %v20750_v57  ;;  %v20815_v50 = vld [vmem:[#allocation67_spill] sm:$0xff] }
 0x759   : > { %v18237_v31 = vsel %vm1727_vm5, %v8615_v43, %v8619_v47  ;;  %v8631_v40 = vor.u32 %v8629_v13, %v8619_v47  ;;  %v8050_v56 = vor.u32 %v8048_v35, %v8047_v41  ;;  %7394 = vst.msk [vmem:[#allocation4 + $0x100] sm:$0xff] %vm7378_vm13, %v7361_v6  ;;  %v7359_v59 = vpop.permute.xlu0 %7358  ;;  %v8064_v43 = vshll.u32 %v7473_v44, 16  ;;  %v20809_v35 = vld [vmem:[#allocation68_spill] sm:$0xff]  ;;  %v20812_v44 = vld [vmem:[#allocation65_spill] sm:$0xff] }
 0x75a   : > { %20806 = vst [vmem:[#allocation84_spill] sm:$0xff] %v18237_v31  ;;  %9124 = vst.msk [vmem:[#allocation2 + $0x88] sm:$0xff] %vm1147_vm2, %v7361_v6  ;;  %v18270_v47 = vmul.bf16 %v20811_v14, %v20810_v33  ;;  %v8090_v60 = vor.u32 %v8088_v19, %v18253_v17  ;;  %v8444_v36 = vshll.u32 %v18257_v42, 16  ;;  %v8645_v14 = vshrl.u32 %v18219_v7, 16 }
 0x75b   : > { %7393 = vst.msk [vmem:[#allocation4 + $0xf0] sm:$0xff] %vm7378_vm13, %v7359_v59  ;;  %v18244_v51 = vsel %vm1727_vm5, %v8631_v40, %v8635_v27  ;;  %v8051_v24 = vsel %vm2338_vm6, %v8031_v55, %v8050_v56  ;;  %v8066_v13 = vor.u32 %v8064_v43, %v18249_v1 }
 0x75c   : > { %9123 = vst.msk [vmem:[#allocation2 + $0x80] sm:$0xff] %vm1147_vm2, %v7359_v59  ;;  %20807 = vst [vmem:[#allocation85_spill] sm:$0xff] %v18244_v51  ;;  %7820 = vmatmul.mubr.bf16.gmra.mrb[212].mxu0 %v7439_v21  ;;  %v9128_v6 = vpop.permute.xlu1 %9127  ;;  %v18263_v21 = vmul.bf16 %v18247_v45, %v20776_v62  ;;  %v8647_v29 = vor.u32 %v8645_v14, %v8635_v27 }
 0x75d   : > { %13275 = vmatprep.mubr.msk.bf16.mxu0 %vm617_vm7, %v18216_v63  ;;  %8373 = vmatmul.mubr.bf16.gmra.mrb[208].mxu1 %v8051_v24  ;;  %9174 = vst.msk [vmem:[#allocation2 + $0x10] sm:$0xff] %vm1164_vm1, %v9128_v6  ;;  %v9126_v55 = vpop.permute.xlu0 %9125  ;;  %v20813_v6 = vld [vmem:[#allocation62_spill] sm:$0xff]  ;;  %v8446_v63 = vrot.slane %v8444_v36, 1 }
 0x75e   : > { %13302 = vmatprep.mubr.msk.bf16.mxu1 %vm617_vm7, %v8075_v61  ;;  %9191 = vst.msk [vmem:[#allocation2 + $0x10] sm:$0xff] %vm1229_vm3, %v20809_v35  ;;  %v8101_v24 = vshrl.u32 %v18263_v21, 16  ;;  %v8449_v35 = vshll.u32 %v18270_v47, 16  ;;  %v8104_v27 = vshll.u32 %v18263_v21, 16 }
 0x75f   : > { %9173 = vst.msk [vmem:[#allocation2 + $0x8] sm:$0xff] %vm1164_vm1, %v9126_v55  ;;  %v20816_v55 = vld [vmem:[#allocation61_spill] sm:$0xff] }
 0x760   : > { %9190 = vst.msk [vmem:[#allocation2 + $0x8] sm:$0xff] %vm1229_vm3, %v20812_v44  ;;  %v9132_v58 = vpop.permute.xlu1 %9131  ;;  %v7443_v40 = vld [vmem:[#allocation4 + $0x100] sm:$0xff]  ;;  %v20817_v44 = vld [vmem:[#allocation19_spill] sm:$0xff] }
 0x761   : > { %9176 = vst.msk [vmem:[#allocation2 + $0x20] sm:$0xff] %vm1164_vm1, %v9132_v58  ;;  %v9130_v56 = vpop.permute.xlu0 %9129  ;;  %v18280_v61 = vmul.bf16 %v7443_v40, %v20813_v6  ;;  %v8067_v58 = vsel %vm2338_vm6, %v8047_v41, %v8066_v13  ;;  %v7477_v51 = vmul.bf16 %v7443_v40, %v20776_v62  ;;  %v8103_v13 = vrot.slane %v8101_v24, 7 }
 0x762   : > { %v7441_v59 = vld [vmem:[#allocation4 + $0xf0] sm:$0xff]  ;;  %9193 = vst.msk [vmem:[#allocation2 + $0x20] sm:$0xff] %vm1229_vm3, %v20815_v50 }
 0x763   : > { %20814 = vst [vmem:[#allocation68_spill] sm:$0xff] %v18280_v61  ;;  %9175 = vst.msk [vmem:[#allocation2 + $0x18] sm:$0xff] %vm1164_vm1, %v9130_v56  ;;  %v7475_v43 = vmul.bf16 %v7441_v59, %v20775_v16  ;;  %v7509_v19 = vmul.bf16 %v7441_v59, %v20816_v55  ;;  %v8091_v16 = vsel %vm2338_vm6, %v18226_v15, %v8090_v60  ;;  %v8665_v7 = vshll.u32 %v18280_v61, 16  ;;  %v20818_v60 = vld [vmem:[#allocation18_spill] sm:$0xff] }
 0x764   : > { %9192 = vst.msk [vmem:[#allocation2 + $0x18] sm:$0xff] %vm1229_vm3, %v20817_v44  ;;  %7828 = vmatmul.mubr.bf16.gmra.mrb[216].mxu0 %v7441_v59  ;;  %v9136_v56 = vpop.permute.xlu1 %9135  ;;  %v8442_v15 = vshrl.u32 %v18257_v42, 16  ;;  %v8093_v36 = vshrl.u32 %v7477_v51, 16  ;;  %v8106_v21 = vor.u32 %v8104_v27, %v8103_v13 }
 0x765   : > { %v8077_v31 = vshrl.u32 %v7475_v43, 16  ;;  %v8649_v50 = vshll.u32 %v7509_v19, 16  ;;  %8381 = vmatmul.mubr.bf16.gmra.mrb[212].mxu1 %v8067_v58  ;;  %13276 = vmatprep.mubr.msk.bf16.mxu0 %vm617_vm7, %v18247_v45  ;;  %9178 = vst.msk [vmem:[#allocation2 + $0x30] sm:$0xff] %vm1164_vm1, %v9136_v56  ;;  %v9134_v41 = vpop.permute.xlu0 %9133  ;;  %v8080_v44 = vshll.u32 %v7475_v43, 16  ;;  %v8661_v62 = vshrl.u32 %v7509_v19, 16 }
 0x766   : > { %13303 = vmatprep.mubr.msk.bf16.mxu1 %vm617_vm7, %v8091_v16  ;;  %9195 = vst.msk [vmem:[#allocation2 + $0x30] sm:$0xff] %vm1229_vm3, %v17752_v0  ;;  %v8451_v16 = vrot.slane %v8449_v35, 1  ;;  %v18310_v19 = vrot.slane %v8665_v7, 1  ;;  %v7486_v0 = vmul.bf16 %v17863_v10, %v16086_v2  ;;  %v8095_v10 = vrot.slane %v8093_v36, 7 }
 0x767   : > { %v8079_v59 = vrot.slane %v8077_v31, 7  ;;  %v8651_v58 = vrot.slane %v8649_v50, 1  ;;  %9177 = vst.msk [vmem:[#allocation2 + $0x28] sm:$0xff] %vm1164_vm1, %v9134_v41  ;;  %v8447_v50 = vor.u32 %v8446_v63, %v8442_v15  ;;  %v8107_v35 = vsel %vm2338_vm6, %v18253_v17, %v8106_v21 }
 0x768   : > { %9194 = vst.msk [vmem:[#allocation2 + $0x28] sm:$0xff] %vm1229_vm3, %v20818_v60  ;;  %v9140_v43 = vpop.permute.xlu1 %9139  ;;  %20820 = vst [vmem:[#allocation65_spill] sm:$0xff] %v18310_v19  ;;  %v8461_v56 = vshrl.u32 %v18270_v47, 16  ;;  %v8465_v7 = vshll.u32 %v7486_v0, 16  ;;  %v8096_v41 = vshll.u32 %v7477_v51, 16  ;;  %v7490_v60 = vmul.bf16 %v17946_v48, %v16106_v4  ;;  %v20824_v48 = vld [vmem:[#allocation70_spill] sm:$0xff] }
 0x769   : > { %v18308_v24 = vsel %vm1727_vm5, %v8647_v29, %v8651_v58  ;;  %v8663_v31 = vor.u32 %v8661_v62, %v8651_v58  ;;  %v8082_v14 = vor.u32 %v8080_v44, %v8079_v59  ;;  %9180 = vst.msk [vmem:[#allocation2 + $0x40] sm:$0xff] %vm1164_vm1, %v9140_v43  ;;  %v9138_v42 = vpop.permute.xlu0 %9137  ;;  %v8452_v63 = vsel %vm1727_vm5, %v8447_v50, %v8451_v16  ;;  %v20825_v43 = vld [vmem:[#allocation25_spill] sm:$0xff] }
 0x76a   : > { %20819 = vst [vmem:[#allocation69_spill] sm:$0xff] %v18308_v24  ;;  %9197 = vst.msk [vmem:[#allocation2 + $0x40] sm:$0xff] %vm1229_vm3, %v17772_v32  ;;  %v8098_v17 = vor.u32 %v8096_v41, %v8095_v10  ;;  %v8463_v47 = vor.u32 %v8461_v56, %v8451_v16  ;;  %v8467_v13 = vrot.slane %v8465_v7, 1  ;;  %v7492_v44 = vmul.bf16 %v17990_v30, %v16124_v34  ;;  %v18383_v7 = vld [vmem:[#allocation2 + $0x10] sm:$0xff] }
 0x76b   : > { %9179 = vst.msk [vmem:[#allocation2 + $0x38] sm:$0xff] %vm1164_vm1, %v9138_v42  ;;  %v18320_v29 = vsel %vm1727_vm5, %v8663_v31, %v18310_v19  ;;  %v8083_v62 = vsel %vm2338_vm6, %v18249_v1, %v8082_v14  ;;  %v7488_v1 = vmul.bf16 %v17902_v46, %v16093_v11  ;;  %v20822_v46 = vld [vmem:[#allocation21_spill] sm:$0xff]  ;;  %v8497_v31 = vshll.u32 %v7490_v60, 16 }
 0x76c   : > { %20821 = vst [vmem:[#allocation67_spill] sm:$0xff] %v18320_v29  ;;  %9196 = vst.msk [vmem:[#allocation2 + $0x38] sm:$0xff] %vm1229_vm3, %v17750_v23  ;;  %7836 = vmatmul.mubr.bf16.gmra.mrb[220].mxu0 %v7443_v40  ;;  %v9144_v32 = vpop.permute.xlu1 %9143  ;;  %v8099_v58 = vsel %vm2338_vm6, %v8079_v59, %v8098_v17  ;;  %v8468_v15 = vsel %vm1727_vm5, %v8463_v47, %v8467_v13  ;;  %v8513_v36 = vshll.u32 %v7492_v44, 16  ;;  %v8477_v59 = vshrl.u32 %v7486_v0, 16  ;;  %v14605_v0 = vld [vmem:[%s20415_s15 + $0x8] sm:$0xff]  }
 0x76d   : > { %8389 = vmatmul.mubr.bf16.gmra.mrb[216].mxu1 %v8083_v62  ;;  %13317 = vmatprep.mubr.msk.bf16.mxu0 %vm617_vm7, %v8452_v63  ;;  %9182 = vst.msk [vmem:[#allocation2 + $0x50] sm:$0xff] %vm1164_vm1, %v9144_v32  ;;  %v9142_v23 = vpop.permute.xlu0 %9141  ;;  %v18366_v14 = vmul.bf16 %v20825_v43, %v16142_v28  ;;  %v8493_v10 = vshrl.u32 %v7488_v1, 16  ;;  %v20827_v32 = vld [vmem:[#allocation20_spill] sm:$0xff]  ;;  %v8525_v41 = vshrl.u32 %v7492_v44, 16  ;;  %v20829_v47 = vld [vmem:[#allocation71_spill] sm:$0xff]  ;;  %v20831_v44 = vld [vmem:[#allocation54_spill] sm:$0xff] }
 0x76e   : > { %13304 = vmatprep.mubr.msk.bf16.mxu1 %vm617_vm7, %v8107_v35  ;;  %9199 = vst.msk [vmem:[#allocation2 + $0x50] sm:$0xff] %vm1229_vm3, %v17792_v5  ;;  %v8481_v5 = vshll.u32 %v7488_v1, 16  ;;  %v8479_v62 = vor.u32 %v8477_v59, %v8467_v13  ;;  %v8515_v21 = vrot.slane %v8513_v36, 1  ;;  %v20828_v35 = vld [vmem:[#allocation72_spill] sm:$0xff]  ;;  %v8499_v1 = vrot.slane %v8497_v31, 1 }
 0x76f   : > { %9181 = vst.msk [vmem:[#allocation2 + $0x48] sm:$0xff] %vm1164_vm1, %v9142_v23  ;;  %v8529_v23 = vshll.u32 %v18366_v14, 16  ;;  %v8509_v13 = vshrl.u32 %v7490_v60, 16 }
 0x770   : > { %9198 = vst.msk [vmem:[#allocation2 + $0x48] sm:$0xff] %vm1229_vm3, %v17770_v37  ;;  %v9148_v40 = vpop.permute.xlu1 %9147  ;;  %v20823_v37 = vld [vmem:[#allocation23_spill] sm:$0xff]  ;;  %v8483_v16 = vrot.slane %v8481_v5, 1  ;;  %v20832_v5 = vld [vmem:[#allocation74_spill] sm:$0xff] }
 0x771   : > { %9184 = vst.msk [vmem:[#allocation2 + $0x60] sm:$0xff] %vm1164_vm1, %v9148_v40  ;;  %v9146_v51 = vpop.permute.xlu0 %9145  ;;  %v8511_v60 = vor.u32 %v8509_v13, %v8499_v1 }
 0x772   : > { %9201 = vst.msk [vmem:[#allocation2 + $0x60] sm:$0xff] %vm1229_vm3, %v17812_v49  ;;  %v18354_v49 = vld [vmem:[#allocation2 + $0x8] sm:$0xff]  ;;  %v8484_v56 = vsel %vm1727_vm5, %v8479_v62, %v8483_v16  ;;  %v8495_v40 = vor.u32 %v8493_v10, %v8483_v16 }
 0x773   : > { %9183 = vst.msk [vmem:[#allocation2 + $0x58] sm:$0xff] %vm1164_vm1, %v9146_v51  ;;  %v18377_v63 = vmul.bf16 %v18354_v49, %v20750_v57  ;;  %v18396_v51 = vld [vmem:[#allocation2 + $0x20] sm:$0xff]  ;;  %v18414_v59 = vld [vmem:[#allocation2 + $0x38] sm:$0xff]  ;;  %v8516_v10 = vsel %vm1727_vm5, %v8511_v60, %v8515_v21 }
 0x774   : > { %9200 = vst.msk [vmem:[#allocation2 + $0x58] sm:$0xff] %vm1229_vm3, %v20822_v46  ;;  %8862 = vmatmul.mubr.bf16.vlgmr.msra.gmra.mrb[224].mxu0 %v20823_v37  ;;  %20830 = vst [vmem:[#allocation18_spill] sm:$0xff] %v18396_v51  ;;  %v18400_v46 = vmul.bf16 %v20832_v5, %v20831_v44  ;;  %v18402_v37 = vld [vmem:[#allocation2 + $0x28] sm:$0xff]  ;;  %v18412_v36 = vmul.bf16 %v18396_v51, %v16093_v11  ;;  %v8500_v43 = vsel %vm1727_vm5, %v8495_v40, %v8499_v1  ;;  %v20836_v1 = vld [vmem:[#allocation22_spill] sm:$0xff] }
 0x775   : > { %8397 = vmatmul.mubr.bf16.gmra.mrb[220].mxu1 %v8099_v58  ;;  %13318 = vmatprep.mubr.msk.bf16.mxu0 %vm617_vm7, %v8468_v15  ;;  %v9152_v30 = vpop.permute.xlu1 %9151  ;;  %20833 = vst [vmem:[#allocation21_spill] sm:$0xff] %v18402_v37  ;;  %v8527_v58 = vor.u32 %v8525_v41, %v8515_v21  ;;  %v14606_v15 = vld [vmem:[%s20415_s15 + $0x10] sm:$0xff]   ;;  %20835 = vst [vmem:[#allocation70_spill] sm:$0xff] %v18414_v59  ;;  %v18456_v5 = vmul.bf16 %v18383_v7, %v20810_v33 }
 0x776   : > { %9186 = vst.msk [vmem:[#allocation2 + $0x70] sm:$0xff] %vm1164_vm1, %v9152_v30  ;;  %14104 = vmatprep.mubr.msk.bf16.mxu1 %vm602_vm0, %v18354_v49  ;;  %v9150_v27 = vpop.permute.xlu0 %9149  ;;  %v9918_v30 = vshll.u32 %v18377_v63, 16  ;;  %v18439_v41 = vld [vmem:[#allocation2 + $0x50] sm:$0xff] }
 0x777   : > { %9203 = vst.msk [vmem:[#allocation2 + $0x70] sm:$0xff] %vm1229_vm3, %v17832_v22  ;;  %v18370_v22 = vld [vmem:[#allocation2 + $0x18] sm:$0xff] }
 0x778   : > { %9185 = vst.msk [vmem:[#allocation2 + $0x68] sm:$0xff] %vm1164_vm1, %v9150_v27  ;;  %20826 = vst [vmem:[#allocation19_spill] sm:$0xff] %v18370_v22  ;;  %v18391_v17 = vmul.bf16 %v18370_v22, %v16086_v2  ;;  %v18408_v27 = vld [vmem:[#allocation2 + $0x30] sm:$0xff]  ;;  %v9920_v21 = vrot.slane %v9918_v30, 1  ;;  %v9943_v30 = vshrl.u32 %v18412_v36, 16 }
 0x779   : > { %9202 = vst.msk [vmem:[#allocation2 + $0x68] sm:$0xff] %vm1229_vm3, %v20824_v48  ;;  %v9156_v42 = vpop.permute.xlu1 %9155  ;;  %20834 = vst [vmem:[#allocation23_spill] sm:$0xff] %v18408_v27  ;;  %v18416_v48 = vrot.slane %v8529_v23, 1  ;;  %v9916_v23 = vshrl.u32 %v18377_v63, 16  ;;  %v18452_v13 = vld [vmem:[#allocation2 + $0x60] sm:$0xff]  ;;  %v9939_v63 = vshll.u32 %v18412_v36, 16  ;;  %v18483_v36 = vmul.bf16 %v18439_v41, %v20711_v20 }
 0x77a   : > { %9188 = vst.msk [vmem:[#allocation2 + $0x80] sm:$0xff] %vm1164_vm1, %v9156_v42  ;;  %v9154_v50 = vpop.permute.xlu0 %9153  ;;  %v9931_v31 = vshll.u32 %v18391_v17, 16  ;;  %v18423_v42 = vmul.bf16 %v18402_v37, %v16106_v4  ;;  %v18495_v4 = vmul.bf16 %v18452_v13, %v20714_v12 }
 0x77b   : > { %9187 = vst.msk [vmem:[#allocation2 + $0x78] sm:$0xff] %vm1164_vm1, %v9154_v50  ;;  %v18425_v50 = vld [vmem:[#allocation2 + $0x40] sm:$0xff]  ;;  %v18450_v40 = vld [vmem:[#allocation2 + $0x58] sm:$0xff]  ;;  %v9987_v54 = vshll.u32 %v18483_v36, 16  ;;  %v9941_v12 = vrot.slane %v9939_v63, 1 }
 0x77c   : > { %9204 = vst.msk [vmem:[#allocation2 + $0x78] sm:$0xff] %vm1229_vm3, %v20827_v32  ;;  %8870 = vmatmul.mubr.bf16.gmra.mrb[228].mxu0 %v20828_v35  ;;  %v18431_v32 = vmul.bf16 %v18408_v27, %v16124_v34  ;;  %v18435_v35 = vsel %vm1727_vm5, %v8527_v58, %v18416_v48  ;;  %v9935_v58 = vshrl.u32 %v18391_v17, 16  ;;  %v18466_v60 = vmul.bf16 %v18425_v50, %v20831_v44 }
 0x77d   : > { %13319 = vmatprep.mubr.msk.bf16.mxu0 %vm617_vm7, %v8484_v56  ;;  %14105 = vmatmul.mubr.msk.bf16.vlgmr.msra.gmra.mrb[224].mxu1 %vm602_vm0, %v18383_v7  ;;  %v18437_v56 = vld [vmem:[#allocation2 + $0x48] sm:$0xff]  ;;  %v18472_v62 = vrot.slane %v9931_v31, 1  ;;  %v9947_v17 = vshll.u32 %v18423_v42, 16  ;;  %v18491_v34 = vmul.bf16 %v18450_v40, %v20713_v3 }
 0x77e   : > { %14108 = vmatprep.mubr.msk.bf16.mxu1 %vm602_vm0, %v18370_v22  ;;  %14137 = vmatpush3.bf16.msra.mxu1 %v20829_v47  ;;  %v18448_v47 = vmul.bf16 %v18414_v59, %v16142_v28  ;;  %v18470_v16 = vld [vmem:[#allocation2 + $0x70] sm:$0xff]  ;;  %v9951_v28 = vshrl.u32 %v18423_v42, 16  ;;  %v9955_v31 = vshll.u32 %v18431_v32, 16  ;;  %v9959_v2 = vshrl.u32 %v18431_v32, 16 }
 0x77f   : > { %14138 = vmatprep.subr.bf16.mxu1 %v14605_v0  ;;  %20837 = vst [vmem:[#allocation25_spill] sm:$0xff] %v18470_v16  ;;  %v18510_v57 = vmul.bf16 %v18470_v16, %v20716_v18  ;;  %v9971_v61 = vshll.u32 %v18466_v60, 16  ;;  %v9975_v29 = vshrl.u32 %v18466_v60, 16  ;;  %v9995_v53 = vshll.u32 %v18491_v34, 16 }
 0x780   : > { %v9963_v42 = vshll.u32 %v18448_v47, 16  ;;  %v9967_v19 = vshrl.u32 %v18448_v47, 16  ;;  %v9991_v47 = vshrl.u32 %v18483_v36, 16  ;;  %v9999_v60 = vshrl.u32 %v18491_v34, 16 }
 0x781   : > { %v18500_v11 = vld [vmem:[#allocation2 + $0x80] sm:$0xff]  ;;  %v10019_v36 = vshll.u32 %v18510_v57, 16  ;;  %v10023_v34 = vshrl.u32 %v18510_v57, 16 }
 0x782   : > { %14139 = vmatpush3.bf16.msra.mxu1 %v14605_v0  ;;  %v14607_v0 = vld [vmem:[%s20415_s15 + $0x18] sm:$0xff]   ;;  %20839 = vst [vmem:[#allocation72_spill] sm:$0xff] %v18500_v11  ;;  %v18524_v18 = vmul.bf16 %v18500_v11, %v20813_v6  ;;  %v18552_v57 = vld [vmem:[%s20415_s15 + $0x60] sm:$0xff]  }
 0x783   : > { %14140 = vmatprep.subr.bf16.mxu1 %v14606_v15  ;;  %v18485_v44 = vld [vmem:[#allocation2 + $0x78] sm:$0xff] }
 0x784   : > { %8878 = vmatmul.mubr.bf16.gmra.mrb[232].mxu0 %v20836_v1  ;;  %v18468_v1 = vld [vmem:[#allocation2 + $0x68] sm:$0xff]  ;;  %20838 = vst [vmem:[#allocation20_spill] sm:$0xff] %v18485_v44  ;;  %v18517_v24 = vmul.bf16 %v18485_v44, %v20816_v55  ;;  %20840 = vst [vmem:[#allocation71_spill] sm:$0xff] %v18524_v18  ;;  %v10003_v55 = vshll.u32 %v18495_v4, 16  ;;  %v9965_v44 = vrot.slane %v9963_v42, 1 }
 0x785   : > { %13320 = vmatprep.mubr.msk.bf16.mxu0 %vm617_vm7, %v8500_v43  ;;  %14109 = vmatmul.mubr.msk.bf16.gmra.mrb[228].mxu1 %vm602_vm0, %v18396_v51  ;;  %v18479_v43 = vmul.bf16 %v18437_v56, %v16188_v52  ;;  %v18506_v33 = vmul.bf16 %v18468_v1, %v20715_v8  ;;  %v20841_v8 = vld [vmem:[#allocation24_spill] sm:$0xff]  ;;  %v9921_v51 = vor.u32 %v9920_v21, %v9916_v23  ;;  %v9949_v21 = vrot.slane %v9947_v17, 1 }
 0x786   : > { %14112 = vmatprep.mubr.msk.bf16.mxu1 %vm602_vm0, %v18402_v37  ;;  %14141 = vmatpush3.bf16.msra.mxu1 %v14606_v15  ;;  %v14608_v15 = vld [vmem:[%s20415_s15 + $0x20] sm:$0xff]   ;;  %v10027_v37 = vshll.u32 %v18517_v24, 16 }
 0x787   : > { %14142 = vmatprep.subr.bf16.mxu1 %v14607_v0  ;;  %v9979_v32 = vshll.u32 %v18479_v43, 16  ;;  %v9983_v45 = vshrl.u32 %v18479_v43, 16  ;;  %v14609_v43 = vld [vmem:[%s20415_s15 + $0x28] sm:$0xff]   ;;  %v10011_v6 = vshll.u32 %v18506_v33, 16  ;;  %v10015_v11 = vshrl.u32 %v18506_v33, 16 }
 0x788   : > { %v9927_v33 = vshrl.u32 %v18456_v5, 16  ;;  %v9953_v63 = vor.u32 %v9951_v28, %v9949_v21  ;;  %v20842_v28 = vld [vmem:[#allocation73_spill] sm:$0xff] }
 0x789   : > { %v9981_v16 = vrot.slane %v9979_v32, 1 }
 0x78a   : > { %14143 = vmatpush3.bf16.msra.mxu1 %v14607_v0  ;;  %v10007_v0 = vshrl.u32 %v18495_v4, 16  ;;  %v10035_v4 = vshll.u32 %v18524_v18, 16  ;;  %v9973_v18 = vrot.slane %v9971_v61, 1 }
 0x78b   : > { %14144 = vmatprep.subr.bf16.mxu1 %v14608_v15 }
 0x78c   : > { %8886 = vmatmul.mubr.bf16.gmra.mrb[236].mxu0 %v20841_v8  ;;  %v9923_v8 = vshll.u32 %v18456_v5, 16  ;;  %v9977_v17 = vor.u32 %v9975_v29, %v9973_v18  ;;  %v10005_v29 = vrot.slane %v10003_v55, 1  ;;  %v10029_v55 = vrot.slane %v10027_v37, 1 }
 0x78d   : > { %13321 = vmatprep.mubr.msk.bf16.mxu0 %vm617_vm7, %v8516_v10  ;;  %14113 = vmatmul.mubr.msk.bf16.gmra.mrb[232].mxu1 %vm602_vm0, %v18408_v27  ;;  %v9937_v10 = vor.u32 %v9935_v58, %v18472_v62  ;;  %v9957_v27 = vrot.slane %v9955_v31, 1  ;;  %v9985_v31 = vor.u32 %v9983_v45, %v9981_v16 }
 0x78e   : > { %14116 = vmatprep.mubr.msk.bf16.mxu1 %vm602_vm0, %v18414_v59  ;;  %14145 = vmatpush3.bf16.msra.mxu1 %v14608_v15  ;;  %v9925_v23 = vrot.slane %v9923_v8, 1  ;;  %v9945_v15 = vor.u32 %v9943_v30, %v9941_v12  ;;  %v9969_v8 = vor.u32 %v9967_v19, %v9965_v44  ;;  %v18579_v45 = vsel %vm1727_vm5, %v9977_v17, %v9981_v16 }
 0x78f   : > { %14146 = vmatprep.subr.bf16.mxu1 %v14609_v43  ;;  %v18555_v59 = vsel %vm1727_vm5, %v9937_v10, %v9941_v12  ;;  %v9961_v22 = vor.u32 %v9959_v2, %v9957_v27  ;;  %v18569_v61 = vsel %vm1727_vm5, %v9953_v63, %v9957_v27  ;;  %v9989_v2 = vrot.slane %v9987_v54, 1 }
 0x790   : > { %v18558_v5 = vsel %vm1727_vm5, %v9921_v51, %v9925_v23  ;;  %v9929_v58 = vor.u32 %v9927_v33, %v9925_v23  ;;  %v18561_v9 = vsel %vm1727_vm5, %v9945_v15, %v9949_v21  ;;  %v18576_v30 = vsel %vm1727_vm5, %v9969_v8, %v9973_v18  ;;  %v9205_v8 = vld [vmem:[#allocation2] sm:$0x80] }
 0x791   : > { %v18572_v51 = vsel %vm1727_vm5, %v9961_v22, %v9965_v44  ;;  %v9997_v19 = vrot.slane %v9995_v53, 1  ;;  %v18586_v22 = vsel %vm1727_vm5, %v9985_v31, %v9989_v2  ;;  %v9993_v54 = vor.u32 %v9991_v47, %v9989_v2 }
 0x792   : > { %14147 = vmatpush3.bf16.msra.mxu1 %v14609_v43  ;;  %v18566_v12 = vsel %vm1727_vm5, %v9929_v58, %v18472_v62  ;;  %v10013_v44 = vrot.slane %v10011_v6, 1  ;;  %v10021_v27 = vrot.slane %v10019_v36, 1  ;;  %v10031_v18 = vshrl.u32 %v18517_v24, 16  ;;  %v20846_v58 = vld [vmem:[#allocation31_spill] sm:$0xff] }
 0x793   : > { %14180 = vmatprep.subr.bf16.mxu1 %v18552_v57  ;;  %v10001_v16 = vor.u32 %v9999_v60, %v9997_v19  ;;  %v10009_v53 = vor.u32 %v10007_v0, %v10005_v29  ;;  %v20843_v62 = vshll.u32 %v18400_v46, 16  ;;  %v18594_v42 = vsel %vm1727_vm5, %v9993_v54, %v9997_v19  ;;  %v20849_v54 = vld [vmem:[#allocation26_spill] sm:$0xff] }
 0x794   : > { %8894 = vmatmul.mubr.bf16.gmra.mrb[240].mxu0 %v20842_v28  ;;  %v10017_v32 = vor.u32 %v10015_v11, %v10013_v44  ;;  %v10025_v43 = vor.u32 %v10023_v34, %v10021_v27  ;;  %v10033_v36 = vor.u32 %v10031_v18, %v10029_v55  ;;  %v18602_v33 = vrot.slane %v10035_v4, 1  ;;  %v20847_v28 = vld [vmem:[#allocation30_spill] sm:$0xff]  ;;  %v20850_v18 = vld [vmem:[#allocation33_spill] sm:$0xff] }
 0x795   : > { %13322 = vmatprep.mubr.msk.bf16.mxu0 %vm617_vm7, %v18435_v35  ;;  %14117 = vmatmul.mubr.msk.bf16.gmra.mrb[236].mxu1 %vm602_vm0, %v18425_v50  ;;  %v8547_v35 = vrot.slane %v20843_v62, 1  ;;  %v18597_v47 = vsel %vm1727_vm5, %v10001_v16, %v10005_v29  ;;  %v18600_v6 = vsel %vm1727_vm5, %v10009_v53, %v10013_v44  ;;  %v7498_v60 = vmul.bf16 %v18098_v38, %v16188_v52  ;;  %v20848_v29 = vld [vmem:[#allocation32_spill] sm:$0xff]  ;;  %v20851_v16 = vld [vmem:[#allocation19_spill] sm:$0xff] }
 0x796   : > { %14120 = vmatprep.mubr.msk.bf16.mxu1 %vm602_vm0, %v18437_v56  ;;  %v18605_v24 = vsel %vm1727_vm5, %v10017_v32, %v10021_v27  ;;  %v18608_v37 = vsel %vm1727_vm5, %v10025_v43, %v10029_v55  ;;  %v20844_v11 = vshrl.u32 %v18366_v14, 16  ;;  %v18617_v34 = vsel %vm1727_vm5, %v10033_v36, %v18602_v33  ;;  %v20852_v55 = vld [vmem:[#allocation25_spill] sm:$0xff]  ;;  %v20855_v36 = vld [vmem:[#allocation76_spill] sm:$0xff] }
 0x797   : > { %v8557_v10 = vshrl.u32 %v18400_v46, 16  ;;  %v8561_v38 = vshll.u32 %v7498_v60, 16  ;;  %v7500_v14 = vmul.bf16 %v18123_v39, %v20711_v20  ;;  %v9223_v63 = vmul.bf16 %v18354_v49, %v20846_v58  ;;  %v20854_v43 = vld [vmem:[#allocation57_spill] sm:$0xff] }
 0x798   : > { %v8543_v0 = vor.u32 %v20844_v11, %v18416_v48  ;;  %v8573_v46 = vshrl.u32 %v7498_v60, 16  ;;  %v7502_v31 = vmul.bf16 %v18143_v26, %v20713_v3  ;;  %v9222_v19 = vmul.bf16 %v9205_v8, %v20847_v28  ;;  %v18739_v3 = vld [vmem:[#allocation4] sm:$0xff] }
 0x799   : > { %v8559_v48 = vor.u32 %v8557_v10, %v8547_v35  ;;  %v8563_v23 = vrot.slane %v8561_v38, 1  ;;  %v8577_v21 = vshll.u32 %v7500_v14, 16  ;;  %v9531_v17 = vshrl.u32 %v9223_v63, 16 }
 0x79a   : > { %v8548_v4 = vsel %vm1727_vm5, %v8543_v0, %v8547_v35  ;;  %v9224_v49 = vmul.bf16 %v18383_v7, %v20848_v29  ;;  %v9225_v53 = vmul.bf16 %v20851_v16, %v20850_v18  ;;  %v8589_v26 = vshrl.u32 %v7500_v14, 16  ;;  %v20853_v35 = vld [vmem:[#allocation20_spill] sm:$0xff] }
 0x79b   : > { %v8564_v15 = vsel %vm1727_vm5, %v8559_v48, %v8563_v23  ;;  %v8579_v39 = vrot.slane %v8577_v21, 1  ;;  %v8575_v2 = vor.u32 %v8573_v46, %v8563_v23  ;;  %v9533_v27 = vrot.slane %v9531_v17, 7  ;;  %v20858_v46 = vld [vmem:[#allocation75_spill] sm:$0xff] }
 0x79c   : > { %8902 = vmatmul.mubr.bf16.gmra.mrb[244].mxu0 %v18126_v25  ;;  %v20845_v25 = vld [vmem:[#allocation27_spill] sm:$0xff]  ;;  %v8593_v62 = vshll.u32 %v7502_v31, 16  ;;  %v9534_v32 = vshll.u32 %v9223_v63, 16  ;;  %v9527_v7 = vshrl.u32 %v9222_v19, 16  ;;  %v7504_v60 = vmul.bf16 %v20855_v36, %v20854_v43  ;;  %v20862_v36 = vld [vmem:[#allocation58_spill] sm:$0xff] }
 0x79d   : > { %13323 = vmatprep.mubr.msk.bf16.mxu0 %vm617_vm7, %v8548_v4  ;;  %14121 = vmatmul.mubr.msk.bf16.gmra.mrb[240].mxu1 %vm602_vm0, %v18439_v41  ;;  %v8580_v44 = vsel %vm1727_vm5, %v8575_v2, %v8579_v39  ;;  %v9539_v11 = vshrl.u32 %v9224_v49, 16  ;;  %v8591_v0 = vor.u32 %v8589_v26, %v8579_v39  ;;  %v9547_v4 = vshrl.u32 %v9225_v53, 16  ;;  %v20859_v17 = vld [vmem:[#allocation35_spill] sm:$0xff]  ;;  %v20860_v2 = vld [vmem:[#allocation21_spill] sm:$0xff]  ;;  %v20861_v39 = vld [vmem:[#allocation72_spill] sm:$0xff] }
 0x79e   : > { %14124 = vmatprep.mubr.msk.bf16.mxu1 %vm602_vm0, %v18450_v40  ;;  %v9536_v10 = vor.u32 %v9534_v32, %v9533_v27  ;;  %v8595_v38 = vrot.slane %v8593_v62, 1  ;;  %v9529_v48 = vrot.slane %v9527_v7, 7  ;;  %v8609_v23 = vshll.u32 %v7504_v60, 16 }
 0x79f   : > { %v9541_v21 = vrot.slane %v9539_v11, 7  ;;  %v9549_v63 = vrot.slane %v9547_v4, 7  ;;  %v9227_v19 = vmul.bf16 %v20860_v2, %v20859_v17  ;;  %v9550_v16 = vshll.u32 %v9225_v53, 16  ;;  %v20863_v11 = vld [vmem:[#allocation29_spill] sm:$0xff]  ;;  %v14611_v2 = vld [vmem:[%s20415_s15 + $0x68] sm:$0xff]   ;;  %v20866_v53 = vld [vmem:[#allocation28_spill] sm:$0xff] }
 0x7a0   : > { %v8596_v8 = vsel %vm1727_vm5, %v8591_v0, %v8595_v38  ;;  %v8605_v26 = vshrl.u32 %v7502_v31, 16  ;;  %v8611_v32 = vrot.slane %v8609_v23, 1  ;;  %v7506_v0 = vmul.bf16 %v20863_v11, %v20862_v36  ;;  %v20867_v36 = vld [vmem:[#allocation37_spill] sm:$0xff] }
 0x7a1   : > { %v9563_v4 = vshrl.u32 %v9227_v19, 16 }
 0x7a3   : > { %v9565_v11 = vrot.slane %v9563_v4, 7  ;;  %v20870_v4 = vld [vmem:[#allocation81_spill] sm:$0xff] }
 0x7a4   : > { %8910 = vmatmul.mubr.bf16.gmra.mrb[248].mxu0 %v20845_v25  ;;  %v20856_v25 = vld [vmem:[#allocation34_spill] sm:$0xff] }
 0x7a5   : > { %13324 = vmatprep.mubr.msk.bf16.mxu0 %vm617_vm7, %v8564_v15  ;;  %14125 = vmatmul.mubr.msk.bf16.gmra.mrb[244].mxu1 %vm602_vm0, %v18452_v13  ;;  %v20857_v15 = vld [vmem:[#allocation18_spill] sm:$0xff] }
 0x7a6   : > { %14128 = vmatprep.mubr.msk.bf16.mxu1 %vm602_vm0, %v18468_v1  ;;  %v9226_v14 = vmul.bf16 %v20857_v15, %v20856_v25  ;;  %v9552_v15 = vor.u32 %v9550_v16, %v9549_v63  ;;  %v20868_v16 = vld [vmem:[#allocation70_spill] sm:$0xff] }
 0x7a8   : > { %v9555_v62 = vshrl.u32 %v9226_v14, 16 }
 0x7ac   : > { %8918 = vmatmul.mubr.bf16.gmra.mrb[252].mxu0 %v20849_v54  ;;  %v9537_v54 = vsel %vm2338_vm6, %v9529_v48, %v9536_v10  ;;  %v9557_v10 = vrot.slane %v9555_v62, 7  ;;  %v20865_v48 = vld [vmem:[#allocation23_spill] sm:$0xff]  ;;  %v9566_v62 = vshll.u32 %v9227_v19, 16 }
 0x7ad   : > { %13325 = vmatprep.mubr.msk.bf16.mxu0 %vm617_vm7, %v8580_v44  ;;  %14129 = vmatmul.mubr.msk.bf16.gmra.mrb[248].mxu1 %vm602_vm0, %v20852_v55  ;;  %v9542_v44 = vshll.u32 %v9224_v49, 16  ;;  %v20864_v49 = vld [vmem:[#allocation36_spill] sm:$0xff] }
 0x7ae   : > { %14132 = vmatprep.mubr.msk.bf16.mxu1 %vm602_vm0, %v20853_v35 }
 0x7af   : > { %v9544_v7 = vor.u32 %v9542_v44, %v9541_v21  ;;  %v8625_v44 = vshll.u32 %v7506_v0, 16 }
 0x7b1   : > { %v9545_v23 = vsel %vm2338_vm6, %v9533_v27, %v9544_v7  ;;  %v14612_v27 = vld [vmem:[%s20415_s15 + $0x70] sm:$0xff]   ;;  %v20869_v7 = vld [vmem:[#allocation59_spill] sm:$0xff] }
 0x7b4   : > { %8926 = vmatmul.mubr.bf16.gmra.mrb[0].mxu0 %v20858_v46  ;;  %v8607_v46 = vor.u32 %v8605_v26, %v8595_v38  ;;  %v9229_v38 = vmul.bf16 %v20868_v16, %v20867_v36  ;;  %v9558_v26 = vshll.u32 %v9226_v14, 16  ;;  %v9568_v14 = vor.u32 %v9566_v62, %v9565_v11 }
 0x7b5   : > { %13326 = vmatprep.mubr.msk.bf16.mxu0 %vm617_vm7, %v8596_v8  ;;  %14133 = vmatmul.mubr.msk.bf16.gmra.mrb[252].mxu1 %vm602_vm0, %v20861_v39  ;;  %v8621_v8 = vshrl.u32 %v7504_v60, 16  ;;  %v9553_v60 = vsel %vm2338_vm6, %v9541_v21, %v9552_v15  ;;  %v8627_v21 = vrot.slane %v8625_v44, 1 }
 0x7b6   : > { %14148 = vmatprep.mubr.msk.bf16.mxu1 %vm602_vm0, %v9537_v54  ;;  %v9228_v54 = vmul.bf16 %v20865_v48, %v20864_v49  ;;  %v8612_v31 = vsel %vm1727_vm5, %v8607_v46, %v8611_v32  ;;  %v18687_v48 = vmul.bf16 %v20870_v4, %v20869_v7 }
 0x7b7   : > { %v8623_v46 = vor.u32 %v8621_v8, %v8611_v32  ;;  %v20871_v8 = vld [vmem:[#allocation38_spill] sm:$0xff] }
 0x7b8   : > { %v8641_v19 = vshll.u32 %v18687_v48, 16  ;;  %v9230_v16 = vmul.bf16 %v18425_v50, %v20871_v8  ;;  %v9574_v4 = vshll.u32 %v9228_v54, 16  ;;  %v9582_v50 = vshll.u32 %v9229_v38, 16 }
 0x7b9   : > { %v8628_v15 = vsel %vm1727_vm5, %v8623_v46, %v8627_v21  ;;  %v9569_v46 = vsel %vm2338_vm6, %v9557_v10, %v9568_v14  ;;  %v20875_v14 = vld [vmem:[#allocation83_spill] sm:$0xff] }
 0x7bc   : > { %8934 = vmatmul.mubr.bf16.gmra.mrb[4].mxu0 %v20866_v53  ;;  %v9571_v53 = vshrl.u32 %v9228_v54, 16  ;;  %v20874_v54 = vld [vmem:[#allocation61_spill] sm:$0xff] }
 0x7bd   : > { %13327 = vmatprep.mubr.msk.bf16.mxu0 %vm617_vm7, %v8612_v31  ;;  %14149 = vmatmul.mubr.msk.bf16.vlgmr.msra.gmra.mrb[224].mxu1 %vm602_vm0, %v9545_v23  ;;  %v9560_v31 = vor.u32 %v9558_v26, %v9557_v10  ;;  %v9579_v23 = vshrl.u32 %v9229_v38, 16 }
 0x7be   : > { %14152 = vmatprep.mubr.msk.bf16.mxu1 %vm602_vm0, %v9553_v60  ;;  %14181 = vmatpush3.bf16.msra.mxu1 %v18552_v57  ;;  %v14613_v57 = vld [vmem:[%s20415_s15 + $0x78] sm:$0xff]   ;;  %v9573_v32 = vrot.slane %v9571_v53, 7  ;;  %v20872_v60 = vld [vmem:[#allocation82_spill] sm:$0xff] }
 0x7bf   : > { %14182 = vmatprep.subr.bf16.mxu1 %v14611_v2  ;;  %v9561_v26 = vsel %vm2338_vm6, %v9549_v63, %v9560_v31  ;;  %v18698_v44 = vrot.slane %v9579_v23, 7  ;;  %v14614_v63 = vld [vmem:[%s20415_s15 + $0x80] sm:$0xff]   ;;  %v8637_v31 = vshrl.u32 %v7506_v0, 16 }
 0x7c1   : > { %v9584_v10 = vor.u32 %v9582_v50, %v18698_v44  ;;  %v8639_v38 = vor.u32 %v8637_v31, %v8627_v21  ;;  %v8653_v31 = vshrl.u32 %v18687_v48, 16 }
 0x7c2   : > { %14183 = vmatpush3.bf16.msra.mxu1 %v14611_v2  ;;  %v20873_v2 = vld [vmem:[#allocation39_spill] sm:$0xff] }
 0x7c3   : > { %14184 = vmatprep.subr.bf16.mxu1 %v14612_v27  ;;  %v9231_v62 = vmul.bf16 %v18437_v56, %v20873_v2  ;;  %v9587_v56 = vshrl.u32 %v9230_v16, 16  ;;  %v9576_v2 = vor.u32 %v9574_v4, %v9573_v32  ;;  %v20877_v4 = vld [vmem:[#allocation84_spill] sm:$0xff] }
 0x7c4   : > { %8942 = vmatmul.mubr.bf16.gmra.mrb[8].mxu0 %v20872_v60 }
 0x7c5   : > { %13328 = vmatprep.mubr.msk.bf16.mxu0 %vm617_vm7, %v8628_v15  ;;  %14153 = vmatmul.mubr.msk.bf16.gmra.mrb[228].mxu1 %vm602_vm0, %v9561_v26  ;;  %v8643_v15 = vrot.slane %v8641_v19, 1  ;;  %v9595_v26 = vshrl.u32 %v9231_v62, 16  ;;  %v9589_v0 = vrot.slane %v9587_v56, 7  ;;  %v9577_v50 = vsel %vm2338_vm6, %v9565_v11, %v9576_v2 }
 0x7c6   : > { %14156 = vmatprep.mubr.msk.bf16.mxu1 %vm602_vm0, %v9569_v46  ;;  %v7717_v53 = vpop.f32.mrb[160].mxu0  ;;  %14185 = vmatpush3.bf16.msra.mxu1 %v14612_v27  ;;  %v18712_v46 = vmul.bf16 %v20875_v14, %v20874_v54  ;;  %v14615_v27 = vld [vmem:[%s20415_s15 + $0x88] sm:$0xff]   ;;  %v20878_v14 = vld [vmem:[#allocation41_spill] sm:$0xff]  ;;  %v9590_v56 = vshll.u32 %v9230_v16, 16  ;;  %v9598_v11 = vshll.u32 %v9231_v62, 16  ;;  %v20879_v16 = vld [vmem:[#allocation62_spill] sm:$0xff] }
 0x7c7   : > { %v7719_v60 = vpop.f32.mrb[161].mxu0  ;;  %14186 = vmatprep.subr.bf16.mxu1 %v14613_v57  ;;  %v18722_v7 = vrot.slane %v9595_v26, 7  ;;  %v9233_v21 = vmul.bf16 %v18450_v40, %v20878_v14  ;;  %v20880_v54 = vld [vmem:[#allocation86_spill] sm:$0xff] }
 0x7c8   : > { %v7720_v23 = vpop.f32.mrb[162].mxu0  ;;  %v20876_v60 = vld [vmem:[#allocation40_spill] sm:$0xff]  ;;  %v9592_v14 = vor.u32 %v9590_v56, %v9589_v0  ;;  %v20882_v56 = vld [vmem:[#allocation85_spill] sm:$0xff] }
 0x7c9   : > { %v7722_v8 = vpop.f32.mrb[163].mxu0  ;;  %v9232_v19 = vmul.bf16 %v18439_v41, %v20876_v60  ;;  %v8657_v41 = vshll.u32 %v18712_v46, 16 }
 0x7ca   : > { %14187 = vmatpush3.bf16.msra.mxu1 %v14613_v57  ;;  %v8644_v8 = vsel %vm1727_vm5, %v8639_v38, %v8643_v15  ;;  %v9585_v57 = vsel %vm2338_vm6, %v9573_v32, %v9584_v10  ;;  %v9600_v10 = vor.u32 %v9598_v11, %v18722_v7 }
 0x7cb   : > { %14188 = vmatprep.subr.bf16.mxu1 %v14614_v63  ;;  %v9603_v26 = vshrl.u32 %v9232_v19, 16 }
 0x7cc   : > { %8950 = vmatmul.mubr.bf16.gmra.mrb[12].mxu0 %v20877_v4 }
 0x7cd   : > { %13329 = vmatprep.mubr.msk.bf16.mxu0 %vm617_vm7, %v8644_v8  ;;  %14157 = vmatmul.mubr.msk.bf16.gmra.mrb[232].mxu1 %vm602_vm0, %v9577_v50  ;;  %v8655_v8 = vor.u32 %v8653_v31, %v8643_v15  ;;  %v9611_v50 = vshrl.u32 %v9233_v21, 16  ;;  %v9605_v15 = vrot.slane %v9603_v26, 7 }
 0x7ce   : > { %14160 = vmatprep.mubr.msk.bf16.mxu1 %vm602_vm0, %v9585_v57  ;;  %v7725_v38 = vpop.f32.mrb[164].mxu0  ;;  %14189 = vmatpush3.bf16.msra.mxu1 %v14614_v63  ;;  %v7512_v57 = vmul.bf16 %v20880_v54, %v20879_v16  ;;  %v8659_v63 = vrot.slane %v8657_v41, 1  ;;  %v9593_v54 = vsel %vm2338_vm6, %v18698_v44, %v9592_v14  ;;  %v7480_v44 = vld [vmem:[#allocation4 + $0x118] sm:$0x1] }
 0x7cf   : > { %v7727_v2 = vpop.f32.mrb[165].mxu0  ;;  %14190 = vmatprep.subr.bf16.mxu1 %v14615_v27  ;;  %v8278_v40 = vpop.f32.mrb[160].mxu1  ;;  %v18748_v41 = vrot.slane %v9611_v50, 7 }
 0x7d0   : > { %v7728_v4 = vpop.f32.mrb[166].mxu0  ;;  %v18732_v60 = vadd.f32 %v8278_v40, %v7717_v53  ;;  %v8280_v32 = vpop.f32.mrb[161].mxu1  ;;  %v20881_v53 = vld [vmem:[#allocation42_spill] sm:$0xff]  ;;  %v8660_v11 = vsel %vm1727_vm5, %v8655_v8, %v8659_v63  ;;  %v8673_v26 = vshll.u32 %v7512_v57, 16  ;;  %v9606_v40 = vshll.u32 %v9232_v19, 16 }
 0x7d1   : > { %v7730_v48 = vpop.f32.mrb[167].mxu0  ;;  %v8281_v43 = vpop.f32.mrb[162].mxu1  ;;  %v9234_v31 = vmul.bf16 %v18452_v13, %v20881_v53  ;;  %v8669_v13 = vshrl.u32 %v18712_v46, 16  ;;  %v9614_v8 = vshll.u32 %v9233_v21, 16  ;;  %v20884_v53 = vld [vmem:[#allocation60_spill] sm:$0xff] }
 0x7d2   : > { %14191 = vmatpush3.bf16.msra.mxu1 %v14615_v27  ;;  %v18737_v62 = vadd.f32 %v8281_v43, %v7720_v23  ;;  %v8283_v2 = vpop.f32.mrb[163].mxu1  ;;  %v20883_v43 = vld [vmem:[#allocation43_spill] sm:$0xff]  ;;  %v9601_v27 = vsel %vm2338_vm6, %v9589_v0, %v9600_v10  ;;  %v8675_v19 = vrot.slane %v8673_v26, 1 }
 0x7d3   : > { %11372 = vmatprep.subr.bf16.mxu1 %v18739_v3  ;;  %v9235_v23 = vmul.bf16 %v18468_v1, %v20883_v43  ;;  %v9619_v14 = vshrl.u32 %v9234_v31, 16  ;;  %v8671_v2 = vor.u32 %v8669_v13, %v8659_v63  ;;  %v9608_v1 = vor.u32 %v9606_v40, %v9605_v15  ;;  %v20886_v13 = vld [vmem:[#allocation69_spill] sm:$0xff] }
 0x7d4   : > { %8958 = vmatmul.mubr.bf16.gmra.mrb[16].mxu0 %v20882_v56  ;;  %v9616_v0 = vor.u32 %v9614_v8, %v18748_v41  ;;  %v20887_v8 = vld [vmem:[#allocation45_spill] sm:$0xff] }
 0x7d5   : > { %13330 = vmatprep.mubr.msk.bf16.mxu0 %vm617_vm7, %v8660_v11  ;;  %14161 = vmatmul.mubr.msk.bf16.gmra.mrb[236].mxu1 %vm602_vm0, %v9593_v54  ;;  %v9627_v56 = vshrl.u32 %v9235_v23, 16  ;;  %v9621_v20 = vrot.slane %v9619_v14, 7  ;;  %v9237_v26 = vmul.bf16 %v20853_v35, %v20887_v8  ;;  %v7479_v14 = vld [vmem:[#allocation4 + $0x110] sm:$0x1] }
 0x7d6   : > { %14164 = vmatprep.mubr.msk.bf16.mxu1 %vm602_vm0, %v9601_v27  ;;  %v7514_v27 = vmul.bf16 %v7480_v44, %v20884_v53  ;;  %v9622_v44 = vshll.u32 %v9234_v31, 16 }
 0x7d7   : > { %v7733_v32 = vpop.f32.mrb[168].mxu0  ;;  %v9629_v40 = vrot.slane %v9627_v56, 7  ;;  %v9643_v35 = vshrl.u32 %v9237_v26, 16 }
 0x7d8   : > { %v7735_v50 = vpop.f32.mrb[169].mxu0  ;;  %v8286_v48 = vpop.f32.mrb[164].mxu1 }
 0x7d9   : > { %v18757_v11 = vadd.f32 %v8286_v48, %v7725_v38  ;;  %v7736_v54 = vpop.f32.mrb[170].mxu0  ;;  %v8288_v43 = vpop.f32.mrb[165].mxu1  ;;  %v20885_v50 = vld [vmem:[#allocation44_spill] sm:$0xff]  ;;  %v8676_v38 = vsel %vm1727_vm5, %v8671_v2, %v8675_v19  ;;  %v9630_v48 = vshll.u32 %v9235_v23, 16 }
 0x7da   : > { %v7738_v46 = vpop.f32.mrb[171].mxu0  ;;  %v8289_v10 = vpop.f32.mrb[166].mxu1  ;;  %v9236_v63 = vmul.bf16 %v20852_v55, %v20885_v50  ;;  %v9609_v43 = vsel %vm2338_vm6, %v18722_v7, %v9608_v1  ;;  %v8689_v55 = vshll.u32 %v7514_v27, 16  ;;  %v20888_v50 = vld [vmem:[#allocation46_spill] sm:$0xff] }
 0x7db   : > { %v18761_v21 = vadd.f32 %v8289_v10, %v7728_v4  ;;  %v8291_v16 = vpop.f32.mrb[167].mxu1  ;;  %v9617_v4 = vsel %vm2338_vm6, %v9605_v15, %v9616_v0  ;;  %v9624_v10 = vor.u32 %v9622_v44, %v9621_v20  ;;  %v9632_v8 = vor.u32 %v9630_v48, %v9629_v40  ;;  %v20890_v44 = vld [vmem:[#allocation68_spill] sm:$0xff] }
 0x7dc   : > { %8966 = vmatmul.mubr.bf16.gmra.mrb[20].mxu0 %v20886_v13  ;;  %v8685_v16 = vshrl.u32 %v7512_v57, 16  ;;  %v9635_v46 = vshrl.u32 %v9236_v63, 16  ;;  %v7513_v57 = vmul.bf16 %v7479_v14, %v20884_v53  ;;  %v8691_v0 = vrot.slane %v8689_v55, 1 }
 0x7dd   : > { %13331 = vmatprep.mubr.msk.bf16.mxu0 %vm617_vm7, %v8676_v38  ;;  %14165 = vmatmul.mubr.msk.bf16.gmra.mrb[240].mxu1 %vm602_vm0, %v9609_v43  ;;  %v8677_v48 = vshrl.u32 %v20890_v44, 16  ;;  %v9645_v14 = vrot.slane %v9643_v35, 7 }
 0x7de   : > { %14168 = vmatprep.mubr.msk.bf16.mxu1 %vm602_vm0, %v9617_v4  ;;  %v8687_v56 = vor.u32 %v8685_v16, %v8675_v19  ;;  %v9637_v4 = vrot.slane %v9635_v46, 7  ;;  %v20889_v19 = vld [vmem:[#allocation67_spill] sm:$0xff]  ;;  %v9625_v16 = vsel %vm2338_vm6, %v18748_v41, %v9624_v10  ;;  %v8681_v55 = vshll.u32 %v7513_v57, 16 }
 0x7df   : > { %v7741_v2 = vpop.f32.mrb[172].mxu0  ;;  %v9638_v46 = vshll.u32 %v9236_v63, 16 }
 0x7e0   : > { %v7743_v7 = vpop.f32.mrb[173].mxu0  ;;  %v8294_v1 = vpop.f32.mrb[168].mxu1 }
 0x7e1   : > { %v18775_v13 = vadd.f32 %v8294_v1, %v7733_v32  ;;  %v7744_v38 = vpop.f32.mrb[174].mxu0  ;;  %v8296_v43 = vpop.f32.mrb[169].mxu1  ;;  %v9238_v7 = vmul.bf16 %v20861_v39, %v20888_v50  ;;  %v8692_v32 = vsel %vm1727_vm5, %v8687_v56, %v8691_v0  ;;  %v20891_v39 = vld [vmem:[#allocation65_spill] sm:$0xff]  ;;  %v9640_v10 = vor.u32 %v9638_v46, %v9637_v4 }
 0x7e2   : > { %v7746_v15 = vpop.f32.mrb[175].mxu0  ;;  %v8297_v31 = vpop.f32.mrb[170].mxu1  ;;  %v8679_v1 = vor.u32 %v8677_v48, %v20891_v39  ;;  %v9646_v43 = vshll.u32 %v9237_v26, 16 }
 0x7e3   : > { %v18778_v27 = vadd.f32 %v8297_v31, %v7736_v54  ;;  %v8299_v23 = vpop.f32.mrb[171].mxu1  ;;  %v9633_v54 = vsel %vm2338_vm6, %v9621_v20, %v9632_v8  ;;  %v9651_v15 = vshrl.u32 %v9238_v7, 16  ;;  %v9641_v26 = vsel %vm2338_vm6, %v9629_v40, %v9640_v10 }
 0x7e4   : > { %8974 = vmatmul.mubr.bf16.gmra.mrb[24].mxu0 %v20889_v19  ;;  %v8683_v19 = vrot.slane %v8681_v55, 1  ;;  %v9654_v48 = vshll.u32 %v9238_v7, 16 }
 0x7e5   : > { %13332 = vmatprep.mubr.msk.bf16.mxu0 %vm617_vm7, %v8692_v32  ;;  %14169 = vmatmul.mubr.msk.bf16.gmra.mrb[244].mxu1 %vm602_vm0, %v9625_v16  ;;  %v9648_v32 = vor.u32 %v9646_v43, %v9645_v14  ;;  %v9653_v44 = vrot.slane %v9651_v15, 7 }
 0x7e6   : > { %14172 = vmatprep.mubr.msk.bf16.mxu1 %vm602_vm0, %v9633_v54  ;;  %v8684_v57 = vsel %vm1727_vm5, %v8679_v1, %v8683_v19 }
 0x7e7   : > { %v7749_v56 = vpop.f32.mrb[176].mxu0  ;;  %v9656_v39 = vor.u32 %v9654_v48, %v9653_v44 }
 0x7e8   : > { %v7751_v31 = vpop.f32.mrb[177].mxu0  ;;  %v8302_v41 = vpop.f32.mrb[172].mxu1 }
 0x7e9   : > { %v18792_v0 = vadd.f32 %v8302_v41, %v7741_v2  ;;  %v7752_v35 = vpop.f32.mrb[178].mxu0  ;;  %v8304_v23 = vpop.f32.mrb[173].mxu1  ;;  %v9649_v2 = vsel %vm2338_vm6, %v9637_v4, %v9648_v32  ;;  %v9657_v10 = vsel %vm2338_vm6, %v9645_v14, %v9656_v39 }
 0x7ea   : > { %v7754_v16 = vpop.f32.mrb[179].mxu0  ;;  %v8305_v20 = vpop.f32.mrb[174].mxu1 }
 0x7eb   : > { %v18794_v8 = vadd.f32 %v8305_v20, %v7744_v38  ;;  %v8307_v63 = vpop.f32.mrb[175].mxu1 }
 0x7ec   : > { %8982 = vmatmul.mubr.bf16.gmra.mrb[28].mxu0 %v8684_v57 }
 0x7ed   : > { %14173 = vmatmul.mubr.msk.bf16.gmra.mrb[248].mxu1 %vm602_vm0, %v9641_v26 }
 0x7ee   : > { %14176 = vmatprep.mubr.msk.bf16.mxu1 %vm602_vm0, %v9649_v2 }
 0x7ef   : > { %v7757_v54 = vpop.f32.mrb[180].mxu0 }
 0x7f0   : > { %v7759_v55 = vpop.f32.mrb[181].mxu0  ;;  %v8310_v46 = vpop.f32.mrb[176].mxu1 }
 0x7f1   : > { %v18801_v38 = vadd.f32 %v8310_v46, %v7749_v56  ;;  %v7760_v43 = vpop.f32.mrb[182].mxu0  ;;  %v8312_v31 = vpop.f32.mrb[177].mxu1 }
 0x7f2   : > { %v7762_v1 = vpop.f32.mrb[183].mxu0  ;;  %v8313_v15 = vpop.f32.mrb[178].mxu1 }
 0x7f3   : > { %v18803_v41 = vadd.f32 %v8313_v15, %v7752_v35  ;;  %v8315_v40 = vpop.f32.mrb[179].mxu1  ;;  %v14616_v35 = vld [vmem:[%s20417_s17] sm:$0xff]  }
 0x7f5   : > { %14177 = vmatmul.mubr.msk.bf16.gmra.mrb[252].mxu1 %vm602_vm0, %v9657_v10 }
 0x7f6   : > { %14192 = vmatprep.mubr.msk.bf16.mxu1 %vm602_vm0, %v18558_v5  ;;  %v14617_v5 = vld [vmem:[%s20417_s17 + $0x8] sm:$0xff]  }
 0x7f7   : > { %v7765_v4 = vpop.f32.mrb[184].mxu0 }
 0x7f8   : > { %v7767_v7 = vpop.f32.mrb[185].mxu0  ;;  %v8318_v23 = vpop.f32.mrb[180].mxu1 }
 0x7f9   : > { %v18809_v19 = vadd.f32 %v8318_v23, %v7757_v54  ;;  %v7768_v56 = vpop.f32.mrb[186].mxu0  ;;  %v8320_v32 = vpop.f32.mrb[181].mxu1 }
 0x7fa   : > { %v7770_v16 = vpop.f32.mrb[187].mxu0  ;;  %v8321_v20 = vpop.f32.mrb[182].mxu1  ;;  %v14621_v32 = vld [vmem:[%s20417_s17 + $0x28] sm:$0xff]  }
 0x7fb   : > { %v18814_v63 = vadd.f32 %v8321_v20, %v7760_v43  ;;  %v8323_v14 = vpop.f32.mrb[183].mxu1  ;;  %v14619_v43 = vld [vmem:[%s20417_s17 + $0x18] sm:$0xff]  }
 0x7fd   : > { %14193 = vmatmul.mubr.msk.bf16.vlgmr.msra.gmra.mrb[224].mxu1 %vm602_vm0, %v18566_v12 }
 0x7fe   : > { %11373 = vmatpush1.bf16.msra.mxu1 %v14616_v35  ;;  %14196 = vmatprep.mubr.msk.bf16.mxu1 %vm602_vm0, %v18555_v59  ;;  %v14618_v59 = vld [vmem:[%s20417_s17 + $0x10] sm:$0xff]  }
 0x7ff   : > { %v7773_v57 = vpop.f32.mrb[188].mxu0  ;;  %11374 = vmatprep.subr.bf16.mxu1 %v18739_v3 }
 0x800   : > { %v7775_v44 = vpop.f32.mrb[189].mxu0  ;;  %v8326_v26 = vpop.f32.mrb[184].mxu1 }
 0x801   : > { %v18824_v2 = vadd.f32 %v8326_v26, %v7765_v4  ;;  %v7776_v48 = vpop.f32.mrb[190].mxu0  ;;  %v8328_v54 = vpop.f32.mrb[185].mxu1 }
 0x802   : > { %11375 = vmatpush1.bf16.msra.mxu1 %v14617_v5  ;;  %v7778_v55 = vpop.f32.mrb[191].mxu0  ;;  %v8329_v12 = vpop.f32.mrb[186].mxu1  ;;  %v14623_v54 = vld [vmem:[%s20417_s17 + $0x38] sm:$0xff]  }
 0x803   : > { %v18829_v46 = vadd.f32 %v8329_v12, %v7768_v56  ;;  %v8331_v39 = vpop.f32.mrb[187].mxu1  ;;  %11376 = vmatprep.subr.bf16.mxu1 %v18739_v3 }
 0x805   : > { %14197 = vmatmul.mubr.msk.bf16.gmra.mrb[228].mxu1 %vm602_vm0, %v18561_v9 }
 0x806   : > { %11377 = vmatpush1.bf16.msra.mxu1 %v14618_v59  ;;  %14200 = vmatprep.mubr.msk.bf16.mxu1 %vm602_vm0, %v18569_v61  ;;  %v14620_v61 = vld [vmem:[%s20417_s17 + $0x20] sm:$0xff]  }
 0x807   : > { %v7781_v31 = vpop.f32.mrb[192].mxu0  ;;  %11378 = vmatprep.subr.bf16.mxu1 %v18739_v3 }
 0x808   : > { %v7783_v1 = vpop.f32.mrb[193].mxu0  ;;  %v8334_v15 = vpop.f32.mrb[188].mxu1 }
 0x809   : > { %v18840_v40 = vadd.f32 %v8334_v15, %v7773_v57  ;;  %v7784_v10 = vpop.f32.mrb[194].mxu0  ;;  %v8336_v4 = vpop.f32.mrb[189].mxu1 }
 0x80a   : > { %11379 = vmatpush1.bf16.msra.mxu1 %v14619_v43  ;;  %v7786_v7 = vpop.f32.mrb[195].mxu0  ;;  %v8337_v9 = vpop.f32.mrb[190].mxu1  ;;  %v20892_v4 = vld [vmem:[#allocation77_spill] sm:$0xff] }
 0x80b   : > { %v18845_v23 = vadd.f32 %v8337_v9, %v7776_v48  ;;  %v8339_v56 = vpop.f32.mrb[191].mxu1  ;;  %11380 = vmatprep.subr.bf16.mxu1 %v18739_v3 }
 0x80d   : > { %14201 = vmatmul.mubr.msk.bf16.gmra.mrb[232].mxu1 %vm602_vm0, %v18572_v51 }
 0x80e   : > { %11381 = vmatpush1.bf16.msra.mxu1 %v14620_v61  ;;  %14204 = vmatprep.mubr.msk.bf16.mxu1 %vm602_vm0, %v18576_v30  ;;  %v14622_v30 = vld [vmem:[%s20417_s17 + $0x30] sm:$0xff]  }
 0x80f   : > { %v7789_v16 = vpop.f32.mrb[196].mxu0  ;;  %11382 = vmatprep.subr.bf16.mxu1 %v18739_v3 }
 0x810   : > { %v7791_v20 = vpop.f32.mrb[197].mxu0  ;;  %v8342_v35 = vpop.f32.mrb[192].mxu1 }
 0x811   : > { %v18856_v14 = vadd.f32 %v8342_v35, %v7781_v31  ;;  %v7792_v5 = vpop.f32.mrb[198].mxu0  ;;  %v8344_v57 = vpop.f32.mrb[193].mxu1 }
 0x812   : > { %11383 = vmatpush1.bf16.msra.mxu1 %v14621_v32  ;;  %v7794_v44 = vpop.f32.mrb[199].mxu0  ;;  %v8345_v51 = vpop.f32.mrb[194].mxu1 }
 0x813   : > { %v18861_v26 = vadd.f32 %v8345_v51, %v7784_v10  ;;  %v8347_v48 = vpop.f32.mrb[195].mxu1  ;;  %11384 = vmatprep.subr.bf16.mxu1 %v18739_v3 }
 0x815   : > { %14205 = vmatmul.mubr.msk.bf16.gmra.mrb[236].mxu1 %vm602_vm0, %v18579_v45 }
 0x816   : > { %11385 = vmatpush1.bf16.msra.mxu1 %v14622_v30  ;;  %14208 = vmatprep.mubr.msk.bf16.mxu1 %vm602_vm0, %v18586_v22  ;;  %v14624_v22 = vld [vmem:[%s20417_s17 + $0x40] sm:$0xff]  }
 0x817   : > { %v7797_v55 = vpop.f32.mrb[200].mxu0  ;;  %11386 = vmatprep.subr.bf16.mxu1 %v18739_v3 }
 0x818   : > { %v7799_v12 = vpop.f32.mrb[201].mxu0  ;;  %v8350_v59 = vpop.f32.mrb[196].mxu1 }
 0x819   : > { %v18872_v39 = vadd.f32 %v8350_v59, %v7789_v16  ;;  %v7800_v43 = vpop.f32.mrb[202].mxu0  ;;  %v8352_v31 = vpop.f32.mrb[197].mxu1 }
 0x81a   : > { %11387 = vmatpush1.bf16.msra.mxu1 %v14623_v54  ;;  %v7802_v1 = vpop.f32.mrb[203].mxu0  ;;  %v8353_v45 = vpop.f32.mrb[198].mxu1 }
 0x81b   : > { %v18877_v15 = vadd.f32 %v8353_v45, %v7792_v5  ;;  %v8355_v10 = vpop.f32.mrb[199].mxu1  ;;  %11388 = vmatprep.subr.bf16.mxu1 %v18739_v3 }
 0x81d   : > { %14209 = vmatmul.mubr.msk.bf16.gmra.mrb[240].mxu1 %vm602_vm0, %v18594_v42 }
 0x81e   : > { %11389 = vmatpush1.bf16.msra.mxu1 %v14624_v22  ;;  %14212 = vmatprep.mubr.msk.bf16.mxu1 %vm602_vm0, %v18597_v47  ;;  %v9239_v47 = vld [vmem:[#allocation2 + $0x88] sm:$0x1] }
 0x81f   : > { %12787 = vmatprep.subr.bf16.mxu1 %v20892_v4  ;;  %v7805_v7 = vpop.f32.mrb[204].mxu0  ;;  %v9256_v59 = vmul.bf16 %v9239_v47, %v20884_v53 }
 0x820   : > { %v7807_v9 = vpop.f32.mrb[205].mxu0  ;;  %v8358_v61 = vpop.f32.mrb[200].mxu1 }
 0x821   : > { %v18885_v56 = vadd.f32 %v8358_v61, %v7797_v55  ;;  %v7808_v32 = vpop.f32.mrb[206].mxu0  ;;  %v8360_v16 = vpop.f32.mrb[201].mxu1  ;;  %v10043_v1 = vshll.u32 %v9256_v59, 16 }
 0x822   : > { %v7810_v20 = vpop.f32.mrb[207].mxu0  ;;  %v8361_v35 = vpop.f32.mrb[202].mxu1 }
 0x823   : > { %v18887_v5 = vadd.f32 %v8361_v35, %v7800_v43  ;;  %v8363_v57 = vpop.f32.mrb[203].mxu1  ;;  %v10045_v20 = vrot.slane %v10043_v1, 1 }
 0x825   : > { %14213 = vmatmul.mubr.msk.bf16.gmra.mrb[244].mxu1 %vm602_vm0, %v18600_v6  ;;  %v20893_v6 = vld [vmem:[#allocation71_spill] sm:$0xff] }
 0x826   : > { %14216 = vmatprep.mubr.msk.bf16.mxu1 %vm602_vm0, %v18605_v24  ;;  %v10039_v24 = vshrl.u32 %v20893_v6, 16 }
 0x827   : > { %v7813_v42 = vpop.f32.mrb[208].mxu0 }
 0x828   : > { %v7815_v44 = vpop.f32.mrb[209].mxu0  ;;  %v8366_v51 = vpop.f32.mrb[204].mxu1  ;;  %v10041_v4 = vor.u32 %v10039_v24, %v18602_v33 }
 0x829   : > { %v18893_v30 = vadd.f32 %v8366_v51, %v7805_v7  ;;  %v7816_v48 = vpop.f32.mrb[210].mxu0  ;;  %v8368_v54 = vpop.f32.mrb[205].mxu1 }
 0x82a   : > { %v7818_v55 = vpop.f32.mrb[211].mxu0  ;;  %v8369_v12 = vpop.f32.mrb[206].mxu1  ;;  %v10046_v57 = vsel %vm1727_vm5, %v10041_v4, %v10045_v20 }
 0x82b   : > { %v18896_v43 = vadd.f32 %v8369_v12, %v7808_v32  ;;  %v8371_v31 = vpop.f32.mrb[207].mxu1 }
 0x82d   : > { %14217 = vmatmul.mubr.msk.bf16.gmra.mrb[248].mxu1 %vm602_vm0, %v18608_v37 }
 0x82e   : > { %14220 = vmatprep.mubr.msk.bf16.mxu1 %vm602_vm0, %v18617_v34 }
 0x82f   : > { %v7821_v45 = vpop.f32.mrb[212].mxu0 }
 0x830   : > { %v7823_v22 = vpop.f32.mrb[213].mxu0  ;;  %v8374_v10 = vpop.f32.mrb[208].mxu1 }
 0x831   : > { %v18904_v7 = vadd.f32 %v8374_v10, %v7813_v42  ;;  %v7824_v9 = vpop.f32.mrb[214].mxu0  ;;  %v8376_v61 = vpop.f32.mrb[209].mxu1 }
 0x832   : > { %v7826_v32 = vpop.f32.mrb[215].mxu0  ;;  %v8377_v16 = vpop.f32.mrb[210].mxu1 }
 0x833   : > { %v18906_v35 = vadd.f32 %v8377_v16, %v7816_v48  ;;  %v8379_v37 = vpop.f32.mrb[211].mxu1  ;;  %v18921_v16 = vld [vmem:[%s20414_s14] ss:$0 sm:$0xff] }
 0x835   : > { %14221 = vmatmul.mubr.msk.bf16.gmra.mrb[252].mxu1 %vm602_vm0, %v10046_v57 }
 0x837   : > { %v7829_v34 = vpop.f32.mrb[216].mxu0 }
 0x838   : > { %v7831_v47 = vpop.f32.mrb[217].mxu0  ;;  %v8382_v44 = vpop.f32.mrb[212].mxu1 }
 0x839   : > { %v18910_v51 = vadd.f32 %v8382_v44, %v7821_v45  ;;  %v7832_v33 = vpop.f32.mrb[218].mxu0  ;;  %v8384_v42 = vpop.f32.mrb[213].mxu1 }
 0x83a   : > { %v7834_v54 = vpop.f32.mrb[219].mxu0  ;;  %v8385_v55 = vpop.f32.mrb[214].mxu1 }
 0x83b   : > { %v18912_v12 = vadd.f32 %v8385_v55, %v7824_v9  ;;  %v8387_v59 = vpop.f32.mrb[215].mxu1 }
 0x83f   : > { %v7837_v31 = vpop.f32.mrb[220].mxu0 }
 0x840   : > { %v7839_v48 = vpop.f32.mrb[221].mxu0  ;;  %v8390_v6 = vpop.f32.mrb[216].mxu1 }
 0x841   : > { %v18914_v24 = vadd.f32 %v8390_v6, %v7829_v34  ;;  %v7840_v1 = vpop.f32.mrb[222].mxu0  ;;  %v8392_v22 = vpop.f32.mrb[217].mxu1 }
 0x842   : > { %v7842_v10 = vpop.f32.mrb[223].mxu0  ;;  %v8393_v4 = vpop.f32.mrb[218].mxu1 }
 0x843   : > { %v18916_v61 = vadd.f32 %v8393_v4, %v7832_v33  ;;  %v8395_v45 = vpop.f32.mrb[219].mxu1 }
 0x847   : > { %v8863_v32 = vpop.f32.mrb[224].mxu0 }
 0x848   : > { %v8990_v9 = vadd.f32 %v8863_v32, %v18732_v60  ;;  %v8398_v20 = vpop.f32.mrb[220].mxu1  ;;  %v8865_v37 = vpop.f32.mrb[225].mxu0 }
 0x849   : > { %v18924_v57 = vadd.f32 %v8398_v20, %v7837_v31  ;;  %v8400_v34 = vpop.f32.mrb[221].mxu1  ;;  %v8866_v47 = vpop.f32.mrb[226].mxu0 }
 0x84a   : > { %v9029_v44 = vadd.f32 %v18921_v16, %v8990_v9  ;;  %v8991_v33 = vadd.f32 %v8866_v47, %v18737_v62  ;;  %v8401_v42 = vpop.f32.mrb[222].mxu1  ;;  %v8868_v54 = vpop.f32.mrb[227].mxu0 }
 0x84b   : > { %v18928_v55 = vadd.f32 %v8401_v42, %v7840_v1  ;;  %v8403_v59 = vpop.f32.mrb[223].mxu1 }
 0x84c   : > { %v9030_v48 = vadd.f32 %v18921_v16, %v8991_v33  ;;  %v9061_v6 = vmax.f32 %v9029_v44, 0.0 }
 0x84e   : > { %v9062_v22 = vmax.f32 %v9030_v48, 0.0 }
 0x84f   : > { %v8871_v60 = vpop.f32.mrb[228].mxu0 }
 0x850   : > { %v18931_v10 = vpack.c.bf16 %v9062_v22, %v9061_v6  ;;  %v8992_v31 = vadd.f32 %v8871_v60, %v18757_v11  ;;  %v8873_v4 = vpop.f32.mrb[229].mxu0 }
 0x851   : > { %v8874_v45 = vpop.f32.mrb[230].mxu0 }
 0x852   : > { %20894 = vst [vmem:[#allocation74_spill] sm:$0xff] %v18931_v10  ;;  %v9031_v32 = vadd.f32 %v18921_v16, %v8992_v31  ;;  %v8993_v62 = vadd.f32 %v8874_v45, %v18761_v21  ;;  %v8876_v9 = vpop.f32.mrb[231].mxu0 }
 0x854   : > { %v9032_v1 = vadd.f32 %v18921_v16, %v8993_v62  ;;  %v9063_v20 = vmax.f32 %v9031_v32, 0.0 }
 0x856   : > { %v9064_v37 = vmax.f32 %v9032_v1, 0.0 }
 0x857   : > { %v8879_v34 = vpop.f32.mrb[232].mxu0 }
 0x858   : > { %v18937_v47 = vpack.c.bf16 %v9064_v37, %v9063_v20  ;;  %v8994_v44 = vadd.f32 %v8879_v34, %v18775_v13  ;;  %v8881_v33 = vpop.f32.mrb[233].mxu0 }
 0x859   : > { %v8882_v42 = vpop.f32.mrb[234].mxu0 }
 0x85a   : > { %20895 = vst [vmem:[#allocation22_spill] sm:$0xff] %v18937_v47  ;;  %v9033_v11 = vadd.f32 %v18921_v16, %v8994_v44  ;;  %v8995_v54 = vadd.f32 %v8882_v42, %v18778_v27  ;;  %v8884_v59 = vpop.f32.mrb[235].mxu0  ;;  %v14625_v27 = vld [vmem:[%s20417_s17 + $0x48] sm:$0xff]  }
 0x85b   : > { %10830 = vmatpush1.bf16.msra.mxu0 %v14625_v27  ;;  %v14626_v59 = vld [vmem:[%s20417_s17 + $0x50] sm:$0xff]  }
 0x85c   : > { %v9034_v48 = vadd.f32 %v18921_v16, %v8995_v54  ;;  %v9065_v21 = vmax.f32 %v9033_v11, 0.0  ;;  %10831 = vmatprep.subr.bf16.mxu0 %v18739_v3 }
 0x85e   : > { %v9066_v6 = vmax.f32 %v9034_v48, 0.0 }
 0x85f   : > { %v8887_v22 = vpop.f32.mrb[236].mxu0  ;;  %10832 = vmatpush1.bf16.msra.mxu0 %v14626_v59 }
 0x860   : > { %v18943_v60 = vpack.c.bf16 %v9066_v6, %v9065_v21  ;;  %v8996_v31 = vadd.f32 %v8887_v22, %v18792_v0  ;;  %v8889_v4 = vpop.f32.mrb[237].mxu0  ;;  %10833 = vmatprep.subr.bf16.mxu0 %v18739_v3 }
 0x861   : > { %v8890_v45 = vpop.f32.mrb[238].mxu0 }
 0x862   : > { %20896 = vst [vmem:[#allocation24_spill] sm:$0xff] %v18943_v60  ;;  %v9035_v13 = vadd.f32 %v18921_v16, %v8996_v31  ;;  %v8997_v32 = vadd.f32 %v8890_v45, %v18794_v8  ;;  %v8892_v62 = vpop.f32.mrb[239].mxu0 }
 0x864   : > { %v9036_v9 = vadd.f32 %v18921_v16, %v8997_v32  ;;  %v9067_v1 = vmax.f32 %v9035_v13, 0.0 }
 0x866   : > { %v9068_v20 = vmax.f32 %v9036_v9, 0.0 }
 0x867   : > { %v8895_v37 = vpop.f32.mrb[240].mxu0 }
 0x868   : > { %v18953_v0 = vpack.c.bf16 %v9068_v20, %v9067_v1  ;;  %v8998_v34 = vadd.f32 %v8895_v37, %v18801_v38  ;;  %v8897_v44 = vpop.f32.mrb[241].mxu0 }
 0x869   : > { %v8898_v33 = vpop.f32.mrb[242].mxu0 }
 0x86a   : > { %20897 = vst [vmem:[#allocation73_spill] sm:$0xff] %v18953_v0  ;;  %v9037_v8 = vadd.f32 %v18921_v16, %v8998_v34  ;;  %v8999_v42 = vadd.f32 %v8898_v33, %v18803_v41  ;;  %v8900_v11 = vpop.f32.mrb[243].mxu0 }
 0x86c   : > { %v9038_v54 = vadd.f32 %v18921_v16, %v8999_v42  ;;  %v9069_v48 = vmax.f32 %v9037_v8, 0.0 }
 0x86e   : > { %v9070_v21 = vmax.f32 %v9038_v54, 0.0 }
 0x86f   : > { %v8903_v6 = vpop.f32.mrb[244].mxu0 }
 0x870   : > { %v18963_v38 = vpack.c.bf16 %v9070_v21, %v9069_v48  ;;  %v9000_v22 = vadd.f32 %v8903_v6, %v18809_v19  ;;  %v8905_v31 = vpop.f32.mrb[245].mxu0 }
 0x871   : > { %v8906_v4 = vpop.f32.mrb[246].mxu0 }
 0x872   : > { %20898 = vst [vmem:[#allocation27_spill] sm:$0xff] %v18963_v38  ;;  %v9039_v41 = vadd.f32 %v18921_v16, %v9000_v22  ;;  %v9001_v45 = vadd.f32 %v8906_v4, %v18814_v63  ;;  %v8908_v13 = vpop.f32.mrb[247].mxu0  ;;  %v14627_v63 = vld [vmem:[%s20417_s17 + $0x58] sm:$0xff]  }
 0x873   : > { %10834 = vmatpush1.bf16.msra.mxu0 %v14627_v63 }
 0x874   : > { %v9040_v32 = vadd.f32 %v18921_v16, %v9001_v45  ;;  %v9071_v62 = vmax.f32 %v9039_v41, 0.0  ;;  %10835 = vmatprep.subr.bf16.mxu0 %v18739_v3 }
 0x876   : > { %v9072_v27 = vmax.f32 %v9040_v32, 0.0 }
 0x877   : > { %v8911_v9 = vpop.f32.mrb[248].mxu0 }
 0x878   : > { %v18969_v1 = vpack.c.bf16 %v9072_v27, %v9071_v62  ;;  %v9002_v20 = vadd.f32 %v8911_v9, %v18824_v2  ;;  %v8913_v37 = vpop.f32.mrb[249].mxu0 }
 0x879   : > { %v8914_v34 = vpop.f32.mrb[250].mxu0 }
 0x87a   : > { %20899 = vst [vmem:[#allocation31_spill] sm:$0xff] %v18969_v1  ;;  %v9041_v19 = vadd.f32 %v18921_v16, %v9002_v20  ;;  %v9003_v44 = vadd.f32 %v8914_v34, %v18829_v46  ;;  %v8916_v33 = vpop.f32.mrb[251].mxu0 }
 0x87c   : > { %v9042_v8 = vadd.f32 %v18921_v16, %v9003_v44  ;;  %v9073_v42 = vmax.f32 %v9041_v19, 0.0 }
 0x87e   : > { %v9074_v11 = vmax.f32 %v9042_v8, 0.0 }
 0x87f   : > { %v8919_v54 = vpop.f32.mrb[252].mxu0 }
 0x880   : > { %v18979_v2 = vpack.c.bf16 %v9074_v11, %v9073_v42  ;;  %v9004_v59 = vadd.f32 %v8919_v54, %v18840_v40  ;;  %v8921_v48 = vpop.f32.mrb[253].mxu0  ;;  %v14629_v54 = vld [vmem:[%s20417_s17 + $0x68] sm:$0xff]  }
 0x881   : > { %v8922_v21 = vpop.f32.mrb[254].mxu0 }
 0x882   : > { %20900 = vst [vmem:[#allocation30_spill] sm:$0xff] %v18979_v2  ;;  %v9043_v46 = vadd.f32 %v18921_v16, %v9004_v59  ;;  %v9005_v6 = vadd.f32 %v8922_v21, %v18845_v23  ;;  %v8924_v22 = vpop.f32.mrb[255].mxu0  ;;  %v14628_v23 = vld [vmem:[%s20417_s17 + $0x60] sm:$0xff]  }
 0x883   : > { %10836 = vmatpush1.bf16.msra.mxu0 %v14628_v23  ;;  %v14632_v23 = vld [vmem:[%s20417_s17 + $0x80] sm:$0xff]  }
 0x884   : > { %v9044_v31 = vadd.f32 %v18921_v16, %v9005_v6  ;;  %v9075_v4 = vmax.f32 %v9043_v46, 0.0  ;;  %10837 = vmatprep.subr.bf16.mxu0 %v18739_v3 }
 0x886   : > { %v9076_v41 = vmax.f32 %v9044_v31, 0.0 }
 0x887   : > { %v8927_v45 = vpop.f32.mrb[0].mxu0  ;;  %10838 = vmatpush1.bf16.msra.mxu0 %v14629_v54 }
 0x888   : > { %v18985_v13 = vpack.c.bf16 %v9076_v41, %v9075_v4  ;;  %v9006_v32 = vadd.f32 %v8927_v45, %v18856_v14  ;;  %v8929_v62 = vpop.f32.mrb[1].mxu0  ;;  %10839 = vmatprep.subr.bf16.mxu0 %v18739_v3  ;;  %v14630_v45 = vld [vmem:[%s20417_s17 + $0x70] sm:$0xff]  }
 0x889   : > { %v8930_v27 = vpop.f32.mrb[2].mxu0  ;;  %v14631_v62 = vld [vmem:[%s20417_s17 + $0x78] sm:$0xff]  }
 0x88a   : > { %20901 = vst [vmem:[#allocation32_spill] sm:$0xff] %v18985_v13  ;;  %v9045_v40 = vadd.f32 %v18921_v16, %v9006_v32  ;;  %v9007_v9 = vadd.f32 %v8930_v27, %v18861_v26  ;;  %v8932_v20 = vpop.f32.mrb[3].mxu0 }
 0x88b   : > { %10840 = vmatpush1.bf16.msra.mxu0 %v14630_v45 }
 0x88c   : > { %v9046_v37 = vadd.f32 %v18921_v16, %v9007_v9  ;;  %v9077_v34 = vmax.f32 %v9045_v40, 0.0  ;;  %10841 = vmatprep.subr.bf16.mxu0 %v18739_v3 }
 0x88e   : > { %v9078_v19 = vmax.f32 %v9046_v37, 0.0 }
 0x88f   : > { %v8935_v44 = vpop.f32.mrb[4].mxu0  ;;  %10842 = vmatpush1.bf16.msra.mxu0 %v14631_v62 }
 0x890   : > { %v18995_v14 = vpack.c.bf16 %v9078_v19, %v9077_v34  ;;  %v9008_v33 = vadd.f32 %v8935_v44, %v18872_v39  ;;  %v8937_v63 = vpop.f32.mrb[5].mxu0  ;;  %10843 = vmatprep.subr.bf16.mxu0 %v18739_v3 }
 0x891   : > { %v8938_v8 = vpop.f32.mrb[6].mxu0 }
 0x892   : > { %20902 = vst [vmem:[#allocation26_spill] sm:$0xff] %v18995_v14  ;;  %v9047_v26 = vadd.f32 %v18921_v16, %v9008_v33  ;;  %v9009_v42 = vadd.f32 %v8938_v8, %v18877_v15  ;;  %v8940_v11 = vpop.f32.mrb[7].mxu0 }
 0x893   : > { %10844 = vmatpush1.bf16.msra.mxu0 %v14632_v23 }
 0x894   : > { %v9048_v59 = vadd.f32 %v18921_v16, %v9009_v42  ;;  %v9079_v48 = vmax.f32 %v9047_v26, 0.0  ;;  %10845 = vmatprep.subr.bf16.mxu0 %v18739_v3 }
 0x896   : > { %v9080_v21 = vmax.f32 %v9048_v59, 0.0 }
 0x897   : > { %v8943_v46 = vpop.f32.mrb[8].mxu0 }
 0x898   : > { %v19005_v39 = vpack.c.bf16 %v9080_v21, %v9079_v48  ;;  %v9010_v6 = vadd.f32 %v8943_v46, %v18885_v56  ;;  %v8945_v22 = vpop.f32.mrb[9].mxu0 }
 0x899   : > { %v8946_v31 = vpop.f32.mrb[10].mxu0 }
 0x89a   : > { %20903 = vst [vmem:[#allocation33_spill] sm:$0xff] %v19005_v39  ;;  %v9049_v15 = vadd.f32 %v18921_v16, %v9010_v6  ;;  %v9011_v4 = vadd.f32 %v8946_v31, %v18887_v5  ;;  %v8948_v41 = vpop.f32.mrb[11].mxu0 }
 0x89c   : > { %v9050_v32 = vadd.f32 %v18921_v16, %v9011_v4  ;;  %v9081_v56 = vmax.f32 %v9049_v15, 0.0 }
 0x89e   : > { %v9082_v27 = vmax.f32 %v9050_v32, 0.0 }
 0x89f   : > { %v8951_v40 = vpop.f32.mrb[12].mxu0 }
 0x8a0   : > { %v19018_v9 = vpack.c.bf16 %v9082_v27, %v9081_v56  ;;  %v9012_v5 = vadd.f32 %v8951_v40, %v18893_v30  ;;  %v8953_v20 = vpop.f32.mrb[13].mxu0 }
 0x8a1   : > { %v8954_v37 = vpop.f32.mrb[14].mxu0 }
 0x8a2   : > { %20904 = vst [vmem:[#allocation19_spill] sm:$0xff] %v19018_v9  ;;  %v9051_v34 = vadd.f32 %v18921_v16, %v9012_v5  ;;  %v9013_v19 = vadd.f32 %v8954_v37, %v18896_v43  ;;  %v8956_v44 = vpop.f32.mrb[15].mxu0 }
 0x8a4   : > { %v9052_v33 = vadd.f32 %v18921_v16, %v9013_v19  ;;  %v9083_v30 = vmax.f32 %v9051_v34, 0.0 }
 0x8a6   : > { %v9084_v63 = vmax.f32 %v9052_v33, 0.0 }
 0x8a7   : > { %v8959_v8 = vpop.f32.mrb[16].mxu0 }
 0x8a8   : > { %v19029_v26 = vpack.c.bf16 %v9084_v63, %v9083_v30  ;;  %v9014_v42 = vadd.f32 %v8959_v8, %v18904_v7  ;;  %v8961_v11 = vpop.f32.mrb[17].mxu0 }
 0x8a9   : > { %v8962_v54 = vpop.f32.mrb[18].mxu0 }
 0x8aa   : > { %20905 = vst [vmem:[#allocation25_spill] sm:$0xff] %v19029_v26  ;;  %v9053_v59 = vadd.f32 %v18921_v16, %v9014_v42  ;;  %v9015_v48 = vadd.f32 %v8962_v54, %v18906_v35  ;;  %v8964_v43 = vpop.f32.mrb[19].mxu0 }
 0x8ac   : > { %v9054_v21 = vadd.f32 %v18921_v16, %v9015_v48  ;;  %v9085_v46 = vmax.f32 %v9053_v59, 0.0 }
 0x8ae   : > { %v9086_v6 = vmax.f32 %v9054_v21, 0.0  ;;  %v19058_v21 = vld [vmem:[%s20416_s16] ss:$0 sm:$0xff] }
 0x8af   : > { %v8967_v22 = vpop.f32.mrb[20].mxu0 }
 0x8b0   : > { %v19035_v31 = vpack.c.bf16 %v9086_v6, %v9085_v46  ;;  %v9016_v15 = vadd.f32 %v8967_v22, %v18910_v51  ;;  %v8969_v4 = vpop.f32.mrb[21].mxu0 }
 0x8b1   : > { %v8970_v41 = vpop.f32.mrb[22].mxu0 }
 0x8b2   : > { %20906 = vst [vmem:[#allocation20_spill] sm:$0xff] %v19035_v31  ;;  %v9055_v7 = vadd.f32 %v18921_v16, %v9016_v15  ;;  %v9017_v45 = vadd.f32 %v8970_v41, %v18912_v12  ;;  %v8972_v32 = vpop.f32.mrb[23].mxu0 }
 0x8b4   : > { %v9056_v62 = vadd.f32 %v18921_v16, %v9017_v45  ;;  %v9087_v35 = vmax.f32 %v9055_v7, 0.0 }
 0x8b6   : > { %v9088_v56 = vmax.f32 %v9056_v62, 0.0 }
 0x8b7   : > { %v8975_v27 = vpop.f32.mrb[24].mxu0 }
 0x8b8   : > { %v19041_v40 = vpack.c.bf16 %v9088_v56, %v9087_v35  ;;  %v9018_v5 = vadd.f32 %v8975_v27, %v18914_v24  ;;  %v8977_v20 = vpop.f32.mrb[25].mxu0 }
 0x8b9   : > { %v8978_v23 = vpop.f32.mrb[26].mxu0 }
 0x8ba   : > { %20907 = vst [vmem:[#allocation76_spill] sm:$0xff] %v19041_v40  ;;  %v9057_v51 = vadd.f32 %v18921_v16, %v9018_v5  ;;  %v9019_v37 = vadd.f32 %v8978_v23, %v18916_v61  ;;  %v8980_v34 = vpop.f32.mrb[27].mxu0 }
 0x8bc   : > { %v9058_v19 = vadd.f32 %v18921_v16, %v9019_v37  ;;  %v9089_v12 = vmax.f32 %v9057_v51, 0.0 }
 0x8be   : > { %v9090_v44 = vmax.f32 %v9058_v19, 0.0 }
 0x8bf   : > { %v8983_v33 = vpop.f32.mrb[28].mxu0 }
 0x8c0   : > { %v19047_v30 = vpack.c.bf16 %v9090_v44, %v9089_v12  ;;  %v9020_v63 = vadd.f32 %v8983_v33, %v18924_v57  ;;  %v8985_v8 = vpop.f32.mrb[29].mxu0  ;;  %v14633_v57 = vld [vmem:[%s20417_s17 + $0x88] sm:$0xff]  }
 0x8c1   : > { %v8986_v42 = vpop.f32.mrb[30].mxu0  ;;  %10846 = vmatpush1.bf16.msra.mxu0 %v14633_v57 }
 0x8c2   : > { %20908 = vst [vmem:[#allocation34_spill] sm:$0xff] %v19047_v30  ;;  %v9059_v24 = vadd.f32 %v18921_v16, %v9020_v63  ;;  %v9021_v11 = vadd.f32 %v8986_v42, %v18928_v55  ;;  %v8988_v54 = vpop.f32.mrb[31].mxu0  ;;  %11933 = vmatprep.subr.bf16.mxu0 %v18739_v3 }
 0x8c4   : > { %v9060_v59 = vadd.f32 %v18921_v16, %v9021_v11  ;;  %v9091_v61 = vmax.f32 %v9059_v24, 0.0 }
 0x8c6   : > { %v9092_v48 = vmax.f32 %v9060_v59, 0.0 }
 0x8c8   : > { %v19053_v43 = vpack.c.bf16 %v9092_v48, %v9091_v61 }
 0x8ca   : > { %20909 = vst [vmem:[#allocation18_spill] sm:$0xff] %v19053_v43 }
 0x8d0   : > { %v14194_v46 = vpop.f32.mrb[224].mxu1 }
 0x8d1   : > { %v10333_v55 = vadd.f32 %v14194_v46, %v19058_v21  ;;  %v10165_v6 = vpop.f32.mrb[225].mxu1 }
 0x8d2   : > { %v10331_v16 = vadd.f32 %v19058_v21, %v10165_v6  ;;  %v14195_v22 = vpop.f32.mrb[226].mxu1 }
 0x8d3   : > { %v10334_v15 = vadd.f32 %v14195_v22, %v19058_v21  ;;  %v10168_v4 = vpop.f32.mrb[227].mxu1  ;;  %v10365_v7 = vmax.f32 %v10333_v55, 0.0 }
 0x8d4   : > { %v10332_v41 = vadd.f32 %v19058_v21, %v10168_v4  ;;  %v10363_v32 = vmax.f32 %v10331_v16, 0.0 }
 0x8d5   : > { %v10366_v45 = vmax.f32 %v10334_v15, 0.0 }
 0x8d6   : > { %v10364_v62 = vmax.f32 %v10332_v41, 0.0 }
 0x8d7   : > { %v10396_v35 = vpack.c.bf16 %v10366_v45, %v10365_v7 }
 0x8d8   : > { %v19068_v56 = vpack.c.bf16 %v10364_v62, %v10363_v32  ;;  %v14198_v27 = vpop.f32.mrb[228].mxu1 }
 0x8d9   : > { %10412 = vst.msk [vmem:[#allocation3 + $0x30] sm:$0xff] %vm4956_vm8, %v10396_v35  ;;  %v10337_v3 = vadd.f32 %v14198_v27, %v19058_v21  ;;  %10509 = vrot.lane.b32.xlu1 %v10396_v35, %s20682_s20  ;;  %v10181_v5 = vpop.f32.mrb[229].mxu1 }
 0x8da   : > { %10411 = vst.msk [vmem:[#allocation3 + $0x20] sm:$0xff] %vm4956_vm8, %v19068_v56  ;;  %v10335_v20 = vadd.f32 %v19058_v21, %v10181_v5  ;;  %10443 = vrot.lane.b32.xlu0 %v19068_v56, %s20910_s2  ;;  %v14199_v23 = vpop.f32.mrb[230].mxu1 }
 0x8db   : > { %v10338_v51 = vadd.f32 %v14199_v23, %v19058_v21  ;;  %v10184_v37 = vpop.f32.mrb[231].mxu1  ;;  %v10369_v19 = vmax.f32 %v10337_v3, 0.0 }
 0x8dc   : > { %v10336_v34 = vadd.f32 %v19058_v21, %v10184_v37  ;;  %v10367_v44 = vmax.f32 %v10335_v20, 0.0 }
 0x8dd   : > { %v10370_v12 = vmax.f32 %v10338_v51, 0.0 }
 0x8de   : > { %v10368_v33 = vmax.f32 %v10336_v34, 0.0  ;;  %10445 = vrot.lane.b32.xlu0 %v10396_v35, %s20910_s2 }
 0x8df   : > { %v10398_v63 = vpack.c.bf16 %v10370_v12, %v10369_v19 }
 0x8e0   : > { %v10397_v8 = vpack.c.bf16 %v10368_v33, %v10367_v44  ;;  %v14202_v42 = vpop.f32.mrb[232].mxu1 }
 0x8e1   : > { %10414 = vst.msk [vmem:[#allocation3 + $0x50] sm:$0xff] %vm4956_vm8, %v10398_v63  ;;  %v10341_v24 = vadd.f32 %v14202_v42, %v19058_v21  ;;  %v10197_v11 = vpop.f32.mrb[233].mxu1 }
 0x8e2   : > { %10413 = vst.msk [vmem:[#allocation3 + $0x40] sm:$0xff] %vm4956_vm8, %v10397_v8  ;;  %v10339_v54 = vadd.f32 %v19058_v21, %v10197_v11  ;;  %10447 = vrot.lane.b32.xlu0 %v10397_v8, %s20910_s2  ;;  %10511 = vrot.lane.b32.xlu1 %v10397_v8, %s20682_s20  ;;  %v14203_v59 = vpop.f32.mrb[234].mxu1 }
 0x8e3   : > { %v10342_v61 = vadd.f32 %v14203_v59, %v19058_v21  ;;  %v10200_v48 = vpop.f32.mrb[235].mxu1  ;;  %v10373_v46 = vmax.f32 %v10341_v24, 0.0 }
 0x8e4   : > { %v10340_v57 = vadd.f32 %v19058_v21, %v10200_v48  ;;  %v10371_v6 = vmax.f32 %v10339_v54, 0.0 }
 0x8e5   : > { %v10374_v55 = vmax.f32 %v10342_v61, 0.0 }
 0x8e6   : > { %v10372_v16 = vmax.f32 %v10340_v57, 0.0  ;;  %10449 = vrot.lane.b32.xlu0 %v10398_v63, %s20910_s2  ;;  %10513 = vrot.lane.b32.xlu1 %v10398_v63, %s20682_s20 }
 0x8e7   : > { %v10400_v22 = vpack.c.bf16 %v10374_v55, %v10373_v46 }
 0x8e8   : > { %v10399_v15 = vpack.c.bf16 %v10372_v16, %v10371_v6  ;;  %v14206_v4 = vpop.f32.mrb[236].mxu1 }
 0x8e9   : > { %10416 = vst.msk [vmem:[#allocation3 + $0x70] sm:$0xff] %vm4956_vm8, %v10400_v22  ;;  %v10345_v41 = vadd.f32 %v14206_v4, %v19058_v21  ;;  %v10213_v7 = vpop.f32.mrb[237].mxu1 }
 0x8ea   : > { %10415 = vst.msk [vmem:[#allocation3 + $0x60] sm:$0xff] %vm4956_vm8, %v10399_v15  ;;  %v10343_v45 = vadd.f32 %v19058_v21, %v10213_v7  ;;  %10451 = vrot.lane.b32.xlu0 %v10399_v15, %s20910_s2  ;;  %10515 = vrot.lane.b32.xlu1 %v10399_v15, %s20682_s20  ;;  %v14207_v32 = vpop.f32.mrb[238].mxu1 }
 0x8eb   : > { %v10346_v62 = vadd.f32 %v14207_v32, %v19058_v21  ;;  %v10216_v35 = vpop.f32.mrb[239].mxu1  ;;  %v10377_v3 = vmax.f32 %v10345_v41, 0.0 }
 0x8ec   : > { %v10344_v27 = vadd.f32 %v19058_v21, %v10216_v35  ;;  %v10375_v20 = vmax.f32 %v10343_v45, 0.0 }
 0x8ed   : > { %v10378_v5 = vmax.f32 %v10346_v62, 0.0 }
 0x8ee   : > { %v10376_v23 = vmax.f32 %v10344_v27, 0.0  ;;  %10453 = vrot.lane.b32.xlu0 %v10400_v22, %s20910_s2  ;;  %10517 = vrot.lane.b32.xlu1 %v10400_v22, %s20682_s20 }
 0x8ef   : > { %v10402_v51 = vpack.c.bf16 %v10378_v5, %v10377_v3 }
 0x8f0   : > { %v10401_v37 = vpack.c.bf16 %v10376_v23, %v10375_v20  ;;  %v14210_v34 = vpop.f32.mrb[240].mxu1 }
 0x8f1   : > { %10418 = vst.msk [vmem:[#allocation3 + $0x90] sm:$0xff] %vm4956_vm8, %v10402_v51  ;;  %v10349_v19 = vadd.f32 %v14210_v34, %v19058_v21  ;;  %v10229_v12 = vpop.f32.mrb[241].mxu1 }
 0x8f2   : > { %10417 = vst.msk [vmem:[#allocation3 + $0x80] sm:$0xff] %vm4956_vm8, %v10401_v37  ;;  %v10347_v44 = vadd.f32 %v19058_v21, %v10229_v12  ;;  %10455 = vrot.lane.b32.xlu0 %v10401_v37, %s20910_s2  ;;  %10519 = vrot.lane.b32.xlu1 %v10401_v37, %s20682_s20  ;;  %v14211_v33 = vpop.f32.mrb[242].mxu1 }
 0x8f3   : > { %v10350_v63 = vadd.f32 %v14211_v33, %v19058_v21  ;;  %v10232_v8 = vpop.f32.mrb[243].mxu1  ;;  %v10381_v24 = vmax.f32 %v10349_v19, 0.0 }
 0x8f4   : > { %v10348_v42 = vadd.f32 %v19058_v21, %v10232_v8  ;;  %v10379_v54 = vmax.f32 %v10347_v44, 0.0 }
 0x8f5   : > { %v10382_v11 = vmax.f32 %v10350_v63, 0.0 }
 0x8f6   : > { %v10380_v59 = vmax.f32 %v10348_v42, 0.0  ;;  %10457 = vrot.lane.b32.xlu0 %v10402_v51, %s20910_s2  ;;  %10521 = vrot.lane.b32.xlu1 %v10402_v51, %s20682_s20 }
 0x8f7   : > { %v10404_v61 = vpack.c.bf16 %v10382_v11, %v10381_v24 }
 0x8f8   : > { %v10403_v48 = vpack.c.bf16 %v10380_v59, %v10379_v54  ;;  %v14214_v57 = vpop.f32.mrb[244].mxu1 }
 0x8f9   : > { %10420 = vst.msk [vmem:[#allocation3 + $0xb0] sm:$0xff] %vm4956_vm8, %v10404_v61  ;;  %v10353_v46 = vadd.f32 %v14214_v57, %v19058_v21  ;;  %v10245_v55 = vpop.f32.mrb[245].mxu1 }
 0x8fa   : > { %10419 = vst.msk [vmem:[#allocation3 + $0xa0] sm:$0xff] %vm4956_vm8, %v10403_v48  ;;  %v10351_v6 = vadd.f32 %v19058_v21, %v10245_v55  ;;  %10459 = vrot.lane.b32.xlu0 %v10403_v48, %s20910_s2  ;;  %10523 = vrot.lane.b32.xlu1 %v10403_v48, %s20682_s20  ;;  %v14215_v16 = vpop.f32.mrb[246].mxu1 }
 0x8fb   : > { %v10354_v22 = vadd.f32 %v14215_v16, %v19058_v21  ;;  %v10248_v15 = vpop.f32.mrb[247].mxu1  ;;  %v10385_v41 = vmax.f32 %v10353_v46, 0.0 }
 0x8fc   : > { %v10352_v4 = vadd.f32 %v19058_v21, %v10248_v15  ;;  %v10383_v45 = vmax.f32 %v10351_v6, 0.0 }
 0x8fd   : > { %v10386_v7 = vmax.f32 %v10354_v22, 0.0 }
 0x8fe   : > { %v10384_v32 = vmax.f32 %v10352_v4, 0.0  ;;  %10461 = vrot.lane.b32.xlu0 %v10404_v61, %s20910_s2  ;;  %10525 = vrot.lane.b32.xlu1 %v10404_v61, %s20682_s20 }
 0x8ff   : > { %v10406_v62 = vpack.c.bf16 %v10386_v7, %v10385_v41 }
 0x900   : > { %v10405_v35 = vpack.c.bf16 %v10384_v32, %v10383_v45  ;;  %v14218_v27 = vpop.f32.mrb[248].mxu1 }
 0x901   : > { %10422 = vst.msk [vmem:[#allocation3 + $0xd0] sm:$0xff] %vm4956_vm8, %v10406_v62  ;;  %v10357_v3 = vadd.f32 %v14218_v27, %v19058_v21  ;;  %v10261_v5 = vpop.f32.mrb[249].mxu1 }
 0x902   : > { %10421 = vst.msk [vmem:[#allocation3 + $0xc0] sm:$0xff] %vm4956_vm8, %v10405_v35  ;;  %v10355_v20 = vadd.f32 %v19058_v21, %v10261_v5  ;;  %10463 = vrot.lane.b32.xlu0 %v10405_v35, %s20910_s2  ;;  %10527 = vrot.lane.b32.xlu1 %v10405_v35, %s20682_s20  ;;  %v14219_v23 = vpop.f32.mrb[250].mxu1  ;;  %v14635_v35 = vld [vmem:[%s20417_s17 + $0x98] sm:$0xff]   ;;  %v19169_v5 = vld [vmem:[#allocation4] sm:$0xff] }
 0x903   : > { %v10358_v51 = vadd.f32 %v14219_v23, %v19058_v21  ;;  %v10264_v37 = vpop.f32.mrb[251].mxu1  ;;  %v10389_v19 = vmax.f32 %v10357_v3, 0.0 }
 0x904   : > { %v10356_v34 = vadd.f32 %v19058_v21, %v10264_v37  ;;  %v10387_v44 = vmax.f32 %v10355_v20, 0.0  ;;  %v14636_v20 = vld [vmem:[%s20417_s17 + $0xa0] sm:$0xff]  }
 0x905   : > { %v10390_v12 = vmax.f32 %v10358_v51, 0.0 }
 0x906   : > { %v10388_v33 = vmax.f32 %v10356_v34, 0.0  ;;  %10465 = vrot.lane.b32.xlu0 %v10406_v62, %s20910_s2  ;;  %10529 = vrot.lane.b32.xlu1 %v10406_v62, %s20682_s20 }
 0x907   : > { %v10408_v63 = vpack.c.bf16 %v10390_v12, %v10389_v19  ;;  %v14637_v19 = vld [vmem:[%s20417_s17 + $0xa8] sm:$0xff]  }
 0x908   : > { %v10407_v8 = vpack.c.bf16 %v10388_v33, %v10387_v44  ;;  %v14222_v42 = vpop.f32.mrb[252].mxu1 }
 0x909   : > { %10424 = vst.msk [vmem:[#allocation3 + $0xf0] sm:$0xff] %vm4956_vm8, %v10408_v63  ;;  %v10361_v24 = vadd.f32 %v14222_v42, %v19058_v21  ;;  %v10277_v11 = vpop.f32.mrb[253].mxu1 }
 0x90a   : > { %10423 = vst.msk [vmem:[#allocation3 + $0xe0] sm:$0xff] %vm4956_vm8, %v10407_v8  ;;  %v10359_v54 = vadd.f32 %v19058_v21, %v10277_v11  ;;  %10467 = vrot.lane.b32.xlu0 %v10407_v8, %s20910_s2  ;;  %10531 = vrot.lane.b32.xlu1 %v10407_v8, %s20682_s20  ;;  %v14223_v59 = vpop.f32.mrb[254].mxu1 }
 0x90b   : > { %v10362_v61 = vadd.f32 %v14223_v59, %v19058_v21  ;;  %v10280_v48 = vpop.f32.mrb[255].mxu1  ;;  %v10393_v46 = vmax.f32 %v10361_v24, 0.0 }
 0x90c   : > { %v10360_v57 = vadd.f32 %v19058_v21, %v10280_v48  ;;  %v10391_v6 = vmax.f32 %v10359_v54, 0.0  ;;  %v14639_v54 = vld [vmem:[%s20417_s17 + $0xb8] sm:$0xff]   ;;  %v14640_v48 = vld [vmem:[%s20417_s17 + $0xc0] sm:$0xff]  }
 0x90d   : > { %v10394_v55 = vmax.f32 %v10362_v61, 0.0 }
 0x90e   : > { %v10392_v16 = vmax.f32 %v10360_v57, 0.0  ;;  %10469 = vrot.lane.b32.xlu0 %v10408_v63, %s20910_s2  ;;  %10533 = vrot.lane.b32.xlu1 %v10408_v63, %s20682_s20  ;;  %v14638_v63 = vld [vmem:[%s20417_s17 + $0xb0] sm:$0xff]  }
 0x90f   : > { %v10410_v22 = vpack.c.bf16 %v10394_v55, %v10393_v46 }
 0x910   : > { %v10409_v15 = vpack.c.bf16 %v10392_v16, %v10391_v6  ;;  %v14641_v16 = vld [vmem:[%s20417_s17 + $0xc8] sm:$0xff]  }
 0x911   : > { %10426 = vst.msk [vmem:[#allocation3 + $0x110] sm:$0xff] %vm4956_vm8, %v10410_v22 }
 0x912   : > { %10425 = vst.msk [vmem:[#allocation3 + $0x100] sm:$0xff] %vm4956_vm8, %v10409_v15  ;;  %10471 = vrot.lane.b32.xlu0 %v10409_v15, %s20910_s2  ;;  %10535 = vrot.lane.b32.xlu1 %v10409_v15, %s20682_s20 }
 0x916   : > { %10507 = vrot.lane.b32.xlu0 %v19068_v56, %s20682_s20  ;;  %10537 = vrot.lane.b32.xlu1 %v10410_v22, %s20682_s20  ;;  %v14634_v56 = vld [vmem:[%s20417_s17 + $0x90] sm:$0xff]  }
 0x91a   : > { %10473 = vrot.lane.b32.xlu1 %v10410_v22, %s20910_s2  ;;  %s12956_s2 = sshll.u32 %s593_s24, 7 }
 0x94b   : > { %v10510_v21 = vpop.permute.xlu1 %10509 }
 0x94c   : > { %10558 = vst.msk [vmem:[#allocation3 + $0x18] sm:$0xff] %vm608_vm4, %v10510_v21  ;;  %v10444_v4 = vpop.permute.xlu0 %10443 }
 0x94d   : > { %10491 = vst.msk [vmem:[#allocation3 + $0x10] sm:$0xff] %vm5037_vm9, %v10444_v4  ;;  %v20911_v4 = vld [vmem:[#allocation47_spill] sm:$0xff] }
 0x94e   : > { %10557 = vst.msk [vmem:[#allocation3 + $0x10] sm:$0xff] %vm5102_vm10, %v10510_v21 }
 0x950   : > { %v10446_v41 = vpop.permute.xlu0 %10445 }
 0x951   : > { %10492 = vst.msk [vmem:[#allocation3 + $0x20] sm:$0xff] %vm5037_vm9, %v10446_v41 }
 0x953   : > { %v19153_v7 = vld [vmem:[#allocation3 + $0x18] sm:$0xff] }
 0x954   : > { %13410 = vmatprep.mubr.msk.bf16.mxu0 %vm608_vm4, %v19153_v7  ;;  %v10448_v45 = vpop.permute.xlu0 %10447  ;;  %v10512_v32 = vpop.permute.xlu1 %10511  ;;  %v10624_v22 = vmul.bf16 %v19153_v7, %v20846_v58  ;;  %v10658_v41 = vmul.bf16 %v19153_v7, %v20911_v4 }
 0x955   : > { %10493 = vst.msk [vmem:[#allocation3 + $0x30] sm:$0xff] %vm5037_vm9, %v10448_v45  ;;  %v19163_v62 = vld [vmem:[#allocation3 + $0x10] sm:$0xff] }
 0x956   : > { %10559 = vst.msk [vmem:[#allocation3 + $0x20] sm:$0xff] %vm5102_vm10, %v10512_v32  ;;  %10862 = vmatmul.mubr.bf16.vlgmr.msra.gmra.mrb[32].mxu0 %v19163_v62  ;;  %v10657_v45 = vmul.bf16 %v19163_v62, %v20911_v4 }
 0x957   : > { %10560 = vst.msk [vmem:[#allocation3 + $0x28] sm:$0xff] %vm608_vm4, %v10512_v32  ;;  %11934 = vmatpush1.bf16.msra.mxu0 %v14634_v56  ;;  %v10623_v56 = vmul.bf16 %v19163_v62, %v20846_v58  ;;  %v14642_v32 = vld [vmem:[%s20417_s17 + $0xd0] sm:$0xff]  }
 0x958   : > { %v10450_v27 = vpop.permute.xlu0 %10449  ;;  %v10514_v3 = vpop.permute.xlu1 %10513  ;;  %11935 = vmatprep.subr.bf16.mxu0 %v19169_v5 }
 0x959   : > { %10494 = vst.msk [vmem:[#allocation3 + $0x40] sm:$0xff] %vm5037_vm9, %v10450_v27  ;;  %v10995_v62 = vshrl.u32 %v10623_v56, 16 }
 0x95a   : > { %10561 = vst.msk [vmem:[#allocation3 + $0x30] sm:$0xff] %vm5102_vm10, %v10514_v3 }
 0x95b   : > { %10562 = vst.msk [vmem:[#allocation3 + $0x38] sm:$0xff] %vm608_vm4, %v10514_v3  ;;  %11936 = vmatpush1.bf16.msra.mxu0 %v14635_v35  ;;  %v11007_v35 = vshrl.u32 %v10624_v22, 16  ;;  %v11566_v3 = vshll.u32 %v10658_v41, 16 }
 0x95c   : > { %v10452_v23 = vpop.permute.xlu0 %10451  ;;  %v10516_v51 = vpop.permute.xlu1 %10515  ;;  %11937 = vmatprep.subr.bf16.mxu0 %v19169_v5 }
 0x95d   : > { %v19180_v34 = vld [vmem:[#allocation3 + $0x20] sm:$0xff]  ;;  %10495 = vst.msk [vmem:[#allocation3 + $0x50] sm:$0xff] %vm5037_vm9, %v10452_v23  ;;  %v11554_v23 = vshll.u32 %v10657_v45, 16 }
 0x95e   : > { %v19178_v37 = vld [vmem:[#allocation3 + $0x28] sm:$0xff]  ;;  %10563 = vst.msk [vmem:[#allocation3 + $0x40] sm:$0xff] %vm5102_vm10, %v10516_v51 }
 0x95f   : > { %10564 = vst.msk [vmem:[#allocation3 + $0x48] sm:$0xff] %vm608_vm4, %v10516_v51  ;;  %13411 = vmatprep.mubr.msk.bf16.mxu0 %vm608_vm4, %v19178_v37  ;;  %11938 = vmatpush1.bf16.msra.mxu0 %v14636_v20 }
 0x960   : > { %10870 = vmatmul.mubr.bf16.gmra.mrb[36].mxu0 %v19180_v34  ;;  %v10454_v12 = vpop.permute.xlu0 %10453  ;;  %v10518_v44 = vpop.permute.xlu1 %10517  ;;  %11939 = vmatprep.subr.bf16.mxu0 %v19169_v5 }
 0x961   : > { %10496 = vst.msk [vmem:[#allocation3 + $0x60] sm:$0xff] %vm5037_vm9, %v10454_v12  ;;  %v19207_v24 = vld [vmem:[#allocation3 + $0x30] sm:$0xff]  ;;  %v11568_v12 = vrot.slane %v11566_v3, 1 }
 0x962   : > { %v19192_v33 = vld [vmem:[#allocation3 + $0x38] sm:$0xff]  ;;  %10565 = vst.msk [vmem:[#allocation3 + $0x50] sm:$0xff] %vm5102_vm10, %v10518_v44 }
 0x963   : > { %10566 = vst.msk [vmem:[#allocation3 + $0x58] sm:$0xff] %vm608_vm4, %v10518_v44  ;;  %13412 = vmatprep.mubr.msk.bf16.mxu0 %vm608_vm4, %v19192_v33  ;;  %11940 = vmatpush1.bf16.msra.mxu0 %v14637_v19  ;;  %v19268_v44 = vmul.bf16 %v19178_v37, %v20848_v29 }
 0x964   : > { %v10456_v8 = vpop.permute.xlu0 %10455  ;;  %v10520_v42 = vpop.permute.xlu1 %10519  ;;  %11941 = vmatprep.subr.bf16.mxu0 %v19169_v5 }
 0x965   : > { %10497 = vst.msk [vmem:[#allocation3 + $0x70] sm:$0xff] %vm5037_vm9, %v10456_v8  ;;  %v19228_v55 = vld [vmem:[#allocation3 + $0x40] sm:$0xff] }
 0x966   : > { %10567 = vst.msk [vmem:[#allocation3 + $0x60] sm:$0xff] %vm5102_vm10, %v10520_v42  ;;  %v19210_v11 = vld [vmem:[#allocation3 + $0x48] sm:$0xff]  ;;  %v20912_v8 = vld [vmem:[#allocation48_spill] sm:$0xff] }
 0x967   : > { %10568 = vst.msk [vmem:[#allocation3 + $0x68] sm:$0xff] %vm608_vm4, %v10520_v42  ;;  %11942 = vmatpush1.bf16.msra.mxu0 %v14638_v63  ;;  %v19272_v63 = vmul.bf16 %v19180_v34, %v20848_v29  ;;  %v19276_v42 = vmul.bf16 %v19180_v34, %v20912_v8  ;;  %v11556_v29 = vrot.slane %v11554_v23, 1  ;;  %v19289_v34 = vmul.bf16 %v19192_v33, %v20850_v18 }
 0x968   : > { %10878 = vmatmul.mubr.bf16.gmra.mrb[40].mxu0 %v19207_v24  ;;  %v10458_v59 = vpop.permute.xlu0 %10457  ;;  %v10522_v61 = vpop.permute.xlu1 %10521  ;;  %11943 = vmatprep.subr.bf16.mxu0 %v19169_v5 }
 0x969   : > { %13413 = vmatprep.mubr.msk.bf16.mxu0 %vm608_vm4, %v19210_v11  ;;  %10498 = vst.msk [vmem:[#allocation3 + $0x80] sm:$0xff] %vm5037_vm9, %v10458_v59  ;;  %v19257_v58 = vld [vmem:[#allocation3 + $0x50] sm:$0xff]  ;;  %v19281_v59 = vrot.slane %v10995_v62, 7  ;;  %v11015_v4 = vshrl.u32 %v19272_v63, 16  ;;  %v11026_v62 = vshll.u32 %v19268_v44, 16 }
 0x96a   : > { %10569 = vst.msk [vmem:[#allocation3 + $0x70] sm:$0xff] %vm5102_vm10, %v10522_v61  ;;  %v19231_v6 = vld [vmem:[#allocation3 + $0x58] sm:$0xff] }
 0x96b   : > { %10570 = vst.msk [vmem:[#allocation3 + $0x78] sm:$0xff] %vm608_vm4, %v10522_v61  ;;  %11944 = vmatpush1.bf16.msra.mxu0 %v14639_v54  ;;  %v11010_v54 = vshll.u32 %v10624_v22, 16  ;;  %v19285_v61 = vmul.bf16 %v19178_v37, %v20912_v8  ;;  %v11023_v22 = vshrl.u32 %v19268_v44, 16  ;;  %v11559_v37 = vshll.u32 %v19276_v42, 16 }
 0x96c   : > { %v10460_v57 = vpop.permute.xlu0 %10459  ;;  %v10524_v46 = vpop.permute.xlu1 %10523  ;;  %11945 = vmatprep.subr.bf16.mxu0 %v19169_v5  ;;  %v19334_v44 = vmul.bf16 %v19210_v11, %v20856_v25 }
 0x96d   : > { %10499 = vst.msk [vmem:[#allocation3 + $0x90] sm:$0xff] %vm5037_vm9, %v10460_v57  ;;  %v10998_v57 = vshll.u32 %v10623_v56, 16 }
 0x96e   : > { %10571 = vst.msk [vmem:[#allocation3 + $0x80] sm:$0xff] %vm5102_vm10, %v10524_v46  ;;  %v19260_v20 = vld [vmem:[#allocation3 + $0x68] sm:$0xff] }
 0x96f   : > { %10572 = vst.msk [vmem:[#allocation3 + $0x88] sm:$0xff] %vm608_vm4, %v10524_v46  ;;  %11946 = vmatpush1.bf16.msra.mxu0 %v14640_v48  ;;  %v11564_v48 = vshrl.u32 %v10658_v41, 16  ;;  %v11552_v46 = vshrl.u32 %v10657_v45, 16  ;;  %v19300_v41 = vld [vmem:[#allocation3 + $0x60] sm:$0xff]  ;;  %v11571_v45 = vshll.u32 %v19285_v61, 16  ;;  %v19317_v3 = vor.u32 %v10998_v57, %v19281_v59 }
 0x970   : > { %10886 = vmatmul.mubr.bf16.gmra.mrb[44].mxu0 %v19228_v55  ;;  %v10462_v15 = vpop.permute.xlu0 %10461  ;;  %v10526_v21 = vpop.permute.xlu1 %10525  ;;  %11947 = vmatprep.subr.bf16.mxu0 %v19169_v5  ;;  %v19344_v57 = vmul.bf16 %v19228_v55, %v20856_v25  ;;  %v20914_v25 = vld [vmem:[#allocation50_spill] sm:$0xff] }
 0x971   : > { %13414 = vmatprep.mubr.msk.bf16.mxu0 %vm608_vm4, %v19231_v6  ;;  %10500 = vst.msk [vmem:[#allocation3 + $0xa0] sm:$0xff] %vm5037_vm9, %v10462_v15  ;;  %v19302_v56 = vor.u32 %v11568_v12, %v11564_v48  ;;  %v19338_v48 = vrot.slane %v11015_v4, 7 }
 0x972   : > { %10573 = vst.msk [vmem:[#allocation3 + $0x90] sm:$0xff] %vm5102_vm10, %v10526_v21 }
 0x973   : > { %10574 = vst.msk [vmem:[#allocation3 + $0x98] sm:$0xff] %vm608_vm4, %v10526_v21  ;;  %11948 = vmatpush1.bf16.msra.mxu0 %v14641_v16 }
 0x974   : > { %v10464_v27 = vpop.permute.xlu0 %10463  ;;  %v10528_v7 = vpop.permute.xlu1 %10527  ;;  %11949 = vmatprep.subr.bf16.mxu0 %v19169_v5  ;;  %v19264_v5 = vrot.slane %v11007_v35, 7 }
 0x975   : > { %10501 = vst.msk [vmem:[#allocation3 + $0xb0] sm:$0xff] %vm5037_vm9, %v10464_v27  ;;  %v19311_v27 = vmul.bf16 %v19207_v24, %v20850_v18 }
 0x976   : > { %10575 = vst.msk [vmem:[#allocation3 + $0xa0] sm:$0xff] %vm5102_vm10, %v10528_v7  ;;  %v19292_v21 = vor.u32 %v11010_v54, %v19264_v5 }
 0x977   : > { %10576 = vst.msk [vmem:[#allocation3 + $0xa8] sm:$0xff] %vm608_vm4, %v10528_v7  ;;  %11950 = vmatpush1.bf16.msra.mxu0 %v14642_v32  ;;  %v20913_v32 = vld [vmem:[#allocation49_spill] sm:$0xff]  ;;  %v19314_v7 = vld [vmem:[#allocation3 + $0x78] sm:$0xff]  ;;  %v11034_v4 = vshll.u32 %v19311_v27, 16 }
 0x978   : > { %10894 = vmatmul.mubr.bf16.gmra.mrb[48].mxu0 %v19257_v58  ;;  %v10466_v51 = vpop.permute.xlu0 %10465  ;;  %v10530_v19 = vpop.permute.xlu1 %10529  ;;  %v19307_v35 = vmul.bf16 %v19192_v33, %v20913_v32  ;;  %v19324_v33 = vor.u32 %v11556_v29, %v11552_v46  ;;  %v19330_v12 = vmul.bf16 %v19207_v24, %v20913_v32  ;;  %v19340_v29 = vrot.slane %v11559_v37, 1  ;;  %v20915_v46 = vld [vmem:[#allocation51_spill] sm:$0xff] }
 0x979   : > { %13415 = vmatprep.mubr.msk.bf16.mxu0 %vm608_vm4, %v19260_v20  ;;  %10502 = vst.msk [vmem:[#allocation3 + $0xc0] sm:$0xff] %vm5037_vm9, %v10466_v51  ;;  %v11018_v51 = vshll.u32 %v19272_v63, 16  ;;  %v19336_v63 = vrot.slane %v11023_v22, 7  ;;  %v11042_v24 = vshll.u32 %v19289_v34, 16  ;;  %v19358_v37 = vmul.bf16 %v19210_v11, %v20914_v25 }
 0x97a   : > { %10577 = vst.msk [vmem:[#allocation3 + $0xb0] sm:$0xff] %vm5102_vm10, %v10530_v19  ;;  %v19362_v32 = vmul.bf16 %v19228_v55, %v20914_v25  ;;  %v19372_v11 = vmul.bf16 %v19231_v6, %v20859_v17  ;;  %v19376_v55 = vmul.bf16 %v19257_v58, %v20859_v17  ;;  %v19389_v23 = vmul.bf16 %v19231_v6, %v20915_v46  ;;  %v19392_v17 = vld [vmem:[#allocation3 + $0x88] sm:$0xff] }
 0x97b   : > { %10578 = vst.msk [vmem:[#allocation3 + $0xb8] sm:$0xff] %vm608_vm4, %v10530_v19  ;;  %v11039_v19 = vshrl.u32 %v19289_v34, 16  ;;  %v11028_v25 = vor.u32 %v11026_v62, %v19336_v63  ;;  %v11050_v62 = vshll.u32 %v19344_v57, 16  ;;  %v19406_v30 = vmul.bf16 %v19257_v58, %v20915_v46 }
 0x97c   : > { %v10468_v16 = vpop.permute.xlu0 %10467  ;;  %v10532_v15 = vpop.permute.xlu1 %10531  ;;  %v11063_v40 = vshrl.u32 %v19376_v55, 16  ;;  %v19455_v26 = vmul.bf16 %v19314_v7, %v20867_v36  ;;  %v20931_v53 = vshll.u32 %v19330_v12, 16 }
 0x97d   : > { %10503 = vst.msk [vmem:[#allocation3 + $0xd0] sm:$0xff] %vm5037_vm9, %v10468_v16  ;;  %v11031_v16 = vshrl.u32 %v19311_v27, 16  ;;  %v11047_v27 = vshrl.u32 %v19344_v57, 16  ;;  %v19422_v58 = vsel %vm2338_vm6, %v19264_v5, %v11028_v25  ;;  %v19438_v5 = vmul.bf16 %v19300_v41, %v20864_v49 }
 0x97e   : > { %10579 = vst.msk [vmem:[#allocation3 + $0xc0] sm:$0xff] %vm5102_vm10, %v10532_v15  ;;  %v19513_v38 = vld [vmem:[#allocation3 + $0xa8] sm:$0xff]  ;;  %v11581_v50 = vrot.slane %v20931_v53, 1 }
 0x97f   : > { %10580 = vst.msk [vmem:[#allocation3 + $0xc8] sm:$0xff] %vm608_vm4, %v10532_v15  ;;  %v19352_v15 = vrot.slane %v11571_v45, 1  ;;  %v11055_v45 = vshrl.u32 %v19334_v44, 16  ;;  %v19412_v57 = vrot.slane %v11047_v27, 7  ;;  %v20916_v27 = vld [vmem:[#allocation52_spill] sm:$0xff] }
 0x980   : > { %10902 = vmatmul.mubr.bf16.gmra.mrb[52].mxu0 %v19300_v41  ;;  %v10470_v8 = vpop.permute.xlu0 %10469  ;;  %v10534_v54 = vpop.permute.xlu1 %10533  ;;  %v19428_v6 = vmul.bf16 %v19260_v20, %v20916_v27  ;;  %v19442_v25 = vmul.bf16 %v19300_v41, %v20916_v27  ;;  %v19458_v41 = vld [vmem:[#allocation3 + $0x80] sm:$0xff] }
 0x981   : > { %13416 = vmatprep.mubr.msk.bf16.mxu0 %vm608_vm4, %v19314_v7  ;;  %10504 = vst.msk [vmem:[#allocation3 + $0xe0] sm:$0xff] %vm5037_vm9, %v10470_v8  ;;  %v19364_v8 = vrot.slane %v11039_v19, 7  ;;  %v19381_v19 = vld [vmem:[#allocation3 + $0x70] sm:$0xff]  ;;  %v19401_v34 = vrot.slane %v11055_v45, 7 }
 0x982   : > { %10581 = vst.msk [vmem:[#allocation3 + $0xd0] sm:$0xff] %vm5102_vm10, %v10534_v54  ;;  %v20945_v53 = vshll.u32 %v19428_v6, 16 }
 0x983   : > { %10582 = vst.msk [vmem:[#allocation3 + $0xd8] sm:$0xff] %vm608_vm4, %v10534_v54  ;;  %v19384_v54 = vrot.slane %v11031_v16, 7  ;;  %v11071_v16 = vshrl.u32 %v19372_v11, 16 }
 0x984   : > { %v10472_v18 = vpop.permute.xlu0 %10471  ;;  %v10536_v22 = vpop.permute.xlu1 %10535 }
 0x985   : > { %10505 = vst.msk [vmem:[#allocation3 + $0xf0] sm:$0xff] %vm5037_vm9, %v10472_v18  ;;  %v11020_v18 = vor.u32 %v11018_v51, %v19338_v48  ;;  %v19410_v51 = vmul.bf16 %v19260_v20, %v20864_v49  ;;  %v19468_v49 = vld [vmem:[#allocation3 + $0x98] sm:$0xff] }
 0x986   : > { %10583 = vst.msk [vmem:[#allocation3 + $0xe0] sm:$0xff] %vm5102_vm10, %v10536_v22  ;;  %v19554_v1 = vld [vmem:[#allocation3 + $0xc8] sm:$0xff] }
 0x987   : > { %10584 = vst.msk [vmem:[#allocation3 + $0xe8] sm:$0xff] %vm608_vm4, %v10536_v22  ;;  %v19432_v31 = vsel %vm2338_vm6, %v19281_v59, %v11020_v18  ;;  %v11087_v20 = vshrl.u32 %v19410_v51, 16  ;;  %v11044_v59 = vor.u32 %v11042_v24, %v19364_v8  ;;  %v11036_v18 = vor.u32 %v11034_v4, %v19384_v54  ;;  %20922 = vst [vmem:[#allocation35_spill] sm:$0xff] %v19554_v1 }
 0x988   : > { %10910 = vmatmul.mubr.bf16.gmra.mrb[56].mxu0 %v19381_v19  ;;  %v10508_v43 = vpop.permute.xlu0 %10507  ;;  %v10538_v22 = vpop.permute.xlu1 %10537 }
 0x989   : > { %13417 = vmatprep.mubr.msk.bf16.mxu0 %vm608_vm4, %v19392_v17  ;;  %10555 = vst.msk [vmem:[#allocation3] sm:$0xff] %vm5102_vm10, %v10508_v43  ;;  %10585 = vst.msk [vmem:[#allocation3 + $0xf0] sm:$0xff] %vm5102_vm10, %v10538_v22  ;;  %v19479_v4 = vrot.slane %v11087_v20, 7  ;;  %v19487_v45 = vsel %vm2338_vm6, %v19336_v63, %v11044_v59  ;;  %v19491_v9 = vsel %vm2338_vm6, %v19338_v48, %v11036_v18  ;;  %v20919_v48 = vshll.u32 %v19334_v44, 16 }
 0x98a   : > { %10556 = vst.msk [vmem:[#allocation3 + $0x8] sm:$0xff] %vm608_vm4, %v10508_v43  ;;  %10586 = vst.msk [vmem:[#allocation3 + $0xf8] sm:$0xff] %vm608_vm4, %v10538_v22  ;;  %v19448_v43 = vrot.slane %v11071_v16, 7  ;;  %v19450_v22 = vrot.slane %v11063_v40, 7  ;;  %v20917_v16 = vld [vmem:[#allocation53_spill] sm:$0xff]  ;;  %v11052_v18 = vor.u32 %v11050_v62, %v19412_v57 }
 0x98b   : > { %v19465_v40 = vmul.bf16 %v19314_v7, %v20917_v16  ;;  %v19475_v27 = vmul.bf16 %v19381_v19, %v20917_v16  ;;  %v20918_v7 = vld [vmem:[#allocation54_spill] sm:$0xff]  ;;  %v11060_v59 = vor.u32 %v20919_v48, %v19401_v34 }
 0x98c   : > { %v10474_v46 = vpop.permute.xlu1 %10473  ;;  %v19483_v24 = vmul.bf16 %v19392_v17, %v20918_v7  ;;  %v19496_v20 = vmul.bf16 %v19458_v41, %v20918_v7  ;;  %v19511_v7 = vmul.bf16 %v19468_v49, %v16188_v52 }
 0x98d   : > { %10506 = vst.msk [vmem:[#allocation3 + $0x100] sm:$0xff] %vm5037_vm9, %v10474_v46  ;;  %v19498_v46 = vld [vmem:[#allocation3 + $0x90] sm:$0xff]  ;;  %v19541_v48 = vsel %vm2338_vm6, %v19364_v8, %v11060_v59  ;;  %v20923_v8 = vshll.u32 %v19372_v11, 16 }
 0x98e   : > { %v19522_v62 = vmul.bf16 %v19498_v46, %v16188_v52  ;;  %v19537_v52 = vld [vmem:[#allocation3 + $0xb0] sm:$0xff] }
 0x98f   : > { %v11076_v59 = vor.u32 %v20923_v8, %v19448_v43  ;;  %v20928_v8 = vshrl.u32 %v19285_v61, 16  ;;  %v19654_v61 = vld [vmem:[#allocation3 + $0xe8] sm:$0xff] }
 0x990   : > { %10918 = vmatmul.mubr.bf16.gmra.mrb[60].mxu0 %v19458_v41  ;;  %v10587_v14 = vld [vmem:[#allocation3] sm:$0x80] }
 0x991   : > { %13418 = vmatprep.mubr.msk.bf16.mxu0 %vm608_vm4, %v19468_v49  ;;  %v10588_v39 = vld [vmem:[#allocation3 + $0x8] sm:$0x80]  ;;  %v10621_v2 = vmul.bf16 %v10587_v14, %v20847_v28  ;;  %v19515_v14 = vld [vmem:[#allocation3 + $0xa0] sm:$0xff] }
 0x992   : > { %v10622_v13 = vmul.bf16 %v10588_v39, %v20847_v28 }
 0x993   : > { %v10991_v28 = vshrl.u32 %v10621_v2, 16  ;;  %v20921_v2 = vld [vmem:[#allocation55_spill] sm:$0xff] }
 0x994   : > { %v11003_v39 = vshrl.u32 %v10622_v13, 16  ;;  %v19526_v13 = vld [vmem:[#allocation3 + $0xb8] sm:$0xff]  ;;  %v19531_v63 = vmul.bf16 %v19513_v38, %v20921_v2  ;;  %v19535_v44 = vmul.bf16 %v19515_v14, %v20921_v2 }
 0x995   : > { %v10993_v60 = vrot.slane %v10991_v28, 7  ;;  %20920 = vst [vmem:[#allocation75_spill] sm:$0xff] %v19526_v13  ;;  %v20924_v28 = vld [vmem:[#allocation56_spill] sm:$0xff] }
 0x996   : > { %v11005_v0 = vrot.slane %v11003_v39, 7  ;;  %v19545_v39 = vsel %vm2338_vm6, %v19384_v54, %v11052_v18  ;;  %v19564_v47 = vmul.bf16 %v19526_v13, %v20924_v28  ;;  %v19608_v18 = vld [vmem:[#allocation3 + $0xd8] sm:$0xff] }
 0x997   : > { %v11001_v2 = vsel %vm2338_vm6, %v10993_v60, %v19317_v3  ;;  %v19569_v60 = vsel %vm1727_vm5, %v19302_v56, %v19352_v15  ;;  %v20925_v3 = vshll.u32 %v19376_v55, 16  ;;  %v11585_v56 = vor.u32 %v20928_v8, %v19352_v15  ;;  %v19619_v8 = vld [vmem:[#allocation3 + $0xd0] sm:$0xff] }
 0x998   : > { %10926 = vmatmul.mubr.bf16.gmra.mrb[64].mxu0 %v19498_v46  ;;  %v11013_v16 = vsel %vm2338_vm6, %v11005_v0, %v19292_v21  ;;  %v19574_v21 = vmul.bf16 %v19537_v52, %v20924_v28  ;;  %v20930_v55 = vshrl.u32 %v19276_v42, 16  ;;  %v20934_v28 = vshrl.u32 %v19307_v35, 16 }
 0x999   : > { %13419 = vmatprep.mubr.msk.bf16.mxu0 %vm608_vm4, %v19513_v38  ;;  %13435 = vmatprep.mubr.msk.bf16.mxu1 %vm608_vm4, %v11013_v16  ;;  %v19579_v11 = vor.u32 %v20925_v3, %v19450_v22  ;;  %v19584_v16 = vsel %vm1727_vm5, %v19324_v33, %v19340_v29  ;;  %v19596_v3 = vld [vmem:[#allocation3 + $0xc0] sm:$0xff]  ;;  %v19600_v33 = vsel %vm2338_vm6, %v19401_v34, %v11076_v59  ;;  %v20932_v34 = vshll.u32 %v19358_v37, 16 }
 0x99a   : > { %11405 = vmatmul.mubr.bf16.vlgmr.msra.gmra.mrb[0].mxu1 %v11001_v2  ;;  %20926 = vst [vmem:[#allocation21_spill] sm:$0xff] %v19584_v16  ;;  %v20927_v2 = vld [vmem:[#allocation57_spill] sm:$0xff]  ;;  %v11577_v10 = vor.u32 %v20930_v55, %v19340_v29  ;;  %v20939_v42 = vshll.u32 %v19362_v32, 16  ;;  %v20940_v15 = vshrl.u32 %v19358_v37, 16 }
 0x99b   : > { %13436 = vmatprep.mubr.msk.bf16.mxu1 %vm608_vm4, %v19422_v58  ;;  %v19593_v0 = vmul.bf16 %v19554_v1, %v20927_v2  ;;  %v20929_v58 = vshll.u32 %v19307_v35, 16  ;;  %v11605_v59 = vrot.slane %v20932_v34, 1  ;;  %v19631_v29 = vmul.bf16 %v19596_v3, %v20927_v2 }
 0x99c   : > { %v19634_v55 = vsel %vm1727_vm5, %v11577_v10, %v11581_v50  ;;  %v11597_v2 = vrot.slane %v20939_v42, 1 }
 0x99d   : > { %v11589_v54 = vrot.slane %v20929_v58, 1  ;;  %20935 = vst [vmem:[#allocation29_spill] sm:$0xff] %v19634_v55  ;;  %v11617_v55 = vor.u32 %v20940_v15, %v11605_v59  ;;  %v19676_v15 = vld [vmem:[#allocation3 + $0xf8] sm:$0xff] }
 0x99f   : > { %v19622_v58 = vsel %vm1727_vm5, %v11585_v56, %v11589_v54  ;;  %v11601_v16 = vor.u32 %v20934_v28, %v11589_v54  ;;  %v20936_v56 = vld [vmem:[#allocation58_spill] sm:$0xff]  ;;  %v20938_v28 = vshrl.u32 %v19330_v12, 16  ;;  %v20943_v12 = vshrl.u32 %v19362_v32, 16 }
 0x9a0   : > { %20933 = vst [vmem:[#allocation72_spill] sm:$0xff] %v19622_v58  ;;  %10934 = vmatmul.mubr.bf16.gmra.mrb[68].mxu0 %v19515_v14  ;;  %v19640_v35 = vmul.bf16 %v19608_v18, %v20936_v56  ;;  %v19652_v10 = vmul.bf16 %v19619_v8, %v20936_v56  ;;  %v11637_v58 = vrot.slane %v20945_v53, 1  ;;  %v20948_v53 = vld [vmem:[#allocation59_spill] sm:$0xff] }
 0x9a1   : > { %13420 = vmatprep.mubr.msk.bf16.mxu0 %vm608_vm4, %v19526_v13  ;;  %v19643_v54 = vsel %vm1727_vm5, %v11601_v16, %v11605_v59  ;;  %v11593_v34 = vor.u32 %v20938_v28, %v11581_v50  ;;  %v20941_v16 = vshll.u32 %v19389_v23, 16  ;;  %v11609_v42 = vor.u32 %v20943_v12, %v11597_v2 }
 0x9a2   : > { %20937 = vst [vmem:[#allocation36_spill] sm:$0xff] %v19643_v54  ;;  %11413 = vmatmul.mubr.bf16.gmra.mrb[4].mxu1 %v19432_v31  ;;  %v20944_v28 = vshll.u32 %v19406_v30, 16  ;;  %v19674_v31 = vld [vmem:[#allocation3 + $0xe0] sm:$0xff]  ;;  %v19686_v12 = vmul.bf16 %v19654_v61, %v20948_v53  ;;  %v11751_v13 = vshrl.u32 %v19652_v10, 16 }
 0x9a3   : > { %v11621_v54 = vrot.slane %v20941_v16, 1  ;;  %v19662_v50 = vsel %vm1727_vm5, %v11593_v34, %v11597_v2  ;;  %13437 = vmatprep.mubr.msk.bf16.mxu1 %vm608_vm4, %v19487_v45  ;;  %v20947_v34 = vshrl.u32 %v19389_v23, 16  ;;  %v11747_v16 = vshll.u32 %v19640_v35, 16 }
 0x9a4   : > { %20942 = vst [vmem:[#allocation23_spill] sm:$0xff] %v19662_v50  ;;  %v11613_v56 = vrot.slane %v20944_v28, 1  ;;  %v20950_v28 = vshrl.u32 %v19406_v30, 16  ;;  %v20953_v23 = vshrl.u32 %v19428_v6, 16  ;;  %v19706_v30 = vmul.bf16 %v19674_v31, %v20948_v53 }
 0x9a5   : > { %v19679_v32 = vsel %vm1727_vm5, %v11617_v55, %v11621_v54  ;;  %v11633_v2 = vor.u32 %v20947_v34, %v11621_v54  ;;  %v20952_v55 = vshll.u32 %v19442_v25, 16  ;;  %v20954_v34 = vshll.u32 %v19465_v40, 16 }
 0x9a6   : > { %20946 = vst [vmem:[#allocation28_spill] sm:$0xff] %v19679_v32  ;;  %v19689_v45 = vsel %vm1727_vm5, %v11609_v42, %v11613_v56  ;;  %v11625_v59 = vor.u32 %v20950_v28, %v11613_v56  ;;  %v11649_v54 = vor.u32 %v20953_v23, %v11637_v58  ;;  %v11739_v42 = vshll.u32 %v19652_v10, 16  ;;  %v20955_v56 = vld [vmem:[#allocation61_spill] sm:$0xff]  ;;  %v19712_v28 = vld [vmem:[#allocation3 + $0xf0] sm:$0xff] }
 0x9a7   : > { %20949 = vst [vmem:[#allocation37_spill] sm:$0xff] %v19689_v45  ;;  %v19694_v37 = vsel %vm1727_vm5, %v11633_v2, %v11637_v58  ;;  %v11629_v32 = vrot.slane %v20952_v55, 1  ;;  %v11653_v50 = vrot.slane %v20954_v34, 1  ;;  %v19710_v2 = vmul.bf16 %v19676_v15, %v20955_v56  ;;  %v19729_v45 = vld [vmem:[#allocation3 + $0x100] sm:$0xff] }
 0x9a8   : > { %20951 = vst [vmem:[#allocation70_spill] sm:$0xff] %v19694_v37  ;;  %10942 = vmatmul.mubr.bf16.gmra.mrb[72].mxu0 %v19537_v52  ;;  %v20959_v55 = vshrl.u32 %v19442_v25, 16  ;;  %v20960_v53 = vshll.u32 %v19475_v27, 16  ;;  %v11763_v37 = vshll.u32 %v19686_v12, 16  ;;  %v11775_v25 = vshrl.u32 %v19686_v12, 16 }
 0x9a9   : > { %20956 = vst [vmem:[#allocation81_spill] sm:$0xff] %v19710_v2  ;;  %v19716_v6 = vsel %vm1727_vm5, %v11625_v59, %v11629_v32  ;;  %v19719_v58 = vsel %vm1727_vm5, %v11649_v54, %v11653_v50  ;;  %13421 = vmatprep.mubr.msk.bf16.mxu0 %vm608_vm4, %v19554_v1  ;;  %v20961_v59 = vshrl.u32 %v19465_v40, 16  ;;  %v20962_v54 = vshll.u32 %v19483_v24, 16 }
 0x9aa   : > { %20957 = vst [vmem:[#allocation82_spill] sm:$0xff] %v19716_v6  ;;  %20958 = vst [vmem:[#allocation83_spill] sm:$0xff] %v19719_v58  ;;  %v11641_v23 = vor.u32 %v20959_v55, %v11629_v32  ;;  %v11645_v34 = vrot.slane %v20960_v53, 1  ;;  %v19738_v32 = vmul.bf16 %v19712_v28, %v20955_v56  ;;  %v20963_v10 = vshrl.u32 %v19475_v27, 16  ;;  %11421 = vmatmul.mubr.bf16.gmra.mrb[8].mxu1 %v19491_v9 }
 0x9ab   : > { %v11665_v6 = vor.u32 %v20961_v59, %v11653_v50  ;;  %v11669_v58 = vrot.slane %v20962_v54, 1  ;;  %v20965_v50 = vshll.u32 %v19496_v20, 16  ;;  %v20966_v12 = vshrl.u32 %v19483_v24, 16  ;;  %13438 = vmatprep.mubr.msk.bf16.mxu1 %vm608_vm4, %v19541_v48 }
 0x9ac   : > { %v19741_v55 = vsel %vm1727_vm5, %v11641_v23, %v11645_v34  ;;  %v11657_v53 = vor.u32 %v20963_v10, %v11645_v34  ;;  %v20967_v56 = vshll.u32 %v19511_v7, 16  ;;  %v11755_v27 = vshll.u32 %v19706_v30, 16 }
 0x9ad   : > { %v19747_v40 = vsel %vm1727_vm5, %v11665_v6, %v11669_v58  ;;  %v11661_v59 = vrot.slane %v20965_v50, 1  ;;  %v11681_v54 = vor.u32 %v20966_v12, %v11669_v58  ;;  %v11767_v23 = vshrl.u32 %v19706_v30, 16  ;;  %v20968_v6 = vld [vmem:[#allocation62_spill] sm:$0xff] }
 0x9ae   : > { %20964 = vst [vmem:[#allocation84_spill] sm:$0xff] %v19747_v40  ;;  %v11685_v1 = vrot.slane %v20967_v56, 1  ;;  %v11779_v9 = vshll.u32 %v19710_v2, 16  ;;  %v19762_v34 = vmul.bf16 %v19729_v45, %v20968_v6  ;;  %v20972_v58 = vshrl.u32 %v19496_v20, 16 }
 0x9af   : > { %v19765_v10 = vsel %vm1727_vm5, %v11657_v53, %v11661_v59  ;;  %v20973_v48 = vshll.u32 %v19522_v62, 16  ;;  %v11771_v30 = vshll.u32 %v19738_v32, 16  ;;  %v11783_v56 = vshrl.u32 %v19738_v32, 16 }
 0x9b0   : > { %20969 = vst [vmem:[#allocation86_spill] sm:$0xff] %v19762_v34  ;;  %20970 = vst [vmem:[#allocation85_spill] sm:$0xff] %v19765_v10  ;;  %v19768_v24 = vsel %vm1727_vm5, %v11681_v54, %v11685_v1  ;;  %v11673_v50 = vor.u32 %v20972_v58, %v11661_v59  ;;  %v20974_v2 = vshrl.u32 %v19511_v7, 16  ;;  %v20975_v40 = vshll.u32 %v19531_v63, 16  ;;  %10950 = vmatmul.mubr.bf16.gmra.mrb[76].mxu0 %v19596_v3 }
 0x9b1   : > { %20971 = vst [vmem:[#allocation69_spill] sm:$0xff] %v19768_v24  ;;  %v11677_v12 = vrot.slane %v20973_v48, 1  ;;  %v20976_v54 = vshrl.u32 %v19522_v62, 16  ;;  %v20977_v59 = vshll.u32 %v19535_v44, 16  ;;  %v20978_v48 = vshll.u32 %v19564_v47, 16  ;;  %13422 = vmatprep.mubr.msk.bf16.mxu0 %vm608_vm4, %v19608_v18 }
 0x9b2   : > { %v11697_v6 = vor.u32 %v20974_v2, %v11685_v1  ;;  %v11701_v53 = vrot.slane %v20975_v40, 1  ;;  %v11787_v7 = vshll.u32 %v19762_v34, 16  ;;  %v20980_v2 = vshrl.u32 %v19531_v63, 16  ;;  %11429 = vmatmul.mubr.bf16.gmra.mrb[12].mxu1 %v19545_v39 }
 0x9b3   : > { %v19781_v10 = vsel %vm1727_vm5, %v11673_v50, %v11677_v12  ;;  %v11689_v20 = vor.u32 %v20976_v54, %v11677_v12  ;;  %v11693_v58 = vrot.slane %v20977_v59, 1  ;;  %v11717_v24 = vrot.slane %v20978_v48, 1  ;;  %13439 = vmatprep.mubr.msk.bf16.mxu1 %vm608_vm4, %v19600_v33 }
 0x9b4   : > { %v19792_v1 = vsel %vm1727_vm5, %v11697_v6, %v11701_v53  ;;  %v11713_v32 = vor.u32 %v20980_v2, %v11701_v53  ;;  %v20981_v40 = vshll.u32 %v19574_v21, 16  ;;  %v20982_v12 = vshrl.u32 %v19535_v44, 16 }
 0x9b5   : > { %20979 = vst [vmem:[#allocation67_spill] sm:$0xff] %v19792_v1  ;;  %v19801_v50 = vsel %vm1727_vm5, %v11689_v20, %v11693_v58  ;;  %v20983_v59 = vshrl.u32 %v19564_v47, 16  ;;  %v20984_v6 = vshll.u32 %v19593_v0, 16  ;;  %v20985_v53 = vshrl.u32 %v19574_v21, 16 }
 0x9b6   : > { %v11709_v62 = vrot.slane %v20981_v40, 1  ;;  %v11705_v54 = vor.u32 %v20982_v12, %v11693_v58  ;;  %v19810_v63 = vsel %vm1727_vm5, %v11713_v32, %v11717_v24  ;;  %v20986_v40 = vshll.u32 %v19631_v29, 16 }
 0x9b7   : > { %v11729_v48 = vor.u32 %v20983_v59, %v11717_v24  ;;  %v11733_v34 = vrot.slane %v20984_v6, 1  ;;  %v11749_v20 = vrot.slane %v11747_v16, 1  ;;  %v20987_v58 = vshrl.u32 %v19593_v0, 16 }
 0x9b8   : > { %v11721_v2 = vor.u32 %v20985_v53, %v11709_v62  ;;  %v11725_v1 = vrot.slane %v20986_v40, 1  ;;  %v19818_v44 = vsel %vm1727_vm5, %v11705_v54, %v11709_v62  ;;  %v11741_v24 = vrot.slane %v11739_v42, 1  ;;  %10958 = vmatmul.mubr.bf16.gmra.mrb[80].mxu0 %v19619_v8 }
 0x9b9   : > { %v19821_v47 = vsel %vm1727_vm5, %v11729_v48, %v11733_v34  ;;  %v11745_v12 = vor.u32 %v20987_v58, %v11733_v34  ;;  %v20988_v16 = vshrl.u32 %v19631_v29, 16  ;;  %v20989_v39 = vshrl.u32 %v19640_v35, 16  ;;  %13423 = vmatprep.mubr.msk.bf16.mxu0 %vm608_vm4, %v19654_v61 }
 0x9ba   : > { %v19828_v21 = vsel %vm1727_vm5, %v11721_v2, %v11725_v1  ;;  %v11765_v54 = vrot.slane %v11763_v37, 1  ;;  %v11753_v48 = vor.u32 %v11751_v13, %v11741_v24  ;;  %v11757_v0 = vrot.slane %v11755_v27, 1 }
 0x9bb   : > { %v11737_v32 = vor.u32 %v20988_v16, %v11725_v1  ;;  %v11761_v62 = vor.u32 %v20989_v39, %v11749_v20  ;;  %v19835_v59 = vsel %vm1727_vm5, %v11745_v12, %v11749_v20  ;;  %v19837_v34 = vrot.slane %v11779_v9, 1  ;;  %v20993_v20 = vld [vmem:[#allocation38_spill] sm:$0xff]  ;;  %v20994_v39 = vld [vmem:[#allocation39_spill] sm:$0xff] }
 0x9bc   : > { %v11777_v6 = vor.u32 %v11775_v25, %v11765_v54  ;;  %v11773_v29 = vrot.slane %v11771_v30, 1  ;;  %v20990_v35 = vshll.u32 %v19410_v51, 16  ;;  %v19849_v37 = vsel %vm1727_vm5, %v11753_v48, %v11757_v0 }
 0x9bd   : > { %v19840_v42 = vsel %vm1727_vm5, %v11737_v32, %v11741_v24  ;;  %v19843_v33 = vsel %vm1727_vm5, %v11761_v62, %v11765_v54  ;;  %v11769_v53 = vor.u32 %v11767_v23, %v11757_v0  ;;  %v19851_v13 = vrot.slane %v11787_v7, 1 }
 0x9be   : > { %v11092_v1 = vor.u32 %v20990_v35, %v19479_v4  ;;  %v19856_v27 = vsel %vm1727_vm5, %v11777_v6, %v19837_v34  ;;  %v11785_v9 = vor.u32 %v11783_v56, %v11773_v29  ;;  %v20991_v51 = vshrl.u32 %v19438_v5, 16 }
 0x9bf   : > { %v19861_v25 = vsel %vm1727_vm5, %v11769_v53, %v11773_v29  ;;  %v10635_v23 = vmul.bf16 %v19381_v19, %v20867_v36  ;;  %v11069_v7 = vsel %vm2338_vm6, %v19412_v57, %v19579_v11  ;;  %v20992_v56 = vshrl.u32 %v19455_v26, 16  ;;  %v20995_v53 = vld [vmem:[#allocation40_spill] sm:$0xff] }
 0x9c0   : > { %v11081_v30 = vrot.slane %v20991_v51, 7  ;;  %v19872_v2 = vsel %vm1727_vm5, %v11785_v9, %v19851_v13  ;;  %v10638_v58 = vmul.bf16 %v19392_v17, %v20993_v20  ;;  %11437 = vmatmul.mubr.bf16.gmra.mrb[16].mxu1 %v11069_v7  ;;  %v11093_v12 = vsel %vm2338_vm6, %v19448_v43, %v11092_v1  ;;  %10966 = vmatmul.mubr.bf16.gmra.mrb[84].mxu0 %v19674_v31 }
 0x9c1   : > { %v11105_v40 = vrot.slane %v20992_v56, 7  ;;  %v11082_v36 = vshll.u32 %v19438_v5, 16  ;;  %13440 = vmatprep.mubr.msk.bf16.mxu1 %vm608_vm4, %v11093_v12  ;;  %v11106_v19 = vshll.u32 %v19455_v26, 16  ;;  %v11095_v57 = vshrl.u32 %v10635_v23, 16  ;;  %13424 = vmatprep.mubr.msk.bf16.mxu0 %vm608_vm4, %v19676_v15 }
 0x9c2   : > { %v11119_v24 = vshrl.u32 %v10638_v58, 16  ;;  %v10637_v32 = vmul.bf16 %v19458_v41, %v20993_v20  ;;  %v10640_v26 = vmul.bf16 %v19468_v49, %v20994_v39  ;;  %v11098_v54 = vshll.u32 %v10635_v23, 16  ;;  %v19896_v41 = vld [vmem:[#allocation3 + $0x108] sm:$0xff] }
 0x9c3   : > { %v11084_v11 = vor.u32 %v11082_v36, %v11081_v30  ;;  %v11108_v16 = vor.u32 %v11106_v19, %v11105_v40  ;;  %v11097_v17 = vrot.slane %v11095_v57, 7  ;;  %v11122_v48 = vshll.u32 %v10638_v58, 16  ;;  %v20996_v36 = vld [vmem:[#allocation41_spill] sm:$0xff]  ;;  %v20997_v19 = vld [vmem:[#allocation75_spill] sm:$0xff] }
 0x9c4   : > { %v11121_v5 = vrot.slane %v11119_v24, 7  ;;  %v11111_v0 = vshrl.u32 %v10637_v32, 16  ;;  %v11135_v29 = vshrl.u32 %v10640_v26, 16  ;;  %v10639_v49 = vmul.bf16 %v19498_v46, %v20994_v39 }
 0x9c5   : > { %v11085_v43 = vsel %vm2338_vm6, %v19450_v22, %v11084_v11  ;;  %v11109_v62 = vsel %vm2338_vm6, %v19479_v4, %v11108_v16  ;;  %v11100_v6 = vor.u32 %v11098_v54, %v11097_v17  ;;  %v10642_v9 = vmul.bf16 %v19513_v38, %v20995_v53 }
 0x9c6   : > { %v11124_v35 = vor.u32 %v11122_v48, %v11121_v5  ;;  %v11113_v22 = vrot.slane %v11111_v0, 7  ;;  %v11137_v1 = vrot.slane %v11135_v29, 7  ;;  %v11114_v23 = vshll.u32 %v10637_v32, 16  ;;  %v21000_v48 = vld [vmem:[#allocation42_spill] sm:$0xff]  ;;  %v21001_v0 = vld [vmem:[#allocation35_spill] sm:$0xff] }
 0x9c7   : > { %v11101_v4 = vsel %vm2338_vm6, %v11081_v30, %v11100_v6  ;;  %v11138_v7 = vshll.u32 %v10640_v26, 16  ;;  %v11127_v56 = vshrl.u32 %v10639_v49, 16  ;;  %v11151_v58 = vshrl.u32 %v10642_v9, 16  ;;  %v20998_v26 = vld [vmem:[#allocation21_spill] sm:$0xff] }
 0x9c8   : > { %11445 = vmatmul.mubr.bf16.gmra.mrb[20].mxu1 %v11085_v43  ;;  %10974 = vmatmul.mubr.bf16.gmra.mrb[88].mxu0 %v19712_v28  ;;  %v11125_v51 = vsel %vm2338_vm6, %v11105_v40, %v11124_v35  ;;  %v11116_v20 = vor.u32 %v11114_v23, %v11113_v22  ;;  %v10641_v38 = vmul.bf16 %v19515_v14, %v20995_v53  ;;  %v11130_v24 = vshll.u32 %v10639_v49, 16  ;;  %v20999_v14 = vld [vmem:[#allocation72_spill] sm:$0xff]  ;;  %v21002_v23 = vld [vmem:[#allocation29_spill] sm:$0xff] }
 0x9c9   : > { %13441 = vmatprep.mubr.msk.bf16.mxu1 %vm608_vm4, %v11109_v62  ;;  %13425 = vmatprep.mubr.msk.bf16.mxu0 %vm608_vm4, %v19896_v41  ;;  %v11140_v12 = vor.u32 %v11138_v7, %v11137_v1  ;;  %v11129_v46 = vrot.slane %v11127_v56, 7  ;;  %v11153_v40 = vrot.slane %v11151_v58, 7  ;;  %v10644_v57 = vmul.bf16 %v20997_v19, %v20996_v36 }
 0x9ca   : > { %v11117_v30 = vsel %vm2338_vm6, %v11097_v17, %v11116_v20  ;;  %v11154_v16 = vshll.u32 %v10642_v9, 16  ;;  %v11143_v32 = vshrl.u32 %v10641_v38, 16  ;;  %v10643_v62 = vmul.bf16 %v19537_v52, %v20996_v36  ;;  %v21003_v52 = vld [vmem:[#allocation36_spill] sm:$0xff]  ;;  %v21004_v20 = vld [vmem:[#allocation43_spill] sm:$0xff] }
 0x9cb   : > { %v11141_v11 = vsel %vm2338_vm6, %v11121_v5, %v11140_v12  ;;  %v11132_v43 = vor.u32 %v11130_v24, %v11129_v46  ;;  %v10646_v6 = vmul.bf16 %v21001_v0, %v21000_v48  ;;  %v11146_v35 = vshll.u32 %v10641_v38, 16  ;;  %v21005_v24 = vld [vmem:[#allocation23_spill] sm:$0xff]  ;;  %v21008_v0 = vld [vmem:[#allocation37_spill] sm:$0xff] }
 0x9cc   : > { %v11156_v39 = vor.u32 %v11154_v16, %v11153_v40  ;;  %v11145_v17 = vrot.slane %v11143_v32, 7  ;;  %v11170_v49 = vshll.u32 %v10644_v57, 16  ;;  %v10645_v7 = vmul.bf16 %v19596_v3, %v21000_v48  ;;  %v21006_v3 = vld [vmem:[#allocation28_spill] sm:$0xff] }
 0x9cd   : > { %v11133_v54 = vsel %vm2338_vm6, %v11113_v22, %v11132_v43  ;;  %v11183_v9 = vshrl.u32 %v10646_v6, 16  ;;  %v10648_v58 = vmul.bf16 %v19608_v18, %v21004_v20  ;;  %v11162_v38 = vshll.u32 %v10643_v62, 16  ;;  %v21007_v32 = vld [vmem:[#allocation44_spill] sm:$0xff] }
 0x9ce   : > { %v11157_v29 = vsel %vm2338_vm6, %v11137_v1, %v11156_v39  ;;  %v11148_v53 = vor.u32 %v11146_v35, %v11145_v17  ;;  %v11175_v36 = vshrl.u32 %v10645_v7, 16  ;;  %v10647_v18 = vmul.bf16 %v19619_v8, %v21004_v20  ;;  %v21009_v8 = vld [vmem:[#allocation70_spill] sm:$0xff] }
 0x9cf   : > { %v11185_v1 = vrot.slane %v11183_v9, 7  ;;  %v10650_v43 = vmul.bf16 %v19654_v61, %v21007_v32  ;;  %v11178_v39 = vshll.u32 %v10645_v7, 16  ;;  %v10649_v61 = vmul.bf16 %v19674_v31, %v21007_v32  ;;  %v21011_v7 = vld [vmem:[#allocation82_spill] sm:$0xff]  ;;  %v21012_v31 = vld [vmem:[#allocation83_spill] sm:$0xff] }
 0x9d0   : > { %11453 = vmatmul.mubr.bf16.gmra.mrb[24].mxu1 %v11101_v4  ;;  %10982 = vmatmul.mubr.bf16.gmra.mrb[92].mxu0 %v19729_v45  ;;  %v11159_v4 = vshrl.u32 %v10643_v62, 16  ;;  %v11149_v56 = vsel %vm2338_vm6, %v11129_v46, %v11148_v53  ;;  %v11177_v46 = vrot.slane %v11175_v36, 7 }
 0x9d1   : > { %13442 = vmatprep.mubr.msk.bf16.mxu1 %vm608_vm4, %v11125_v51  ;;  %13460 = vmatprep.mubr.msk.bf16.mxu0 %vm608_vm4, %v19569_v60  ;;  %v11167_v60 = vshrl.u32 %v10644_v57, 16  ;;  %v11199_v57 = vshrl.u32 %v10648_v58, 16  ;;  %v11218_v53 = vshll.u32 %v10650_v43, 16  ;;  %v11207_v9 = vshrl.u32 %v10649_v61, 16 }
 0x9d2   : > { %v11161_v22 = vrot.slane %v11159_v4, 7  ;;  %v11180_v62 = vor.u32 %v11178_v39, %v11177_v46  ;;  %v11194_v4 = vshll.u32 %v10647_v18, 16  ;;  %v21016_v39 = vld [vmem:[#allocation69_spill] sm:$0xff] }
 0x9d3   : > { %v11169_v5 = vrot.slane %v11167_v60, 7 }
 0x9d4   : > { %v11164_v19 = vor.u32 %v11162_v38, %v11161_v22  ;;  %v21013_v38 = vld [vmem:[#allocation46_spill] sm:$0xff] }
 0x9d5   : > { %v11172_v51 = vor.u32 %v11170_v49, %v11169_v5 }
 0x9d6   : > { %v11165_v16 = vsel %vm2338_vm6, %v11145_v17, %v11164_v19 }
 0x9d7   : > { %v11173_v12 = vsel %vm2338_vm6, %v11153_v40, %v11172_v51  ;;  %v11201_v40 = vrot.slane %v11199_v57, 7 }
 0x9d8   : > { %11461 = vmatmul.mubr.bf16.gmra.mrb[28].mxu1 %v11117_v30  ;;  %11966 = vmatmul.mubr.bf16.vlgmr.msra.gmra.mrb[96].mxu0 %v20998_v26  ;;  %v11186_v30 = vshll.u32 %v10646_v6, 16  ;;  %v11202_v26 = vshll.u32 %v10648_v58, 16  ;;  %v11181_v6 = vsel %vm2338_vm6, %v11161_v22, %v11180_v62  ;;  %v11209_v22 = vrot.slane %v11207_v9, 7 }
 0x9d9   : > { %13443 = vmatprep.mubr.msk.bf16.mxu1 %vm608_vm4, %v11141_v11  ;;  %13461 = vmatprep.mubr.msk.bf16.mxu0 %vm608_vm4, %v20999_v14  ;;  %v11191_v14 = vshrl.u32 %v10647_v18, 16  ;;  %v11210_v58 = vshll.u32 %v10649_v61, 16 }
 0x9da   : > { %v11188_v11 = vor.u32 %v11186_v30, %v11185_v1  ;;  %v11204_v48 = vor.u32 %v11202_v26, %v11201_v40  ;;  %v10654_v30 = vmul.bf16 %v19896_v41, %v21013_v38 }
 0x9db   : > { %v11193_v17 = vrot.slane %v11191_v14, 7  ;;  %v11212_v19 = vor.u32 %v11210_v58, %v11209_v22  ;;  %v21021_v58 = vld [vmem:[#allocation86_spill] sm:$0xff] }
 0x9dc   : > { %v11189_v60 = vsel %vm2338_vm6, %v11169_v5, %v11188_v11  ;;  %v11205_v49 = vsel %vm2338_vm6, %v11185_v1, %v11204_v48  ;;  %v11247_v11 = vshrl.u32 %v10654_v30, 16 }
 0x9dd   : > { %v11196_v51 = vor.u32 %v11194_v4, %v11193_v17 }
 0x9e0   : > { %11469 = vmatmul.mubr.bf16.gmra.mrb[32].mxu1 %v11133_v54  ;;  %11974 = vmatmul.mubr.bf16.gmra.mrb[100].mxu0 %v21002_v23  ;;  %v11215_v54 = vshrl.u32 %v10650_v43, 16 }
 0x9e1   : > { %13444 = vmatprep.mubr.msk.bf16.mxu1 %vm608_vm4, %v11157_v29  ;;  %13462 = vmatprep.mubr.msk.bf16.mxu0 %vm608_vm4, %v21003_v52  ;;  %v21010_v29 = vld [vmem:[#allocation45_spill] sm:$0xff] }
 0x9e2   : > { %v11217_v5 = vrot.slane %v11215_v54, 7  ;;  %v10652_v35 = vmul.bf16 %v19676_v15, %v21010_v29  ;;  %v10651_v15 = vmul.bf16 %v19712_v28, %v21010_v29  ;;  %v21014_v28 = vld [vmem:[#allocation84_spill] sm:$0xff] }
 0x9e4   : > { %v11231_v23 = vshrl.u32 %v10652_v35, 16  ;;  %v11220_v52 = vor.u32 %v11218_v53, %v11217_v5  ;;  %v11223_v36 = vshrl.u32 %v10651_v15, 16 }
 0x9e6   : > { %v11233_v1 = vrot.slane %v11231_v23, 7  ;;  %v11221_v20 = vsel %vm2338_vm6, %v11201_v40, %v11220_v52  ;;  %v11249_v40 = vrot.slane %v11247_v11, 7 }
 0x9e8   : > { %11477 = vmatmul.mubr.bf16.gmra.mrb[36].mxu1 %v11149_v56  ;;  %11982 = vmatmul.mubr.bf16.gmra.mrb[104].mxu0 %v21005_v24  ;;  %v11197_v56 = vsel %vm2338_vm6, %v11177_v46, %v11196_v51  ;;  %v11225_v24 = vrot.slane %v11223_v36, 7  ;;  %v11213_v46 = vsel %vm2338_vm6, %v11193_v17, %v11212_v19 }
 0x9e9   : > { %13445 = vmatprep.mubr.msk.bf16.mxu1 %vm608_vm4, %v11173_v12  ;;  %13463 = vmatprep.mubr.msk.bf16.mxu0 %vm608_vm4, %v21006_v3  ;;  %v11234_v12 = vshll.u32 %v10652_v35, 16  ;;  %v10653_v3 = vmul.bf16 %v19729_v45, %v21013_v38 }
 0x9eb   : > { %v11236_v57 = vor.u32 %v11234_v12, %v11233_v1  ;;  %v11239_v32 = vshrl.u32 %v10653_v3, 16  ;;  %v11242_v54 = vshll.u32 %v10653_v3, 16  ;;  %v11799_v12 = vshrl.u32 %v21021_v58, 16 }
 0x9ed   : > { %v11237_v18 = vsel %vm2338_vm6, %v11217_v5, %v11236_v57  ;;  %v11241_v14 = vrot.slane %v11239_v32, 7  ;;  %v21019_v5 = vld [vmem:[#allocation81_spill] sm:$0xff]  ;;  %v11801_v36 = vor.u32 %v11799_v12, %v19851_v13 }
 0x9ee   : > { %v11791_v29 = vshrl.u32 %v21019_v5, 16 }
 0x9ef   : > { %v11244_v48 = vor.u32 %v11242_v54, %v11241_v14 }
 0x9f0   : > { %11485 = vmatmul.mubr.bf16.gmra.mrb[40].mxu1 %v11165_v16  ;;  %11990 = vmatmul.mubr.bf16.gmra.mrb[108].mxu0 %v21008_v0  ;;  %v11226_v16 = vshll.u32 %v10651_v15, 16  ;;  %v21017_v0 = vld [vmem:[#allocation67_spill] sm:$0xff]  ;;  %v11793_v4 = vor.u32 %v11791_v29, %v19837_v34 }
 0x9f1   : > { %13446 = vmatprep.mubr.msk.bf16.mxu1 %vm608_vm4, %v11189_v60  ;;  %13464 = vmatprep.mubr.msk.bf16.mxu0 %vm608_vm4, %v21009_v8  ;;  %v21015_v60 = vld [vmem:[#allocation85_spill] sm:$0xff]  ;;  %v11245_v8 = vsel %vm2338_vm6, %v11225_v24, %v11244_v48 }
 0x9f2   : > { %v11228_v43 = vor.u32 %v11226_v16, %v11225_v24 }
 0x9f4   : > { %v11229_v45 = vsel %vm2338_vm6, %v11209_v22, %v11228_v43 }
 0x9f8   : > { %11493 = vmatmul.mubr.bf16.gmra.mrb[44].mxu1 %v11181_v6  ;;  %11998 = vmatmul.mubr.bf16.gmra.mrb[112].mxu0 %v21011_v7  ;;  %v10655_v7 = vld [vmem:[#allocation3 + $0x110] sm:$0x1] }
 0x9f9   : > { %13447 = vmatprep.mubr.msk.bf16.mxu1 %vm608_vm4, %v11205_v49  ;;  %13465 = vmatprep.mubr.msk.bf16.mxu0 %vm608_vm4, %v21012_v31 }
 0xa00   : > { %11501 = vmatmul.mubr.bf16.gmra.mrb[48].mxu1 %v11197_v56  ;;  %12006 = vmatmul.mubr.bf16.gmra.mrb[116].mxu0 %v19741_v55  ;;  %v11250_v55 = vshll.u32 %v10654_v30, 16 }
 0xa01   : > { %13448 = vmatprep.mubr.msk.bf16.mxu1 %vm608_vm4, %v11221_v20  ;;  %13466 = vmatprep.mubr.msk.bf16.mxu0 %vm608_vm4, %v21014_v28 }
 0xa02   : > { %v11252_v26 = vor.u32 %v11250_v55, %v11249_v40 }
 0xa04   : > { %v11253_v62 = vsel %vm2338_vm6, %v11233_v1, %v11252_v26 }
 0xa08   : > { %11509 = vmatmul.mubr.bf16.gmra.mrb[52].mxu1 %v11213_v46  ;;  %12014 = vmatmul.mubr.bf16.gmra.mrb[120].mxu0 %v21015_v60 }
 0xa09   : > { %13449 = vmatprep.mubr.msk.bf16.mxu1 %vm608_vm4, %v11237_v18  ;;  %13467 = vmatprep.mubr.msk.bf16.mxu0 %vm608_vm4, %v21016_v39 }
 0xa10   : > { %11517 = vmatmul.mubr.bf16.gmra.mrb[56].mxu1 %v11229_v45  ;;  %12022 = vmatmul.mubr.bf16.gmra.mrb[124].mxu0 %v19781_v10 }
 0xa11   : > { %13450 = vmatprep.mubr.msk.bf16.mxu1 %vm608_vm4, %v11253_v62  ;;  %13468 = vmatprep.mubr.msk.bf16.mxu0 %vm608_vm4, %v21017_v0 }
 0xa18   : > { %11525 = vmatmul.mubr.bf16.gmra.mrb[60].mxu1 %v11245_v8  ;;  %12030 = vmatmul.mubr.bf16.gmra.mrb[128].mxu0 %v19801_v50 }
 0xa19   : > { %13469 = vmatprep.mubr.msk.bf16.mxu0 %vm608_vm4, %v19810_v63 }
 0xa20   : > { %12038 = vmatmul.mubr.bf16.gmra.mrb[132].mxu0 %v19818_v44 }
 0xa21   : > { %13470 = vmatprep.mubr.msk.bf16.mxu0 %vm608_vm4, %v19821_v47  ;;  %v21018_v47 = vld [vmem:[#allocation62_spill] sm:$0xff] }
 0xa28   : > { %12046 = vmatmul.mubr.bf16.gmra.mrb[136].mxu0 %v19828_v21  ;;  %v10688_v21 = vmul.bf16 %v19896_v41, %v21018_v47  ;;  %v21020_v41 = vld [vmem:[#allocation60_spill] sm:$0xff] }
 0xa29   : > { %13471 = vmatprep.mubr.msk.bf16.mxu0 %vm608_vm4, %v19835_v59  ;;  %v19994_v10 = vpop.f32.mrb[32].mxu0  ;;  %v10689_v56 = vmul.bf16 %v10655_v7, %v21020_v41 }
 0xa2a   : > { %v10865_v17 = vpop.f32.mrb[33].mxu0 }
 0xa2b   : > { %v19996_v61 = vpop.f32.mrb[34].mxu0  ;;  %v11803_v38 = vshll.u32 %v10689_v56, 16 }
 0xa2c   : > { %v10868_v6 = vpop.f32.mrb[35].mxu0 }
 0xa2d   : > { %v11805_v11 = vrot.slane %v11803_v38, 1 }
 0xa2f   : > { %v11806_v24 = vsel %vm1727_vm5, %v11801_v36, %v11805_v11 }
 0xa30   : > { %12054 = vmatmul.mubr.bf16.gmra.mrb[140].mxu0 %v19840_v42  ;;  %v11795_v42 = vshll.u32 %v10688_v21, 16 }
 0xa31   : > { %13472 = vmatprep.mubr.msk.bf16.mxu0 %vm608_vm4, %v19843_v33  ;;  %v10656_v33 = vld [vmem:[#allocation3 + $0x118] sm:$0x1] }
 0xa32   : > { %v11797_v51 = vrot.slane %v11795_v42, 1  ;;  %v10690_v23 = vmul.bf16 %v10656_v33, %v21020_v41 }
 0xa33   : > { %v20001_v50 = vpop.f32.mrb[36].mxu0 }
 0xa34   : > { %v10873_v63 = vpop.f32.mrb[37].mxu0  ;;  %v11811_v52 = vshll.u32 %v10690_v23, 16 }
 0xa35   : > { %v20003_v44 = vpop.f32.mrb[38].mxu0 }
 0xa36   : > { %v10876_v59 = vpop.f32.mrb[39].mxu0  ;;  %v11813_v20 = vrot.slane %v11811_v52, 1 }
 0xa38   : > { %12062 = vmatmul.mubr.bf16.gmra.mrb[144].mxu0 %v19849_v37  ;;  %v11798_v37 = vsel %vm1727_vm5, %v11793_v4, %v11797_v51 }
 0xa39   : > { %13473 = vmatprep.mubr.msk.bf16.mxu0 %vm608_vm4, %v19856_v27  ;;  %v11807_v27 = vshrl.u32 %v10688_v21, 16 }
 0xa3b   : > { %v20011_v35 = vpop.f32.mrb[40].mxu0  ;;  %v11809_v15 = vor.u32 %v11807_v27, %v11797_v51 }
 0xa3c   : > { %v10881_v49 = vpop.f32.mrb[41].mxu0 }
 0xa3d   : > { %v20014_v53 = vpop.f32.mrb[42].mxu0 }
 0xa3e   : > { %v10884_v9 = vpop.f32.mrb[43].mxu0 }
 0xa40   : > { %12070 = vmatmul.mubr.bf16.gmra.mrb[148].mxu0 %v19861_v25  ;;  %v11814_v25 = vsel %vm1727_vm5, %v11809_v15, %v11813_v20 }
 0xa41   : > { %13474 = vmatprep.mubr.msk.bf16.mxu0 %vm608_vm4, %v11798_v37 }
 0xa43   : > { %v20020_v31 = vpop.f32.mrb[44].mxu0 }
 0xa44   : > { %v10889_v22 = vpop.f32.mrb[45].mxu0 }
 0xa45   : > { %v20022_v34 = vpop.f32.mrb[46].mxu0 }
 0xa46   : > { %v10892_v1 = vpop.f32.mrb[47].mxu0 }
 0xa48   : > { %12078 = vmatmul.mubr.bf16.gmra.mrb[152].mxu0 %v19872_v2 }
 0xa49   : > { %13475 = vmatprep.mubr.msk.bf16.mxu0 %vm608_vm4, %v11814_v25 }
 0xa4b   : > { %v20029_v30 = vpop.f32.mrb[48].mxu0 }
 0xa4c   : > { %v10897_v19 = vpop.f32.mrb[49].mxu0 }
 0xa4d   : > { %v20032_v57 = vpop.f32.mrb[50].mxu0 }
 0xa4e   : > { %v10900_v28 = vpop.f32.mrb[51].mxu0 }
 0xa50   : > { %12086 = vmatmul.mubr.bf16.gmra.mrb[156].mxu0 %v11806_v24 }
 0xa53   : > { %v20035_v2 = vpop.f32.mrb[52].mxu0 }
 0xa54   : > { %v10905_v3 = vpop.f32.mrb[53].mxu0 }
 0xa55   : > { %v20037_v46 = vpop.f32.mrb[54].mxu0 }
 0xa56   : > { %v10908_v18 = vpop.f32.mrb[55].mxu0 }
 0xa5b   : > { %v20039_v16 = vpop.f32.mrb[56].mxu0 }
 0xa5c   : > { %v10913_v40 = vpop.f32.mrb[57].mxu0 }
 0xa5d   : > { %v20041_v32 = vpop.f32.mrb[58].mxu0 }
 0xa5e   : > { %v10916_v13 = vpop.f32.mrb[59].mxu0 }
 0xa63   : > { %v20043_v43 = vpop.f32.mrb[60].mxu0 }
 0xa64   : > { %v10921_v55 = vpop.f32.mrb[61].mxu0 }
 0xa65   : > { %v20045_v60 = vpop.f32.mrb[62].mxu0 }
 0xa66   : > { %v10924_v39 = vpop.f32.mrb[63].mxu0 }
 0xa6b   : > { %v20047_v26 = vpop.f32.mrb[64].mxu0 }
 0xa6c   : > { %v10929_v14 = vpop.f32.mrb[65].mxu0 }
 0xa6d   : > { %v20049_v45 = vpop.f32.mrb[66].mxu0  ;;  %v11406_v54 = vpop.f32.mrb[0].mxu1 }
 0xa6e   : > { %v10932_v62 = vpop.f32.mrb[67].mxu0  ;;  %v20052_v48 = vadd.f32 %v11406_v54, %v19994_v10  ;;  %v11408_v0 = vpop.f32.mrb[1].mxu1 }
 0xa6f   : > { %v11409_v8 = vpop.f32.mrb[2].mxu1 }
 0xa70   : > { %v20055_v17 = vadd.f32 %v11409_v8, %v19996_v61  ;;  %v11411_v6 = vpop.f32.mrb[3].mxu1 }
 0xa73   : > { %v20057_v63 = vpop.f32.mrb[68].mxu0 }
 0xa74   : > { %v10937_v47 = vpop.f32.mrb[69].mxu0 }
 0xa75   : > { %v20059_v21 = vpop.f32.mrb[70].mxu0  ;;  %v11414_v5 = vpop.f32.mrb[4].mxu1 }
 0xa76   : > { %v10940_v59 = vpop.f32.mrb[71].mxu0  ;;  %v20062_v29 = vadd.f32 %v11414_v5, %v20001_v50  ;;  %v11416_v42 = vpop.f32.mrb[5].mxu1 }
 0xa77   : > { %v11417_v33 = vpop.f32.mrb[6].mxu1 }
 0xa78   : > { %v20065_v10 = vadd.f32 %v11417_v33, %v20003_v44  ;;  %v11419_v49 = vpop.f32.mrb[7].mxu1 }
 0xa7b   : > { %v20067_v4 = vpop.f32.mrb[72].mxu0 }
 0xa7c   : > { %v10945_v61 = vpop.f32.mrb[73].mxu0 }
 0xa7d   : > { %v20069_v9 = vpop.f32.mrb[74].mxu0  ;;  %v11422_v41 = vpop.f32.mrb[8].mxu1 }
 0xa7e   : > { %v10948_v51 = vpop.f32.mrb[75].mxu0  ;;  %v20072_v23 = vadd.f32 %v11422_v41, %v20011_v35  ;;  %v11424_v37 = vpop.f32.mrb[9].mxu1 }
 0xa7f   : > { %v11425_v27 = vpop.f32.mrb[10].mxu1 }
 0xa80   : > { %v20075_v50 = vadd.f32 %v11425_v27, %v20014_v53  ;;  %v11427_v52 = vpop.f32.mrb[11].mxu1 }
 0xa83   : > { %v20077_v7 = vpop.f32.mrb[76].mxu0 }
 0xa84   : > { %v10953_v44 = vpop.f32.mrb[77].mxu0 }
 0xa85   : > { %v20079_v22 = vpop.f32.mrb[78].mxu0  ;;  %v11430_v56 = vpop.f32.mrb[12].mxu1 }
 0xa86   : > { %v10956_v15 = vpop.f32.mrb[79].mxu0  ;;  %v20082_v1 = vadd.f32 %v11430_v56, %v20020_v31  ;;  %v11432_v20 = vpop.f32.mrb[13].mxu1 }
 0xa87   : > { %v11433_v25 = vpop.f32.mrb[14].mxu1 }
 0xa88   : > { %v20085_v35 = vadd.f32 %v11433_v25, %v20022_v34  ;;  %v11435_v58 = vpop.f32.mrb[15].mxu1 }
 0xa8b   : > { %v20087_v12 = vpop.f32.mrb[80].mxu0 }
 0xa8c   : > { %v10961_v53 = vpop.f32.mrb[81].mxu0 }
 0xa8d   : > { %v20089_v38 = vpop.f32.mrb[82].mxu0 }
 0xa8e   : > { %v10964_v36 = vpop.f32.mrb[83].mxu0 }
 0xa93   : > { %v11438_v19 = vpop.f32.mrb[16].mxu1  ;;  %v20097_v18 = vpop.f32.mrb[84].mxu0 }
 0xa94   : > { %v20092_v11 = vadd.f32 %v11438_v19, %v20029_v30  ;;  %v11440_v28 = vpop.f32.mrb[17].mxu1  ;;  %v10969_v34 = vpop.f32.mrb[85].mxu0 }
 0xa95   : > { %v11441_v24 = vpop.f32.mrb[18].mxu1  ;;  %v20099_v40 = vpop.f32.mrb[86].mxu0 }
 0xa96   : > { %v20095_v31 = vadd.f32 %v11441_v24, %v20032_v57  ;;  %v11443_v3 = vpop.f32.mrb[19].mxu1  ;;  %v10972_v13 = vpop.f32.mrb[87].mxu0 }
 0xa9b   : > { %v11446_v55 = vpop.f32.mrb[20].mxu1  ;;  %v20107_v0 = vpop.f32.mrb[88].mxu0 }
 0xa9c   : > { %v20102_v39 = vadd.f32 %v11446_v55, %v20035_v2  ;;  %v11448_v14 = vpop.f32.mrb[21].mxu1  ;;  %v10977_v57 = vpop.f32.mrb[89].mxu0 }
 0xa9d   : > { %v11449_v62 = vpop.f32.mrb[22].mxu1  ;;  %v20109_v8 = vpop.f32.mrb[90].mxu0 }
 0xa9e   : > { %v20105_v30 = vadd.f32 %v11449_v62, %v20037_v46  ;;  %v11451_v54 = vpop.f32.mrb[23].mxu1  ;;  %v10980_v6 = vpop.f32.mrb[91].mxu0 }
 0xaa3   : > { %v11454_v47 = vpop.f32.mrb[24].mxu1  ;;  %v20117_v49 = vpop.f32.mrb[92].mxu0 }
 0xaa4   : > { %v20112_v59 = vadd.f32 %v11454_v47, %v20039_v16  ;;  %v11456_v5 = vpop.f32.mrb[25].mxu1  ;;  %v10985_v46 = vpop.f32.mrb[93].mxu0 }
 0xaa5   : > { %v11457_v42 = vpop.f32.mrb[26].mxu1  ;;  %v20119_v61 = vpop.f32.mrb[94].mxu0 }
 0xaa6   : > { %v20115_v2 = vadd.f32 %v11457_v42, %v20041_v32  ;;  %v11459_v33 = vpop.f32.mrb[27].mxu1  ;;  %v10988_v51 = vpop.f32.mrb[95].mxu0  ;;  %v20130_v32 = vld [vmem:[%s20418_s18] ss:$0 sm:$0xff] }
 0xaab   : > { %v11462_v41 = vpop.f32.mrb[28].mxu1  ;;  %v11967_v15 = vpop.f32.mrb[96].mxu0 }
 0xaac   : > { %v20122_v37 = vadd.f32 %v11462_v41, %v20043_v43  ;;  %v11464_v27 = vpop.f32.mrb[29].mxu1  ;;  %v12094_v56 = vadd.f32 %v11967_v15, %v20052_v48  ;;  %v11969_v20 = vpop.f32.mrb[97].mxu0 }
 0xaad   : > { %v11465_v52 = vpop.f32.mrb[30].mxu1  ;;  %v11970_v25 = vpop.f32.mrb[98].mxu0 }
 0xaae   : > { %v20125_v16 = vadd.f32 %v11465_v52, %v20045_v60  ;;  %v11467_v44 = vpop.f32.mrb[31].mxu1  ;;  %v12133_v58 = vadd.f32 %v20130_v32, %v12094_v56  ;;  %v12095_v43 = vadd.f32 %v11970_v25, %v20055_v17  ;;  %v11972_v36 = vpop.f32.mrb[99].mxu0 }
 0xab0   : > { %v12134_v28 = vadd.f32 %v20130_v32, %v12095_v43  ;;  %v12165_v48 = vmax.f32 %v12133_v58, 0.0 }
 0xab2   : > { %v12166_v13 = vmax.f32 %v12134_v28, 0.0 }
 0xab3   : > { %v11470_v53 = vpop.f32.mrb[32].mxu1  ;;  %v11975_v55 = vpop.f32.mrb[100].mxu0 }
 0xab4   : > { %v20136_v60 = vadd.f32 %v11470_v53, %v20047_v26  ;;  %v11472_v19 = vpop.f32.mrb[33].mxu1  ;;  %v12197_v14 = vpack.c.bf16 %v12166_v13, %v12165_v48  ;;  %v12096_v62 = vadd.f32 %v11975_v55, %v20062_v29  ;;  %v11977_v17 = vpop.f32.mrb[101].mxu0 }
 0xab5   : > { %v11473_v24 = vpop.f32.mrb[34].mxu1  ;;  %v11978_v54 = vpop.f32.mrb[102].mxu0 }
 0xab6   : > { %v20140_v3 = vadd.f32 %v11473_v24, %v20049_v45  ;;  %v11475_v34 = vpop.f32.mrb[35].mxu1  ;;  %v12135_v57 = vadd.f32 %v20130_v32, %v12096_v62  ;;  %v12097_v26 = vadd.f32 %v11978_v54, %v20065_v10  ;;  %12642 = vrot.lane.b32.xlu0 %v12197_v14, %s14767_s26  ;;  %v11980_v47 = vpop.f32.mrb[103].mxu0 }
 0xab8   : > { %v12136_v42 = vadd.f32 %v20130_v32, %v12097_v26  ;;  %v12167_v51 = vmax.f32 %v12135_v57, 0.0 }
 0xaba   : > { %v12168_v41 = vmax.f32 %v12136_v42, 0.0 }
 0xabb   : > { %v11478_v6 = vpop.f32.mrb[36].mxu1  ;;  %v11983_v27 = vpop.f32.mrb[104].mxu0 }
 0xabc   : > { %v20147_v45 = vadd.f32 %v11478_v6, %v20057_v63  ;;  %v11480_v5 = vpop.f32.mrb[37].mxu1  ;;  %v12198_v10 = vpack.c.bf16 %v12168_v41, %v12167_v51  ;;  %v12098_v52 = vadd.f32 %v11983_v27, %v20072_v23  ;;  %v11985_v44 = vpop.f32.mrb[105].mxu0 }
 0xabd   : > { %v11481_v33 = vpop.f32.mrb[38].mxu1  ;;  %v11986_v15 = vpop.f32.mrb[106].mxu0 }
 0xabe   : > { %v20151_v29 = vadd.f32 %v11481_v33, %v20059_v21  ;;  %v11483_v46 = vpop.f32.mrb[39].mxu1  ;;  %v12137_v56 = vadd.f32 %v20130_v32, %v12098_v52  ;;  %v12099_v63 = vadd.f32 %v11986_v15, %v20075_v50  ;;  %12644 = vrot.lane.b32.xlu1 %v12198_v10, %s14767_s26  ;;  %v11988_v25 = vpop.f32.mrb[107].mxu0 }
 0xac0   : > { %v12138_v43 = vadd.f32 %v20130_v32, %v12099_v63  ;;  %v12169_v19 = vmax.f32 %v12137_v56, 0.0 }
 0xac2   : > { %v12170_v28 = vmax.f32 %v12138_v43, 0.0 }
 0xac3   : > { %v11486_v20 = vpop.f32.mrb[40].mxu1  ;;  %v11991_v24 = vpop.f32.mrb[108].mxu0 }
 0xac4   : > { %v20158_v21 = vadd.f32 %v11486_v20, %v20067_v4  ;;  %v11488_v58 = vpop.f32.mrb[41].mxu1  ;;  %v12199_v34 = vpack.c.bf16 %v12170_v28, %v12169_v19  ;;  %v12100_v50 = vadd.f32 %v11991_v24, %v20082_v1  ;;  %v11993_v48 = vpop.f32.mrb[109].mxu0 }
 0xac5   : > { %v11489_v53 = vpop.f32.mrb[42].mxu1  ;;  %v11994_v13 = vpop.f32.mrb[110].mxu0 }
 0xac6   : > { %v20162_v36 = vadd.f32 %v11489_v53, %v20069_v9  ;;  %v11491_v23 = vpop.f32.mrb[43].mxu1  ;;  %v12139_v55 = vadd.f32 %v20130_v32, %v12100_v50  ;;  %v12101_v4 = vadd.f32 %v11994_v13, %v20085_v35  ;;  %12646 = vrot.lane.b32.xlu0 %v12199_v34, %s14767_s26  ;;  %v11996_v62 = vpop.f32.mrb[111].mxu0 }
 0xac8   : > { %v12140_v54 = vadd.f32 %v20130_v32, %v12101_v4  ;;  %v12171_v6 = vmax.f32 %v12139_v55, 0.0 }
 0xaca   : > { %v12172_v47 = vmax.f32 %v12140_v54, 0.0 }
 0xacb   : > { %v11494_v14 = vpop.f32.mrb[44].mxu1  ;;  %v11999_v5 = vpop.f32.mrb[112].mxu0 }
 0xacc   : > { %v20169_v9 = vadd.f32 %v11494_v14, %v20077_v7  ;;  %v11496_v17 = vpop.f32.mrb[45].mxu1  ;;  %v12200_v42 = vpack.c.bf16 %v12172_v47, %v12171_v6  ;;  %v12102_v35 = vadd.f32 %v11999_v5, %v20092_v11  ;;  %v12001_v33 = vpop.f32.mrb[113].mxu0 }
 0xacd   : > { %v11497_v57 = vpop.f32.mrb[46].mxu1  ;;  %v12002_v46 = vpop.f32.mrb[114].mxu0 }
 0xace   : > { %v20173_v26 = vadd.f32 %v11497_v57, %v20079_v22  ;;  %v11499_v1 = vpop.f32.mrb[47].mxu1  ;;  %v12141_v51 = vadd.f32 %v20130_v32, %v12102_v35  ;;  %v12103_v7 = vadd.f32 %v12002_v46, %v20095_v31  ;;  %12648 = vrot.lane.b32.xlu1 %v12200_v42, %s14767_s26  ;;  %v12004_v27 = vpop.f32.mrb[115].mxu0 }
 0xad0   : > { %v12142_v52 = vadd.f32 %v20130_v32, %v12103_v7  ;;  %v12173_v56 = vmax.f32 %v12141_v51, 0.0 }
 0xad2   : > { %v12174_v63 = vmax.f32 %v12142_v52, 0.0 }
 0xad3   : > { %v11502_v41 = vpop.f32.mrb[48].mxu1  ;;  %v12007_v20 = vpop.f32.mrb[116].mxu0 }
 0xad4   : > { %v20180_v22 = vadd.f32 %v11502_v41, %v20087_v12  ;;  %v11504_v10 = vpop.f32.mrb[49].mxu1  ;;  %v12201_v25 = vpack.c.bf16 %v12174_v63, %v12173_v56  ;;  %v12104_v31 = vadd.f32 %v12007_v20, %v20102_v39  ;;  %v12009_v58 = vpop.f32.mrb[117].mxu0 }
 0xad5   : > { %v11505_v44 = vpop.f32.mrb[50].mxu1  ;;  %v12010_v43 = vpop.f32.mrb[118].mxu0 }
 0xad6   : > { %v20184_v15 = vadd.f32 %v11505_v44, %v20089_v38  ;;  %v11507_v11 = vpop.f32.mrb[51].mxu1  ;;  %v12143_v53 = vadd.f32 %v20130_v32, %v12104_v31  ;;  %v12105_v12 = vadd.f32 %v12010_v43, %v20105_v30  ;;  %12650 = vrot.lane.b32.xlu0 %v12201_v25, %s14767_s26  ;;  %v12012_v19 = vpop.f32.mrb[119].mxu0 }
 0xad8   : > { %v12144_v24 = vadd.f32 %v20130_v32, %v12105_v12  ;;  %v12175_v48 = vmax.f32 %v12143_v53, 0.0 }
 0xada   : > { %v12176_v13 = vmax.f32 %v12144_v24, 0.0 }
 0xadb   : > { %v11510_v23 = vpop.f32.mrb[52].mxu1  ;;  %v12015_v55 = vpop.f32.mrb[120].mxu0 }
 0xadc   : > { %v20191_v38 = vadd.f32 %v11510_v23, %v20097_v18  ;;  %v11512_v28 = vpop.f32.mrb[53].mxu1  ;;  %v12202_v4 = vpack.c.bf16 %v12176_v13, %v12175_v48  ;;  %v12106_v30 = vadd.f32 %v12015_v55, %v20112_v59  ;;  %v12017_v14 = vpop.f32.mrb[121].mxu0 }
 0xadd   : > { %v11513_v34 = vpop.f32.mrb[54].mxu1  ;;  %v12018_v62 = vpop.f32.mrb[122].mxu0 }
 0xade   : > { %v20195_v50 = vadd.f32 %v11513_v34, %v20099_v40  ;;  %v11515_v39 = vpop.f32.mrb[55].mxu1  ;;  %v12145_v17 = vadd.f32 %v20130_v32, %v12106_v30  ;;  %v12107_v18 = vadd.f32 %v12018_v62, %v20115_v2  ;;  %12652 = vrot.lane.b32.xlu1 %v12202_v4, %s14767_s26  ;;  %v12020_v57 = vpop.f32.mrb[123].mxu0 }
 0xae0   : > { %v12146_v6 = vadd.f32 %v20130_v32, %v12107_v18  ;;  %v12177_v42 = vmax.f32 %v12145_v17, 0.0 }
 0xae2   : > { %v12178_v35 = vmax.f32 %v12146_v6, 0.0 }
 0xae3   : > { %v11518_v54 = vpop.f32.mrb[56].mxu1  ;;  %v12023_v33 = vpop.f32.mrb[124].mxu0 }
 0xae4   : > { %v20202_v40 = vadd.f32 %v11518_v54, %v20107_v0  ;;  %v11520_v1 = vpop.f32.mrb[57].mxu1  ;;  %v12203_v46 = vpack.c.bf16 %v12178_v35, %v12177_v42  ;;  %v12108_v2 = vadd.f32 %v12023_v33, %v20122_v37  ;;  %v12025_v51 = vpop.f32.mrb[125].mxu0 }
 0xae5   : > { %v11521_v47 = vpop.f32.mrb[58].mxu1  ;;  %v12026_v7 = vpop.f32.mrb[126].mxu0 }
 0xae6   : > { %v20206_v5 = vadd.f32 %v11521_v47, %v20109_v8  ;;  %v11523_v59 = vpop.f32.mrb[59].mxu1  ;;  %v12147_v41 = vadd.f32 %v20130_v32, %v12108_v2  ;;  %v12109_v0 = vadd.f32 %v12026_v7, %v20125_v16  ;;  %12654 = vrot.lane.b32.xlu0 %v12203_v46, %s14767_s26  ;;  %v12028_v10 = vpop.f32.mrb[127].mxu0 }
 0xae8   : > { %v12148_v44 = vadd.f32 %v20130_v32, %v12109_v0  ;;  %v12179_v63 = vmax.f32 %v12147_v41, 0.0 }
 0xaea   : > { %v12180_v20 = vmax.f32 %v12148_v44, 0.0 }
 0xaeb   : > { %v11526_v27 = vpop.f32.mrb[60].mxu1  ;;  %v12031_v25 = vpop.f32.mrb[128].mxu0 }
 0xaec   : > { %v20213_v8 = vadd.f32 %v11526_v27, %v20117_v49  ;;  %v11528_v52 = vpop.f32.mrb[61].mxu1  ;;  %v12204_v31 = vpack.c.bf16 %v12180_v20, %v12179_v63  ;;  %v12110_v16 = vadd.f32 %v12031_v25, %v20136_v60  ;;  %v12033_v58 = vpop.f32.mrb[129].mxu0 }
 0xaed   : > { %v11529_v11 = vpop.f32.mrb[62].mxu1  ;;  %v12034_v43 = vpop.f32.mrb[130].mxu0 }
 0xaee   : > { %v20217_v56 = vadd.f32 %v11529_v11, %v20119_v61  ;;  %v11531_v37 = vpop.f32.mrb[63].mxu1  ;;  %v12149_v53 = vadd.f32 %v20130_v32, %v12110_v16  ;;  %v12111_v49 = vadd.f32 %v12034_v43, %v20140_v3  ;;  %12656 = vrot.lane.b32.xlu1 %v12204_v31, %s14767_s26  ;;  %v12036_v12 = vpop.f32.mrb[131].mxu0 }
 0xaf0   : > { %v12150_v23 = vadd.f32 %v20130_v32, %v12111_v49  ;;  %v12181_v61 = vmax.f32 %v12149_v53, 0.0 }
 0xaf2   : > { %v12182_v19 = vmax.f32 %v12150_v23, 0.0 }
 0xaf3   : > { %v12039_v28 = vpop.f32.mrb[132].mxu0 }
 0xaf4   : > { %v12205_v24 = vpack.c.bf16 %v12182_v19, %v12181_v61  ;;  %v12112_v34 = vadd.f32 %v12039_v28, %v20147_v45  ;;  %v12041_v39 = vpop.f32.mrb[133].mxu0 }
 0xaf5   : > { %v12042_v48 = vpop.f32.mrb[134].mxu0 }
 0xaf6   : > { %v12151_v60 = vadd.f32 %v20130_v32, %v12112_v34  ;;  %v12113_v13 = vadd.f32 %v12042_v48, %v20151_v29  ;;  %12658 = vrot.lane.b32.xlu0 %v12205_v24, %s14767_s26  ;;  %v12044_v3 = vpop.f32.mrb[135].mxu0 }
 0xaf7   : > { %v14645_v3 = vld [vmem:[%s21022_s23 + $0x4] ss:$8 sps:$4 sm:$0xff]  }
 0xaf8   : > { %v12152_v55 = vadd.f32 %v20130_v32, %v12113_v13  ;;  %v12183_v4 = vmax.f32 %v12151_v60, 0.0  ;;  %12819 = vmatprep.mubr.bf16.mxu1 %v14645_v3  ;;  %v21042_v3 = vld [vmem:[#allocation66_spill] sm:$0xff] }
 0xafa   : > { %v12184_v30 = vmax.f32 %v12152_v55, 0.0 }
 0xafb   : > { %v12047_v14 = vpop.f32.mrb[136].mxu0 }
 0xafc   : > { %v12206_v62 = vpack.c.bf16 %v12184_v30, %v12183_v4  ;;  %v12114_v17 = vadd.f32 %v12047_v14, %v20158_v21  ;;  %v12049_v18 = vpop.f32.mrb[137].mxu0  ;;  %v12563_v14 = vld [vmem:[#allocation5 + $0x8] sm:$0xff] }
 0xafd   : > { %v12050_v54 = vpop.f32.mrb[138].mxu0 }
 0xafe   : > { %v12153_v45 = vadd.f32 %v20130_v32, %v12114_v17  ;;  %v12115_v57 = vadd.f32 %v12050_v54, %v20162_v36  ;;  %12660 = vrot.lane.b32.xlu1 %v12206_v62, %s14767_s26  ;;  %v12052_v29 = vpop.f32.mrb[139].mxu0 }
 0xb00   : > { %v12154_v1 = vadd.f32 %v20130_v32, %v12115_v57  ;;  %v12185_v6 = vmax.f32 %v12153_v45, 0.0 }
 0xb02   : > { %v12186_v47 = vmax.f32 %v12154_v1, 0.0  ;;  %v21023_v1 = vld [vmem:[#allocation74_spill] sm:$0xff] }
 0xb03   : > { %v12055_v59 = vpop.f32.mrb[140].mxu0 }
 0xb04   : > { %v12207_v42 = vpack.c.bf16 %v12186_v47, %v12185_v6  ;;  %v12116_v35 = vadd.f32 %v12055_v59, %v20169_v9  ;;  %v12057_v33 = vpop.f32.mrb[141].mxu0  ;;  %v14686_v6 = vld [vmem:[#allocation5 + $0x10] sm:$0xff] }
 0xb05   : > { %v12058_v46 = vpop.f32.mrb[142].mxu0  ;;  %v12564_v33 = vld [vmem:[#allocation5 + $0x10] sm:$0xff] }
 0xb06   : > { %v12155_v21 = vadd.f32 %v20130_v32, %v12116_v35  ;;  %v12117_v2 = vadd.f32 %v12058_v46, %v20173_v26  ;;  %12662 = vrot.lane.b32.xlu0 %v12207_v42, %s14767_s26  ;;  %v12060_v36 = vpop.f32.mrb[143].mxu0  ;;  %v14687_v46 = vld [vmem:[#allocation5 + $0x20] sm:$0xff] }
 0xb07   : > { %v14688_v36 = vld [vmem:[#allocation5 + $0x18] sm:$0xff] }
 0xb08   : > { %v12156_v51 = vadd.f32 %v20130_v32, %v12117_v2  ;;  %v12187_v7 = vmax.f32 %v12155_v21, 0.0  ;;  %v21024_v2 = vld [vmem:[#allocation22_spill] sm:$0xff] }
 0xb0a   : > { %v12188_v41 = vmax.f32 %v12156_v51, 0.0 }
 0xb0b   : > { %v12063_v0 = vpop.f32.mrb[144].mxu0 }
 0xb0c   : > { %v12208_v27 = vpack.c.bf16 %v12188_v41, %v12187_v7  ;;  %v12118_v10 = vadd.f32 %v12063_v0, %v20180_v22  ;;  %v12065_v52 = vpop.f32.mrb[145].mxu0  ;;  %v21025_v41 = vld [vmem:[#allocation24_spill] sm:$0xff] }
 0xb0d   : > { %v12066_v44 = vpop.f32.mrb[146].mxu0  ;;  %v21027_v52 = vld [vmem:[#allocation73_spill] sm:$0xff] }
 0xb0e   : > { %v12157_v9 = vadd.f32 %v20130_v32, %v12118_v10  ;;  %v12119_v11 = vadd.f32 %v12066_v44, %v20184_v15  ;;  %12664 = vrot.lane.b32.xlu1 %v12208_v27, %s14767_s26  ;;  %v12068_v26 = vpop.f32.mrb[147].mxu0  ;;  %v21026_v27 = vld [vmem:[#allocation78_spill] sm:$0xff] }
 0xb0f   : > { %v21029_v26 = vld [vmem:[#allocation27_spill] sm:$0xff] }
 0xb10   : > { %v12158_v37 = vadd.f32 %v20130_v32, %v12119_v11  ;;  %v12189_v63 = vmax.f32 %v12157_v9, 0.0  ;;  %v21028_v9 = vld [vmem:[#allocation79_spill] sm:$0xff] }
 0xb12   : > { %v12190_v20 = vmax.f32 %v12158_v37, 0.0 }
 0xb13   : > { %v12071_v25 = vpop.f32.mrb[148].mxu0 }
 0xb14   : > { %v12209_v31 = vpack.c.bf16 %v12190_v20, %v12189_v63  ;;  %v12120_v16 = vadd.f32 %v12071_v25, %v20191_v38  ;;  %v12073_v58 = vpop.f32.mrb[149].mxu0  ;;  %v21030_v63 = vld [vmem:[#allocation80_spill] sm:$0xff]  ;;  %v21031_v25 = vld [vmem:[#allocation31_spill] sm:$0xff] }
 0xb15   : > { %v12074_v43 = vpop.f32.mrb[150].mxu0 }
 0xb16   : > { %v12159_v22 = vadd.f32 %v20130_v32, %v12120_v16  ;;  %v12121_v53 = vadd.f32 %v12074_v43, %v20195_v50  ;;  %12666 = vrot.lane.b32.xlu0 %v12209_v31, %s14767_s26  ;;  %v12076_v15 = vpop.f32.mrb[151].mxu0  ;;  %v21032_v16 = vld [vmem:[#allocation15_spill] sm:$0xff]  ;;  %v21033_v43 = vld [vmem:[#allocation30_spill] sm:$0xff] }
 0xb18   : > { %v12160_v49 = vadd.f32 %v20130_v32, %v12121_v53  ;;  %v12191_v12 = vmax.f32 %v12159_v22, 0.0  ;;  %v21034_v53 = vld [vmem:[#allocation64_spill] sm:$0xff] }
 0xb1a   : > { %v12192_v23 = vmax.f32 %v12160_v49, 0.0  ;;  %v21035_v49 = vld [vmem:[#allocation32_spill] sm:$0xff] }
 0xb1b   : > { %v12079_v61 = vpop.f32.mrb[152].mxu0 }
 0xb1c   : > { %v12210_v19 = vpack.c.bf16 %v12192_v23, %v12191_v12  ;;  %v12122_v28 = vadd.f32 %v12079_v61, %v20202_v40  ;;  %v12081_v24 = vpop.f32.mrb[153].mxu0  ;;  %v21036_v23 = vld [vmem:[#allocation14_spill] sm:$0xff] }
 0xb1d   : > { %v12082_v34 = vpop.f32.mrb[154].mxu0  ;;  %v21038_v24 = vld [vmem:[#allocation63_spill] sm:$0xff] }
 0xb1e   : > { %v12161_v38 = vadd.f32 %v20130_v32, %v12122_v28  ;;  %v12123_v39 = vadd.f32 %v12082_v34, %v20206_v5  ;;  %12668 = vrot.lane.b32.xlu1 %v12210_v19, %s14767_s26  ;;  %v12084_v50 = vpop.f32.mrb[155].mxu0  ;;  %v14685_v5 = vld [vmem:[#allocation5 + $0x18] sm:$0xff]  ;;  %v21037_v19 = vld [vmem:[#allocation26_spill] sm:$0xff] }
 0xb1f   : > { %v12595_v17 = vmax.bf16 %v14685_v5, %v12563_v14  ;;  %v21040_v50 = vld [vmem:[#allocation17_spill] sm:$0xff]  ;;  %v21044_v14 = vld [vmem:[#allocation16_spill] sm:$0xff] }
 0xb20   : > { %v12162_v48 = vadd.f32 %v20130_v32, %v12123_v39  ;;  %v12193_v60 = vmax.f32 %v12161_v38, 0.0  ;;  %v21039_v38 = vld [vmem:[#allocation33_spill] sm:$0xff] }
 0xb21   : > { %v12611_v47 = vmax.bf16 %v14686_v6, %v12595_v17 }
 0xb22   : > { %v12194_v13 = vmax.f32 %v12162_v48, 0.0 }
 0xb23   : > { %v12087_v55 = vpop.f32.mrb[156].mxu0 }
 0xb24   : > { %v12211_v4 = vpack.c.bf16 %v12194_v13, %v12193_v60  ;;  %v12124_v40 = vadd.f32 %v12087_v55, %v20213_v8  ;;  %v12089_v30 = vpop.f32.mrb[157].mxu0  ;;  %v21041_v60 = vld [vmem:[#allocation19_spill] sm:$0xff] }
 0xb25   : > { %v12090_v62 = vpop.f32.mrb[158].mxu0  ;;  %v12591_v30 = vld [vmem:[#allocation5 + $0x78] sm:$0xff] }
 0xb26   : > { %v12163_v18 = vadd.f32 %v20130_v32, %v12124_v40  ;;  %v12125_v54 = vadd.f32 %v12090_v62, %v20217_v56  ;;  %12670 = vrot.lane.b32.xlu0 %v12211_v4, %s14767_s26  ;;  %v12092_v45 = vpop.f32.mrb[159].mxu0  ;;  %v12596_v56 = vmax.bf16 %v14687_v46, %v12564_v33  ;;  %v21043_v4 = vld [vmem:[#allocation25_spill] sm:$0xff]  ;;  %v14693_v33 = vld [vmem:[#allocation4] sm:$0xff] }
 0xb27   : > { %v14689_v62 = vld [vmem:[#allocation5 + $0x68] sm:$0xff]  ;;  %v14690_v45 = vld [vmem:[#allocation5 + $0x70] sm:$0xff]  ;;  %v12609_v46 = vmax.bf16 %v14693_v33, %v12591_v30 }
 0xb28   : > { %v12164_v57 = vadd.f32 %v20130_v32, %v12125_v54  ;;  %v12643_v29 = vpop.permute.xlu0 %12642  ;;  %v12195_v59 = vmax.f32 %v12163_v18, 0.0  ;;  %v12612_v51 = vmax.bf16 %v14688_v36, %v12596_v56  ;;  %v12607_v5 = vmax.bf16 %v14689_v62, %v12591_v30  ;;  %v21045_v18 = vld [vmem:[#allocation20_spill] sm:$0xff] }
 0xb29   : > { %v12677_v8 = vsel %vm12674_vm14, %v21023_v1, %v12643_v29  ;;  %v12592_v29 = vld [vmem:[#allocation5 + $0x80] sm:$0xff]  ;;  %v14691_v1 = vld [vmem:[#allocation5 + $0x70] sm:$0xff] }
 0xb2a   : > { %v12196_v42 = vmax.f32 %v12164_v57, 0.0  ;;  %12788 = vmatpush1.bf16.msra.mxu1 %v12677_v8  ;;  %v12623_v57 = vmax.bf16 %v14690_v45, %v12607_v5  ;;  %v12608_v8 = vmax.bf16 %v14691_v1, %v12592_v29 }
 0xb2b   : > { %12789 = vmatprep.subr.bf16.mxu1 %v12611_v47  ;;  %v21046_v47 = vld [vmem:[#allocation76_spill] sm:$0xff] }
 0xb2c   : > { %v12212_v35 = vpack.c.bf16 %v12196_v42, %v12195_v59  ;;  %v14692_v42 = vld [vmem:[#allocation5 + $0x78] sm:$0xff] }
 0xb2e   : > { %12672 = vrot.lane.b32.xlu1 %v12212_v35, %s14767_s26  ;;  %v12624_v35 = vmax.bf16 %v14692_v42, %v12608_v8  ;;  %s20329_s26 = scalar_lea.vmem [#allocation6], %s12956_s2  ;;  %s14699_s2 = sshll.u32 %s14768_s4, 4  ;;  %s14700_s2 = int_to_ptr.vmem [resolvable:$false] %s14699_s2 }
 0xb2f   : > { %s12890_s28 = sshll.u32 %s20329_s26, 4  ;;  %s14701_s5 = scalar_lea.vmem %s14700_s2, 4096  ;;  %s20352_s28 = int_to_ptr.vmem [resolvable:$true] %s12890_s28 }
 0xb30   : > { %v12645_v21 = vpop.permute.xlu1 %12644  ;;  %s14695_s0 = scalar_lea.vmem %s20352_s28, 2048  ;;  %p14702_p0 = scmp.lt.s32.totalorder %s20352_s28, %s14700_s2 }
 0xb31   : > { %v12681_v32 = vsel %vm12674_vm14, %v21024_v2, %v12645_v21  ;;  %v21047_v21 = vld [vmem:[#allocation34_spill] sm:$0xff]  ;;  %p14696_p11 = scmp.ne.s32.totalorder %s20352_s28, %s14695_s0  ;;  %p14703_p1 = scmp.lt.s32.totalorder %s14701_s5, %s14695_s0 }
 0xb32   : > { %12790 = vmatpush1.bf16.msra.mxu1 %v12681_v32  ;;  %v14694_v32 = vld [vmem:[#allocation5 + $0x80] sm:$0xff] }
 0xb33   : > { %12791 = vmatprep.subr.bf16.mxu1 %v12612_v51  ;;  %v12625_v36 = vmax.bf16 %v14694_v32, %v12609_v46  ;;  %p14697_p12 = pnand %p14696_p11, %p14908_p5  ;;  %p14704_p2 = por %p14703_p1, %p14702_p0 }
 0xb35   : > { %p14698_p13 = pneg %p14697_p12 }
 0xb37   : > { %p14705_p3 = pnand %p14704_p2, %p14698_p13 }
 0xb38   : > { %v12647_v7 = vpop.permute.xlu0 %12646 }
 0xb39   : > { %v12685_v0 = vsel %vm12674_vm14, %v21025_v41, %v12647_v7  ;;  %v21048_v7 = vld [vmem:[#allocation18_spill] sm:$0xff] }
 0xb3a   : > { %12792 = vmatpush1.bf16.msra.mxu1 %v12685_v0  ;;  %v14643_v0 = vld [vmem:[%s21022_s23] ss:$8 sps:$4 sm:$0xff]  }
 0xb3b   : > { %12793 = vmatprep.subr.bf16.mxu1 %v21026_v27  ;;  %v14648_v27 = vld [vmem:[%s21022_s23 + $0x14] ss:$8 sps:$4 sm:$0xff]  }
 0xb40   : > { %v12649_v10 = vpop.permute.xlu1 %12648 }
 0xb41   : > { %v12689_v44 = vsel %vm12674_vm14, %v21027_v52, %v12649_v10  ;;  %v14646_v10 = vld [vmem:[%s21022_s23 + $0x10] ss:$8 sps:$4 sm:$0xff]   ;;  %v14651_v52 = vld [vmem:[%s21022_s23 + $0x24] ss:$8 sps:$4 sm:$0xff]  }
 0xb42   : > { %12794 = vmatpush1.bf16.msra.mxu1 %v12689_v44  ;;  %v14649_v44 = vld [vmem:[%s21022_s23 + $0x20] ss:$8 sps:$4 sm:$0xff]  }
 0xb43   : > { %12795 = vmatprep.subr.bf16.mxu1 %v21028_v9  ;;  %v14654_v9 = vld [vmem:[%s21022_s23 + $0x34] ss:$8 sps:$4 sm:$0xff]  }
 0xb48   : > { %v12651_v11 = vpop.permute.xlu0 %12650 }
 0xb49   : > { %v12693_v37 = vsel %vm12674_vm14, %v21029_v26, %v12651_v11  ;;  %v14652_v11 = vld [vmem:[%s21022_s23 + $0x30] ss:$8 sps:$4 sm:$0xff]  }
 0xb4a   : > { %12796 = vmatpush1.bf16.msra.mxu1 %v12693_v37 }
 0xb4b   : > { %12797 = vmatprep.subr.bf16.mxu1 %v21030_v63 }
 0xb50   : > { %v12653_v20 = vpop.permute.xlu1 %12652 }
 0xb51   : > { %v12697_v31 = vsel %vm12674_vm14, %v21031_v25, %v12653_v20 }
 0xb52   : > { %12798 = vmatpush1.bf16.msra.mxu1 %v12697_v31 }
 0xb53   : > { %12799 = vmatprep.subr.bf16.mxu1 %v21032_v16 }
 0xb58   : > { %v12655_v58 = vpop.permute.xlu0 %12654 }
 0xb59   : > { %v12701_v22 = vsel %vm12674_vm14, %v21033_v43, %v12655_v58 }
 0xb5a   : > { %12800 = vmatpush1.bf16.msra.mxu1 %v12701_v22 }
 0xb5b   : > { %12801 = vmatprep.subr.bf16.mxu1 %v21034_v53 }
 0xb60   : > { %v12657_v15 = vpop.permute.xlu1 %12656 }
 0xb61   : > { %v12705_v12 = vsel %vm12674_vm14, %v21035_v49, %v12657_v15 }
 0xb62   : > { %12802 = vmatpush1.bf16.msra.mxu1 %v12705_v12 }
 0xb63   : > { %12803 = vmatprep.subr.bf16.mxu1 %v21036_v23 }
 0xb68   : > { %v12659_v61 = vpop.permute.xlu0 %12658 }
 0xb69   : > { %v12709_v28 = vsel %vm12674_vm14, %v21037_v19, %v12659_v61 }
 0xb6a   : > { %12804 = vmatpush1.bf16.msra.mxu1 %v12709_v28 }
 0xb6b   : > { %12805 = vmatprep.subr.bf16.mxu1 %v21038_v24 }
 0xb70   : > { %v12661_v34 = vpop.permute.xlu1 %12660 }
 0xb71   : > { %v12713_v39 = vsel %vm12674_vm14, %v21039_v38, %v12661_v34 }
 0xb72   : > { %12806 = vmatpush1.bf16.msra.mxu1 %v12713_v39 }
 0xb73   : > { %12807 = vmatprep.subr.bf16.mxu1 %v21040_v50 }
 0xb78   : > { %v12663_v48 = vpop.permute.xlu0 %12662 }
 0xb79   : > { %v12717_v13 = vsel %vm12674_vm14, %v21041_v60, %v12663_v48 }
 0xb7a   : > { %12808 = vmatpush1.bf16.msra.mxu1 %v12717_v13 }
 0xb7b   : > { %12809 = vmatprep.subr.bf16.mxu1 %v21042_v3 }
 0xb80   : > { %v12665_v55 = vpop.permute.xlu1 %12664 }
 0xb81   : > { %v12721_v40 = vsel %vm12674_vm14, %v21043_v4, %v12665_v55 }
 0xb82   : > { %12810 = vmatpush1.bf16.msra.mxu1 %v12721_v40 }
 0xb83   : > { %12811 = vmatprep.subr.bf16.mxu1 %v21044_v14 }
 0xb88   : > { %v12667_v17 = vpop.permute.xlu0 %12666 }
 0xb89   : > { %v12725_v54 = vsel %vm12674_vm14, %v21045_v18, %v12667_v17 }
 0xb8a   : > { %12812 = vmatpush1.bf16.msra.mxu1 %v12725_v54 }
 0xb8b   : > { %12813 = vmatprep.subr.bf16.mxu1 %v12623_v57 }
 0xb90   : > { %v12669_v6 = vpop.permute.xlu1 %12668 }
 0xb91   : > { %v12729_v59 = vsel %vm12674_vm14, %v21046_v47, %v12669_v6 }
 0xb92   : > { %12814 = vmatpush1.bf16.msra.mxu1 %v12729_v59 }
 0xb93   : > { %12815 = vmatprep.subr.bf16.mxu1 %v12624_v35 }
 0xb98   : > { %v12671_v56 = vpop.permute.xlu0 %12670 }
 0xb99   : > { %v12733_v2 = vsel %vm12674_vm14, %v21047_v21, %v12671_v56 }
 0xb9a   : > { %12816 = vmatpush1.bf16.msra.mxu1 %v12733_v2 }
 0xb9b   : > { %12817 = vmatprep.subr.bf16.mxu1 %v12625_v36 }
 0xba0   : > { %v12673_v51 = vpop.permute.xlu1 %12672 }
 0xba1   : > { %v12737_v41 = vsel %vm12674_vm14, %v21048_v7, %v12673_v51 }
 0xba2   : > { %12818 = vmatpush1.bf16.msra.mxu1 %v12737_v41 }
 0xba5   : > { %12820 = vmatmul.mubr.bf16.vlgmr.msra.gmra.mrb[64].mxu1 %v14643_v0 }
 0xba6   : > { %12829 = vmatprep.mubr.bf16.mxu1 %v14648_v27 }
 0xbad   : > { %12830 = vmatmul.mubr.bf16.gmra.mrb[68].mxu1 %v14646_v10 }
 0xbae   : > { %12839 = vmatprep.mubr.bf16.mxu1 %v14651_v52 }
 0xbb5   : > { %12840 = vmatmul.mubr.bf16.gmra.mrb[72].mxu1 %v14649_v44 }
 0xbb6   : > { %12849 = vmatprep.mubr.bf16.mxu1 %v14654_v9 }
 0xbbd   : > { %12850 = vmatmul.mubr.bf16.gmra.mrb[76].mxu1 %v14652_v11 }
 0xc78   : > { %v12821_v26 = vpop.f32.mrb[64].mxu1 }
 0xc79   : > { %12860 = vst [vmem:[%s20329_s26] sm:$0xff] %v12821_v26  ;;  %v12823_v37 = vpop.f32.mrb[65].mxu1 }
 0xc7a   : > { %12861 = vst [vmem:[%s20329_s26 + $0x8] sm:$0xff] %v12823_v37  ;;  %v12825_v63 = vpop.f32.mrb[66].mxu1 }
 0xc7b   : > { %12862 = vst [vmem:[%s20329_s26 + $0x10] sm:$0xff] %v12825_v63  ;;  %v12827_v20 = vpop.f32.mrb[67].mxu1 }
 0xc7c   : > { %12863 = vst [vmem:[%s20329_s26 + $0x18] sm:$0xff] %v12827_v20 }
 0xc80   : > { %v12831_v25 = vpop.f32.mrb[68].mxu1 }
 0xc81   : > { %12864 = vst [vmem:[%s20329_s26 + $0x20] sm:$0xff] %v12831_v25  ;;  %v12833_v31 = vpop.f32.mrb[69].mxu1 }
 0xc82   : > { %12865 = vst [vmem:[%s20329_s26 + $0x28] sm:$0xff] %v12833_v31  ;;  %v12835_v16 = vpop.f32.mrb[70].mxu1 }
 0xc83   : > { %12866 = vst [vmem:[%s20329_s26 + $0x30] sm:$0xff] %v12835_v16  ;;  %v12837_v58 = vpop.f32.mrb[71].mxu1 }
 0xc84   : > { %12867 = vst [vmem:[%s20329_s26 + $0x38] sm:$0xff] %v12837_v58 }
 0xc88   : > { %v12841_v43 = vpop.f32.mrb[72].mxu1 }
 0xc89   : > { %12868 = vst [vmem:[%s20329_s26 + $0x40] sm:$0xff] %v12841_v43  ;;  %v12843_v22 = vpop.f32.mrb[73].mxu1 }
 0xc8a   : > { %12869 = vst [vmem:[%s20329_s26 + $0x48] sm:$0xff] %v12843_v22  ;;  %v12845_v53 = vpop.f32.mrb[74].mxu1 }
 0xc8b   : > { %12870 = vst [vmem:[%s20329_s26 + $0x50] sm:$0xff] %v12845_v53  ;;  %v12847_v15 = vpop.f32.mrb[75].mxu1 }
 0xc8c   : > { %12871 = vst [vmem:[%s20329_s26 + $0x58] sm:$0xff] %v12847_v15 }
 0xc90   : > { %v12851_v49 = vpop.f32.mrb[76].mxu1 }
 0xc91   : > { %12872 = vst [vmem:[%s20329_s26 + $0x60] sm:$0xff] %v12851_v49  ;;  %v12853_v12 = vpop.f32.mrb[77].mxu1 }
 0xc92   : > { %12873 = vst [vmem:[%s20329_s26 + $0x68] sm:$0xff] %v12853_v12  ;;  %v12855_v23 = vpop.f32.mrb[78].mxu1 }
 0xc93   : > { %12874 = vst [vmem:[%s20329_s26 + $0x70] sm:$0xff] %v12855_v23  ;;  %v12857_v61 = vpop.f32.mrb[79].mxu1 }
 0xc94   : > { %12875 = vst [vmem:[%s20329_s26 + $0x78] sm:$0xff] %v12857_v61 }
 0xc95   : > { %14708 = shalt.err (!%p14705_p3)
}
 0xc96   : > { %s14709_s24 = scalar_lea.hbm %s20349_s27, 2048  ;;  %s14713_s25 = scalar_lea.hbm %s20419_s19, 4096 }
 0xc97   : > { %p14710_p4 = scmp.ne.s32.totalorder %s20349_s27, %s14709_s24  ;;  %p14714_p9 = scmp.lt.u32.totalorder %s20349_s27, %s20419_s19 }
 0xc98   : > { %p14715_p10 = scmp.lt.u32.totalorder %s14713_s25, %s14709_s24  ;;  %p14717_p12 = scmp.lt.u32.totalorder %s14709_s24, %s20349_s27 }
 0xc99   : > { %p14711_p7 = pnand %p14710_p4, %p14908_p5 }
 0xc9a   : > { %p14716_p11 = por %p14715_p10, %p14714_p9 }
 0xc9b   : > { %p14712_p8 = pneg %p14711_p7 }
 0xc9c   : > { %p14718_p13 = por %p14717_p12, %p14716_p11 }
 0xc9e   : > { %p14719_p0 = pnand %p14718_p13, %p14712_p8 }
 0xca0   : > { %14722 = shalt.err (!%p14719_p0)
}
 0xca1   : > { %s14769_s0 = smov 256   ;;  %s21049_s5 = smov 16  }
 0xca2   : > { %14416 = dma.vmem_to_hbm [thread:$0]  (%p14908_p5), %s20352_s28, 2048, %s20349_s27, %s20358_s1, %s14769_s0, %s14769_s0, %s21049_s5  }
 0xca3 PF: > { %s21050_s26 = sld [smem:[#allocation9_spill]]  ;;  %p14422_p1 = scmp.ge.s32.totalorder %s14757_s21, 2 }
 0xca5   : > { %p14419_p2 = pnand %p14422_p1, %p14912_p6 }
 0xca9   : > { %s12905_s4 = sand.u32 1, %s21050_s26  }
 0xcaa   : > { %s12906_s24 = scalar_lea.sflag [#allocation7], %s12905_s4 }
 0xcab   : > { %14740 = dma.done.wait (!%p14419_p2), %s12906_s24, 2048  }
 0xcac   : > { %14742 = vsyncadd (!%p14419_p2), %s12906_s24, 4294965248  ;;  %s21052_s21 = sld [smem:[#allocation11_spill]]  ;;  %s21053_s25 = sld [smem:[#allocation10_spill]] }
 0xcad   : > { %s21054_s20 = sld [smem:[#allocation12_spill]]  ;;  %s21055_s0 = smov %s14749_s30 }
 0xcb2   : > { %p29_p3 = scmp.ge.s32.totalorder %s21052_s21, 4   ;;  %s21056_s30 = smov %s21053_s25 }
 0xcb4   :  { %31 = sbr.rel (!%p29_p3) target bundleno = 10 (0xa), region = 131 }
 0xcbb   :  { %12911 = vsyncpa [#allocation7], 1 }
 0xcbc   :  { %12913 = vsyncpa [#allocation7 + $0x1], 1 }

</bundles_post_ra>
